<compile_context>
chip_gen: v5e
topology: v5e:2x2
jax: 0.10.0
libtpu: 0.0.40
codegen_flags: <defaults>
</compile_context>

<pallas_src>
from functools import partial

import jax
import jax.numpy as jnp
from jax.experimental import pallas as pl
from jax.experimental.pallas import tpu as pltpu


def _round_up(a, m):
    return (a + m - 1) // m * m


# ---------------------------------------------------------------------------
# Zero-fill column-shift helpers.
# They lower to a lane rotate + select (XLU + one VPU select), i.e. the same
# hardware path as pltpu.roll, but the conv zero boundary is built in so no
# extra wrap masks are needed and the width stays exactly Wo (lane aligned).
# ---------------------------------------------------------------------------
def _left_nbr(a):
    """out[:, c] = a[:, c-1]; column 0 is zero (conv zero padding)."""
    z = jnp.zeros((a.shape[0], 1), a.dtype)
    return jnp.concatenate([z, a[:, :-1]], axis=1)


def _right_nbr(a):
    """out[:, c] = a[:, c+1]; last column is zero (conv zero padding)."""
    z = jnp.zeros((a.shape[0], 1), a.dtype)
    return jnp.concatenate([a[:, 1:], z], axis=1)


# ---------------------------------------------------------------------------
# Fused kernel: conv1 + LeakyReLU + conv2 + Sigmoid + MappingXY
# ---------------------------------------------------------------------------
def _position_xy_kernel(x_ref, w1_ref, b1_ref, w2_ref, b2_ref,
                        y_ref, pmap_ref, *, C, H, W, TH, Wo, ds):
    """One (batch, row-tile) grid step.

    x_ref   : (1, C, H_pad+4, Wo)  zero-padded input, resident per batch (VMEM)
    w1_ref  : (C*C*9,) SMEM  folded conv1 weights, OIHW flattened
    b1_ref  : (C,)     SMEM  folded conv1 bias
    w2_ref  : (2*C*9,) SMEM  folded conv2 weights
    b2_ref  : (2,)     SMEM  folded conv2 bias
    y_ref   : (1, 2, TH, Wo)  sigmoid output block (lane-dense, Wo % 128 == 0)
    pmap_ref: (1, 2, TH, Wo)  MappingXY output block
    """
    t = pl.program_id(1)
    RH = TH + 2                        # conv1 rows needed by conv2 (1-row halo each side)
    r0 = pl.multiple_of(t * TH, 8)     # aligned start row of this tile's x window

    # ------------- conv1 (3x3, pad 1, BN folded) : results stay in vregs ---------
    h_acc = [jnp.full((RH, Wo), b1_ref[co], jnp.float32) for co in range(C)]
    for ci in range(C):
        s = x_ref[0, ci, pl.ds(r0, TH + 4), :]             # (TH+4, Wo) aligned load
        cols = (_left_nbr(s), s, _right_nbr(s))            # dx = 0, 1, 2 (hoisted per ci)
        for dx in range(3):
            v = cols[dx]
            for dy in range(3):
                slab = v[dy:dy + RH, :]                    # (RH, Wo) sublane slice
                for co in range(C):
                    widx = ((co * C + ci) * 3 + dy) * 3 + dx
                    h_acc[co] = h_acc[co] + w1_ref[widx] * slab

    # LeakyReLU(0.1), then zero out rows/cols outside the real image: these act
    # as conv2's zero padding and also kill the H_pad / Wo padding garbage.
    g_row = t * TH - 1 + jax.lax.broadcasted_iota(jnp.int32, (RH, Wo), 0)
    ok = jnp.logical_and(g_row >= 0, g_row < H)
    if Wo > W:                                             # static branch
        col = jax.lax.broadcasted_iota(jnp.int32, (RH, Wo), 1)
        ok = jnp.logical_and(ok, col < W)
    h = []
    for co in range(C):
        a = h_acc[co]
        a = jnp.where(a >= 0.0, a, 0.1 * a)
        h.append(jnp.where(ok, a, 0.0))

    # ------------- conv2 (3x3, pad 1, BN folded) + Sigmoid ------------------------
    y_acc = [jnp.full((TH, Wo), b2_ref[co], jnp.float32) for co in range(2)]
    for ci in range(C):
        cols = (_left_nbr(h[ci]), h[ci], _right_nbr(h[ci]))
        for dx in range(3):
            v = cols[dx]
            for dy in range(3):
                slab = v[dy:dy + TH, :]                    # (TH, Wo)
                for co in range(2):
                    widx = ((co * C + ci) * 3 + dy) * 3 + dx
                    y_acc[co] = y_acc[co] + w2_ref[widx] * slab

    y0 = jax.nn.sigmoid(y_acc[0])
    y1 = jax.nn.sigmoid(y_acc[1])

    # ------------- MappingXY (global row = tile base + local row) -----------------
    rloc = jax.lax.broadcasted_iota(jnp.int32, (TH, Wo), 0)
    cloc = jax.lax.broadcasted_iota(jnp.int32, (TH, Wo), 1)
    row = (rloc + t * TH).astype(jnp.float32)
    colf = cloc.astype(jnp.float32)

    y_ref[0, 0] = y0
    y_ref[0, 1] = y1
    pmap_ref[0, 0] = (row + y0) * ds
    pmap_ref[0, 1] = (colf + y1) * ds


# ---------------------------------------------------------------------------
# Wrapper
# ---------------------------------------------------------------------------
def _pick_tile_h(H, tile_max=32):
    """Pick a row-tile height (multiple of 8).  Whole image if it fits one tile,
    otherwise minimize (H_pad + per-step overhead) over multiples of 8 <= tile_max."""
    Hr = _round_up(H, 8)
    tile_max = max(_round_up(tile_max, 8), 8)
    if Hr <= tile_max:
        return Hr
    best_th, best_cost = 8, None
    for th in range(tile_max, 7, -8):
        n = pl.cdiv(H, th)
        cost = n * (th + 2 + 16)       # halo rows + ~per-step pipeline overhead proxy
        if best_cost is None or cost < best_cost:
            best_th, best_cost = th, cost
    return best_th


def position_xy_forward(x_nchw, params, downsampling=8, tile_h=32):
    """Returns (pmap, x) in NCHW, matching PositionXY.forward."""
    B, C, H, W = x_nchw.shape
    TH = _pick_tile_h(H, tile_h)
    H_pad = _round_up(H, TH)
    Wo = _round_up(W, 128)             # lane-dense compute & stores
    n_tiles = H_pad // TH

    # Single zero pad: 2 halo rows top, 2 + (H_pad - H) rows bottom, W -> Wo columns.
    xp = jnp.pad(x_nchw.astype(jnp.float32),
                 ((0, 0), (0, 0), (2, 2 + H_pad - H), (0, Wo - W)))

    w1f = params["w1"].reshape(-1).astype(jnp.float32)   # (C*C*9,)
    b1 = params["b1"].astype(jnp.float32)                # (C,)
    w2f = params["w2"].reshape(-1).astype(jnp.float32)   # (2*C*9,)
    b2 = params["b2"].astype(jnp.float32)                # (2,)

    kernel = partial(_position_xy_kernel, C=C, H=H, W=W, TH=TH, Wo=Wo,
                     ds=float(downsampling))

    smem_spec = pl.BlockSpec(memory_space=pltpu.MemorySpace.SMEM)
    y, pmap = pl.pallas_call(
        kernel,
        out_shape=(
            jax.ShapeDtypeStruct((B, 2, H_pad, Wo), jnp.float32),
            jax.ShapeDtypeStruct((B, 2, H_pad, Wo), jnp.float32),
        ),
        grid=(B, n_tiles),
        in_specs=[
            # Full padded image per batch; block index is constant along t so the
            # block stays resident in VMEM across all row tiles (DMA'd once per b).
            pl.BlockSpec((1, C, H_pad + 4, Wo), lambda b, t: (b, 0, 0, 0)),
            smem_spec,   # w1
            smem_spec,   # b1
            smem_spec,   # w2
            smem_spec,   # b2
        ],
        out_specs=(
            pl.BlockSpec((1, 2, TH, Wo), lambda b, t: (b, 0, t, 0)),
            pl.BlockSpec((1, 2, TH, Wo), lambda b, t: (b, 0, t, 0)),
        ),
        compiler_params=pltpu.CompilerParams(
            dimension_semantics=("parallel", "parallel"),
            vmem_limit_bytes=32 * 1024 * 1024,
        ),
    )(xp, w1f, b1, w2f, b2)

    if H_pad != H or Wo != W:
        y = y[:, :, :H, :W]
        pmap = pmap[:, :, :H, :W]
    return pmap, y


# ---------------------------------------------------------------------------
# Deterministic parameter construction (BN folded, eval mode, OIHW like PyTorch)
# ---------------------------------------------------------------------------
def make_params(key, in_channels):
    eps = 1e-4
    C = in_channels
    ks = jax.random.split(key, 8)

    # conv_1: Conv2d(C, C, 3) + BN(C) + LeakyReLU(0.1)
    w1 = 0.1 * jax.random.normal(ks[0], (C, C, 3, 3), jnp.float32)
    b1 = 0.1 * jax.random.normal(ks[1], (C,), jnp.float32)
    g1 = 1.0 + 0.1 * jax.random.normal(ks[2], (C,), jnp.float32)
    beta1 = 0.1 * jax.random.normal(ks[3], (C,), jnp.float32)
    s1 = g1 / jnp.sqrt(1.0 + eps)                  # running_var=1, running_mean=0
    w1f = w1 * s1[:, None, None, None]
    b1f = b1 * s1 + beta1

    # conv_2: Conv2d(C, 2, 3) + BN(2) + Sigmoid
    w2 = 0.1 * jax.random.normal(ks[4], (2, C, 3, 3), jnp.float32)
    b2 = 0.1 * jax.random.normal(ks[5], (2,), jnp.float32)
    g2 = 1.0 + 0.1 * jax.random.normal(ks[6], (2,), jnp.float32)
    beta2 = 0.1 * jax.random.normal(ks[7], (2,), jnp.float32)
    s2 = g2 / jnp.sqrt(1.0 + eps)
    w2f = w2 * s2[:, None, None, None]
    b2f = b2 * s2 + beta2

    return {"w1": w1f, "b1": b1f, "w2": w2f, "b2": b2f}


# ---------------------------------------------------------------------------
# Pure-JAX/XLA reference (independent of the kernel) for a sanity check
# ---------------------------------------------------------------------------
def _ref_forward(x, params, downsampling=8):
    dn = ("NCHW", "OIHW", "NCHW")
    h = jax.lax.conv_general_dilated(x, params["w1"], window_strides=(1, 1),
                                     padding=((1, 1), (1, 1)),
                                     dimension_numbers=dn)
    h = h + params["b1"][None, :, None, None]
    h = jnp.where(h >= 0.0, h, 0.1 * h)
    y = jax.lax.conv_general_dilated(h, params["w2"], window_strides=(1, 1),
                                     padding=((1, 1), (1, 1)),
                                     dimension_numbers=dn)
    y = y + params["b2"][None, :, None, None]
    y = jax.nn.sigmoid(y)
    _, _, H, W = x.shape
    ii = jnp.arange(H, dtype=jnp.float32)[None, :, None]
    jj = jnp.arange(W, dtype=jnp.float32)[None, None, :]
    pmap = jnp.stack([(ii + y[:, 0]) * downsampling,
                      (jj + y[:, 1]) * downsampling], axis=1)
    return pmap, y


def _check(B, C, H, W, key, tile_h=32):
    k_x, k_p = jax.random.split(key)
    x = jax.random.normal(k_x, (B, C, H, W), jnp.float32)
    params = make_params(k_p, C)

    fwd = jax.jit(partial(position_xy_forward, tile_h=tile_h))
    pmap, y = fwd(x, params)
    pmap = jax.block_until_ready(pmap)
    y = jax.block_until_ready(y)

    pmap_ref, y_ref = _ref_forward(x, params)
    assert pmap.shape == (B, 2, H, W) and y.shape == (B, 2, H, W)
    assert jnp.allclose(y, y_ref, atol=1e-3, rtol=1e-3), \
        float(jnp.max(jnp.abs(y - y_ref)))
    assert jnp.allclose(pmap, pmap_ref, atol=1e-2, rtol=1e-3), \
        float(jnp.max(jnp.abs(pmap - pmap_ref)))


# ---------------------------------------------------------------------------
if __name__ == "__main__":
    key = jax.random.PRNGKey(0)
    k1, k2, k3 = jax.random.split(key, 3)
    # primary small shape from the spec (single row tile, Wo > W masking path)
    _check(B=2, C=4, H=16, W=16, key=k1)
    # multiple row tiles, H padded up to a multiple of TH, W padded to 128
    _check(B=2, C=4, H=40, W=48, key=k2, tile_h=16)
    # W already lane-aligned (Wo == W path), multiple row tiles
    _check(B=1, C=4, H=24, W=128, key=k3, tile_h=8)
    print("KERNEL_OK")
</pallas_src>

<mosaic_0001>
module attributes {stable_mosaic.version = 11 : i64} {
  func.func @_position_xy_kernel(%arg0: i32, %arg1: i32, %arg2: memref<1x4x20x128xf32, #tpu.memory_space<vmem>>, %arg3: memref<144xf32, #tpu.memory_space<smem>>, %arg4: memref<4xf32, #tpu.memory_space<smem>>, %arg5: memref<72xf32, #tpu.memory_space<smem>>, %arg6: memref<2xf32, #tpu.memory_space<smem>>, %arg7: memref<1x2x16x128xf32, #tpu.memory_space<vmem>>, %arg8: memref<1x2x16x128xf32, #tpu.memory_space<vmem>>) attributes {dimension_semantics = [#tpu.dimension_semantics<parallel>, #tpu.dimension_semantics<parallel>], iteration_bounds = array<i64: 2, 1>, scalar_prefetch = 0 : i64, scratch_operands = 0 : i64, tpu.core_type = #tpu.core_type<tc>, window_params = [{transform_indices = @transform_0, window_bounds = array<i64: 1, 4, 20, 128>}, {transform_indices = @transform_1, window_bounds = array<i64: 144>}, {transform_indices = @transform_2, window_bounds = array<i64: 4>}, {transform_indices = @transform_3, window_bounds = array<i64: 72>}, {transform_indices = @transform_4, window_bounds = array<i64: 2>}, {transform_indices = @transform_5, window_bounds = array<i64: 1, 2, 16, 128>}, {transform_indices = @transform_6, window_bounds = array<i64: 1, 2, 16, 128>}]} {
    %c16_i32 = arith.constant 16 : i32
    %0 = arith.muli %arg1, %c16_i32 : i32
    %1 = tpu.assume_multiple %0, 8 : i32
    %c0 = arith.constant 0 : index
    %2 = memref.load %arg4[%c0] : memref<4xf32, #tpu.memory_space<smem>>
    %3 = vector.broadcast %2 : f32 to vector<18x128xf32>
    %c1 = arith.constant 1 : index
    %4 = memref.load %arg4[%c1] : memref<4xf32, #tpu.memory_space<smem>>
    %5 = vector.broadcast %4 : f32 to vector<18x128xf32>
    %c2 = arith.constant 2 : index
    %6 = memref.load %arg4[%c2] : memref<4xf32, #tpu.memory_space<smem>>
    %7 = vector.broadcast %6 : f32 to vector<18x128xf32>
    %c3 = arith.constant 3 : index
    %8 = memref.load %arg4[%c3] : memref<4xf32, #tpu.memory_space<smem>>
    %9 = vector.broadcast %8 : f32 to vector<18x128xf32>
    %c0_0 = arith.constant 0 : index
    %c0_1 = arith.constant 0 : index
    %10 = arith.index_cast %1 : i32 to index
    %c0_2 = arith.constant 0 : index
    %11 = vector.load %arg2[%c0_0, %c0_1, %10, %c0_2] : memref<1x4x20x128xf32, #tpu.memory_space<vmem>>, vector<1x1x20x128xf32>
    %12 = vector.shape_cast %11 : vector<1x1x20x128xf32> to vector<20x128xf32>
    %cst = arith.constant 0.000000e+00 : f32
    %13 = vector.broadcast %cst : f32 to vector<20x1xf32>
    %14 = vector.extract_strided_slice %12 {offsets = [0, 0], sizes = [20, 127], strides = [1, 1]} : vector<20x128xf32> to vector<20x127xf32>
    %15 = tpu.concatenate %13, %14 in 1 : vector<20x1xf32>, vector<20x127xf32> -> vector<20x128xf32>
    %cst_3 = arith.constant 0.000000e+00 : f32
    %16 = vector.broadcast %cst_3 : f32 to vector<20x1xf32>
    %17 = vector.extract_strided_slice %12 {offsets = [0, 1], sizes = [20, 127], strides = [1, 1]} : vector<20x128xf32> to vector<20x127xf32>
    %18 = tpu.concatenate %17, %16 in 1 : vector<20x127xf32>, vector<20x1xf32> -> vector<20x128xf32>
    %19 = vector.extract_strided_slice %15 {offsets = [0, 0], sizes = [18, 128], strides = [1, 1]} : vector<20x128xf32> to vector<18x128xf32>
    %c0_4 = arith.constant 0 : index
    %20 = memref.load %arg3[%c0_4] : memref<144xf32, #tpu.memory_space<smem>>
    %21 = vector.broadcast %20 : f32 to vector<18x128xf32>
    %22 = arith.mulf %21, %19 : vector<18x128xf32>
    %23 = arith.addf %3, %22 : vector<18x128xf32>
    %c36 = arith.constant 36 : index
    %24 = memref.load %arg3[%c36] : memref<144xf32, #tpu.memory_space<smem>>
    %25 = vector.broadcast %24 : f32 to vector<18x128xf32>
    %26 = arith.mulf %25, %19 : vector<18x128xf32>
    %27 = arith.addf %5, %26 : vector<18x128xf32>
    %c72 = arith.constant 72 : index
    %28 = memref.load %arg3[%c72] : memref<144xf32, #tpu.memory_space<smem>>
    %29 = vector.broadcast %28 : f32 to vector<18x128xf32>
    %30 = arith.mulf %29, %19 : vector<18x128xf32>
    %31 = arith.addf %7, %30 : vector<18x128xf32>
    %c108 = arith.constant 108 : index
    %32 = memref.load %arg3[%c108] : memref<144xf32, #tpu.memory_space<smem>>
    %33 = vector.broadcast %32 : f32 to vector<18x128xf32>
    %34 = arith.mulf %33, %19 : vector<18x128xf32>
    %35 = arith.addf %9, %34 : vector<18x128xf32>
    %36 = vector.extract_strided_slice %15 {offsets = [1, 0], sizes = [18, 128], strides = [1, 1]} : vector<20x128xf32> to vector<18x128xf32>
    %c3_5 = arith.constant 3 : index
    %37 = memref.load %arg3[%c3_5] : memref<144xf32, #tpu.memory_space<smem>>
    %38 = vector.broadcast %37 : f32 to vector<18x128xf32>
    %39 = arith.mulf %38, %36 : vector<18x128xf32>
    %40 = arith.addf %23, %39 : vector<18x128xf32>
    %c39 = arith.constant 39 : index
    %41 = memref.load %arg3[%c39] : memref<144xf32, #tpu.memory_space<smem>>
    %42 = vector.broadcast %41 : f32 to vector<18x128xf32>
    %43 = arith.mulf %42, %36 : vector<18x128xf32>
    %44 = arith.addf %27, %43 : vector<18x128xf32>
    %c75 = arith.constant 75 : index
    %45 = memref.load %arg3[%c75] : memref<144xf32, #tpu.memory_space<smem>>
    %46 = vector.broadcast %45 : f32 to vector<18x128xf32>
    %47 = arith.mulf %46, %36 : vector<18x128xf32>
    %48 = arith.addf %31, %47 : vector<18x128xf32>
    %c111 = arith.constant 111 : index
    %49 = memref.load %arg3[%c111] : memref<144xf32, #tpu.memory_space<smem>>
    %50 = vector.broadcast %49 : f32 to vector<18x128xf32>
    %51 = arith.mulf %50, %36 : vector<18x128xf32>
    %52 = arith.addf %35, %51 : vector<18x128xf32>
    %53 = vector.extract_strided_slice %15 {offsets = [2, 0], sizes = [18, 128], strides = [1, 1]} : vector<20x128xf32> to vector<18x128xf32>
    %c6 = arith.constant 6 : index
    %54 = memref.load %arg3[%c6] : memref<144xf32, #tpu.memory_space<smem>>
    %55 = vector.broadcast %54 : f32 to vector<18x128xf32>
    %56 = arith.mulf %55, %53 : vector<18x128xf32>
    %57 = arith.addf %40, %56 : vector<18x128xf32>
    %c42 = arith.constant 42 : index
    %58 = memref.load %arg3[%c42] : memref<144xf32, #tpu.memory_space<smem>>
    %59 = vector.broadcast %58 : f32 to vector<18x128xf32>
    %60 = arith.mulf %59, %53 : vector<18x128xf32>
    %61 = arith.addf %44, %60 : vector<18x128xf32>
    %c78 = arith.constant 78 : index
    %62 = memref.load %arg3[%c78] : memref<144xf32, #tpu.memory_space<smem>>
    %63 = vector.broadcast %62 : f32 to vector<18x128xf32>
    %64 = arith.mulf %63, %53 : vector<18x128xf32>
    %65 = arith.addf %48, %64 : vector<18x128xf32>
    %c114 = arith.constant 114 : index
    %66 = memref.load %arg3[%c114] : memref<144xf32, #tpu.memory_space<smem>>
    %67 = vector.broadcast %66 : f32 to vector<18x128xf32>
    %68 = arith.mulf %67, %53 : vector<18x128xf32>
    %69 = arith.addf %52, %68 : vector<18x128xf32>
    %70 = vector.extract_strided_slice %12 {offsets = [0, 0], sizes = [18, 128], strides = [1, 1]} : vector<20x128xf32> to vector<18x128xf32>
    %c1_6 = arith.constant 1 : index
    %71 = memref.load %arg3[%c1_6] : memref<144xf32, #tpu.memory_space<smem>>
    %72 = vector.broadcast %71 : f32 to vector<18x128xf32>
    %73 = arith.mulf %72, %70 : vector<18x128xf32>
    %74 = arith.addf %57, %73 : vector<18x128xf32>
    %c37 = arith.constant 37 : index
    %75 = memref.load %arg3[%c37] : memref<144xf32, #tpu.memory_space<smem>>
    %76 = vector.broadcast %75 : f32 to vector<18x128xf32>
    %77 = arith.mulf %76, %70 : vector<18x128xf32>
    %78 = arith.addf %61, %77 : vector<18x128xf32>
    %c73 = arith.constant 73 : index
    %79 = memref.load %arg3[%c73] : memref<144xf32, #tpu.memory_space<smem>>
    %80 = vector.broadcast %79 : f32 to vector<18x128xf32>
    %81 = arith.mulf %80, %70 : vector<18x128xf32>
    %82 = arith.addf %65, %81 : vector<18x128xf32>
    %c109 = arith.constant 109 : index
    %83 = memref.load %arg3[%c109] : memref<144xf32, #tpu.memory_space<smem>>
    %84 = vector.broadcast %83 : f32 to vector<18x128xf32>
    %85 = arith.mulf %84, %70 : vector<18x128xf32>
    %86 = arith.addf %69, %85 : vector<18x128xf32>
    %87 = vector.extract_strided_slice %12 {offsets = [1, 0], sizes = [18, 128], strides = [1, 1]} : vector<20x128xf32> to vector<18x128xf32>
    %c4 = arith.constant 4 : index
    %88 = memref.load %arg3[%c4] : memref<144xf32, #tpu.memory_space<smem>>
    %89 = vector.broadcast %88 : f32 to vector<18x128xf32>
    %90 = arith.mulf %89, %87 : vector<18x128xf32>
    %91 = arith.addf %74, %90 : vector<18x128xf32>
    %c40 = arith.constant 40 : index
    %92 = memref.load %arg3[%c40] : memref<144xf32, #tpu.memory_space<smem>>
    %93 = vector.broadcast %92 : f32 to vector<18x128xf32>
    %94 = arith.mulf %93, %87 : vector<18x128xf32>
    %95 = arith.addf %78, %94 : vector<18x128xf32>
    %c76 = arith.constant 76 : index
    %96 = memref.load %arg3[%c76] : memref<144xf32, #tpu.memory_space<smem>>
    %97 = vector.broadcast %96 : f32 to vector<18x128xf32>
    %98 = arith.mulf %97, %87 : vector<18x128xf32>
    %99 = arith.addf %82, %98 : vector<18x128xf32>
    %c112 = arith.constant 112 : index
    %100 = memref.load %arg3[%c112] : memref<144xf32, #tpu.memory_space<smem>>
    %101 = vector.broadcast %100 : f32 to vector<18x128xf32>
    %102 = arith.mulf %101, %87 : vector<18x128xf32>
    %103 = arith.addf %86, %102 : vector<18x128xf32>
    %104 = vector.extract_strided_slice %12 {offsets = [2, 0], sizes = [18, 128], strides = [1, 1]} : vector<20x128xf32> to vector<18x128xf32>
    %c7 = arith.constant 7 : index
    %105 = memref.load %arg3[%c7] : memref<144xf32, #tpu.memory_space<smem>>
    %106 = vector.broadcast %105 : f32 to vector<18x128xf32>
    %107 = arith.mulf %106, %104 : vector<18x128xf32>
    %108 = arith.addf %91, %107 : vector<18x128xf32>
    %c43 = arith.constant 43 : index
    %109 = memref.load %arg3[%c43] : memref<144xf32, #tpu.memory_space<smem>>
    %110 = vector.broadcast %109 : f32 to vector<18x128xf32>
    %111 = arith.mulf %110, %104 : vector<18x128xf32>
    %112 = arith.addf %95, %111 : vector<18x128xf32>
    %c79 = arith.constant 79 : index
    %113 = memref.load %arg3[%c79] : memref<144xf32, #tpu.memory_space<smem>>
    %114 = vector.broadcast %113 : f32 to vector<18x128xf32>
    %115 = arith.mulf %114, %104 : vector<18x128xf32>
    %116 = arith.addf %99, %115 : vector<18x128xf32>
    %c115 = arith.constant 115 : index
    %117 = memref.load %arg3[%c115] : memref<144xf32, #tpu.memory_space<smem>>
    %118 = vector.broadcast %117 : f32 to vector<18x128xf32>
    %119 = arith.mulf %118, %104 : vector<18x128xf32>
    %120 = arith.addf %103, %119 : vector<18x128xf32>
    %121 = vector.extract_strided_slice %18 {offsets = [0, 0], sizes = [18, 128], strides = [1, 1]} : vector<20x128xf32> to vector<18x128xf32>
    %c2_7 = arith.constant 2 : index
    %122 = memref.load %arg3[%c2_7] : memref<144xf32, #tpu.memory_space<smem>>
    %123 = vector.broadcast %122 : f32 to vector<18x128xf32>
    %124 = arith.mulf %123, %121 : vector<18x128xf32>
    %125 = arith.addf %108, %124 : vector<18x128xf32>
    %c38 = arith.constant 38 : index
    %126 = memref.load %arg3[%c38] : memref<144xf32, #tpu.memory_space<smem>>
    %127 = vector.broadcast %126 : f32 to vector<18x128xf32>
    %128 = arith.mulf %127, %121 : vector<18x128xf32>
    %129 = arith.addf %112, %128 : vector<18x128xf32>
    %c74 = arith.constant 74 : index
    %130 = memref.load %arg3[%c74] : memref<144xf32, #tpu.memory_space<smem>>
    %131 = vector.broadcast %130 : f32 to vector<18x128xf32>
    %132 = arith.mulf %131, %121 : vector<18x128xf32>
    %133 = arith.addf %116, %132 : vector<18x128xf32>
    %c110 = arith.constant 110 : index
    %134 = memref.load %arg3[%c110] : memref<144xf32, #tpu.memory_space<smem>>
    %135 = vector.broadcast %134 : f32 to vector<18x128xf32>
    %136 = arith.mulf %135, %121 : vector<18x128xf32>
    %137 = arith.addf %120, %136 : vector<18x128xf32>
    %138 = vector.extract_strided_slice %18 {offsets = [1, 0], sizes = [18, 128], strides = [1, 1]} : vector<20x128xf32> to vector<18x128xf32>
    %c5 = arith.constant 5 : index
    %139 = memref.load %arg3[%c5] : memref<144xf32, #tpu.memory_space<smem>>
    %140 = vector.broadcast %139 : f32 to vector<18x128xf32>
    %141 = arith.mulf %140, %138 : vector<18x128xf32>
    %142 = arith.addf %125, %141 : vector<18x128xf32>
    %c41 = arith.constant 41 : index
    %143 = memref.load %arg3[%c41] : memref<144xf32, #tpu.memory_space<smem>>
    %144 = vector.broadcast %143 : f32 to vector<18x128xf32>
    %145 = arith.mulf %144, %138 : vector<18x128xf32>
    %146 = arith.addf %129, %145 : vector<18x128xf32>
    %c77 = arith.constant 77 : index
    %147 = memref.load %arg3[%c77] : memref<144xf32, #tpu.memory_space<smem>>
    %148 = vector.broadcast %147 : f32 to vector<18x128xf32>
    %149 = arith.mulf %148, %138 : vector<18x128xf32>
    %150 = arith.addf %133, %149 : vector<18x128xf32>
    %c113 = arith.constant 113 : index
    %151 = memref.load %arg3[%c113] : memref<144xf32, #tpu.memory_space<smem>>
    %152 = vector.broadcast %151 : f32 to vector<18x128xf32>
    %153 = arith.mulf %152, %138 : vector<18x128xf32>
    %154 = arith.addf %137, %153 : vector<18x128xf32>
    %155 = vector.extract_strided_slice %18 {offsets = [2, 0], sizes = [18, 128], strides = [1, 1]} : vector<20x128xf32> to vector<18x128xf32>
    %c8 = arith.constant 8 : index
    %156 = memref.load %arg3[%c8] : memref<144xf32, #tpu.memory_space<smem>>
    %157 = vector.broadcast %156 : f32 to vector<18x128xf32>
    %158 = arith.mulf %157, %155 : vector<18x128xf32>
    %159 = arith.addf %142, %158 : vector<18x128xf32>
    %c44 = arith.constant 44 : index
    %160 = memref.load %arg3[%c44] : memref<144xf32, #tpu.memory_space<smem>>
    %161 = vector.broadcast %160 : f32 to vector<18x128xf32>
    %162 = arith.mulf %161, %155 : vector<18x128xf32>
    %163 = arith.addf %146, %162 : vector<18x128xf32>
    %c80 = arith.constant 80 : index
    %164 = memref.load %arg3[%c80] : memref<144xf32, #tpu.memory_space<smem>>
    %165 = vector.broadcast %164 : f32 to vector<18x128xf32>
    %166 = arith.mulf %165, %155 : vector<18x128xf32>
    %167 = arith.addf %150, %166 : vector<18x128xf32>
    %c116 = arith.constant 116 : index
    %168 = memref.load %arg3[%c116] : memref<144xf32, #tpu.memory_space<smem>>
    %169 = vector.broadcast %168 : f32 to vector<18x128xf32>
    %170 = arith.mulf %169, %155 : vector<18x128xf32>
    %171 = arith.addf %154, %170 : vector<18x128xf32>
    %c0_8 = arith.constant 0 : index
    %c1_9 = arith.constant 1 : index
    %172 = arith.index_cast %1 : i32 to index
    %c0_10 = arith.constant 0 : index
    %173 = vector.load %arg2[%c0_8, %c1_9, %172, %c0_10] : memref<1x4x20x128xf32, #tpu.memory_space<vmem>>, vector<1x1x20x128xf32>
    %174 = vector.shape_cast %173 : vector<1x1x20x128xf32> to vector<20x128xf32>
    %cst_11 = arith.constant 0.000000e+00 : f32
    %175 = vector.broadcast %cst_11 : f32 to vector<20x1xf32>
    %176 = vector.extract_strided_slice %174 {offsets = [0, 0], sizes = [20, 127], strides = [1, 1]} : vector<20x128xf32> to vector<20x127xf32>
    %177 = tpu.concatenate %175, %176 in 1 : vector<20x1xf32>, vector<20x127xf32> -> vector<20x128xf32>
    %cst_12 = arith.constant 0.000000e+00 : f32
    %178 = vector.broadcast %cst_12 : f32 to vector<20x1xf32>
    %179 = vector.extract_strided_slice %174 {offsets = [0, 1], sizes = [20, 127], strides = [1, 1]} : vector<20x128xf32> to vector<20x127xf32>
    %180 = tpu.concatenate %179, %178 in 1 : vector<20x127xf32>, vector<20x1xf32> -> vector<20x128xf32>
    %181 = vector.extract_strided_slice %177 {offsets = [0, 0], sizes = [18, 128], strides = [1, 1]} : vector<20x128xf32> to vector<18x128xf32>
    %c9 = arith.constant 9 : index
    %182 = memref.load %arg3[%c9] : memref<144xf32, #tpu.memory_space<smem>>
    %183 = vector.broadcast %182 : f32 to vector<18x128xf32>
    %184 = arith.mulf %183, %181 : vector<18x128xf32>
    %185 = arith.addf %159, %184 : vector<18x128xf32>
    %c45 = arith.constant 45 : index
    %186 = memref.load %arg3[%c45] : memref<144xf32, #tpu.memory_space<smem>>
    %187 = vector.broadcast %186 : f32 to vector<18x128xf32>
    %188 = arith.mulf %187, %181 : vector<18x128xf32>
    %189 = arith.addf %163, %188 : vector<18x128xf32>
    %c81 = arith.constant 81 : index
    %190 = memref.load %arg3[%c81] : memref<144xf32, #tpu.memory_space<smem>>
    %191 = vector.broadcast %190 : f32 to vector<18x128xf32>
    %192 = arith.mulf %191, %181 : vector<18x128xf32>
    %193 = arith.addf %167, %192 : vector<18x128xf32>
    %c117 = arith.constant 117 : index
    %194 = memref.load %arg3[%c117] : memref<144xf32, #tpu.memory_space<smem>>
    %195 = vector.broadcast %194 : f32 to vector<18x128xf32>
    %196 = arith.mulf %195, %181 : vector<18x128xf32>
    %197 = arith.addf %171, %196 : vector<18x128xf32>
    %198 = vector.extract_strided_slice %177 {offsets = [1, 0], sizes = [18, 128], strides = [1, 1]} : vector<20x128xf32> to vector<18x128xf32>
    %c12 = arith.constant 12 : index
    %199 = memref.load %arg3[%c12] : memref<144xf32, #tpu.memory_space<smem>>
    %200 = vector.broadcast %199 : f32 to vector<18x128xf32>
    %201 = arith.mulf %200, %198 : vector<18x128xf32>
    %202 = arith.addf %185, %201 : vector<18x128xf32>
    %c48 = arith.constant 48 : index
    %203 = memref.load %arg3[%c48] : memref<144xf32, #tpu.memory_space<smem>>
    %204 = vector.broadcast %203 : f32 to vector<18x128xf32>
    %205 = arith.mulf %204, %198 : vector<18x128xf32>
    %206 = arith.addf %189, %205 : vector<18x128xf32>
    %c84 = arith.constant 84 : index
    %207 = memref.load %arg3[%c84] : memref<144xf32, #tpu.memory_space<smem>>
    %208 = vector.broadcast %207 : f32 to vector<18x128xf32>
    %209 = arith.mulf %208, %198 : vector<18x128xf32>
    %210 = arith.addf %193, %209 : vector<18x128xf32>
    %c120 = arith.constant 120 : index
    %211 = memref.load %arg3[%c120] : memref<144xf32, #tpu.memory_space<smem>>
    %212 = vector.broadcast %211 : f32 to vector<18x128xf32>
    %213 = arith.mulf %212, %198 : vector<18x128xf32>
    %214 = arith.addf %197, %213 : vector<18x128xf32>
    %215 = vector.extract_strided_slice %177 {offsets = [2, 0], sizes = [18, 128], strides = [1, 1]} : vector<20x128xf32> to vector<18x128xf32>
    %c15 = arith.constant 15 : index
    %216 = memref.load %arg3[%c15] : memref<144xf32, #tpu.memory_space<smem>>
    %217 = vector.broadcast %216 : f32 to vector<18x128xf32>
    %218 = arith.mulf %217, %215 : vector<18x128xf32>
    %219 = arith.addf %202, %218 : vector<18x128xf32>
    %c51 = arith.constant 51 : index
    %220 = memref.load %arg3[%c51] : memref<144xf32, #tpu.memory_space<smem>>
    %221 = vector.broadcast %220 : f32 to vector<18x128xf32>
    %222 = arith.mulf %221, %215 : vector<18x128xf32>
    %223 = arith.addf %206, %222 : vector<18x128xf32>
    %c87 = arith.constant 87 : index
    %224 = memref.load %arg3[%c87] : memref<144xf32, #tpu.memory_space<smem>>
    %225 = vector.broadcast %224 : f32 to vector<18x128xf32>
    %226 = arith.mulf %225, %215 : vector<18x128xf32>
    %227 = arith.addf %210, %226 : vector<18x128xf32>
    %c123 = arith.constant 123 : index
    %228 = memref.load %arg3[%c123] : memref<144xf32, #tpu.memory_space<smem>>
    %229 = vector.broadcast %228 : f32 to vector<18x128xf32>
    %230 = arith.mulf %229, %215 : vector<18x128xf32>
    %231 = arith.addf %214, %230 : vector<18x128xf32>
    %232 = vector.extract_strided_slice %174 {offsets = [0, 0], sizes = [18, 128], strides = [1, 1]} : vector<20x128xf32> to vector<18x128xf32>
    %c10 = arith.constant 10 : index
    %233 = memref.load %arg3[%c10] : memref<144xf32, #tpu.memory_space<smem>>
    %234 = vector.broadcast %233 : f32 to vector<18x128xf32>
    %235 = arith.mulf %234, %232 : vector<18x128xf32>
    %236 = arith.addf %219, %235 : vector<18x128xf32>
    %c46 = arith.constant 46 : index
    %237 = memref.load %arg3[%c46] : memref<144xf32, #tpu.memory_space<smem>>
    %238 = vector.broadcast %237 : f32 to vector<18x128xf32>
    %239 = arith.mulf %238, %232 : vector<18x128xf32>
    %240 = arith.addf %223, %239 : vector<18x128xf32>
    %c82 = arith.constant 82 : index
    %241 = memref.load %arg3[%c82] : memref<144xf32, #tpu.memory_space<smem>>
    %242 = vector.broadcast %241 : f32 to vector<18x128xf32>
    %243 = arith.mulf %242, %232 : vector<18x128xf32>
    %244 = arith.addf %227, %243 : vector<18x128xf32>
    %c118 = arith.constant 118 : index
    %245 = memref.load %arg3[%c118] : memref<144xf32, #tpu.memory_space<smem>>
    %246 = vector.broadcast %245 : f32 to vector<18x128xf32>
    %247 = arith.mulf %246, %232 : vector<18x128xf32>
    %248 = arith.addf %231, %247 : vector<18x128xf32>
    %249 = vector.extract_strided_slice %174 {offsets = [1, 0], sizes = [18, 128], strides = [1, 1]} : vector<20x128xf32> to vector<18x128xf32>
    %c13 = arith.constant 13 : index
    %250 = memref.load %arg3[%c13] : memref<144xf32, #tpu.memory_space<smem>>
    %251 = vector.broadcast %250 : f32 to vector<18x128xf32>
    %252 = arith.mulf %251, %249 : vector<18x128xf32>
    %253 = arith.addf %236, %252 : vector<18x128xf32>
    %c49 = arith.constant 49 : index
    %254 = memref.load %arg3[%c49] : memref<144xf32, #tpu.memory_space<smem>>
    %255 = vector.broadcast %254 : f32 to vector<18x128xf32>
    %256 = arith.mulf %255, %249 : vector<18x128xf32>
    %257 = arith.addf %240, %256 : vector<18x128xf32>
    %c85 = arith.constant 85 : index
    %258 = memref.load %arg3[%c85] : memref<144xf32, #tpu.memory_space<smem>>
    %259 = vector.broadcast %258 : f32 to vector<18x128xf32>
    %260 = arith.mulf %259, %249 : vector<18x128xf32>
    %261 = arith.addf %244, %260 : vector<18x128xf32>
    %c121 = arith.constant 121 : index
    %262 = memref.load %arg3[%c121] : memref<144xf32, #tpu.memory_space<smem>>
    %263 = vector.broadcast %262 : f32 to vector<18x128xf32>
    %264 = arith.mulf %263, %249 : vector<18x128xf32>
    %265 = arith.addf %248, %264 : vector<18x128xf32>
    %266 = vector.extract_strided_slice %174 {offsets = [2, 0], sizes = [18, 128], strides = [1, 1]} : vector<20x128xf32> to vector<18x128xf32>
    %c16 = arith.constant 16 : index
    %267 = memref.load %arg3[%c16] : memref<144xf32, #tpu.memory_space<smem>>
    %268 = vector.broadcast %267 : f32 to vector<18x128xf32>
    %269 = arith.mulf %268, %266 : vector<18x128xf32>
    %270 = arith.addf %253, %269 : vector<18x128xf32>
    %c52 = arith.constant 52 : index
    %271 = memref.load %arg3[%c52] : memref<144xf32, #tpu.memory_space<smem>>
    %272 = vector.broadcast %271 : f32 to vector<18x128xf32>
    %273 = arith.mulf %272, %266 : vector<18x128xf32>
    %274 = arith.addf %257, %273 : vector<18x128xf32>
    %c88 = arith.constant 88 : index
    %275 = memref.load %arg3[%c88] : memref<144xf32, #tpu.memory_space<smem>>
    %276 = vector.broadcast %275 : f32 to vector<18x128xf32>
    %277 = arith.mulf %276, %266 : vector<18x128xf32>
    %278 = arith.addf %261, %277 : vector<18x128xf32>
    %c124 = arith.constant 124 : index
    %279 = memref.load %arg3[%c124] : memref<144xf32, #tpu.memory_space<smem>>
    %280 = vector.broadcast %279 : f32 to vector<18x128xf32>
    %281 = arith.mulf %280, %266 : vector<18x128xf32>
    %282 = arith.addf %265, %281 : vector<18x128xf32>
    %283 = vector.extract_strided_slice %180 {offsets = [0, 0], sizes = [18, 128], strides = [1, 1]} : vector<20x128xf32> to vector<18x128xf32>
    %c11 = arith.constant 11 : index
    %284 = memref.load %arg3[%c11] : memref<144xf32, #tpu.memory_space<smem>>
    %285 = vector.broadcast %284 : f32 to vector<18x128xf32>
    %286 = arith.mulf %285, %283 : vector<18x128xf32>
    %287 = arith.addf %270, %286 : vector<18x128xf32>
    %c47 = arith.constant 47 : index
    %288 = memref.load %arg3[%c47] : memref<144xf32, #tpu.memory_space<smem>>
    %289 = vector.broadcast %288 : f32 to vector<18x128xf32>
    %290 = arith.mulf %289, %283 : vector<18x128xf32>
    %291 = arith.addf %274, %290 : vector<18x128xf32>
    %c83 = arith.constant 83 : index
    %292 = memref.load %arg3[%c83] : memref<144xf32, #tpu.memory_space<smem>>
    %293 = vector.broadcast %292 : f32 to vector<18x128xf32>
    %294 = arith.mulf %293, %283 : vector<18x128xf32>
    %295 = arith.addf %278, %294 : vector<18x128xf32>
    %c119 = arith.constant 119 : index
    %296 = memref.load %arg3[%c119] : memref<144xf32, #tpu.memory_space<smem>>
    %297 = vector.broadcast %296 : f32 to vector<18x128xf32>
    %298 = arith.mulf %297, %283 : vector<18x128xf32>
    %299 = arith.addf %282, %298 : vector<18x128xf32>
    %300 = vector.extract_strided_slice %180 {offsets = [1, 0], sizes = [18, 128], strides = [1, 1]} : vector<20x128xf32> to vector<18x128xf32>
    %c14 = arith.constant 14 : index
    %301 = memref.load %arg3[%c14] : memref<144xf32, #tpu.memory_space<smem>>
    %302 = vector.broadcast %301 : f32 to vector<18x128xf32>
    %303 = arith.mulf %302, %300 : vector<18x128xf32>
    %304 = arith.addf %287, %303 : vector<18x128xf32>
    %c50 = arith.constant 50 : index
    %305 = memref.load %arg3[%c50] : memref<144xf32, #tpu.memory_space<smem>>
    %306 = vector.broadcast %305 : f32 to vector<18x128xf32>
    %307 = arith.mulf %306, %300 : vector<18x128xf32>
    %308 = arith.addf %291, %307 : vector<18x128xf32>
    %c86 = arith.constant 86 : index
    %309 = memref.load %arg3[%c86] : memref<144xf32, #tpu.memory_space<smem>>
    %310 = vector.broadcast %309 : f32 to vector<18x128xf32>
    %311 = arith.mulf %310, %300 : vector<18x128xf32>
    %312 = arith.addf %295, %311 : vector<18x128xf32>
    %c122 = arith.constant 122 : index
    %313 = memref.load %arg3[%c122] : memref<144xf32, #tpu.memory_space<smem>>
    %314 = vector.broadcast %313 : f32 to vector<18x128xf32>
    %315 = arith.mulf %314, %300 : vector<18x128xf32>
    %316 = arith.addf %299, %315 : vector<18x128xf32>
    %317 = vector.extract_strided_slice %180 {offsets = [2, 0], sizes = [18, 128], strides = [1, 1]} : vector<20x128xf32> to vector<18x128xf32>
    %c17 = arith.constant 17 : index
    %318 = memref.load %arg3[%c17] : memref<144xf32, #tpu.memory_space<smem>>
    %319 = vector.broadcast %318 : f32 to vector<18x128xf32>
    %320 = arith.mulf %319, %317 : vector<18x128xf32>
    %321 = arith.addf %304, %320 : vector<18x128xf32>
    %c53 = arith.constant 53 : index
    %322 = memref.load %arg3[%c53] : memref<144xf32, #tpu.memory_space<smem>>
    %323 = vector.broadcast %322 : f32 to vector<18x128xf32>
    %324 = arith.mulf %323, %317 : vector<18x128xf32>
    %325 = arith.addf %308, %324 : vector<18x128xf32>
    %c89 = arith.constant 89 : index
    %326 = memref.load %arg3[%c89] : memref<144xf32, #tpu.memory_space<smem>>
    %327 = vector.broadcast %326 : f32 to vector<18x128xf32>
    %328 = arith.mulf %327, %317 : vector<18x128xf32>
    %329 = arith.addf %312, %328 : vector<18x128xf32>
    %c125 = arith.constant 125 : index
    %330 = memref.load %arg3[%c125] : memref<144xf32, #tpu.memory_space<smem>>
    %331 = vector.broadcast %330 : f32 to vector<18x128xf32>
    %332 = arith.mulf %331, %317 : vector<18x128xf32>
    %333 = arith.addf %316, %332 : vector<18x128xf32>
    %c0_13 = arith.constant 0 : index
    %c2_14 = arith.constant 2 : index
    %334 = arith.index_cast %1 : i32 to index
    %c0_15 = arith.constant 0 : index
    %335 = vector.load %arg2[%c0_13, %c2_14, %334, %c0_15] : memref<1x4x20x128xf32, #tpu.memory_space<vmem>>, vector<1x1x20x128xf32>
    %336 = vector.shape_cast %335 : vector<1x1x20x128xf32> to vector<20x128xf32>
    %cst_16 = arith.constant 0.000000e+00 : f32
    %337 = vector.broadcast %cst_16 : f32 to vector<20x1xf32>
    %338 = vector.extract_strided_slice %336 {offsets = [0, 0], sizes = [20, 127], strides = [1, 1]} : vector<20x128xf32> to vector<20x127xf32>
    %339 = tpu.concatenate %337, %338 in 1 : vector<20x1xf32>, vector<20x127xf32> -> vector<20x128xf32>
    %cst_17 = arith.constant 0.000000e+00 : f32
    %340 = vector.broadcast %cst_17 : f32 to vector<20x1xf32>
    %341 = vector.extract_strided_slice %336 {offsets = [0, 1], sizes = [20, 127], strides = [1, 1]} : vector<20x128xf32> to vector<20x127xf32>
    %342 = tpu.concatenate %341, %340 in 1 : vector<20x127xf32>, vector<20x1xf32> -> vector<20x128xf32>
    %343 = vector.extract_strided_slice %339 {offsets = [0, 0], sizes = [18, 128], strides = [1, 1]} : vector<20x128xf32> to vector<18x128xf32>
    %c18 = arith.constant 18 : index
    %344 = memref.load %arg3[%c18] : memref<144xf32, #tpu.memory_space<smem>>
    %345 = vector.broadcast %344 : f32 to vector<18x128xf32>
    %346 = arith.mulf %345, %343 : vector<18x128xf32>
    %347 = arith.addf %321, %346 : vector<18x128xf32>
    %c54 = arith.constant 54 : index
    %348 = memref.load %arg3[%c54] : memref<144xf32, #tpu.memory_space<smem>>
    %349 = vector.broadcast %348 : f32 to vector<18x128xf32>
    %350 = arith.mulf %349, %343 : vector<18x128xf32>
    %351 = arith.addf %325, %350 : vector<18x128xf32>
    %c90 = arith.constant 90 : index
    %352 = memref.load %arg3[%c90] : memref<144xf32, #tpu.memory_space<smem>>
    %353 = vector.broadcast %352 : f32 to vector<18x128xf32>
    %354 = arith.mulf %353, %343 : vector<18x128xf32>
    %355 = arith.addf %329, %354 : vector<18x128xf32>
    %c126 = arith.constant 126 : index
    %356 = memref.load %arg3[%c126] : memref<144xf32, #tpu.memory_space<smem>>
    %357 = vector.broadcast %356 : f32 to vector<18x128xf32>
    %358 = arith.mulf %357, %343 : vector<18x128xf32>
    %359 = arith.addf %333, %358 : vector<18x128xf32>
    %360 = vector.extract_strided_slice %339 {offsets = [1, 0], sizes = [18, 128], strides = [1, 1]} : vector<20x128xf32> to vector<18x128xf32>
    %c21 = arith.constant 21 : index
    %361 = memref.load %arg3[%c21] : memref<144xf32, #tpu.memory_space<smem>>
    %362 = vector.broadcast %361 : f32 to vector<18x128xf32>
    %363 = arith.mulf %362, %360 : vector<18x128xf32>
    %364 = arith.addf %347, %363 : vector<18x128xf32>
    %c57 = arith.constant 57 : index
    %365 = memref.load %arg3[%c57] : memref<144xf32, #tpu.memory_space<smem>>
    %366 = vector.broadcast %365 : f32 to vector<18x128xf32>
    %367 = arith.mulf %366, %360 : vector<18x128xf32>
    %368 = arith.addf %351, %367 : vector<18x128xf32>
    %c93 = arith.constant 93 : index
    %369 = memref.load %arg3[%c93] : memref<144xf32, #tpu.memory_space<smem>>
    %370 = vector.broadcast %369 : f32 to vector<18x128xf32>
    %371 = arith.mulf %370, %360 : vector<18x128xf32>
    %372 = arith.addf %355, %371 : vector<18x128xf32>
    %c129 = arith.constant 129 : index
    %373 = memref.load %arg3[%c129] : memref<144xf32, #tpu.memory_space<smem>>
    %374 = vector.broadcast %373 : f32 to vector<18x128xf32>
    %375 = arith.mulf %374, %360 : vector<18x128xf32>
    %376 = arith.addf %359, %375 : vector<18x128xf32>
    %377 = vector.extract_strided_slice %339 {offsets = [2, 0], sizes = [18, 128], strides = [1, 1]} : vector<20x128xf32> to vector<18x128xf32>
    %c24 = arith.constant 24 : index
    %378 = memref.load %arg3[%c24] : memref<144xf32, #tpu.memory_space<smem>>
    %379 = vector.broadcast %378 : f32 to vector<18x128xf32>
    %380 = arith.mulf %379, %377 : vector<18x128xf32>
    %381 = arith.addf %364, %380 : vector<18x128xf32>
    %c60 = arith.constant 60 : index
    %382 = memref.load %arg3[%c60] : memref<144xf32, #tpu.memory_space<smem>>
    %383 = vector.broadcast %382 : f32 to vector<18x128xf32>
    %384 = arith.mulf %383, %377 : vector<18x128xf32>
    %385 = arith.addf %368, %384 : vector<18x128xf32>
    %c96 = arith.constant 96 : index
    %386 = memref.load %arg3[%c96] : memref<144xf32, #tpu.memory_space<smem>>
    %387 = vector.broadcast %386 : f32 to vector<18x128xf32>
    %388 = arith.mulf %387, %377 : vector<18x128xf32>
    %389 = arith.addf %372, %388 : vector<18x128xf32>
    %c132 = arith.constant 132 : index
    %390 = memref.load %arg3[%c132] : memref<144xf32, #tpu.memory_space<smem>>
    %391 = vector.broadcast %390 : f32 to vector<18x128xf32>
    %392 = arith.mulf %391, %377 : vector<18x128xf32>
    %393 = arith.addf %376, %392 : vector<18x128xf32>
    %394 = vector.extract_strided_slice %336 {offsets = [0, 0], sizes = [18, 128], strides = [1, 1]} : vector<20x128xf32> to vector<18x128xf32>
    %c19 = arith.constant 19 : index
    %395 = memref.load %arg3[%c19] : memref<144xf32, #tpu.memory_space<smem>>
    %396 = vector.broadcast %395 : f32 to vector<18x128xf32>
    %397 = arith.mulf %396, %394 : vector<18x128xf32>
    %398 = arith.addf %381, %397 : vector<18x128xf32>
    %c55 = arith.constant 55 : index
    %399 = memref.load %arg3[%c55] : memref<144xf32, #tpu.memory_space<smem>>
    %400 = vector.broadcast %399 : f32 to vector<18x128xf32>
    %401 = arith.mulf %400, %394 : vector<18x128xf32>
    %402 = arith.addf %385, %401 : vector<18x128xf32>
    %c91 = arith.constant 91 : index
    %403 = memref.load %arg3[%c91] : memref<144xf32, #tpu.memory_space<smem>>
    %404 = vector.broadcast %403 : f32 to vector<18x128xf32>
    %405 = arith.mulf %404, %394 : vector<18x128xf32>
    %406 = arith.addf %389, %405 : vector<18x128xf32>
    %c127 = arith.constant 127 : index
    %407 = memref.load %arg3[%c127] : memref<144xf32, #tpu.memory_space<smem>>
    %408 = vector.broadcast %407 : f32 to vector<18x128xf32>
    %409 = arith.mulf %408, %394 : vector<18x128xf32>
    %410 = arith.addf %393, %409 : vector<18x128xf32>
    %411 = vector.extract_strided_slice %336 {offsets = [1, 0], sizes = [18, 128], strides = [1, 1]} : vector<20x128xf32> to vector<18x128xf32>
    %c22 = arith.constant 22 : index
    %412 = memref.load %arg3[%c22] : memref<144xf32, #tpu.memory_space<smem>>
    %413 = vector.broadcast %412 : f32 to vector<18x128xf32>
    %414 = arith.mulf %413, %411 : vector<18x128xf32>
    %415 = arith.addf %398, %414 : vector<18x128xf32>
    %c58 = arith.constant 58 : index
    %416 = memref.load %arg3[%c58] : memref<144xf32, #tpu.memory_space<smem>>
    %417 = vector.broadcast %416 : f32 to vector<18x128xf32>
    %418 = arith.mulf %417, %411 : vector<18x128xf32>
    %419 = arith.addf %402, %418 : vector<18x128xf32>
    %c94 = arith.constant 94 : index
    %420 = memref.load %arg3[%c94] : memref<144xf32, #tpu.memory_space<smem>>
    %421 = vector.broadcast %420 : f32 to vector<18x128xf32>
    %422 = arith.mulf %421, %411 : vector<18x128xf32>
    %423 = arith.addf %406, %422 : vector<18x128xf32>
    %c130 = arith.constant 130 : index
    %424 = memref.load %arg3[%c130] : memref<144xf32, #tpu.memory_space<smem>>
    %425 = vector.broadcast %424 : f32 to vector<18x128xf32>
    %426 = arith.mulf %425, %411 : vector<18x128xf32>
    %427 = arith.addf %410, %426 : vector<18x128xf32>
    %428 = vector.extract_strided_slice %336 {offsets = [2, 0], sizes = [18, 128], strides = [1, 1]} : vector<20x128xf32> to vector<18x128xf32>
    %c25 = arith.constant 25 : index
    %429 = memref.load %arg3[%c25] : memref<144xf32, #tpu.memory_space<smem>>
    %430 = vector.broadcast %429 : f32 to vector<18x128xf32>
    %431 = arith.mulf %430, %428 : vector<18x128xf32>
    %432 = arith.addf %415, %431 : vector<18x128xf32>
    %c61 = arith.constant 61 : index
    %433 = memref.load %arg3[%c61] : memref<144xf32, #tpu.memory_space<smem>>
    %434 = vector.broadcast %433 : f32 to vector<18x128xf32>
    %435 = arith.mulf %434, %428 : vector<18x128xf32>
    %436 = arith.addf %419, %435 : vector<18x128xf32>
    %c97 = arith.constant 97 : index
    %437 = memref.load %arg3[%c97] : memref<144xf32, #tpu.memory_space<smem>>
    %438 = vector.broadcast %437 : f32 to vector<18x128xf32>
    %439 = arith.mulf %438, %428 : vector<18x128xf32>
    %440 = arith.addf %423, %439 : vector<18x128xf32>
    %c133 = arith.constant 133 : index
    %441 = memref.load %arg3[%c133] : memref<144xf32, #tpu.memory_space<smem>>
    %442 = vector.broadcast %441 : f32 to vector<18x128xf32>
    %443 = arith.mulf %442, %428 : vector<18x128xf32>
    %444 = arith.addf %427, %443 : vector<18x128xf32>
    %445 = vector.extract_strided_slice %342 {offsets = [0, 0], sizes = [18, 128], strides = [1, 1]} : vector<20x128xf32> to vector<18x128xf32>
    %c20 = arith.constant 20 : index
    %446 = memref.load %arg3[%c20] : memref<144xf32, #tpu.memory_space<smem>>
    %447 = vector.broadcast %446 : f32 to vector<18x128xf32>
    %448 = arith.mulf %447, %445 : vector<18x128xf32>
    %449 = arith.addf %432, %448 : vector<18x128xf32>
    %c56 = arith.constant 56 : index
    %450 = memref.load %arg3[%c56] : memref<144xf32, #tpu.memory_space<smem>>
    %451 = vector.broadcast %450 : f32 to vector<18x128xf32>
    %452 = arith.mulf %451, %445 : vector<18x128xf32>
    %453 = arith.addf %436, %452 : vector<18x128xf32>
    %c92 = arith.constant 92 : index
    %454 = memref.load %arg3[%c92] : memref<144xf32, #tpu.memory_space<smem>>
    %455 = vector.broadcast %454 : f32 to vector<18x128xf32>
    %456 = arith.mulf %455, %445 : vector<18x128xf32>
    %457 = arith.addf %440, %456 : vector<18x128xf32>
    %c128 = arith.constant 128 : index
    %458 = memref.load %arg3[%c128] : memref<144xf32, #tpu.memory_space<smem>>
    %459 = vector.broadcast %458 : f32 to vector<18x128xf32>
    %460 = arith.mulf %459, %445 : vector<18x128xf32>
    %461 = arith.addf %444, %460 : vector<18x128xf32>
    %462 = vector.extract_strided_slice %342 {offsets = [1, 0], sizes = [18, 128], strides = [1, 1]} : vector<20x128xf32> to vector<18x128xf32>
    %c23 = arith.constant 23 : index
    %463 = memref.load %arg3[%c23] : memref<144xf32, #tpu.memory_space<smem>>
    %464 = vector.broadcast %463 : f32 to vector<18x128xf32>
    %465 = arith.mulf %464, %462 : vector<18x128xf32>
    %466 = arith.addf %449, %465 : vector<18x128xf32>
    %c59 = arith.constant 59 : index
    %467 = memref.load %arg3[%c59] : memref<144xf32, #tpu.memory_space<smem>>
    %468 = vector.broadcast %467 : f32 to vector<18x128xf32>
    %469 = arith.mulf %468, %462 : vector<18x128xf32>
    %470 = arith.addf %453, %469 : vector<18x128xf32>
    %c95 = arith.constant 95 : index
    %471 = memref.load %arg3[%c95] : memref<144xf32, #tpu.memory_space<smem>>
    %472 = vector.broadcast %471 : f32 to vector<18x128xf32>
    %473 = arith.mulf %472, %462 : vector<18x128xf32>
    %474 = arith.addf %457, %473 : vector<18x128xf32>
    %c131 = arith.constant 131 : index
    %475 = memref.load %arg3[%c131] : memref<144xf32, #tpu.memory_space<smem>>
    %476 = vector.broadcast %475 : f32 to vector<18x128xf32>
    %477 = arith.mulf %476, %462 : vector<18x128xf32>
    %478 = arith.addf %461, %477 : vector<18x128xf32>
    %479 = vector.extract_strided_slice %342 {offsets = [2, 0], sizes = [18, 128], strides = [1, 1]} : vector<20x128xf32> to vector<18x128xf32>
    %c26 = arith.constant 26 : index
    %480 = memref.load %arg3[%c26] : memref<144xf32, #tpu.memory_space<smem>>
    %481 = vector.broadcast %480 : f32 to vector<18x128xf32>
    %482 = arith.mulf %481, %479 : vector<18x128xf32>
    %483 = arith.addf %466, %482 : vector<18x128xf32>
    %c62 = arith.constant 62 : index
    %484 = memref.load %arg3[%c62] : memref<144xf32, #tpu.memory_space<smem>>
    %485 = vector.broadcast %484 : f32 to vector<18x128xf32>
    %486 = arith.mulf %485, %479 : vector<18x128xf32>
    %487 = arith.addf %470, %486 : vector<18x128xf32>
    %c98 = arith.constant 98 : index
    %488 = memref.load %arg3[%c98] : memref<144xf32, #tpu.memory_space<smem>>
    %489 = vector.broadcast %488 : f32 to vector<18x128xf32>
    %490 = arith.mulf %489, %479 : vector<18x128xf32>
    %491 = arith.addf %474, %490 : vector<18x128xf32>
    %c134 = arith.constant 134 : index
    %492 = memref.load %arg3[%c134] : memref<144xf32, #tpu.memory_space<smem>>
    %493 = vector.broadcast %492 : f32 to vector<18x128xf32>
    %494 = arith.mulf %493, %479 : vector<18x128xf32>
    %495 = arith.addf %478, %494 : vector<18x128xf32>
    %c0_18 = arith.constant 0 : index
    %c3_19 = arith.constant 3 : index
    %496 = arith.index_cast %1 : i32 to index
    %c0_20 = arith.constant 0 : index
    %497 = vector.load %arg2[%c0_18, %c3_19, %496, %c0_20] : memref<1x4x20x128xf32, #tpu.memory_space<vmem>>, vector<1x1x20x128xf32>
    %498 = vector.shape_cast %497 : vector<1x1x20x128xf32> to vector<20x128xf32>
    %cst_21 = arith.constant 0.000000e+00 : f32
    %499 = vector.broadcast %cst_21 : f32 to vector<20x1xf32>
    %500 = vector.extract_strided_slice %498 {offsets = [0, 0], sizes = [20, 127], strides = [1, 1]} : vector<20x128xf32> to vector<20x127xf32>
    %501 = tpu.concatenate %499, %500 in 1 : vector<20x1xf32>, vector<20x127xf32> -> vector<20x128xf32>
    %cst_22 = arith.constant 0.000000e+00 : f32
    %502 = vector.broadcast %cst_22 : f32 to vector<20x1xf32>
    %503 = vector.extract_strided_slice %498 {offsets = [0, 1], sizes = [20, 127], strides = [1, 1]} : vector<20x128xf32> to vector<20x127xf32>
    %504 = tpu.concatenate %503, %502 in 1 : vector<20x127xf32>, vector<20x1xf32> -> vector<20x128xf32>
    %505 = vector.extract_strided_slice %501 {offsets = [0, 0], sizes = [18, 128], strides = [1, 1]} : vector<20x128xf32> to vector<18x128xf32>
    %c27 = arith.constant 27 : index
    %506 = memref.load %arg3[%c27] : memref<144xf32, #tpu.memory_space<smem>>
    %507 = vector.broadcast %506 : f32 to vector<18x128xf32>
    %508 = arith.mulf %507, %505 : vector<18x128xf32>
    %509 = arith.addf %483, %508 : vector<18x128xf32>
    %c63 = arith.constant 63 : index
    %510 = memref.load %arg3[%c63] : memref<144xf32, #tpu.memory_space<smem>>
    %511 = vector.broadcast %510 : f32 to vector<18x128xf32>
    %512 = arith.mulf %511, %505 : vector<18x128xf32>
    %513 = arith.addf %487, %512 : vector<18x128xf32>
    %c99 = arith.constant 99 : index
    %514 = memref.load %arg3[%c99] : memref<144xf32, #tpu.memory_space<smem>>
    %515 = vector.broadcast %514 : f32 to vector<18x128xf32>
    %516 = arith.mulf %515, %505 : vector<18x128xf32>
    %517 = arith.addf %491, %516 : vector<18x128xf32>
    %c135 = arith.constant 135 : index
    %518 = memref.load %arg3[%c135] : memref<144xf32, #tpu.memory_space<smem>>
    %519 = vector.broadcast %518 : f32 to vector<18x128xf32>
    %520 = arith.mulf %519, %505 : vector<18x128xf32>
    %521 = arith.addf %495, %520 : vector<18x128xf32>
    %522 = vector.extract_strided_slice %501 {offsets = [1, 0], sizes = [18, 128], strides = [1, 1]} : vector<20x128xf32> to vector<18x128xf32>
    %c30 = arith.constant 30 : index
    %523 = memref.load %arg3[%c30] : memref<144xf32, #tpu.memory_space<smem>>
    %524 = vector.broadcast %523 : f32 to vector<18x128xf32>
    %525 = arith.mulf %524, %522 : vector<18x128xf32>
    %526 = arith.addf %509, %525 : vector<18x128xf32>
    %c66 = arith.constant 66 : index
    %527 = memref.load %arg3[%c66] : memref<144xf32, #tpu.memory_space<smem>>
    %528 = vector.broadcast %527 : f32 to vector<18x128xf32>
    %529 = arith.mulf %528, %522 : vector<18x128xf32>
    %530 = arith.addf %513, %529 : vector<18x128xf32>
    %c102 = arith.constant 102 : index
    %531 = memref.load %arg3[%c102] : memref<144xf32, #tpu.memory_space<smem>>
    %532 = vector.broadcast %531 : f32 to vector<18x128xf32>
    %533 = arith.mulf %532, %522 : vector<18x128xf32>
    %534 = arith.addf %517, %533 : vector<18x128xf32>
    %c138 = arith.constant 138 : index
    %535 = memref.load %arg3[%c138] : memref<144xf32, #tpu.memory_space<smem>>
    %536 = vector.broadcast %535 : f32 to vector<18x128xf32>
    %537 = arith.mulf %536, %522 : vector<18x128xf32>
    %538 = arith.addf %521, %537 : vector<18x128xf32>
    %539 = vector.extract_strided_slice %501 {offsets = [2, 0], sizes = [18, 128], strides = [1, 1]} : vector<20x128xf32> to vector<18x128xf32>
    %c33 = arith.constant 33 : index
    %540 = memref.load %arg3[%c33] : memref<144xf32, #tpu.memory_space<smem>>
    %541 = vector.broadcast %540 : f32 to vector<18x128xf32>
    %542 = arith.mulf %541, %539 : vector<18x128xf32>
    %543 = arith.addf %526, %542 : vector<18x128xf32>
    %c69 = arith.constant 69 : index
    %544 = memref.load %arg3[%c69] : memref<144xf32, #tpu.memory_space<smem>>
    %545 = vector.broadcast %544 : f32 to vector<18x128xf32>
    %546 = arith.mulf %545, %539 : vector<18x128xf32>
    %547 = arith.addf %530, %546 : vector<18x128xf32>
    %c105 = arith.constant 105 : index
    %548 = memref.load %arg3[%c105] : memref<144xf32, #tpu.memory_space<smem>>
    %549 = vector.broadcast %548 : f32 to vector<18x128xf32>
    %550 = arith.mulf %549, %539 : vector<18x128xf32>
    %551 = arith.addf %534, %550 : vector<18x128xf32>
    %c141 = arith.constant 141 : index
    %552 = memref.load %arg3[%c141] : memref<144xf32, #tpu.memory_space<smem>>
    %553 = vector.broadcast %552 : f32 to vector<18x128xf32>
    %554 = arith.mulf %553, %539 : vector<18x128xf32>
    %555 = arith.addf %538, %554 : vector<18x128xf32>
    %556 = vector.extract_strided_slice %498 {offsets = [0, 0], sizes = [18, 128], strides = [1, 1]} : vector<20x128xf32> to vector<18x128xf32>
    %c28 = arith.constant 28 : index
    %557 = memref.load %arg3[%c28] : memref<144xf32, #tpu.memory_space<smem>>
    %558 = vector.broadcast %557 : f32 to vector<18x128xf32>
    %559 = arith.mulf %558, %556 : vector<18x128xf32>
    %560 = arith.addf %543, %559 : vector<18x128xf32>
    %c64 = arith.constant 64 : index
    %561 = memref.load %arg3[%c64] : memref<144xf32, #tpu.memory_space<smem>>
    %562 = vector.broadcast %561 : f32 to vector<18x128xf32>
    %563 = arith.mulf %562, %556 : vector<18x128xf32>
    %564 = arith.addf %547, %563 : vector<18x128xf32>
    %c100 = arith.constant 100 : index
    %565 = memref.load %arg3[%c100] : memref<144xf32, #tpu.memory_space<smem>>
    %566 = vector.broadcast %565 : f32 to vector<18x128xf32>
    %567 = arith.mulf %566, %556 : vector<18x128xf32>
    %568 = arith.addf %551, %567 : vector<18x128xf32>
    %c136 = arith.constant 136 : index
    %569 = memref.load %arg3[%c136] : memref<144xf32, #tpu.memory_space<smem>>
    %570 = vector.broadcast %569 : f32 to vector<18x128xf32>
    %571 = arith.mulf %570, %556 : vector<18x128xf32>
    %572 = arith.addf %555, %571 : vector<18x128xf32>
    %573 = vector.extract_strided_slice %498 {offsets = [1, 0], sizes = [18, 128], strides = [1, 1]} : vector<20x128xf32> to vector<18x128xf32>
    %c31 = arith.constant 31 : index
    %574 = memref.load %arg3[%c31] : memref<144xf32, #tpu.memory_space<smem>>
    %575 = vector.broadcast %574 : f32 to vector<18x128xf32>
    %576 = arith.mulf %575, %573 : vector<18x128xf32>
    %577 = arith.addf %560, %576 : vector<18x128xf32>
    %c67 = arith.constant 67 : index
    %578 = memref.load %arg3[%c67] : memref<144xf32, #tpu.memory_space<smem>>
    %579 = vector.broadcast %578 : f32 to vector<18x128xf32>
    %580 = arith.mulf %579, %573 : vector<18x128xf32>
    %581 = arith.addf %564, %580 : vector<18x128xf32>
    %c103 = arith.constant 103 : index
    %582 = memref.load %arg3[%c103] : memref<144xf32, #tpu.memory_space<smem>>
    %583 = vector.broadcast %582 : f32 to vector<18x128xf32>
    %584 = arith.mulf %583, %573 : vector<18x128xf32>
    %585 = arith.addf %568, %584 : vector<18x128xf32>
    %c139 = arith.constant 139 : index
    %586 = memref.load %arg3[%c139] : memref<144xf32, #tpu.memory_space<smem>>
    %587 = vector.broadcast %586 : f32 to vector<18x128xf32>
    %588 = arith.mulf %587, %573 : vector<18x128xf32>
    %589 = arith.addf %572, %588 : vector<18x128xf32>
    %590 = vector.extract_strided_slice %498 {offsets = [2, 0], sizes = [18, 128], strides = [1, 1]} : vector<20x128xf32> to vector<18x128xf32>
    %c34 = arith.constant 34 : index
    %591 = memref.load %arg3[%c34] : memref<144xf32, #tpu.memory_space<smem>>
    %592 = vector.broadcast %591 : f32 to vector<18x128xf32>
    %593 = arith.mulf %592, %590 : vector<18x128xf32>
    %594 = arith.addf %577, %593 : vector<18x128xf32>
    %c70 = arith.constant 70 : index
    %595 = memref.load %arg3[%c70] : memref<144xf32, #tpu.memory_space<smem>>
    %596 = vector.broadcast %595 : f32 to vector<18x128xf32>
    %597 = arith.mulf %596, %590 : vector<18x128xf32>
    %598 = arith.addf %581, %597 : vector<18x128xf32>
    %c106 = arith.constant 106 : index
    %599 = memref.load %arg3[%c106] : memref<144xf32, #tpu.memory_space<smem>>
    %600 = vector.broadcast %599 : f32 to vector<18x128xf32>
    %601 = arith.mulf %600, %590 : vector<18x128xf32>
    %602 = arith.addf %585, %601 : vector<18x128xf32>
    %c142 = arith.constant 142 : index
    %603 = memref.load %arg3[%c142] : memref<144xf32, #tpu.memory_space<smem>>
    %604 = vector.broadcast %603 : f32 to vector<18x128xf32>
    %605 = arith.mulf %604, %590 : vector<18x128xf32>
    %606 = arith.addf %589, %605 : vector<18x128xf32>
    %607 = vector.extract_strided_slice %504 {offsets = [0, 0], sizes = [18, 128], strides = [1, 1]} : vector<20x128xf32> to vector<18x128xf32>
    %c29 = arith.constant 29 : index
    %608 = memref.load %arg3[%c29] : memref<144xf32, #tpu.memory_space<smem>>
    %609 = vector.broadcast %608 : f32 to vector<18x128xf32>
    %610 = arith.mulf %609, %607 : vector<18x128xf32>
    %611 = arith.addf %594, %610 : vector<18x128xf32>
    %c65 = arith.constant 65 : index
    %612 = memref.load %arg3[%c65] : memref<144xf32, #tpu.memory_space<smem>>
    %613 = vector.broadcast %612 : f32 to vector<18x128xf32>
    %614 = arith.mulf %613, %607 : vector<18x128xf32>
    %615 = arith.addf %598, %614 : vector<18x128xf32>
    %c101 = arith.constant 101 : index
    %616 = memref.load %arg3[%c101] : memref<144xf32, #tpu.memory_space<smem>>
    %617 = vector.broadcast %616 : f32 to vector<18x128xf32>
    %618 = arith.mulf %617, %607 : vector<18x128xf32>
    %619 = arith.addf %602, %618 : vector<18x128xf32>
    %c137 = arith.constant 137 : index
    %620 = memref.load %arg3[%c137] : memref<144xf32, #tpu.memory_space<smem>>
    %621 = vector.broadcast %620 : f32 to vector<18x128xf32>
    %622 = arith.mulf %621, %607 : vector<18x128xf32>
    %623 = arith.addf %606, %622 : vector<18x128xf32>
    %624 = vector.extract_strided_slice %504 {offsets = [1, 0], sizes = [18, 128], strides = [1, 1]} : vector<20x128xf32> to vector<18x128xf32>
    %c32 = arith.constant 32 : index
    %625 = memref.load %arg3[%c32] : memref<144xf32, #tpu.memory_space<smem>>
    %626 = vector.broadcast %625 : f32 to vector<18x128xf32>
    %627 = arith.mulf %626, %624 : vector<18x128xf32>
    %628 = arith.addf %611, %627 : vector<18x128xf32>
    %c68 = arith.constant 68 : index
    %629 = memref.load %arg3[%c68] : memref<144xf32, #tpu.memory_space<smem>>
    %630 = vector.broadcast %629 : f32 to vector<18x128xf32>
    %631 = arith.mulf %630, %624 : vector<18x128xf32>
    %632 = arith.addf %615, %631 : vector<18x128xf32>
    %c104 = arith.constant 104 : index
    %633 = memref.load %arg3[%c104] : memref<144xf32, #tpu.memory_space<smem>>
    %634 = vector.broadcast %633 : f32 to vector<18x128xf32>
    %635 = arith.mulf %634, %624 : vector<18x128xf32>
    %636 = arith.addf %619, %635 : vector<18x128xf32>
    %c140 = arith.constant 140 : index
    %637 = memref.load %arg3[%c140] : memref<144xf32, #tpu.memory_space<smem>>
    %638 = vector.broadcast %637 : f32 to vector<18x128xf32>
    %639 = arith.mulf %638, %624 : vector<18x128xf32>
    %640 = arith.addf %623, %639 : vector<18x128xf32>
    %641 = vector.extract_strided_slice %504 {offsets = [2, 0], sizes = [18, 128], strides = [1, 1]} : vector<20x128xf32> to vector<18x128xf32>
    %c35 = arith.constant 35 : index
    %642 = memref.load %arg3[%c35] : memref<144xf32, #tpu.memory_space<smem>>
    %643 = vector.broadcast %642 : f32 to vector<18x128xf32>
    %644 = arith.mulf %643, %641 : vector<18x128xf32>
    %645 = arith.addf %628, %644 : vector<18x128xf32>
    %c71 = arith.constant 71 : index
    %646 = memref.load %arg3[%c71] : memref<144xf32, #tpu.memory_space<smem>>
    %647 = vector.broadcast %646 : f32 to vector<18x128xf32>
    %648 = arith.mulf %647, %641 : vector<18x128xf32>
    %649 = arith.addf %632, %648 : vector<18x128xf32>
    %c107 = arith.constant 107 : index
    %650 = memref.load %arg3[%c107] : memref<144xf32, #tpu.memory_space<smem>>
    %651 = vector.broadcast %650 : f32 to vector<18x128xf32>
    %652 = arith.mulf %651, %641 : vector<18x128xf32>
    %653 = arith.addf %636, %652 : vector<18x128xf32>
    %c143 = arith.constant 143 : index
    %654 = memref.load %arg3[%c143] : memref<144xf32, #tpu.memory_space<smem>>
    %655 = vector.broadcast %654 : f32 to vector<18x128xf32>
    %656 = arith.mulf %655, %641 : vector<18x128xf32>
    %657 = arith.addf %640, %656 : vector<18x128xf32>
    %c16_i32_23 = arith.constant 16 : i32
    %658 = arith.muli %arg1, %c16_i32_23 : i32
    %c1_i32 = arith.constant 1 : i32
    %659 = arith.subi %658, %c1_i32 : i32
    %660 = tpu.iota {dimensions = array<i32: 0>} : vector<18x128xi32>
    %661 = vector.broadcast %659 : i32 to vector<18x128xi32>
    %662 = arith.addi %661, %660 : vector<18x128xi32>
    %c0_i32 = arith.constant 0 : i32
    %663 = vector.broadcast %c0_i32 : i32 to vector<18x128xi32>
    %664 = arith.cmpi sge, %662, %663 : vector<18x128xi32>
    %c16_i32_24 = arith.constant 16 : i32
    %665 = vector.broadcast %c16_i32_24 : i32 to vector<18x128xi32>
    %666 = arith.cmpi slt, %662, %665 : vector<18x128xi32>
    %667 = arith.andi %664, %666 : vector<18x128xi1>
    %668 = tpu.iota {dimensions = array<i32: 1>} : vector<18x128xi32>
    %c16_i32_25 = arith.constant 16 : i32
    %669 = vector.broadcast %c16_i32_25 : i32 to vector<18x128xi32>
    %670 = arith.cmpi slt, %668, %669 : vector<18x128xi32>
    %671 = arith.andi %667, %670 : vector<18x128xi1>
    %cst_26 = arith.constant 0.000000e+00 : f32
    %672 = vector.broadcast %cst_26 : f32 to vector<18x128xf32>
    %673 = arith.cmpf oge, %645, %672 : vector<18x128xf32>
    %cst_27 = arith.constant 1.000000e-01 : f32
    %674 = vector.broadcast %cst_27 : f32 to vector<18x128xf32>
    %675 = arith.mulf %674, %645 : vector<18x128xf32>
    %676 = arith.select %673, %645, %675 : vector<18x128xi1>, vector<18x128xf32>
    %cst_28 = arith.constant 0.000000e+00 : f32
    %677 = vector.broadcast %cst_28 : f32 to vector<18x128xf32>
    %678 = arith.select %671, %676, %677 : vector<18x128xi1>, vector<18x128xf32>
    %cst_29 = arith.constant 0.000000e+00 : f32
    %679 = vector.broadcast %cst_29 : f32 to vector<18x128xf32>
    %680 = arith.cmpf oge, %649, %679 : vector<18x128xf32>
    %cst_30 = arith.constant 1.000000e-01 : f32
    %681 = vector.broadcast %cst_30 : f32 to vector<18x128xf32>
    %682 = arith.mulf %681, %649 : vector<18x128xf32>
    %683 = arith.select %680, %649, %682 : vector<18x128xi1>, vector<18x128xf32>
    %cst_31 = arith.constant 0.000000e+00 : f32
    %684 = vector.broadcast %cst_31 : f32 to vector<18x128xf32>
    %685 = arith.select %671, %683, %684 : vector<18x128xi1>, vector<18x128xf32>
    %cst_32 = arith.constant 0.000000e+00 : f32
    %686 = vector.broadcast %cst_32 : f32 to vector<18x128xf32>
    %687 = arith.cmpf oge, %653, %686 : vector<18x128xf32>
    %cst_33 = arith.constant 1.000000e-01 : f32
    %688 = vector.broadcast %cst_33 : f32 to vector<18x128xf32>
    %689 = arith.mulf %688, %653 : vector<18x128xf32>
    %690 = arith.select %687, %653, %689 : vector<18x128xi1>, vector<18x128xf32>
    %cst_34 = arith.constant 0.000000e+00 : f32
    %691 = vector.broadcast %cst_34 : f32 to vector<18x128xf32>
    %692 = arith.select %671, %690, %691 : vector<18x128xi1>, vector<18x128xf32>
    %cst_35 = arith.constant 0.000000e+00 : f32
    %693 = vector.broadcast %cst_35 : f32 to vector<18x128xf32>
    %694 = arith.cmpf oge, %657, %693 : vector<18x128xf32>
    %cst_36 = arith.constant 1.000000e-01 : f32
    %695 = vector.broadcast %cst_36 : f32 to vector<18x128xf32>
    %696 = arith.mulf %695, %657 : vector<18x128xf32>
    %697 = arith.select %694, %657, %696 : vector<18x128xi1>, vector<18x128xf32>
    %cst_37 = arith.constant 0.000000e+00 : f32
    %698 = vector.broadcast %cst_37 : f32 to vector<18x128xf32>
    %699 = arith.select %671, %697, %698 : vector<18x128xi1>, vector<18x128xf32>
    %c0_38 = arith.constant 0 : index
    %700 = memref.load %arg6[%c0_38] : memref<2xf32, #tpu.memory_space<smem>>
    %701 = vector.broadcast %700 : f32 to vector<16x128xf32>
    %c1_39 = arith.constant 1 : index
    %702 = memref.load %arg6[%c1_39] : memref<2xf32, #tpu.memory_space<smem>>
    %703 = vector.broadcast %702 : f32 to vector<16x128xf32>
    %cst_40 = arith.constant 0.000000e+00 : f32
    %704 = vector.broadcast %cst_40 : f32 to vector<18x1xf32>
    %705 = vector.extract_strided_slice %678 {offsets = [0, 0], sizes = [18, 127], strides = [1, 1]} : vector<18x128xf32> to vector<18x127xf32>
    %706 = tpu.concatenate %704, %705 in 1 : vector<18x1xf32>, vector<18x127xf32> -> vector<18x128xf32>
    %cst_41 = arith.constant 0.000000e+00 : f32
    %707 = vector.broadcast %cst_41 : f32 to vector<18x1xf32>
    %708 = vector.extract_strided_slice %678 {offsets = [0, 1], sizes = [18, 127], strides = [1, 1]} : vector<18x128xf32> to vector<18x127xf32>
    %709 = tpu.concatenate %708, %707 in 1 : vector<18x127xf32>, vector<18x1xf32> -> vector<18x128xf32>
    %710 = vector.extract_strided_slice %706 {offsets = [0, 0], sizes = [16, 128], strides = [1, 1]} : vector<18x128xf32> to vector<16x128xf32>
    %c0_42 = arith.constant 0 : index
    %711 = memref.load %arg5[%c0_42] : memref<72xf32, #tpu.memory_space<smem>>
    %712 = vector.broadcast %711 : f32 to vector<16x128xf32>
    %713 = arith.mulf %712, %710 : vector<16x128xf32>
    %714 = arith.addf %701, %713 : vector<16x128xf32>
    %c36_43 = arith.constant 36 : index
    %715 = memref.load %arg5[%c36_43] : memref<72xf32, #tpu.memory_space<smem>>
    %716 = vector.broadcast %715 : f32 to vector<16x128xf32>
    %717 = arith.mulf %716, %710 : vector<16x128xf32>
    %718 = arith.addf %703, %717 : vector<16x128xf32>
    %719 = vector.extract_strided_slice %706 {offsets = [1, 0], sizes = [16, 128], strides = [1, 1]} : vector<18x128xf32> to vector<16x128xf32>
    %c3_44 = arith.constant 3 : index
    %720 = memref.load %arg5[%c3_44] : memref<72xf32, #tpu.memory_space<smem>>
    %721 = vector.broadcast %720 : f32 to vector<16x128xf32>
    %722 = arith.mulf %721, %719 : vector<16x128xf32>
    %723 = arith.addf %714, %722 : vector<16x128xf32>
    %c39_45 = arith.constant 39 : index
    %724 = memref.load %arg5[%c39_45] : memref<72xf32, #tpu.memory_space<smem>>
    %725 = vector.broadcast %724 : f32 to vector<16x128xf32>
    %726 = arith.mulf %725, %719 : vector<16x128xf32>
    %727 = arith.addf %718, %726 : vector<16x128xf32>
    %728 = vector.extract_strided_slice %706 {offsets = [2, 0], sizes = [16, 128], strides = [1, 1]} : vector<18x128xf32> to vector<16x128xf32>
    %c6_46 = arith.constant 6 : index
    %729 = memref.load %arg5[%c6_46] : memref<72xf32, #tpu.memory_space<smem>>
    %730 = vector.broadcast %729 : f32 to vector<16x128xf32>
    %731 = arith.mulf %730, %728 : vector<16x128xf32>
    %732 = arith.addf %723, %731 : vector<16x128xf32>
    %c42_47 = arith.constant 42 : index
    %733 = memref.load %arg5[%c42_47] : memref<72xf32, #tpu.memory_space<smem>>
    %734 = vector.broadcast %733 : f32 to vector<16x128xf32>
    %735 = arith.mulf %734, %728 : vector<16x128xf32>
    %736 = arith.addf %727, %735 : vector<16x128xf32>
    %737 = vector.extract_strided_slice %678 {offsets = [0, 0], sizes = [16, 128], strides = [1, 1]} : vector<18x128xf32> to vector<16x128xf32>
    %c1_48 = arith.constant 1 : index
    %738 = memref.load %arg5[%c1_48] : memref<72xf32, #tpu.memory_space<smem>>
    %739 = vector.broadcast %738 : f32 to vector<16x128xf32>
    %740 = arith.mulf %739, %737 : vector<16x128xf32>
    %741 = arith.addf %732, %740 : vector<16x128xf32>
    %c37_49 = arith.constant 37 : index
    %742 = memref.load %arg5[%c37_49] : memref<72xf32, #tpu.memory_space<smem>>
    %743 = vector.broadcast %742 : f32 to vector<16x128xf32>
    %744 = arith.mulf %743, %737 : vector<16x128xf32>
    %745 = arith.addf %736, %744 : vector<16x128xf32>
    %746 = vector.extract_strided_slice %678 {offsets = [1, 0], sizes = [16, 128], strides = [1, 1]} : vector<18x128xf32> to vector<16x128xf32>
    %c4_50 = arith.constant 4 : index
    %747 = memref.load %arg5[%c4_50] : memref<72xf32, #tpu.memory_space<smem>>
    %748 = vector.broadcast %747 : f32 to vector<16x128xf32>
    %749 = arith.mulf %748, %746 : vector<16x128xf32>
    %750 = arith.addf %741, %749 : vector<16x128xf32>
    %c40_51 = arith.constant 40 : index
    %751 = memref.load %arg5[%c40_51] : memref<72xf32, #tpu.memory_space<smem>>
    %752 = vector.broadcast %751 : f32 to vector<16x128xf32>
    %753 = arith.mulf %752, %746 : vector<16x128xf32>
    %754 = arith.addf %745, %753 : vector<16x128xf32>
    %755 = vector.extract_strided_slice %678 {offsets = [2, 0], sizes = [16, 128], strides = [1, 1]} : vector<18x128xf32> to vector<16x128xf32>
    %c7_52 = arith.constant 7 : index
    %756 = memref.load %arg5[%c7_52] : memref<72xf32, #tpu.memory_space<smem>>
    %757 = vector.broadcast %756 : f32 to vector<16x128xf32>
    %758 = arith.mulf %757, %755 : vector<16x128xf32>
    %759 = arith.addf %750, %758 : vector<16x128xf32>
    %c43_53 = arith.constant 43 : index
    %760 = memref.load %arg5[%c43_53] : memref<72xf32, #tpu.memory_space<smem>>
    %761 = vector.broadcast %760 : f32 to vector<16x128xf32>
    %762 = arith.mulf %761, %755 : vector<16x128xf32>
    %763 = arith.addf %754, %762 : vector<16x128xf32>
    %764 = vector.extract_strided_slice %709 {offsets = [0, 0], sizes = [16, 128], strides = [1, 1]} : vector<18x128xf32> to vector<16x128xf32>
    %c2_54 = arith.constant 2 : index
    %765 = memref.load %arg5[%c2_54] : memref<72xf32, #tpu.memory_space<smem>>
    %766 = vector.broadcast %765 : f32 to vector<16x128xf32>
    %767 = arith.mulf %766, %764 : vector<16x128xf32>
    %768 = arith.addf %759, %767 : vector<16x128xf32>
    %c38_55 = arith.constant 38 : index
    %769 = memref.load %arg5[%c38_55] : memref<72xf32, #tpu.memory_space<smem>>
    %770 = vector.broadcast %769 : f32 to vector<16x128xf32>
    %771 = arith.mulf %770, %764 : vector<16x128xf32>
    %772 = arith.addf %763, %771 : vector<16x128xf32>
    %773 = vector.extract_strided_slice %709 {offsets = [1, 0], sizes = [16, 128], strides = [1, 1]} : vector<18x128xf32> to vector<16x128xf32>
    %c5_56 = arith.constant 5 : index
    %774 = memref.load %arg5[%c5_56] : memref<72xf32, #tpu.memory_space<smem>>
    %775 = vector.broadcast %774 : f32 to vector<16x128xf32>
    %776 = arith.mulf %775, %773 : vector<16x128xf32>
    %777 = arith.addf %768, %776 : vector<16x128xf32>
    %c41_57 = arith.constant 41 : index
    %778 = memref.load %arg5[%c41_57] : memref<72xf32, #tpu.memory_space<smem>>
    %779 = vector.broadcast %778 : f32 to vector<16x128xf32>
    %780 = arith.mulf %779, %773 : vector<16x128xf32>
    %781 = arith.addf %772, %780 : vector<16x128xf32>
    %782 = vector.extract_strided_slice %709 {offsets = [2, 0], sizes = [16, 128], strides = [1, 1]} : vector<18x128xf32> to vector<16x128xf32>
    %c8_58 = arith.constant 8 : index
    %783 = memref.load %arg5[%c8_58] : memref<72xf32, #tpu.memory_space<smem>>
    %784 = vector.broadcast %783 : f32 to vector<16x128xf32>
    %785 = arith.mulf %784, %782 : vector<16x128xf32>
    %786 = arith.addf %777, %785 : vector<16x128xf32>
    %c44_59 = arith.constant 44 : index
    %787 = memref.load %arg5[%c44_59] : memref<72xf32, #tpu.memory_space<smem>>
    %788 = vector.broadcast %787 : f32 to vector<16x128xf32>
    %789 = arith.mulf %788, %782 : vector<16x128xf32>
    %790 = arith.addf %781, %789 : vector<16x128xf32>
    %cst_60 = arith.constant 0.000000e+00 : f32
    %791 = vector.broadcast %cst_60 : f32 to vector<18x1xf32>
    %792 = vector.extract_strided_slice %685 {offsets = [0, 0], sizes = [18, 127], strides = [1, 1]} : vector<18x128xf32> to vector<18x127xf32>
    %793 = tpu.concatenate %791, %792 in 1 : vector<18x1xf32>, vector<18x127xf32> -> vector<18x128xf32>
    %cst_61 = arith.constant 0.000000e+00 : f32
    %794 = vector.broadcast %cst_61 : f32 to vector<18x1xf32>
    %795 = vector.extract_strided_slice %685 {offsets = [0, 1], sizes = [18, 127], strides = [1, 1]} : vector<18x128xf32> to vector<18x127xf32>
    %796 = tpu.concatenate %795, %794 in 1 : vector<18x127xf32>, vector<18x1xf32> -> vector<18x128xf32>
    %797 = vector.extract_strided_slice %793 {offsets = [0, 0], sizes = [16, 128], strides = [1, 1]} : vector<18x128xf32> to vector<16x128xf32>
    %c9_62 = arith.constant 9 : index
    %798 = memref.load %arg5[%c9_62] : memref<72xf32, #tpu.memory_space<smem>>
    %799 = vector.broadcast %798 : f32 to vector<16x128xf32>
    %800 = arith.mulf %799, %797 : vector<16x128xf32>
    %801 = arith.addf %786, %800 : vector<16x128xf32>
    %c45_63 = arith.constant 45 : index
    %802 = memref.load %arg5[%c45_63] : memref<72xf32, #tpu.memory_space<smem>>
    %803 = vector.broadcast %802 : f32 to vector<16x128xf32>
    %804 = arith.mulf %803, %797 : vector<16x128xf32>
    %805 = arith.addf %790, %804 : vector<16x128xf32>
    %806 = vector.extract_strided_slice %793 {offsets = [1, 0], sizes = [16, 128], strides = [1, 1]} : vector<18x128xf32> to vector<16x128xf32>
    %c12_64 = arith.constant 12 : index
    %807 = memref.load %arg5[%c12_64] : memref<72xf32, #tpu.memory_space<smem>>
    %808 = vector.broadcast %807 : f32 to vector<16x128xf32>
    %809 = arith.mulf %808, %806 : vector<16x128xf32>
    %810 = arith.addf %801, %809 : vector<16x128xf32>
    %c48_65 = arith.constant 48 : index
    %811 = memref.load %arg5[%c48_65] : memref<72xf32, #tpu.memory_space<smem>>
    %812 = vector.broadcast %811 : f32 to vector<16x128xf32>
    %813 = arith.mulf %812, %806 : vector<16x128xf32>
    %814 = arith.addf %805, %813 : vector<16x128xf32>
    %815 = vector.extract_strided_slice %793 {offsets = [2, 0], sizes = [16, 128], strides = [1, 1]} : vector<18x128xf32> to vector<16x128xf32>
    %c15_66 = arith.constant 15 : index
    %816 = memref.load %arg5[%c15_66] : memref<72xf32, #tpu.memory_space<smem>>
    %817 = vector.broadcast %816 : f32 to vector<16x128xf32>
    %818 = arith.mulf %817, %815 : vector<16x128xf32>
    %819 = arith.addf %810, %818 : vector<16x128xf32>
    %c51_67 = arith.constant 51 : index
    %820 = memref.load %arg5[%c51_67] : memref<72xf32, #tpu.memory_space<smem>>
    %821 = vector.broadcast %820 : f32 to vector<16x128xf32>
    %822 = arith.mulf %821, %815 : vector<16x128xf32>
    %823 = arith.addf %814, %822 : vector<16x128xf32>
    %824 = vector.extract_strided_slice %685 {offsets = [0, 0], sizes = [16, 128], strides = [1, 1]} : vector<18x128xf32> to vector<16x128xf32>
    %c10_68 = arith.constant 10 : index
    %825 = memref.load %arg5[%c10_68] : memref<72xf32, #tpu.memory_space<smem>>
    %826 = vector.broadcast %825 : f32 to vector<16x128xf32>
    %827 = arith.mulf %826, %824 : vector<16x128xf32>
    %828 = arith.addf %819, %827 : vector<16x128xf32>
    %c46_69 = arith.constant 46 : index
    %829 = memref.load %arg5[%c46_69] : memref<72xf32, #tpu.memory_space<smem>>
    %830 = vector.broadcast %829 : f32 to vector<16x128xf32>
    %831 = arith.mulf %830, %824 : vector<16x128xf32>
    %832 = arith.addf %823, %831 : vector<16x128xf32>
    %833 = vector.extract_strided_slice %685 {offsets = [1, 0], sizes = [16, 128], strides = [1, 1]} : vector<18x128xf32> to vector<16x128xf32>
    %c13_70 = arith.constant 13 : index
    %834 = memref.load %arg5[%c13_70] : memref<72xf32, #tpu.memory_space<smem>>
    %835 = vector.broadcast %834 : f32 to vector<16x128xf32>
    %836 = arith.mulf %835, %833 : vector<16x128xf32>
    %837 = arith.addf %828, %836 : vector<16x128xf32>
    %c49_71 = arith.constant 49 : index
    %838 = memref.load %arg5[%c49_71] : memref<72xf32, #tpu.memory_space<smem>>
    %839 = vector.broadcast %838 : f32 to vector<16x128xf32>
    %840 = arith.mulf %839, %833 : vector<16x128xf32>
    %841 = arith.addf %832, %840 : vector<16x128xf32>
    %842 = vector.extract_strided_slice %685 {offsets = [2, 0], sizes = [16, 128], strides = [1, 1]} : vector<18x128xf32> to vector<16x128xf32>
    %c16_72 = arith.constant 16 : index
    %843 = memref.load %arg5[%c16_72] : memref<72xf32, #tpu.memory_space<smem>>
    %844 = vector.broadcast %843 : f32 to vector<16x128xf32>
    %845 = arith.mulf %844, %842 : vector<16x128xf32>
    %846 = arith.addf %837, %845 : vector<16x128xf32>
    %c52_73 = arith.constant 52 : index
    %847 = memref.load %arg5[%c52_73] : memref<72xf32, #tpu.memory_space<smem>>
    %848 = vector.broadcast %847 : f32 to vector<16x128xf32>
    %849 = arith.mulf %848, %842 : vector<16x128xf32>
    %850 = arith.addf %841, %849 : vector<16x128xf32>
    %851 = vector.extract_strided_slice %796 {offsets = [0, 0], sizes = [16, 128], strides = [1, 1]} : vector<18x128xf32> to vector<16x128xf32>
    %c11_74 = arith.constant 11 : index
    %852 = memref.load %arg5[%c11_74] : memref<72xf32, #tpu.memory_space<smem>>
    %853 = vector.broadcast %852 : f32 to vector<16x128xf32>
    %854 = arith.mulf %853, %851 : vector<16x128xf32>
    %855 = arith.addf %846, %854 : vector<16x128xf32>
    %c47_75 = arith.constant 47 : index
    %856 = memref.load %arg5[%c47_75] : memref<72xf32, #tpu.memory_space<smem>>
    %857 = vector.broadcast %856 : f32 to vector<16x128xf32>
    %858 = arith.mulf %857, %851 : vector<16x128xf32>
    %859 = arith.addf %850, %858 : vector<16x128xf32>
    %860 = vector.extract_strided_slice %796 {offsets = [1, 0], sizes = [16, 128], strides = [1, 1]} : vector<18x128xf32> to vector<16x128xf32>
    %c14_76 = arith.constant 14 : index
    %861 = memref.load %arg5[%c14_76] : memref<72xf32, #tpu.memory_space<smem>>
    %862 = vector.broadcast %861 : f32 to vector<16x128xf32>
    %863 = arith.mulf %862, %860 : vector<16x128xf32>
    %864 = arith.addf %855, %863 : vector<16x128xf32>
    %c50_77 = arith.constant 50 : index
    %865 = memref.load %arg5[%c50_77] : memref<72xf32, #tpu.memory_space<smem>>
    %866 = vector.broadcast %865 : f32 to vector<16x128xf32>
    %867 = arith.mulf %866, %860 : vector<16x128xf32>
    %868 = arith.addf %859, %867 : vector<16x128xf32>
    %869 = vector.extract_strided_slice %796 {offsets = [2, 0], sizes = [16, 128], strides = [1, 1]} : vector<18x128xf32> to vector<16x128xf32>
    %c17_78 = arith.constant 17 : index
    %870 = memref.load %arg5[%c17_78] : memref<72xf32, #tpu.memory_space<smem>>
    %871 = vector.broadcast %870 : f32 to vector<16x128xf32>
    %872 = arith.mulf %871, %869 : vector<16x128xf32>
    %873 = arith.addf %864, %872 : vector<16x128xf32>
    %c53_79 = arith.constant 53 : index
    %874 = memref.load %arg5[%c53_79] : memref<72xf32, #tpu.memory_space<smem>>
    %875 = vector.broadcast %874 : f32 to vector<16x128xf32>
    %876 = arith.mulf %875, %869 : vector<16x128xf32>
    %877 = arith.addf %868, %876 : vector<16x128xf32>
    %cst_80 = arith.constant 0.000000e+00 : f32
    %878 = vector.broadcast %cst_80 : f32 to vector<18x1xf32>
    %879 = vector.extract_strided_slice %692 {offsets = [0, 0], sizes = [18, 127], strides = [1, 1]} : vector<18x128xf32> to vector<18x127xf32>
    %880 = tpu.concatenate %878, %879 in 1 : vector<18x1xf32>, vector<18x127xf32> -> vector<18x128xf32>
    %cst_81 = arith.constant 0.000000e+00 : f32
    %881 = vector.broadcast %cst_81 : f32 to vector<18x1xf32>
    %882 = vector.extract_strided_slice %692 {offsets = [0, 1], sizes = [18, 127], strides = [1, 1]} : vector<18x128xf32> to vector<18x127xf32>
    %883 = tpu.concatenate %882, %881 in 1 : vector<18x127xf32>, vector<18x1xf32> -> vector<18x128xf32>
    %884 = vector.extract_strided_slice %880 {offsets = [0, 0], sizes = [16, 128], strides = [1, 1]} : vector<18x128xf32> to vector<16x128xf32>
    %c18_82 = arith.constant 18 : index
    %885 = memref.load %arg5[%c18_82] : memref<72xf32, #tpu.memory_space<smem>>
    %886 = vector.broadcast %885 : f32 to vector<16x128xf32>
    %887 = arith.mulf %886, %884 : vector<16x128xf32>
    %888 = arith.addf %873, %887 : vector<16x128xf32>
    %c54_83 = arith.constant 54 : index
    %889 = memref.load %arg5[%c54_83] : memref<72xf32, #tpu.memory_space<smem>>
    %890 = vector.broadcast %889 : f32 to vector<16x128xf32>
    %891 = arith.mulf %890, %884 : vector<16x128xf32>
    %892 = arith.addf %877, %891 : vector<16x128xf32>
    %893 = vector.extract_strided_slice %880 {offsets = [1, 0], sizes = [16, 128], strides = [1, 1]} : vector<18x128xf32> to vector<16x128xf32>
    %c21_84 = arith.constant 21 : index
    %894 = memref.load %arg5[%c21_84] : memref<72xf32, #tpu.memory_space<smem>>
    %895 = vector.broadcast %894 : f32 to vector<16x128xf32>
    %896 = arith.mulf %895, %893 : vector<16x128xf32>
    %897 = arith.addf %888, %896 : vector<16x128xf32>
    %c57_85 = arith.constant 57 : index
    %898 = memref.load %arg5[%c57_85] : memref<72xf32, #tpu.memory_space<smem>>
    %899 = vector.broadcast %898 : f32 to vector<16x128xf32>
    %900 = arith.mulf %899, %893 : vector<16x128xf32>
    %901 = arith.addf %892, %900 : vector<16x128xf32>
    %902 = vector.extract_strided_slice %880 {offsets = [2, 0], sizes = [16, 128], strides = [1, 1]} : vector<18x128xf32> to vector<16x128xf32>
    %c24_86 = arith.constant 24 : index
    %903 = memref.load %arg5[%c24_86] : memref<72xf32, #tpu.memory_space<smem>>
    %904 = vector.broadcast %903 : f32 to vector<16x128xf32>
    %905 = arith.mulf %904, %902 : vector<16x128xf32>
    %906 = arith.addf %897, %905 : vector<16x128xf32>
    %c60_87 = arith.constant 60 : index
    %907 = memref.load %arg5[%c60_87] : memref<72xf32, #tpu.memory_space<smem>>
    %908 = vector.broadcast %907 : f32 to vector<16x128xf32>
    %909 = arith.mulf %908, %902 : vector<16x128xf32>
    %910 = arith.addf %901, %909 : vector<16x128xf32>
    %911 = vector.extract_strided_slice %692 {offsets = [0, 0], sizes = [16, 128], strides = [1, 1]} : vector<18x128xf32> to vector<16x128xf32>
    %c19_88 = arith.constant 19 : index
    %912 = memref.load %arg5[%c19_88] : memref<72xf32, #tpu.memory_space<smem>>
    %913 = vector.broadcast %912 : f32 to vector<16x128xf32>
    %914 = arith.mulf %913, %911 : vector<16x128xf32>
    %915 = arith.addf %906, %914 : vector<16x128xf32>
    %c55_89 = arith.constant 55 : index
    %916 = memref.load %arg5[%c55_89] : memref<72xf32, #tpu.memory_space<smem>>
    %917 = vector.broadcast %916 : f32 to vector<16x128xf32>
    %918 = arith.mulf %917, %911 : vector<16x128xf32>
    %919 = arith.addf %910, %918 : vector<16x128xf32>
    %920 = vector.extract_strided_slice %692 {offsets = [1, 0], sizes = [16, 128], strides = [1, 1]} : vector<18x128xf32> to vector<16x128xf32>
    %c22_90 = arith.constant 22 : index
    %921 = memref.load %arg5[%c22_90] : memref<72xf32, #tpu.memory_space<smem>>
    %922 = vector.broadcast %921 : f32 to vector<16x128xf32>
    %923 = arith.mulf %922, %920 : vector<16x128xf32>
    %924 = arith.addf %915, %923 : vector<16x128xf32>
    %c58_91 = arith.constant 58 : index
    %925 = memref.load %arg5[%c58_91] : memref<72xf32, #tpu.memory_space<smem>>
    %926 = vector.broadcast %925 : f32 to vector<16x128xf32>
    %927 = arith.mulf %926, %920 : vector<16x128xf32>
    %928 = arith.addf %919, %927 : vector<16x128xf32>
    %929 = vector.extract_strided_slice %692 {offsets = [2, 0], sizes = [16, 128], strides = [1, 1]} : vector<18x128xf32> to vector<16x128xf32>
    %c25_92 = arith.constant 25 : index
    %930 = memref.load %arg5[%c25_92] : memref<72xf32, #tpu.memory_space<smem>>
    %931 = vector.broadcast %930 : f32 to vector<16x128xf32>
    %932 = arith.mulf %931, %929 : vector<16x128xf32>
    %933 = arith.addf %924, %932 : vector<16x128xf32>
    %c61_93 = arith.constant 61 : index
    %934 = memref.load %arg5[%c61_93] : memref<72xf32, #tpu.memory_space<smem>>
    %935 = vector.broadcast %934 : f32 to vector<16x128xf32>
    %936 = arith.mulf %935, %929 : vector<16x128xf32>
    %937 = arith.addf %928, %936 : vector<16x128xf32>
    %938 = vector.extract_strided_slice %883 {offsets = [0, 0], sizes = [16, 128], strides = [1, 1]} : vector<18x128xf32> to vector<16x128xf32>
    %c20_94 = arith.constant 20 : index
    %939 = memref.load %arg5[%c20_94] : memref<72xf32, #tpu.memory_space<smem>>
    %940 = vector.broadcast %939 : f32 to vector<16x128xf32>
    %941 = arith.mulf %940, %938 : vector<16x128xf32>
    %942 = arith.addf %933, %941 : vector<16x128xf32>
    %c56_95 = arith.constant 56 : index
    %943 = memref.load %arg5[%c56_95] : memref<72xf32, #tpu.memory_space<smem>>
    %944 = vector.broadcast %943 : f32 to vector<16x128xf32>
    %945 = arith.mulf %944, %938 : vector<16x128xf32>
    %946 = arith.addf %937, %945 : vector<16x128xf32>
    %947 = vector.extract_strided_slice %883 {offsets = [1, 0], sizes = [16, 128], strides = [1, 1]} : vector<18x128xf32> to vector<16x128xf32>
    %c23_96 = arith.constant 23 : index
    %948 = memref.load %arg5[%c23_96] : memref<72xf32, #tpu.memory_space<smem>>
    %949 = vector.broadcast %948 : f32 to vector<16x128xf32>
    %950 = arith.mulf %949, %947 : vector<16x128xf32>
    %951 = arith.addf %942, %950 : vector<16x128xf32>
    %c59_97 = arith.constant 59 : index
    %952 = memref.load %arg5[%c59_97] : memref<72xf32, #tpu.memory_space<smem>>
    %953 = vector.broadcast %952 : f32 to vector<16x128xf32>
    %954 = arith.mulf %953, %947 : vector<16x128xf32>
    %955 = arith.addf %946, %954 : vector<16x128xf32>
    %956 = vector.extract_strided_slice %883 {offsets = [2, 0], sizes = [16, 128], strides = [1, 1]} : vector<18x128xf32> to vector<16x128xf32>
    %c26_98 = arith.constant 26 : index
    %957 = memref.load %arg5[%c26_98] : memref<72xf32, #tpu.memory_space<smem>>
    %958 = vector.broadcast %957 : f32 to vector<16x128xf32>
    %959 = arith.mulf %958, %956 : vector<16x128xf32>
    %960 = arith.addf %951, %959 : vector<16x128xf32>
    %c62_99 = arith.constant 62 : index
    %961 = memref.load %arg5[%c62_99] : memref<72xf32, #tpu.memory_space<smem>>
    %962 = vector.broadcast %961 : f32 to vector<16x128xf32>
    %963 = arith.mulf %962, %956 : vector<16x128xf32>
    %964 = arith.addf %955, %963 : vector<16x128xf32>
    %cst_100 = arith.constant 0.000000e+00 : f32
    %965 = vector.broadcast %cst_100 : f32 to vector<18x1xf32>
    %966 = vector.extract_strided_slice %699 {offsets = [0, 0], sizes = [18, 127], strides = [1, 1]} : vector<18x128xf32> to vector<18x127xf32>
    %967 = tpu.concatenate %965, %966 in 1 : vector<18x1xf32>, vector<18x127xf32> -> vector<18x128xf32>
    %cst_101 = arith.constant 0.000000e+00 : f32
    %968 = vector.broadcast %cst_101 : f32 to vector<18x1xf32>
    %969 = vector.extract_strided_slice %699 {offsets = [0, 1], sizes = [18, 127], strides = [1, 1]} : vector<18x128xf32> to vector<18x127xf32>
    %970 = tpu.concatenate %969, %968 in 1 : vector<18x127xf32>, vector<18x1xf32> -> vector<18x128xf32>
    %971 = vector.extract_strided_slice %967 {offsets = [0, 0], sizes = [16, 128], strides = [1, 1]} : vector<18x128xf32> to vector<16x128xf32>
    %c27_102 = arith.constant 27 : index
    %972 = memref.load %arg5[%c27_102] : memref<72xf32, #tpu.memory_space<smem>>
    %973 = vector.broadcast %972 : f32 to vector<16x128xf32>
    %974 = arith.mulf %973, %971 : vector<16x128xf32>
    %975 = arith.addf %960, %974 : vector<16x128xf32>
    %c63_103 = arith.constant 63 : index
    %976 = memref.load %arg5[%c63_103] : memref<72xf32, #tpu.memory_space<smem>>
    %977 = vector.broadcast %976 : f32 to vector<16x128xf32>
    %978 = arith.mulf %977, %971 : vector<16x128xf32>
    %979 = arith.addf %964, %978 : vector<16x128xf32>
    %980 = vector.extract_strided_slice %967 {offsets = [1, 0], sizes = [16, 128], strides = [1, 1]} : vector<18x128xf32> to vector<16x128xf32>
    %c30_104 = arith.constant 30 : index
    %981 = memref.load %arg5[%c30_104] : memref<72xf32, #tpu.memory_space<smem>>
    %982 = vector.broadcast %981 : f32 to vector<16x128xf32>
    %983 = arith.mulf %982, %980 : vector<16x128xf32>
    %984 = arith.addf %975, %983 : vector<16x128xf32>
    %c66_105 = arith.constant 66 : index
    %985 = memref.load %arg5[%c66_105] : memref<72xf32, #tpu.memory_space<smem>>
    %986 = vector.broadcast %985 : f32 to vector<16x128xf32>
    %987 = arith.mulf %986, %980 : vector<16x128xf32>
    %988 = arith.addf %979, %987 : vector<16x128xf32>
    %989 = vector.extract_strided_slice %967 {offsets = [2, 0], sizes = [16, 128], strides = [1, 1]} : vector<18x128xf32> to vector<16x128xf32>
    %c33_106 = arith.constant 33 : index
    %990 = memref.load %arg5[%c33_106] : memref<72xf32, #tpu.memory_space<smem>>
    %991 = vector.broadcast %990 : f32 to vector<16x128xf32>
    %992 = arith.mulf %991, %989 : vector<16x128xf32>
    %993 = arith.addf %984, %992 : vector<16x128xf32>
    %c69_107 = arith.constant 69 : index
    %994 = memref.load %arg5[%c69_107] : memref<72xf32, #tpu.memory_space<smem>>
    %995 = vector.broadcast %994 : f32 to vector<16x128xf32>
    %996 = arith.mulf %995, %989 : vector<16x128xf32>
    %997 = arith.addf %988, %996 : vector<16x128xf32>
    %998 = vector.extract_strided_slice %699 {offsets = [0, 0], sizes = [16, 128], strides = [1, 1]} : vector<18x128xf32> to vector<16x128xf32>
    %c28_108 = arith.constant 28 : index
    %999 = memref.load %arg5[%c28_108] : memref<72xf32, #tpu.memory_space<smem>>
    %1000 = vector.broadcast %999 : f32 to vector<16x128xf32>
    %1001 = arith.mulf %1000, %998 : vector<16x128xf32>
    %1002 = arith.addf %993, %1001 : vector<16x128xf32>
    %c64_109 = arith.constant 64 : index
    %1003 = memref.load %arg5[%c64_109] : memref<72xf32, #tpu.memory_space<smem>>
    %1004 = vector.broadcast %1003 : f32 to vector<16x128xf32>
    %1005 = arith.mulf %1004, %998 : vector<16x128xf32>
    %1006 = arith.addf %997, %1005 : vector<16x128xf32>
    %1007 = vector.extract_strided_slice %699 {offsets = [1, 0], sizes = [16, 128], strides = [1, 1]} : vector<18x128xf32> to vector<16x128xf32>
    %c31_110 = arith.constant 31 : index
    %1008 = memref.load %arg5[%c31_110] : memref<72xf32, #tpu.memory_space<smem>>
    %1009 = vector.broadcast %1008 : f32 to vector<16x128xf32>
    %1010 = arith.mulf %1009, %1007 : vector<16x128xf32>
    %1011 = arith.addf %1002, %1010 : vector<16x128xf32>
    %c67_111 = arith.constant 67 : index
    %1012 = memref.load %arg5[%c67_111] : memref<72xf32, #tpu.memory_space<smem>>
    %1013 = vector.broadcast %1012 : f32 to vector<16x128xf32>
    %1014 = arith.mulf %1013, %1007 : vector<16x128xf32>
    %1015 = arith.addf %1006, %1014 : vector<16x128xf32>
    %1016 = vector.extract_strided_slice %699 {offsets = [2, 0], sizes = [16, 128], strides = [1, 1]} : vector<18x128xf32> to vector<16x128xf32>
    %c34_112 = arith.constant 34 : index
    %1017 = memref.load %arg5[%c34_112] : memref<72xf32, #tpu.memory_space<smem>>
    %1018 = vector.broadcast %1017 : f32 to vector<16x128xf32>
    %1019 = arith.mulf %1018, %1016 : vector<16x128xf32>
    %1020 = arith.addf %1011, %1019 : vector<16x128xf32>
    %c70_113 = arith.constant 70 : index
    %1021 = memref.load %arg5[%c70_113] : memref<72xf32, #tpu.memory_space<smem>>
    %1022 = vector.broadcast %1021 : f32 to vector<16x128xf32>
    %1023 = arith.mulf %1022, %1016 : vector<16x128xf32>
    %1024 = arith.addf %1015, %1023 : vector<16x128xf32>
    %1025 = vector.extract_strided_slice %970 {offsets = [0, 0], sizes = [16, 128], strides = [1, 1]} : vector<18x128xf32> to vector<16x128xf32>
    %c29_114 = arith.constant 29 : index
    %1026 = memref.load %arg5[%c29_114] : memref<72xf32, #tpu.memory_space<smem>>
    %1027 = vector.broadcast %1026 : f32 to vector<16x128xf32>
    %1028 = arith.mulf %1027, %1025 : vector<16x128xf32>
    %1029 = arith.addf %1020, %1028 : vector<16x128xf32>
    %c65_115 = arith.constant 65 : index
    %1030 = memref.load %arg5[%c65_115] : memref<72xf32, #tpu.memory_space<smem>>
    %1031 = vector.broadcast %1030 : f32 to vector<16x128xf32>
    %1032 = arith.mulf %1031, %1025 : vector<16x128xf32>
    %1033 = arith.addf %1024, %1032 : vector<16x128xf32>
    %1034 = vector.extract_strided_slice %970 {offsets = [1, 0], sizes = [16, 128], strides = [1, 1]} : vector<18x128xf32> to vector<16x128xf32>
    %c32_116 = arith.constant 32 : index
    %1035 = memref.load %arg5[%c32_116] : memref<72xf32, #tpu.memory_space<smem>>
    %1036 = vector.broadcast %1035 : f32 to vector<16x128xf32>
    %1037 = arith.mulf %1036, %1034 : vector<16x128xf32>
    %1038 = arith.addf %1029, %1037 : vector<16x128xf32>
    %c68_117 = arith.constant 68 : index
    %1039 = memref.load %arg5[%c68_117] : memref<72xf32, #tpu.memory_space<smem>>
    %1040 = vector.broadcast %1039 : f32 to vector<16x128xf32>
    %1041 = arith.mulf %1040, %1034 : vector<16x128xf32>
    %1042 = arith.addf %1033, %1041 : vector<16x128xf32>
    %1043 = vector.extract_strided_slice %970 {offsets = [2, 0], sizes = [16, 128], strides = [1, 1]} : vector<18x128xf32> to vector<16x128xf32>
    %c35_118 = arith.constant 35 : index
    %1044 = memref.load %arg5[%c35_118] : memref<72xf32, #tpu.memory_space<smem>>
    %1045 = vector.broadcast %1044 : f32 to vector<16x128xf32>
    %1046 = arith.mulf %1045, %1043 : vector<16x128xf32>
    %1047 = arith.addf %1038, %1046 : vector<16x128xf32>
    %c71_119 = arith.constant 71 : index
    %1048 = memref.load %arg5[%c71_119] : memref<72xf32, #tpu.memory_space<smem>>
    %1049 = vector.broadcast %1048 : f32 to vector<16x128xf32>
    %1050 = arith.mulf %1049, %1043 : vector<16x128xf32>
    %1051 = arith.addf %1042, %1050 : vector<16x128xf32>
    %1052 = arith.negf %1047 : vector<16x128xf32>
    %1053 = math.exp %1052 : vector<16x128xf32>
    %cst_120 = arith.constant 1.000000e+00 : f32
    %1054 = vector.broadcast %cst_120 : f32 to vector<16x128xf32>
    %1055 = arith.addf %1054, %1053 : vector<16x128xf32>
    %1056 = arith.divf %1054, %1055 : vector<16x128xf32>
    %1057 = arith.negf %1051 : vector<16x128xf32>
    %1058 = math.exp %1057 : vector<16x128xf32>
    %cst_121 = arith.constant 1.000000e+00 : f32
    %1059 = vector.broadcast %cst_121 : f32 to vector<16x128xf32>
    %1060 = arith.addf %1059, %1058 : vector<16x128xf32>
    %1061 = arith.divf %1059, %1060 : vector<16x128xf32>
    %1062 = tpu.iota {dimensions = array<i32: 0>} : vector<16x128xi32>
    %1063 = tpu.iota {dimensions = array<i32: 1>} : vector<16x128xi32>
    %c16_i32_122 = arith.constant 16 : i32
    %1064 = arith.muli %arg1, %c16_i32_122 : i32
    %1065 = vector.broadcast %1064 : i32 to vector<16x128xi32>
    %1066 = arith.addi %1062, %1065 : vector<16x128xi32>
    %1067 = arith.sitofp %1066 : vector<16x128xi32> to vector<16x128xf32>
    %1068 = arith.sitofp %1063 : vector<16x128xi32> to vector<16x128xf32>
    %c0_123 = arith.constant 0 : index
    %c0_124 = arith.constant 0 : index
    %c0_125 = arith.constant 0 : index
    %c0_126 = arith.constant 0 : index
    %1069 = vector.load %arg7[%c0_123, %c0_124, %c0_125, %c0_126] : memref<1x2x16x128xf32, #tpu.memory_space<vmem>>, vector<1x1x16x128xf32>
    %1070 = vector.shape_cast %1069 : vector<1x1x16x128xf32> to vector<16x128xf32>
    %1071 = vector.shape_cast %1056 : vector<16x128xf32> to vector<1x1x16x128xf32>
    tpu.vector_store %arg7[%c0_123, %c0_124, %c0_125, %c0_126], %1071 {strides = array<i32>} : memref<1x2x16x128xf32, #tpu.memory_space<vmem>>, vector<1x1x16x128xf32>,
    %c0_127 = arith.constant 0 : index
    %c1_128 = arith.constant 1 : index
    %c0_129 = arith.constant 0 : index
    %c0_130 = arith.constant 0 : index
    %1072 = vector.load %arg7[%c0_127, %c1_128, %c0_129, %c0_130] : memref<1x2x16x128xf32, #tpu.memory_space<vmem>>, vector<1x1x16x128xf32>
    %1073 = vector.shape_cast %1072 : vector<1x1x16x128xf32> to vector<16x128xf32>
    %1074 = vector.shape_cast %1061 : vector<16x128xf32> to vector<1x1x16x128xf32>
    tpu.vector_store %arg7[%c0_127, %c1_128, %c0_129, %c0_130], %1074 {strides = array<i32>} : memref<1x2x16x128xf32, #tpu.memory_space<vmem>>, vector<1x1x16x128xf32>,
    %1075 = arith.addf %1067, %1056 : vector<16x128xf32>
    %cst_131 = arith.constant 8.000000e+00 : f32
    %1076 = vector.broadcast %cst_131 : f32 to vector<16x128xf32>
    %1077 = arith.mulf %1075, %1076 : vector<16x128xf32>
    %c0_132 = arith.constant 0 : index
    %c0_133 = arith.constant 0 : index
    %c0_134 = arith.constant 0 : index
    %c0_135 = arith.constant 0 : index
    %1078 = vector.load %arg8[%c0_132, %c0_133, %c0_134, %c0_135] : memref<1x2x16x128xf32, #tpu.memory_space<vmem>>, vector<1x1x16x128xf32>
    %1079 = vector.shape_cast %1078 : vector<1x1x16x128xf32> to vector<16x128xf32>
    %1080 = vector.shape_cast %1077 : vector<16x128xf32> to vector<1x1x16x128xf32>
    tpu.vector_store %arg8[%c0_132, %c0_133, %c0_134, %c0_135], %1080 {strides = array<i32>} : memref<1x2x16x128xf32, #tpu.memory_space<vmem>>, vector<1x1x16x128xf32>,
    %1081 = arith.addf %1068, %1061 : vector<16x128xf32>
    %cst_136 = arith.constant 8.000000e+00 : f32
    %1082 = vector.broadcast %cst_136 : f32 to vector<16x128xf32>
    %1083 = arith.mulf %1081, %1082 : vector<16x128xf32>
    %c0_137 = arith.constant 0 : index
    %c1_138 = arith.constant 1 : index
    %c0_139 = arith.constant 0 : index
    %c0_140 = arith.constant 0 : index
    %1084 = vector.load %arg8[%c0_137, %c1_138, %c0_139, %c0_140] : memref<1x2x16x128xf32, #tpu.memory_space<vmem>>, vector<1x1x16x128xf32>
    %1085 = vector.shape_cast %1084 : vector<1x1x16x128xf32> to vector<16x128xf32>
    %1086 = vector.shape_cast %1083 : vector<16x128xf32> to vector<1x1x16x128xf32>
    tpu.vector_store %arg8[%c0_137, %c1_138, %c0_139, %c0_140], %1086 {strides = array<i32>} : memref<1x2x16x128xf32, #tpu.memory_space<vmem>>, vector<1x1x16x128xf32>,
    return
  }
  func.func @transform_0(%arg0: i32, %arg1: i32) -> (i32, i32, i32, i32) {
    %c0_i32 = arith.constant 0 : i32
    %c0_i32_0 = arith.constant 0 : i32
    %c0_i32_1 = arith.constant 0 : i32
    %c0_i32_2 = arith.constant 0 : i32
    return %arg0, %c0_i32, %c0_i32_0, %c0_i32_1 : i32, i32, i32, i32
  }
  func.func @transform_1(%arg0: i32, %arg1: i32) -> i32 {
    %c0_i32 = arith.constant 0 : i32
    %c0_i32_0 = arith.constant 0 : i32
    return %c0_i32 : i32
  }
  func.func @transform_2(%arg0: i32, %arg1: i32) -> i32 {
    %c0_i32 = arith.constant 0 : i32
    %c0_i32_0 = arith.constant 0 : i32
    return %c0_i32 : i32
  }
  func.func @transform_3(%arg0: i32, %arg1: i32) -> i32 {
    %c0_i32 = arith.constant 0 : i32
    %c0_i32_0 = arith.constant 0 : i32
    return %c0_i32 : i32
  }
  func.func @transform_4(%arg0: i32, %arg1: i32) -> i32 {
    %c0_i32 = arith.constant 0 : i32
    %c0_i32_0 = arith.constant 0 : i32
    return %c0_i32 : i32
  }
  func.func @transform_5(%arg0: i32, %arg1: i32) -> (i32, i32, i32, i32) {
    %c0_i32 = arith.constant 0 : i32
    %c0_i32_0 = arith.constant 0 : i32
    %c0_i32_1 = arith.constant 0 : i32
    return %arg0, %c0_i32, %arg1, %c0_i32_0 : i32, i32, i32, i32
  }
  func.func @transform_6(%arg0: i32, %arg1: i32) -> (i32, i32, i32, i32) {
    %c0_i32 = arith.constant 0 : i32
    %c0_i32_0 = arith.constant 0 : i32
    %c0_i32_1 = arith.constant 0 : i32
    return %arg0, %c0_i32, %arg1, %c0_i32_0 : i32, i32, i32, i32
  }
}

</mosaic_0001>

<bundles_post_ra>
// kernel: position_xy_forward.1
= control target key start
LH: loop header
LB: loop body
LE: loop exit
PB: predicated region body
PF: predicated region fallthrough
CT: control target
= control target key end

     0   :  { %s9201_s0 = inlined_call_operand.vmem [shape: f32[2,4,20,128], index: 0, kind: input, shape index: {}]   ;;  %s9202_s1 = inlined_call_operand.vmem [shape: f32[144], index: 1, kind: input, shape index: {}]   ;;  %s9203_s2 = inlined_call_operand.vmem [shape: f32[4], index: 2, kind: input, shape index: {}]   ;;  %s9204_s3 = inlined_call_operand.vmem [shape: f32[72], index: 3, kind: input, shape index: {}]   ;;  %s9205_s4 = inlined_call_operand.vmem [shape: f32[2], index: 4, kind: input, shape index: {}]   ;;  %s9206_s5 = inlined_call_operand.hbm [shape: f32[2,2,16,128], index: 5, kind: output, shape index: {0}]   ;;  %s9207_s6 = inlined_call_operand.hbm [shape: f32[2,2,16,128], index: 6, kind: output, shape index: {1}]  }
   0x1   :  { %9554 = sst [smem:[#allocation85_spill]] %s9201_s0 }
   0x2   :  { %9555 = sst [smem:[#allocation86_spill]] %s9202_s1 }
   0x3   :  { %9556 = sst [smem:[#allocation87_spill]] %s9203_s2 }
   0x4   :  { %9557 = sst [smem:[#allocation88_spill]] %s9204_s3 }
   0x5   :  { %9558 = sst [smem:[#allocation89_spill]] %s9205_s4 }
   0x6   :  { %9559 = sst [smem:[#allocation90_spill]] %s9206_s5 }
   0x7   :  { %9560 = sst [smem:[#allocation91_spill]] %s9207_s6 }
   0x8   :  { %12 = vsyncpa [#allocation4], 0 }
   0x9   :  { %13 = vsyncpa [#allocation6], 0 }
   0xa   :  { %14 = vsyncpa [#allocation9], 0 }
   0xb   :  { %15 = vsyncpa [#allocation3], 0 }
   0xc   :  { %17 = vsyncpa [#allocation3 + $0x1], 0 }
   0xd   :  { %18 = vsyncpa [#allocation12], 0 }
   0xe   :  { %20 = vsyncpa [#allocation12 + $0x1], 0  ;;  %s4745_s21 = smov 0   ;;  %s4747_s22 = smov 0  }
   0xf   :  { %s4749_s23 = smov 0   ;;  %s4751_s24 = smov 0  }
  0x10   :  { %s4753_s25 = smov 0   ;;  %s4755_s26 = smov 0  }
  0x11 LB: > { %9561 = sst [smem:[#allocation18_spill]] %s4680_s21  ;;  %s4126_s27 = sadd.s32 4294967295, %s4700_s26   ;;  %s4700_s26 = sphi %s4755_s26, %s26_s26   ;;  %s4696_s25 = sphi %s4753_s25, %s10267_s25   ;;  %s4692_s24 = sphi %s4751_s24, %s10266_s24   ;;  %s4688_s23 = sphi %s4749_s23, %s10265_s23   ;;  %s4684_s22 = sphi %s4747_s22, %s10264_s22   ;;  %s4680_s21 = sphi %s4745_s21, %s10263_s21  }
  0x12   : > { %9562 = sst [smem:[#allocation19_spill]] %s4684_s22  ;;  %s4127_s28 = sadd.s32 4294967294, %s4700_s26  }
  0x13   : > { %9563 = sst [smem:[#allocation20_spill]] %s4688_s23  ;;  %s38_s29 = sadd.s32 1, %s4696_s25 }
  0x14   : > { %9564 = sst [smem:[#allocation21_spill]] %s4692_s24  ;;  %s157_s30 = sadd.s32 1, %s4688_s23 }
  0x15   : > { %9565 = sst [smem:[#allocation22_spill]] %s4696_s25  ;;  %p40_p0 = scmp.ge.s32.totalorder %s38_s29, 2 }
  0x16   : > { %9566 = sst [smem:[#allocation23_spill]] %s4700_s26  ;;  %p167_p1 = scmp.ne.s32.totalorder %s4688_s23, %s4684_s22 }
  0x17   : > { %p168_p2 = scmp.eq.s32.totalorder %s4126_s27, 1  ;;  %p173_p3 = scmp.ne.s32.totalorder %s4684_s22, %s4680_s21 }
  0x18   : > { %s10269_s29 = smov (%p40_p0, %s38_s29), 0  ;;  %p174_p5 = scmp.eq.s32.totalorder %s4127_s28, 1 }
  0x19   : > { %9567 = sst [smem:[#allocation24_spill]] %s10269_s29  ;;  %p4785_p4 = por %p168_p2, %p167_p1 }
  0x1a   : > { %s152_s8 = ssub.s32 %s4696_s25, %s10269_s29  ;;  %p4128_p6 = scmp.ge.s32.totalorder %s4700_s26, 1 }
  0x1b   : > { %s9568_s7 = scalar_select %p4785_p4, 1, 0 }
  0x1c   : > { %p155_p7 = scmp.eq.s32.totalorder %s152_s8, 0  ;;  %p4792_p8 = por %p174_p5, %p173_p3 }
  0x1d   : > { %9569 = sst [smem:[#allocation25_spill]] %s9568_s7  ;;  %p209_p9 = scmp.lt.s32.totalorder %s4700_s26, 3 }
  0x1e   : > { %s9570_s9 = scalar_select %p4792_p8, 1, 0 }
  0x1f   : > { %s4798_s10 = scalar_select %p155_p7, %s4688_s23, %s157_s30  }
  0x20   : > { %9571 = sst [smem:[#allocation26_spill]] %s9570_s9  ;;  %p4800_p10 = pnand %p4128_p6, %p209_p9 }
  0x21   : > { %9572 = sst [smem:[#allocation27_spill]] %s4798_s10  ;;  %p4804_p11 = scmp.eq.s32.totalorder %s4126_s27, 0 }
  0x22   : > { %s9575_s2 = sld [smem:[#allocation87_spill]]  ;;  %p4408_p12 = pneg %p4800_p10 }
  0x23   : > { %s9576_s1 = sld [smem:[#allocation86_spill]]  ;;  %s4702_s28 = smov [#allocation5]  }
  0x24   : > { %p4409_p13 = pnand %p4804_p11, %p4408_p12  ;;  %s9577_s3 = sld [smem:[#allocation88_spill]] }
  0x25   : > { %s4703_s30 = smov [#allocation2]   ;;  %s4704_s8 = smov [#allocation7]  }
  0x26   : > { %s9578_s4 = sld [smem:[#allocation89_spill]]  ;;  %s4705_s16 = smov [#allocation8]  }
  0x28   : > { %s231_s15 = sshll.u32 %s9575_s2, 4  ;;  %s232_s15 = int_to_ptr.vmem [resolvable:$true] %s231_s15 }
  0x29   : > { %s221_s18 = sshll.u32 %s9576_s1, 4  ;;  %s222_s18 = int_to_ptr.vmem [resolvable:$true] %s221_s18 }
  0x2a   : > { %s241_s27 = sshll.u32 %s9577_s3, 4  ;;  %s242_s27 = int_to_ptr.vmem [resolvable:$true] %s241_s27 }
  0x2b   : > { %4414 = dma.vmem_to_smem (!%p4409_p13), %s232_s15, 16, %s4702_s28, [#allocation6]  }
  0x2c   : > { %4411 = dma.vmem_to_smem (!%p4409_p13), %s222_s18, 32, %s4703_s30, [#allocation4]  }
  0x2d   : > { %4417 = dma.vmem_to_smem (!%p4409_p13), %s242_s27, 16, %s4704_s8, [#allocation6]  }
  0x2e   : > { %s251_s2 = sshll.u32 %s9578_s4, 4  ;;  %272 = sbr.rel (%p4800_p10) target bundleno = 821 (0x335), region = 40  ;;  %s252_s2 = int_to_ptr.vmem [resolvable:$true] %s251_s2 }
  0x2f   : > { %4420 = dma.vmem_to_smem (!%p4409_p13), %s252_s2, 16, %s4705_s16, [#allocation9]  }
  0x33   : > { %4659 = dma.done.wait (%p4804_p11), [#allocation4], 32  }
  0x34   : > { %4661 = vsyncadd (%p4804_p11), [#allocation4], 4294967264 }
  0x35   : > { %4663 = dma.done.wait (%p4804_p11), [#allocation6], 32  }
  0x36   : > { %4665 = vsyncadd (%p4804_p11), [#allocation6], 4294967264 }
  0x37   : > { %4667 = dma.done.wait (%p4804_p11), [#allocation9], 16  }
  0x38   : > { %4669 = vsyncadd (%p4804_p11), [#allocation9], 4294967280 }
  0x39   : > { %294 = sfence }
  0x3a   : > { %p324_p0 = scmp.lt.s32.totalorder %s4692_s24, 1  ;;  %s9579_s0 = sld [smem:[#allocation85_spill]]  ;;  %vm369_vm0 = vcmask 1039360   ;;  %vm356_vm1 = vcmask 7168   ;;  %vm413_vm2 = vcmask 1046528   ;;  %vm490_vm3 = vcmask 1045504  }
  0x3b   : > { %s9210_s12 = smov 1   ;;  %s9208_s19 = smov 127  }
  0x3c   : > { %s325_s2 = scalar_select %p324_p0, %s4692_s24, 1 }
  0x3d   : > { %s332_s20 = sld [smem:[#allocation5]] }
  0x3e   : > { %s4387_s11 = smul.u32 96, %s325_s2  ;;  %s4897_s27 = sld [smem:[#allocation5 + $0x1]] }
  0x3f   : > { %s4899_s28 = sld [smem:[#allocation5 + $0x2]] }
  0x40   : > { %s4843_s18 = scalar_lea.vmem %s9579_s0, %s4387_s11  ;;  %s4901_s30 = sld [smem:[#allocation5 + $0x3]] }
  0x41   : > { %9580 = sst [smem:[#allocation28_spill]] %s4843_s18  ;;  %v4846_v0 = vld [vmem:[%s4843_s18 + $0x10] sm:$0xf]  ;;  %v4849_v1 = vld [vmem:[%s4843_s18] sm:$0xff]  ;;  %v4856_v2 = vld [vmem:[%s4843_s18 + $0x8] sm:$0xff] }
  0x42   : > { %9581 = vst [vmem:[#allocation29_spill] sm:$0xff] %v4849_v1  ;;  %351 = vrot.lane.b32.xlu1 %v4846_v0, %s9210_s12  ;;  %347 = vrot.lane.b32.xlu0 %v4849_v1, %s9210_s12  ;;  %v4181_v3 = vld [vmem:[%s4843_s18 + $0x20] sm:$0xff]  ;;  %v4180_v4 = vld [vmem:[%s4843_s18 + $0x18] sm:$0xff]  ;;  %s4903_s8 = sld [smem:[#allocation2]] }
  0x43   : > { %9582 = vst [vmem:[#allocation30_spill] sm:$0xff] %v4856_v2  ;;  %362 = vrot.lane.b32.xlu2 %v4856_v2, %s9208_s19  ;;  %v4869_v5 = vld [vmem:[%s4843_s18 + $0x28] sm:$0xf]  ;;  %v4220_v6 = vld [vmem:[%s4843_s18 + $0x38] sm:$0xff]  ;;  %v4219_v7 = vld [vmem:[%s4843_s18 + $0x30] sm:$0xff]  ;;  %s4905_s13 = sld [smem:[#allocation2 + $0x24]] }
  0x44   : > { %9583 = vst [vmem:[#allocation31_spill] sm:$0xff] %v4869_v5  ;;  %v4221_v8 = vld [vmem:[%s4843_s18 + $0x40] sm:$0xf]  ;;  %v4259_v9 = vld [vmem:[%s4843_s18 + $0x50] sm:$0xff]  ;;  %v4258_v10 = vld [vmem:[%s4843_s18 + $0x48] sm:$0xff]  ;;  %s4907_s14 = sld [smem:[#allocation2 + $0x48]]  ;;  %v4949_v12 = vstv %s332_s20 }
  0x45   : > { %v4260_v11 = vld [vmem:[%s4843_s18 + $0x58] sm:$0xf]  ;;  %s4909_s16 = sld [smem:[#allocation2 + $0x6c]]  ;;  %v4954_v13 = vstv %s4897_s27  ;;  %v4957_v14 = vstv %s4899_s28 }
  0x46   : > { %s4911_s2 = sld [smem:[#allocation2 + $0x3]]  ;;  %v4960_v15 = vstv %s4901_s30 }
  0x47   : > { %s4913_s11 = sld [smem:[#allocation2 + $0x27]] }
  0x48   : > { %s4915_s15 = sld [smem:[#allocation2 + $0x4b]]  ;;  %v4963_v16 = vstv %s4903_s8 }
  0x49   : > { %s4917_s17 = sld [smem:[#allocation2 + $0x6f]]  ;;  %v4968_v17 = vstv %s4905_s13 }
  0x4a   : > { %349 = vrot.lane.b32.xlu0 %v4856_v2, %s9210_s12  ;;  %360 = vrot.lane.b32.xlu1 %v4849_v1, %s9208_s19  ;;  %s4923_s0 = sld [smem:[#allocation2 + $0x4e]]  ;;  %v4971_v18 = vstv %s4907_s14 }
  0x4b   : > { %364 = vrot.lane.b32.xlu2 %v4846_v0, %s9208_s19  ;;  %s4925_s1 = sld [smem:[#allocation2 + $0x72]]  ;;  %v4974_v19 = vstv %s4909_s16 }
  0x4c   : > { %s4156_s3 = sld [smem:[#allocation2 + $0x1]]  ;;  %v4977_v20 = vstv %s4911_s2 }
  0x4d   : > { %s4157_s4 = sld [smem:[#allocation2 + $0x25]]  ;;  %v4982_v21 = vstv %s4913_s11 }
  0x4e   : > { %s4158_s29 = sld [smem:[#allocation2 + $0x49]]  ;;  %v4993_v25 = vstv %s4915_s15 }
  0x4f   : > { %s4927_s25 = sld [smem:[#allocation2 + $0x6d]]  ;;  %v4996_v26 = vstv %s4917_s17 }
  0x50   : > { %s4929_s10 = sld [smem:[#allocation2 + $0x2]]  ;;  %v5007_v29 = vstv %s4923_s0 }
  0x51   : > { %s4931_s23 = sld [smem:[#allocation2 + $0x26]]  ;;  %v5010_v30 = vstv %s4925_s1 }
  0x52   : > { %937 = vrot.lane.b32.xlu1 %v4181_v3, %s9210_s12  ;;  %935 = vrot.lane.b32.xlu0 %v4180_v4, %s9210_s12  ;;  %s4933_s9 = sld [smem:[#allocation2 + $0x4a]]  ;;  %v4984_v22 = vstv %s4156_s3 }
  0x53   : > { %939 = vrot.lane.b32.xlu2 %v4869_v5, %s9210_s12  ;;  %s4935_s21 = sld [smem:[#allocation2 + $0x6e]]  ;;  %9585 = vst [vmem:[#allocation33_spill] sm:$0xff] %v4984_v22  ;;  %v4986_v23 = vstv %s4157_s4  ;;  %v5019_v32 = vmul.f32 %v4984_v22, %v4846_v0 }
  0x54   : > { %s4937_s26 = sld [smem:[#allocation2 + $0x5]]  ;;  %9586 = vst [vmem:[#allocation34_spill] sm:$0xff] %v4986_v23  ;;  %v4988_v24 = vstv %s4158_s29  ;;  %v5023_v33 = vmul.f32 %v4986_v23, %v4846_v0 }
  0x55   : > { %s4939_s7 = sld [smem:[#allocation2 + $0x29]]  ;;  %9587 = vst [vmem:[#allocation35_spill] sm:$0xff] %v4988_v24  ;;  %v5013_v31 = vstv %s4927_s25  ;;  %v5027_v34 = vmul.f32 %v4988_v24, %v4846_v0 }
  0x56   : > { %s4941_s6 = sld [smem:[#allocation2 + $0x4d]]  ;;  %9588 = vst [vmem:[#allocation36_spill] sm:$0xff] %v5013_v31  ;;  %v5030_v35 = vstv %s4929_s10  ;;  %v5088_v53 = vmul.f32 %v5013_v31, %v4846_v0 }
  0x57   : > { %s4943_s5 = sld [smem:[#allocation2 + $0x71]]  ;;  %9590 = vst [vmem:[#allocation37_spill] sm:$0xff] %v5030_v35  ;;  %v5061_v45 = vstv %s4931_s23 }
  0x58   : > { %s4945_s24 = sld [smem:[#allocation2 + $0x8]]  ;;  %9598 = vst [vmem:[#allocation45_spill] sm:$0xff] %v5061_v45  ;;  %v5064_v46 = vstv %s4933_s9 }
  0x59   : > { %9584 = sst [smem:[#allocation32_spill]] %s4935_s21  ;;  %9599 = vst [vmem:[#allocation46_spill] sm:$0xff] %v5064_v46 }
  0x5a   : > { %949 = vrot.lane.b32.xlu1 %v4181_v3, %s9208_s19  ;;  %947 = vrot.lane.b32.xlu0 %v4180_v4, %s9208_s19  ;;  %s4947_s22 = sld [smem:[#allocation2 + $0x2c]]  ;;  %v5035_v36 = vstv %s4937_s26 }
  0x5b   : > { %951 = vrot.lane.b32.xlu2 %v4869_v5, %s9208_s19  ;;  %s4951_s18 = sld [smem:[#allocation2 + $0x50]]  ;;  %9591 = vst [vmem:[#allocation38_spill] sm:$0xff] %v5035_v36  ;;  %v5038_v37 = vstv %s4939_s7  ;;  %v5192_v5 = vmul.f32 %v5013_v31, %v4856_v2 }
  0x5c   : > { %s4965_s21 = sld [smem:[#allocation2 + $0x74]]  ;;  %9592 = vst [vmem:[#allocation39_spill] sm:$0xff] %v5038_v37  ;;  %v5041_v38 = vstv %s4941_s6 }
  0x5d   : > { %s4979_s20 = sld [smem:[#allocation2 + $0x4]]  ;;  %9593 = vst [vmem:[#allocation40_spill] sm:$0xff] %v5041_v38  ;;  %v5044_v39 = vstv %s4943_s5 }
  0x5e   : > { %s4990_s27 = sld [smem:[#allocation2 + $0x28]]  ;;  %9594 = vst [vmem:[#allocation41_spill] sm:$0xff] %v5044_v39  ;;  %v5049_v41 = vstv %s4945_s24 }
  0x5f   : > { %s5004_s3 = sld [smem:[#allocation2 + $0x4c]]  ;;  %9595 = vst [vmem:[#allocation42_spill] sm:$0xff] %v5049_v41 }
  0x60   : > { %s5015_s4 = sld [smem:[#allocation2 + $0x70]]  ;;  %v5052_v42 = vstv %s4947_s22  ;;  %9625 = vst [vmem:[#allocation72_spill] sm:$0xff] %v5192_v5 }
  0x61   : > { %s9589_s0 = sld [smem:[#allocation32_spill]]  ;;  %9596 = vst [vmem:[#allocation43_spill] sm:$0xff] %v5052_v42  ;;  %v5055_v43 = vstv %s4951_s18 }
  0x62   : > { %1521 = vrot.lane.b32.xlu1 %v4220_v6, %s9210_s12  ;;  %1519 = vrot.lane.b32.xlu0 %v4219_v7, %s9210_s12  ;;  %s5032_s1 = sld [smem:[#allocation2 + $0x7]]  ;;  %9597 = vst [vmem:[#allocation44_spill] sm:$0xff] %v5055_v43  ;;  %v5070_v48 = vstv %s4965_s21 }
  0x63   : > { %1523 = vrot.lane.b32.xlu2 %v4221_v8, %s9210_s12  ;;  %s5046_s25 = sld [smem:[#allocation2 + $0x2b]]  ;;  %9601 = vst [vmem:[#allocation48_spill] sm:$0xff] %v5070_v48 }
  0x64   : > { %s5058_s29 = sld [smem:[#allocation2 + $0x4f]] }
  0x65   : > { %s5072_s5 = sld [smem:[#allocation2 + $0x73]] }
  0x66   : > { %s5502_s6 = sld [smem:[#allocation2 + $0x9]] }
  0x67   : > { %v5067_v47 = vstv %s9589_s0  ;;  %s5511_s21 = sld [smem:[#allocation2 + $0xc]] }
  0x68   : > { %9600 = vst [vmem:[#allocation47_spill] sm:$0xff] %v5067_v47  ;;  %s5518_s22 = sld [smem:[#allocation2 + $0x2d]] }
  0x69   : > { %v5153_v4 = vstv %s5046_s25  ;;  %s5524_s23 = sld [smem:[#allocation2 + $0x51]] }
  0x6a   : > { %1533 = vrot.lane.b32.xlu1 %v4220_v6, %s9208_s19  ;;  %1531 = vrot.lane.b32.xlu0 %v4219_v7, %s9208_s19  ;;  %9619 = vst [vmem:[#allocation66_spill] sm:$0xff] %v5153_v4  ;;  %v5156_v62 = vstv %s5058_s29  ;;  %s5532_s24 = sld [smem:[#allocation2 + $0x75]] }
  0x6b   : > { %1535 = vrot.lane.b32.xlu2 %v4221_v8, %s9208_s19  ;;  %v5150_v8 = vstv %s5032_s1  ;;  %9620 = vst [vmem:[#allocation67_spill] sm:$0xff] %v5156_v62  ;;  %v5159_v61 = vstv %s5072_s5  ;;  %s5541_s26 = sld [smem:[#allocation2 + $0x30]] }
  0x6c   : > { %9618 = vst [vmem:[#allocation65_spill] sm:$0xff] %v5150_v8  ;;  %s5546_s7 = sld [smem:[#allocation2 + $0x54]] }
  0x6d   : > { %9621 = vst [vmem:[#allocation68_spill] sm:$0xff] %v5159_v61  ;;  %s5551_s9 = sld [smem:[#allocation2 + $0x78]] }
  0x6e   : > { %s5559_s10 = sld [smem:[#allocation2 + $0xf]] }
  0x6f   : > { %s5567_s18 = sld [smem:[#allocation2 + $0x33]] }
  0x70   : > { %s5590_s28 = sld [smem:[#allocation2 + $0x2e]] }
  0x71   : > { %s5594_s30 = sld [smem:[#allocation2 + $0x52]] }
  0x72   : > { %2105 = vrot.lane.b32.xlu1 %v4259_v9, %s9210_s12  ;;  %2103 = vrot.lane.b32.xlu0 %v4258_v10, %s9210_s12  ;;  %s5600_s8 = sld [smem:[#allocation2 + $0x76]] }
  0x73   : > { %2107 = vrot.lane.b32.xlu2 %v4260_v11, %s9210_s12  ;;  %s4921_s12 = sld [smem:[#allocation2 + $0x2a]] }
  0x74   : > { %s5614_s13 = sld [smem:[#allocation2 + $0x7b]] }
  0x75   : > { %s5863_s14 = sld [smem:[#allocation2 + $0xd]] }
  0x76   : > { %s5880_s16 = sld [smem:[#allocation2 + $0x31]] }
  0x77   : > { %s5885_s2 = sld [smem:[#allocation2 + $0x55]] }
  0x78   : > { %s5896_s11 = sld [smem:[#allocation2 + $0x79]] }
  0x79   : > { %v5002_v28 = vstv %s4921_s12  ;;  %s5574_s12 = sld [smem:[#allocation2 + $0x57]] }
  0x7a   : > { %2117 = vrot.lane.b32.xlu1 %v4259_v9, %s9208_s19  ;;  %2115 = vrot.lane.b32.xlu0 %v4258_v10, %s9208_s19  ;;  %v5122_v9 = vstv %s4979_s20  ;;  %v5125_v10 = vstv %s4990_s27  ;;  %s5904_s15 = sld [smem:[#allocation2 + $0x10]] }
  0x7b   : > { %2119 = vrot.lane.b32.xlu2 %v4260_v11, %s9208_s19  ;;  %s4919_s19 = sld [smem:[#allocation2 + $0x6]]  ;;  %9614 = vst [vmem:[#allocation61_spill] sm:$0xff] %v5122_v9  ;;  %v5128_v11 = vstv %s5004_s3  ;;  %v5139_v63 = vmul.f32 %v5125_v10, %v4846_v0 }
  0x7c   : > { %9615 = vst [vmem:[#allocation62_spill] sm:$0xff] %v5125_v10  ;;  %v5143_v7 = vmul.f32 %v5128_v11, %v4846_v0  ;;  %s5909_s17 = sld [smem:[#allocation2 + $0x34]] }
  0x7d   : > { %9616 = vst [vmem:[#allocation63_spill] sm:$0xff] %v5128_v11  ;;  %s5926_s20 = sld [smem:[#allocation2 + $0x58]] }
  0x7e   : > { %s5944_s27 = sld [smem:[#allocation2 + $0x7c]] }
  0x7f   : > { %s5957_s3 = sld [smem:[#allocation2 + $0xb]] }
  0x80   : > { %s5969_s0 = sld [smem:[#allocation2 + $0x53]] }
  0x81   : > { %v4999_v27 = vstv %s4919_s19  ;;  %s5582_s19 = sld [smem:[#allocation2 + $0xa]] }
  0x82   : > { %s5975_s1 = sld [smem:[#allocation2 + $0x77]] }
  0x83   : > { %s5982_s25 = sld [smem:[#allocation2 + $0xe]] }
  0x84   : > { %s5984_s29 = sld [smem:[#allocation2 + $0x32]] }
  0x85   : > { %s5990_s5 = sld [smem:[#allocation2 + $0x56]] }
  0x9d   : > { %v363_v40 = vpop.permute.xlu2 %362 }
  0x9e   : > { %v371_v44 = vsel %vm369_vm0, %v363_v40, 0.0  ;;  %v5131_v40 = vstv %s5015_s4  ;;  %s5963_s4 = sld [smem:[#allocation2 + $0x2f]] }
  0x9f   : > { %v5075_v49 = vmul.f32 %v5035_v36, %v371_v44  ;;  %v5078_v50 = vmul.f32 %v5038_v37, %v371_v44  ;;  %v5081_v51 = vmul.f32 %v5041_v38, %v371_v44  ;;  %v5084_v52 = vmul.f32 %v5044_v39, %v371_v44  ;;  %9617 = vst [vmem:[#allocation64_spill] sm:$0xff] %v5131_v40 }
  0xa0   : > { %v5091_v54 = vmul.f32 %v5049_v41, %v371_v44  ;;  %v5094_v55 = vmul.f32 %v5052_v42, %v371_v44  ;;  %v5097_v56 = vmul.f32 %v5055_v43, %v371_v44  ;;  %v5100_v57 = vmul.f32 %v5030_v35, %v371_v44 }
  0xa1   : > { %9602 = vst [vmem:[#allocation49_spill] sm:$0xff] %v5075_v49  ;;  %v5103_v58 = vmul.f32 %v5061_v45, %v371_v44  ;;  %v5106_v59 = vmul.f32 %v5064_v46, %v371_v44  ;;  %v5109_v60 = vmul.f32 %v5067_v47, %v371_v44  ;;  %v5115_v3 = vmul.f32 %v5070_v48, %v371_v44 }
  0xa2   : > { %9603 = vst [vmem:[#allocation50_spill] sm:$0xff] %v5078_v50  ;;  %v5135_v44 = vmul.f32 %v5122_v9, %v4846_v0  ;;  %v5147_v6 = vmul.f32 %v5131_v40, %v4846_v0 }
  0xa3   : > { %9604 = vst [vmem:[#allocation51_spill] sm:$0xff] %v5081_v51 }
  0xa4   : > { %9605 = vst [vmem:[#allocation52_spill] sm:$0xff] %v5084_v52 }
  0xa5   : > { %9606 = vst [vmem:[#allocation53_spill] sm:$0xff] %v5091_v54  ;;  %v5176_v54 = vmul.f32 %v5150_v8, %v4846_v0 }
  0xa6   : > { %9607 = vst [vmem:[#allocation54_spill] sm:$0xff] %v5094_v55  ;;  %v365_v55 = vpop.permute.xlu2 %364 }
  0xa7   : > { %9608 = vst [vmem:[#allocation55_spill] sm:$0xff] %v5097_v56  ;;  %v5188_v56 = vmul.f32 %v5159_v61, %v4846_v0 }
  0xa8   : > { %9609 = vst [vmem:[#allocation56_spill] sm:$0xff] %v5100_v57  ;;  %v5172_v57 = vmul.f32 %v4988_v24, %v4856_v2 }
  0xa9   : > { %9610 = vst [vmem:[#allocation57_spill] sm:$0xff] %v5103_v58  ;;  %v5168_v58 = vmul.f32 %v4986_v23, %v4856_v2 }
  0xaa   : > { %9611 = vst [vmem:[#allocation58_spill] sm:$0xff] %v5106_v59  ;;  %v5164_v59 = vmul.f32 %v4984_v22, %v4856_v2 }
  0xab   : > { %9612 = vst [vmem:[#allocation59_spill] sm:$0xff] %v5109_v60  ;;  %v5180_v60 = vmul.f32 %v5153_v4, %v4846_v0 }
  0xac   : > { %9613 = vst [vmem:[#allocation60_spill] sm:$0xff] %v5115_v3  ;;  %v5184_v3 = vmul.f32 %v5156_v62, %v4846_v0  ;;  %v5201_v0 = vsel %vm369_vm0, %v365_v55, 0.0 }
  0xad   : > { %9622 = vst [vmem:[#allocation69_spill] sm:$0xff] %v5168_v58  ;;  %v9630_v58 = vrot.slane %v5135_v44, 1 }
  0xae   : > { %9623 = vst [vmem:[#allocation70_spill] sm:$0xff] %v5172_v57 }
  0xaf   : > { %9624 = vst [vmem:[#allocation71_spill] sm:$0xff] %v5188_v56 }
  0xb0   : > { %9626 = vst [vmem:[#allocation73_spill] sm:$0xff] %v5201_v0 }
  0xb4   : > { %v352_v1 = vpop.permute.xlu1 %351  ;;  %v348_v4 = vpop.permute.xlu0 %347 }
  0xb5   : > { %v359_v31 = vsel %vm356_vm1, 0.0, %v352_v1  ;;  %v357_v61 = vsel %vm356_vm1, 0.0, %v348_v4 }
  0xb6   : > { %v377_v22 = vmul.f32 %v4963_v16, %v359_v31  ;;  %v385_v11 = vmul.f32 %v4968_v17, %v359_v31  ;;  %v393_v8 = vmul.f32 %v4971_v18, %v359_v31  ;;  %v401_v62 = vmul.f32 %v4974_v19, %v359_v31 }
  0xb7   : > { %v5212_v40 = vmul.f32 %v4977_v20, %v359_v31  ;;  %v5215_v55 = vmul.f32 %v4982_v21, %v359_v31  ;;  %v5218_v1 = vmul.f32 %v4993_v25, %v359_v31  ;;  %v5221_v4 = vmul.f32 %v4996_v26, %v359_v31 }
  0xb8   : > { %v380_v23 = vadd.f32 %v377_v22, %v4949_v12  ;;  %v388_v24 = vadd.f32 %v385_v11, %v4954_v13  ;;  %v396_v10 = vadd.f32 %v393_v8, %v4957_v14  ;;  %v404_v9 = vadd.f32 %v401_v62, %v4960_v15 }
  0xb9   : > { %v9282_v2 = vrot.slane %v5212_v40, 1  ;;  %v9280_v48 = vrot.slane %v5215_v55, 1  ;;  %v9281_v51 = vrot.slane %v5218_v1, 1  ;;  %v5232_v50 = vmul.f32 %v4999_v27, %v359_v31 }
  0xba   : > { %v5235_v49 = vmul.f32 %v5002_v28, %v359_v31  ;;  %v5238_v22 = vmul.f32 %v5007_v29, %v359_v31  ;;  %v5241_v8 = vmul.f32 %v5010_v30, %v359_v31  ;;  %v9627_v43 = vrot.slane %v5221_v4, 1 }
  0xbb   : > { %v424_v62 = vadd.f32 %v9282_v2, %v380_v23  ;;  %v443_v11 = vadd.f32 %v9280_v48, %v388_v24  ;;  %v462_v52 = vadd.f32 %v9281_v51, %v396_v10  ;;  %v9288_v57 = vrot.slane %v5232_v50, 2 }
  0xbc   : > { %v481_v5 = vadd.f32 %v9627_v43, %v404_v9  ;;  %v9287_v42 = vrot.slane %v5235_v49, 2  ;;  %v9292_v41 = vrot.slane %v5238_v22, 2  ;;  %v9291_v31 = vrot.slane %v5241_v8, 2 }
  0xbd   : > { %v375_v39 = vmul.f32 %v4963_v16, %v357_v61  ;;  %v383_v23 = vmul.f32 %v4968_v17, %v357_v61  ;;  %v391_v24 = vmul.f32 %v4971_v18, %v357_v61  ;;  %v399_v48 = vmul.f32 %v4974_v19, %v357_v61 }
  0xbe   : > { %v501_v10 = vadd.f32 %v9288_v57, %v424_v62  ;;  %v520_v43 = vadd.f32 %v9287_v42, %v443_v11  ;;  %v5265_v9 = vmul.f32 %v5030_v35, %v5201_v0  ;;  %v5269_v51 = vmul.f32 %v5061_v45, %v5201_v0 }
  0xbf   : > { %v539_v2 = vadd.f32 %v9292_v41, %v462_v52  ;;  %v558_v38 = vadd.f32 %v9291_v31, %v481_v5  ;;  %v378_v37 = vadd.f32 %v375_v39, %v4949_v12  ;;  %v5277_v62 = vadd.f32 %v383_v23, %v4954_v13 }
  0xc0   : > { %9628 = vst [vmem:[#allocation74_spill] sm:$0xff] %v5265_v9  ;;  %v566_v11 = vadd.f32 %v5019_v32, %v501_v10  ;;  %v574_v42 = vadd.f32 %v5023_v33, %v520_v43  ;;  %v394_v57 = vadd.f32 %v391_v24, %v4957_v14  ;;  %v402_v45 = vadd.f32 %v399_v48, %v4960_v15  ;;  %v350_v24 = vpop.permute.xlu0 %349 }
  0xc1   : > { %9629 = vst [vmem:[#allocation75_spill] sm:$0xff] %v5269_v51  ;;  %v407_v35 = vmul.f32 %v4977_v20, %v357_v61  ;;  %v427_v52 = vmul.f32 %v4982_v21, %v357_v61  ;;  %v446_v5 = vmul.f32 %v4993_v25, %v357_v61  ;;  %v465_v39 = vmul.f32 %v4996_v26, %v357_v61 }
  0xc2   : > { %v5288_v23 = vmul.f32 %v4999_v27, %v357_v61  ;;  %v5291_v32 = vmul.f32 %v5002_v28, %v357_v61  ;;  %v5294_v33 = vmul.f32 %v5007_v29, %v357_v61  ;;  %v5297_v48 = vmul.f32 %v5010_v30, %v357_v61 }
  0xc3   : > { %v582_v10 = vadd.f32 %v5027_v34, %v539_v2  ;;  %v590_v43 = vadd.f32 %v5088_v53, %v558_v38  ;;  %v414_v31 = vrot.slane %v407_v35, 1  ;;  %v433_v41 = vrot.slane %v427_v52, 1 }
  0xc4   : > { %v452_v36 = vrot.slane %v446_v5, 1  ;;  %v471_v47 = vrot.slane %v465_v39, 1  ;;  %v491_v46 = vrot.slane %v5288_v23, 2  ;;  %v510_v0 = vrot.slane %v5291_v32, 2 }
  0xc5   : > { %v529_v51 = vrot.slane %v5294_v33, 2  ;;  %v548_v9 = vrot.slane %v5297_v48, 2  ;;  %v358_v61 = vsel %vm356_vm1, 0.0, %v350_v24  ;;  %v609_v56 = vadd.f32 %v9630_v58, %v566_v11 }
  0xc6   : > { %v376_v2 = vmul.f32 %v4963_v16, %v358_v61  ;;  %v384_v34 = vmul.f32 %v4968_v17, %v358_v61  ;;  %v400_v35 = vmul.f32 %v4974_v19, %v358_v61  ;;  %v9631_v38 = vrot.slane %v5139_v63, 1 }
  0xc7   : > { %v408_v52 = vmul.f32 %v4977_v20, %v358_v61  ;;  %v428_v5 = vmul.f32 %v4982_v21, %v358_v61  ;;  %v447_v39 = vmul.f32 %v4993_v25, %v358_v61  ;;  %v466_v23 = vmul.f32 %v4996_v26, %v358_v61 }
  0xc8   : > { %v628_v53 = vadd.f32 %v9631_v38, %v574_v42  ;;  %v379_v58 = vadd.f32 %v376_v2, %v4949_v12  ;;  %v387_v11 = vadd.f32 %v384_v34, %v4954_v13  ;;  %v392_v16 = vmul.f32 %v4971_v18, %v358_v61 }
  0xc9   : > { %v9632_v17 = vrot.slane %v5143_v7, 1  ;;  %v415_v32 = vrot.slane %v408_v52, 1  ;;  %v434_v33 = vrot.slane %v428_v5, 1  ;;  %v453_v42 = vrot.slane %v447_v39, 1 }
  0xca   : > { %v472_v48 = vrot.slane %v466_v23, 1  ;;  %v403_v20 = vadd.f32 %v400_v35, %v4960_v15  ;;  %v485_v21 = vmul.f32 %v4999_v27, %v358_v61  ;;  %v505_v25 = vmul.f32 %v5002_v28, %v358_v61 }
  0xcb   : > { %v647_v19 = vadd.f32 %v9632_v17, %v582_v10  ;;  %v524_v26 = vmul.f32 %v5007_v29, %v358_v61  ;;  %v416_v12 = vsel %vm413_vm2, %v414_v31, %v415_v32  ;;  %v9633_v13 = vrot.slane %v5212_v40, 1 }
  0xcc   : > { %v9634_v24 = vrot.slane %v5215_v55, 1  ;;  %v543_v2 = vmul.f32 %v5010_v30, %v358_v61  ;;  %v395_v15 = vadd.f32 %v392_v16, %v4957_v14  ;;  %v422_v34 = vadd.f32 %v416_v12, %v378_v37 }
  0xcd   : > { %v418_v18 = vsel %vm413_vm2, %v415_v32, %v9633_v13  ;;  %v435_v28 = vsel %vm413_vm2, %v433_v41, %v434_v33  ;;  %v454_v29 = vsel %vm413_vm2, %v452_v36, %v453_v42  ;;  %v9635_v31 = vrot.slane %v5218_v1, 1 }
  0xce   : > { %v437_v10 = vsel %vm413_vm2, %v434_v33, %v9634_v24  ;;  %v423_v27 = vadd.f32 %v418_v18, %v379_v58  ;;  %v473_v35 = vsel %vm413_vm2, %v471_v47, %v472_v48  ;;  %v9636_v55 = vrot.slane %v5221_v4, 1  ;;  %v9648_v24 = vld [vmem:[#allocation69_spill] sm:$0xff] }
  0xcf   : > { %v456_v40 = vsel %vm413_vm2, %v453_v42, %v9635_v31  ;;  %v442_v52 = vadd.f32 %v437_v10, %v387_v11  ;;  %v460_v30 = vadd.f32 %v454_v29, %v394_v57  ;;  %v479_v61 = vadd.f32 %v473_v35, %v402_v45  ;;  %v9650_v10 = vld [vmem:[#allocation74_spill] sm:$0xff] }
  0xd0   : > { %v475_v38 = vsel %vm413_vm2, %v472_v48, %v9636_v55  ;;  %v492_v37 = vrot.slane %v485_v21, 2  ;;  %v511_v5 = vrot.slane %v505_v25, 2  ;;  %v530_v39 = vrot.slane %v524_v26, 2  ;;  %v9653_v29 = vld [vmem:[#allocation46_spill] sm:$0xff]  ;;  %v9656_v55 = vld [vmem:[#allocation39_spill] sm:$0xff] }
  0xd1   : > { %v480_v14 = vadd.f32 %v475_v38, %v403_v20  ;;  %v549_v41 = vrot.slane %v543_v2, 2  ;;  %v441_v36 = vadd.f32 %v435_v28, %v5277_v62  ;;  %v461_v23 = vadd.f32 %v456_v40, %v395_v15  ;;  %v9651_v15 = vld [vmem:[#allocation75_spill] sm:$0xff]  ;;  %v9652_v28 = vld [vmem:[#allocation73_spill] sm:$0xff]  ;;  %v9655_v35 = vld [vmem:[#allocation38_spill] sm:$0xff] }
  0xd2   : > { %v9637_v1 = vrot.slane %v5147_v6, 1  ;;  %v9638_v47 = vrot.slane %v5176_v54, 2  ;;  %v9639_v4 = vrot.slane %v5232_v50, 2  ;;  %v9640_v45 = vrot.slane %v5235_v49, 2 }
  0xd3   : > { %v9641_v17 = vrot.slane %v5180_v60, 2  ;;  %v9642_v62 = vrot.slane %v5184_v3, 2  ;;  %v493_v42 = vsel %vm490_vm3, %v491_v46, %v492_v37  ;;  %v512_v48 = vsel %vm490_vm3, %v510_v0, %v511_v5 }
  0xd4   : > { %v666_v58 = vadd.f32 %v9637_v1, %v590_v43  ;;  %v685_v16 = vadd.f32 %v9638_v47, %v609_v56  ;;  %v495_v11 = vsel %vm490_vm3, %v492_v37, %v9639_v4  ;;  %v514_v57 = vsel %vm490_vm3, %v511_v5, %v9640_v45  ;;  %v9659_v5 = vld [vmem:[#allocation42_spill] sm:$0xff] }
  0xd5   : > { %v704_v32 = vadd.f32 %v9641_v17, %v628_v53  ;;  %v723_v33 = vadd.f32 %v9642_v62, %v647_v19  ;;  %v500_v43 = vadd.f32 %v495_v11, %v423_v27  ;;  %v519_v56 = vadd.f32 %v514_v57, %v442_v52  ;;  %v9657_v52 = vld [vmem:[#allocation40_spill] sm:$0xff]  ;;  %v9666_v62 = vld [vmem:[#allocation49_spill] sm:$0xff] }
  0xd6   : > { %v531_v50 = vsel %vm490_vm3, %v529_v51, %v530_v39  ;;  %v9643_v20 = vrot.slane %v5238_v22, 2  ;;  %v550_v21 = vsel %vm490_vm3, %v548_v9, %v549_v41  ;;  %v9644_v25 = vrot.slane %v5241_v8, 2  ;;  %v9646_v22 = vld [vmem:[#allocation71_spill] sm:$0xff]  ;;  %v9663_v11 = vld [vmem:[#allocation72_spill] sm:$0xff] }
  0xd7   : > { %v5369_v26 = vadd.f32 %v531_v50, %v460_v30  ;;  %v5371_v46 = vadd.f32 %v550_v21, %v479_v61  ;;  %v5373_v0 = vadd.f32 %v493_v42, %v422_v34  ;;  %v5375_v13 = vadd.f32 %v512_v48, %v441_v36  ;;  %v9654_v34 = vld [vmem:[#allocation47_spill] sm:$0xff]  ;;  %v9665_v17 = vld [vmem:[#allocation44_spill] sm:$0xff]  ;;  %v9669_v50 = vld [vmem:[#allocation50_spill] sm:$0xff] }
  0xd8   : > { %v533_v49 = vsel %vm490_vm3, %v530_v39, %v9643_v20  ;;  %v552_v53 = vsel %vm490_vm3, %v549_v41, %v9644_v25  ;;  %v5378_v51 = vadd.f32 %v5164_v59, %v500_v43  ;;  %v9647_v18 = vrot.slane %v9646_v22, 2  ;;  %v9660_v41 = vld [vmem:[#allocation43_spill] sm:$0xff]  ;;  %v9672_v25 = vld [vmem:[#allocation52_spill] sm:$0xff] }
  0xd9   : > { %v538_v19 = vadd.f32 %v533_v49, %v461_v23  ;;  %v557_v12 = vadd.f32 %v552_v53, %v480_v14  ;;  %v5383_v8 = vadd.f32 %v9648_v24, %v519_v56  ;;  %v750_v2 = vadd.f32 %v9650_v10, %v685_v16  ;;  %v9658_v14 = vld [vmem:[#allocation41_spill] sm:$0xff]  ;;  %v9661_v16 = vld [vmem:[#allocation70_spill] sm:$0xff]  ;;  %v9691_v56 = vld [vmem:[#allocation35_spill] sm:$0xff] }
  0xda   : > { %9645 = vst [vmem:[#allocation76_spill] sm:$0xff] %v5378_v51  ;;  %v742_v9 = vadd.f32 %v9647_v18, %v666_v58  ;;  %v758_v27 = vadd.f32 %v9651_v15, %v704_v32  ;;  %v763_v31 = vmul.f32 %v9653_v29, %v9652_v28  ;;  %v771_v40 = vmul.f32 %v9654_v34, %v9652_v28  ;;  %v9678_v15 = vld [vmem:[#allocation48_spill] sm:$0xff] }
  0xdb   : > { %9649 = vst [vmem:[#allocation71_spill] sm:$0xff] %v5383_v8  ;;  %v779_v59 = vmul.f32 %v9655_v35, %v9652_v28  ;;  %v798_v38 = vmul.f32 %v9656_v55, %v9652_v28  ;;  %v817_v30 = vmul.f32 %v9657_v52, %v9652_v28  ;;  %v836_v37 = vmul.f32 %v9658_v14, %v9652_v28 }
  0xdc   : > { %v766_v61 = vadd.f32 %v763_v31, %v723_v33  ;;  %v5401_v39 = vmul.f32 %v9659_v5, %v9652_v28  ;;  %v5405_v36 = vmul.f32 %v9660_v41, %v9652_v28  ;;  %v774_v23 = vadd.f32 %v771_v40, %v742_v9  ;;  %v9675_v9 = vld [vmem:[#allocation51_spill] sm:$0xff] }
  0xdd   : > { %v786_v1 = vrot.slane %v779_v59, 1  ;;  %v805_v58 = vrot.slane %v798_v38, 1  ;;  %v824_v47 = vrot.slane %v817_v30, 1  ;;  %v5408_v4 = vadd.f32 %v9661_v16, %v538_v19  ;;  %v9679_v40 = vld [vmem:[#allocation30_spill] sm:$0xff]  ;;  %v9680_v59 = vld [vmem:[#allocation61_spill] sm:$0xff]  ;;  %v9681_v30 = vld [vmem:[#allocation62_spill] sm:$0xff] }
  0xde   : > { %v5411_v45 = vadd.f32 %v9663_v11, %v557_v12  ;;  %v843_v57 = vrot.slane %v836_v37, 1  ;;  %v5415_v32 = vmul.f32 %v9665_v17, %v9652_v28  ;;  %v9667_v33 = vrot.slane %v9666_v62, 1  ;;  %v9685_v11 = vld [vmem:[#allocation66_spill] sm:$0xff] }
  0xdf   : > { %9662 = vst [vmem:[#allocation69_spill] sm:$0xff] %v5408_v4  ;;  %v5422_v43 = vadd.f32 %v786_v1, %v750_v2  ;;  %v9670_v20 = vrot.slane %v9669_v50, 1  ;;  %v831_v21 = vadd.f32 %v824_v47, %v766_v61  ;;  %v9673_v53 = vrot.slane %v9672_v25, 1  ;;  %v9692_v4 = vld [vmem:[#allocation36_spill] sm:$0xff] }
  0xe0   : > { %9664 = vst [vmem:[#allocation74_spill] sm:$0xff] %v5411_v45  ;;  %v5420_v42 = vsel %vm413_vm2, %v9667_v33, %v786_v1  ;;  %v850_v12 = vadd.f32 %v843_v57, %v774_v23  ;;  %v5436_v18 = vadd.f32 %v805_v58, %v758_v27  ;;  %v9676_v24 = vrot.slane %v9675_v9, 1  ;;  %v9682_v27 = vld [vmem:[#allocation63_spill] sm:$0xff]  ;;  %v9683_v23 = vld [vmem:[#allocation64_spill] sm:$0xff]  ;;  %v361_v33 = vpop.permute.xlu1 %360 }
  0xe1   : > { %9668 = vst [vmem:[#allocation75_spill] sm:$0xff] %v5420_v42  ;;  %v5429_v49 = vsel %vm413_vm2, %v9670_v20, %v805_v58  ;;  %v5434_v19 = vsel %vm413_vm2, %v9673_v53, %v843_v57  ;;  %v9303_v2 = vrot.slane %v5415_v32, 2  ;;  %v5446_v31 = vmul.f32 %v9678_v15, %v9652_v28  ;;  %v9687_v20 = vld [vmem:[#allocation68_spill] sm:$0xff]  ;;  %v9689_v53 = vld [vmem:[#allocation33_spill] sm:$0xff] }
  0xe2   : > { %9671 = vst [vmem:[#allocation73_spill] sm:$0xff] %v5429_v49  ;;  %v5441_v10 = vsel %vm413_vm2, %v9676_v24, %v824_v47  ;;  %v5450_v38 = vmul.f32 %v9680_v59, %v9679_v40  ;;  %v5454_v61 = vmul.f32 %v9681_v30, %v9679_v40  ;;  %v5458_v37 = vmul.f32 %v9682_v27, %v9679_v40  ;;  %v9684_v47 = vld [vmem:[#allocation65_spill] sm:$0xff] }
  0xe3   : > { %9674 = vst [vmem:[#allocation46_spill] sm:$0xff] %v5434_v19  ;;  %v5462_v1 = vmul.f32 %v9683_v23, %v9679_v40  ;;  %v5466_v28 = vadd.f32 %v9303_v2, %v831_v21  ;;  %v9304_v58 = vrot.slane %v5446_v31, 2  ;;  %v5471_v16 = vmul.f32 %v9684_v47, %v9679_v40  ;;  %v9686_v19 = vld [vmem:[#allocation67_spill] sm:$0xff]  ;;  %v9688_v21 = vld [vmem:[#allocation29_spill] sm:$0xff] }
  0xe4   : > { %9677 = vst [vmem:[#allocation47_spill] sm:$0xff] %v5441_v10  ;;  %v5475_v57 = vmul.f32 %v9685_v11, %v9679_v40  ;;  %v5489_v10 = vmul.f32 %v9686_v19, %v9679_v40  ;;  %v5493_v49 = vmul.f32 %v9687_v20, %v9679_v40  ;;  %v5496_v24 = vsel %vm369_vm0, %v361_v33, 0.0 }
  0xe5   : > { %v5483_v2 = vadd.f32 %v9304_v58, %v850_v12  ;;  %v561_v42 = vmul.f32 %v9689_v53, %v9688_v21  ;;  %v9690_v12 = vld [vmem:[#allocation34_spill] sm:$0xff]  ;;  %v577_v45 = vmul.f32 %v9691_v56, %v9688_v21  ;;  %v585_v40 = vmul.f32 %v9692_v4, %v9688_v21 }
  0xe6   : > { %v569_v58 = vmul.f32 %v9690_v12, %v9688_v21  ;;  %v593_v33 = vmul.f32 %v9680_v59, %v9688_v21  ;;  %v612_v48 = vmul.f32 %v9681_v30, %v9688_v21  ;;  %v631_v59 = vmul.f32 %v9682_v27, %v9688_v21 }
  0xe7   : > { %v564_v8 = vadd.f32 %v561_v42, %v5373_v0  ;;  %v580_v56 = vadd.f32 %v577_v45, %v5369_v26  ;;  %v588_v4 = vadd.f32 %v585_v40, %v5371_v46  ;;  %v650_v0 = vmul.f32 %v9683_v23, %v9688_v21 }
  0xe8   : > { %v572_v12 = vadd.f32 %v569_v58, %v5375_v13  ;;  %v599_v51 = vrot.slane %v593_v33, 1  ;;  %v618_v53 = vrot.slane %v612_v48, 1  ;;  %v669_v13 = vmul.f32 %v9684_v47, %v9688_v21 }
  0xe9   : > { %v688_v42 = vmul.f32 %v9685_v11, %v9688_v21  ;;  %v9693_v26 = vrot.slane %v5450_v38, 1  ;;  %v637_v45 = vrot.slane %v631_v59, 1  ;;  %v707_v30 = vmul.f32 %v9686_v19, %v9688_v21 }
  0xea   : > { %v726_v48 = vmul.f32 %v9687_v20, %v9688_v21  ;;  %v9694_v23 = vrot.slane %v5454_v61, 1  ;;  %v656_v47 = vrot.slane %v650_v0, 1  ;;  %v675_v11 = vrot.slane %v669_v13, 2 }
  0xeb   : > { %v601_v46 = vsel %vm413_vm2, %v599_v51, %v9693_v26  ;;  %v9695_v51 = vrot.slane %v5458_v37, 1  ;;  %v694_v19 = vrot.slane %v688_v42, 2  ;;  %v713_v59 = vrot.slane %v707_v30, 2 }
  0xec   : > { %v607_v27 = vadd.f32 %v601_v46, %v564_v8  ;;  %v620_v58 = vsel %vm413_vm2, %v618_v53, %v9694_v23  ;;  %v9696_v8 = vrot.slane %v5462_v1, 1  ;;  %v9697_v53 = vrot.slane %v5471_v16, 2 }
  0xed   : > { %v626_v40 = vadd.f32 %v620_v58, %v572_v12  ;;  %v639_v33 = vsel %vm413_vm2, %v637_v45, %v9695_v51  ;;  %v732_v13 = vrot.slane %v726_v48, 2  ;;  %v9698_v46 = vrot.slane %v5475_v57, 2 }
  0xee   : > { %v645_v20 = vadd.f32 %v639_v33, %v580_v56  ;;  %v658_v21 = vsel %vm413_vm2, %v656_v47, %v9696_v8  ;;  %v677_v0 = vsel %vm490_vm3, %v675_v11, %v9697_v53  ;;  %v9699_v45 = vrot.slane %v5489_v10, 2  ;;  %v9701_v47 = vld [vmem:[#allocation37_spill] sm:$0xff] }
  0xef   : > { %v664_v12 = vadd.f32 %v658_v21, %v588_v4  ;;  %v683_v26 = vadd.f32 %v677_v0, %v607_v27  ;;  %v696_v42 = vsel %vm490_vm3, %v694_v19, %v9698_v46  ;;  %v9700_v58 = vrot.slane %v5493_v49, 2  ;;  %v9702_v11 = vld [vmem:[#allocation45_spill] sm:$0xff] }
  0xf0   : > { %v715_v56 = vsel %vm490_vm3, %v713_v59, %v9699_v45  ;;  %v702_v30 = vadd.f32 %v696_v42, %v626_v40  ;;  %v745_v4 = vmul.f32 %v9701_v47, %v5496_v24  ;;  %v753_v51 = vmul.f32 %v9702_v11, %v5496_v24 }
  0xf1   : > { %v721_v23 = vadd.f32 %v715_v56, %v645_v20  ;;  %v734_v48 = vsel %vm490_vm3, %v732_v13, %v9700_v58  ;;  %v761_v33 = vmul.f32 %v9653_v29, %v5496_v24  ;;  %v769_v40 = vmul.f32 %v9654_v34, %v5496_v24 }
  0xf2   : > { %v740_v27 = vadd.f32 %v734_v48, %v664_v12  ;;  %v748_v19 = vadd.f32 %v745_v4, %v683_v26  ;;  %v777_v59 = vmul.f32 %v9655_v35, %v5496_v24  ;;  %v796_v20 = vmul.f32 %v9656_v55, %v5496_v24 }
  0xf3   : > { %v815_v8 = vmul.f32 %v9657_v52, %v5496_v24  ;;  %v756_v21 = vadd.f32 %v753_v51, %v702_v30  ;;  %v764_v53 = vadd.f32 %v761_v33, %v721_v23  ;;  %v834_v34 = vmul.f32 %v9658_v14, %v5496_v24 }
  0xf4   : > { %v772_v29 = vadd.f32 %v769_v40, %v740_v27  ;;  %v783_v0 = vrot.slane %v777_v59, 1  ;;  %v802_v13 = vrot.slane %v796_v20, 1  ;;  %v5598_v35 = vmul.f32 %v9659_v5, %v5496_v24 }
  0xf5   : > { %v821_v12 = vrot.slane %v815_v8, 1  ;;  %v840_v55 = vrot.slane %v834_v34, 1  ;;  %v5604_v52 = vmul.f32 %v9660_v41, %v5496_v24  ;;  %v5608_v26 = vmul.f32 %v9665_v17, %v5496_v24 }
  0xf6   : > { %v5612_v14 = vmul.f32 %v9678_v15, %v5496_v24  ;;  %v9703_v5 = vrot.slane %v5401_v39, 2  ;;  %v9704_v41 = vrot.slane %v5405_v36, 2  ;;  %v9705_v17 = vrot.slane %v9666_v62, 1 }
  0xf7   : > { %v9706_v15 = vrot.slane %v9675_v9, 1  ;;  %v9707_v56 = vrot.slane %v9669_v50, 1  ;;  %v5647_v4 = vstv %s5502_s6  ;;  %v5650_v27 = vstv %s5518_s22  ;;  %s9780_s6 = sld [smem:[#allocation28_spill]] }
  0xf8   : > { %v869_v46 = vadd.f32 %v9703_v5, %v5422_v43  ;;  %v888_v42 = vadd.f32 %v9704_v41, %v5436_v18  ;;  %v785_v45 = vsel %vm413_vm2, %v783_v0, %v9705_v17  ;;  %v9709_v18 = vrot.slane %v9672_v25, 1  ;;  %s6006_s22 = sld [smem:[#allocation2 + $0x11]] }
  0xf9   : > { %v823_v24 = vsel %vm413_vm2, %v821_v12, %v9706_v15  ;;  %v804_v43 = vsel %vm413_vm2, %v802_v13, %v9707_v56  ;;  %v5637_v9 = vadd.f32 %v785_v45, %v748_v19  ;;  %v5653_v11 = vstv %s5524_s23  ;;  %s6008_s23 = sld [smem:[#allocation2 + $0x35]] }
  0xfa   : > { %v5631_v30 = vadd.f32 %v823_v24, %v764_v53  ;;  %v842_v62 = vsel %vm413_vm2, %v840_v55, %v9709_v18  ;;  %v5639_v58 = vadd.f32 %v804_v43, %v756_v21  ;;  %v5656_v51 = vstv %s5532_s24  ;;  %v940_v21 = vpop.permute.xlu2 %939  ;;  %v9717_v55 = vld [vmem:[#allocation31_spill] sm:$0xff]  ;;  %s6023_s24 = sld [smem:[#allocation2 + $0x59]] }
  0xfb   : > { %9710 = vst [vmem:[#allocation39_spill] sm:$0xff] %v5637_v9  ;;  %v5641_v50 = vadd.f32 %v842_v62, %v772_v29  ;;  %v5659_v33 = vstv %s5511_s21  ;;  %v5662_v40 = vstv %s5541_s26  ;;  %v5665_v19 = vstv %s5546_s7  ;;  %s5998_s21 = sld [smem:[#allocation2 + $0x7a]] }
  0xfc   : > { %9708 = vst [vmem:[#allocation38_spill] sm:$0xff] %v5631_v30  ;;  %v5668_v59 = vstv %s5551_s9  ;;  %v5671_v20 = vstv %s5559_s10  ;;  %v5674_v8 = vstv %s5567_s18  ;;  %v5677_v53 = vstv %s5582_s19  ;;  %s6035_s26 = sld [smem:[#allocation2 + $0x7d]] }
  0xfd   : > { %9711 = vst [vmem:[#allocation40_spill] sm:$0xff] %v5639_v58  ;;  %v5680_v29 = vstv %s5590_s28  ;;  %v5683_v34 = vstv %s5594_s30  ;;  %v5686_v0 = vstv %s5600_s8  ;;  %v5689_v13 = vstv %s5574_s12  ;;  %s6051_s7 = sld [smem:[#allocation2 + $0x12]] }
  0xfe   : > { %9712 = vst [vmem:[#allocation41_spill] sm:$0xff] %v5641_v50  ;;  %v5692_v12 = vstv %s5614_s13  ;;  %v1147_v5 = vmul.f32 %v9717_v55, %v5677_v53  ;;  %v1155_v41 = vmul.f32 %v9717_v55, %v5680_v29  ;;  %v1163_v17 = vmul.f32 %v9717_v55, %v5683_v34  ;;  %s6063_s9 = sld [smem:[#allocation2 + $0x36]] }
  0xff   : > { %9713 = vst [vmem:[#allocation42_spill] sm:$0xff] %v5677_v53  ;;  %v1171_v45 = vmul.f32 %v9717_v55, %v5686_v0  ;;  %v946_v15 = vsel %vm356_vm1, 0.0, %v940_v21  ;;  %v9718_v24 = vrot.slane %v5135_v44, 1  ;;  %v9719_v56 = vrot.slane %v5450_v38, 1  ;;  %s6077_s10 = sld [smem:[#allocation2 + $0x5a]] }
 0x100   : > { %9714 = vst [vmem:[#allocation43_spill] sm:$0xff] %v5680_v29  ;;  %v963_v18 = vmul.f32 %v5647_v4, %v946_v15  ;;  %v971_v62 = vmul.f32 %v5650_v27, %v946_v15  ;;  %v979_v47 = vmul.f32 %v5653_v11, %v946_v15  ;;  %v987_v25 = vmul.f32 %v5656_v51, %v946_v15  ;;  %s6085_s18 = sld [smem:[#allocation2 + $0x7e]] }
 0x101   : > { %9715 = vst [vmem:[#allocation70_spill] sm:$0xff] %v5683_v34  ;;  %v603_v43 = vsel %vm413_vm2, %v9719_v56, %v9718_v24  ;;  %v5713_v48 = vmul.f32 %v5659_v33, %v946_v15  ;;  %v5716_v55 = vmul.f32 %v5662_v40, %v946_v15  ;;  %v5719_v44 = vmul.f32 %v5665_v19, %v946_v15  ;;  %s6099_s12 = sld [smem:[#allocation2 + $0x15]] }
 0x102   : > { %9716 = vst [vmem:[#allocation72_spill] sm:$0xff] %v5686_v0  ;;  %v5722_v38 = vmul.f32 %v5668_v59, %v946_v15  ;;  %v966_v21 = vadd.f32 %v963_v18, %v869_v46  ;;  %v974_v24 = vadd.f32 %v971_v62, %v888_v42  ;;  %v982_v56 = vadd.f32 %v979_v47, %v5466_v28  ;;  %s6113_s19 = sld [smem:[#allocation2 + $0x39]] }
 0x103   : > { %v990_v23 = vadd.f32 %v987_v25, %v5483_v2  ;;  %v9316_v0 = vrot.slane %v5713_v48, 1  ;;  %v9313_v34 = vrot.slane %v5716_v55, 1  ;;  %v9315_v29 = vrot.slane %v5719_v44, 1  ;;  %s6119_s28 = sld [smem:[#allocation2 + $0x5d]] }
 0x104   : > { %v9314_v53 = vrot.slane %v5722_v38, 1  ;;  %v5731_v50 = vmul.f32 %v5671_v20, %v946_v15  ;;  %v5734_v30 = vmul.f32 %v5674_v8, %v946_v15  ;;  %v5737_v46 = vmul.f32 %v5689_v13, %v946_v15  ;;  %s6133_s30 = sld [smem:[#allocation2 + $0x81]] }
 0x105   : > { %v5740_v28 = vmul.f32 %v5692_v12, %v946_v15  ;;  %v1009_v2 = vadd.f32 %v9316_v0, %v966_v21  ;;  %v1028_v42 = vadd.f32 %v9313_v34, %v974_v24  ;;  %v1047_v25 = vadd.f32 %v9315_v29, %v982_v56  ;;  %s6143_s8 = sld [smem:[#allocation2 + $0x18]] }
 0x106   : > { %v1066_v47 = vadd.f32 %v9314_v53, %v990_v23  ;;  %v9319_v18 = vrot.slane %v5731_v50, 2  ;;  %v9317_v62 = vrot.slane %v5734_v30, 2  ;;  %v9318_v58 = vrot.slane %v5737_v46, 2  ;;  %s6157_s13 = sld [smem:[#allocation2 + $0x3c]] }
 0x107   : > { %v9720_v9 = vrot.slane %v5139_v63, 1  ;;  %v9721_v21 = vrot.slane %v5454_v61, 1  ;;  %v9722_v34 = vrot.slane %v5143_v7, 1  ;;  %v9723_v56 = vrot.slane %v5458_v37, 1 }
 0x108   : > { %v9724_v53 = vrot.slane %v5147_v6, 1  ;;  %v9725_v29 = vrot.slane %v5462_v1, 1  ;;  %v9726_v15 = vrot.slane %v5176_v54, 2  ;;  %v9727_v63 = vrot.slane %v5471_v16, 2 }
 0x109   : > { %v622_v24 = vsel %vm413_vm2, %v9721_v21, %v9720_v9  ;;  %v641_v23 = vsel %vm413_vm2, %v9723_v56, %v9722_v34  ;;  %v1085_v9 = vadd.f32 %v9319_v18, %v1009_v2  ;;  %v1104_v7 = vadd.f32 %v9317_v62, %v1028_v42  ;;  %v9736_v21 = vld [vmem:[#allocation55_spill] sm:$0xff]  ;;  %v938_v56 = vpop.permute.xlu1 %937 }
 0x10a   : > { %v660_v0 = vsel %vm413_vm2, %v9725_v29, %v9724_v53  ;;  %v679_v61 = vsel %vm490_vm3, %v9727_v63, %v9726_v15  ;;  %v1123_v37 = vadd.f32 %v9318_v58, %v1047_v25  ;;  %v9728_v6 = vrot.slane %v5740_v28, 2 }
 0x10b   : > { %v9729_v53 = vrot.slane %v5180_v60, 2  ;;  %v9730_v54 = vrot.slane %v5475_v57, 2  ;;  %v9731_v29 = vrot.slane %v5184_v3, 2  ;;  %v9732_v34 = vrot.slane %v5489_v10, 2 }
 0x10c   : > { %v1142_v1 = vadd.f32 %v9728_v6, %v1066_v47  ;;  %v9733_v42 = vrot.slane %v9646_v22, 2  ;;  %v9734_v15 = vrot.slane %v5493_v49, 2  ;;  %v9735_v47 = vrot.slane %v5415_v32, 2  ;;  %v9739_v6 = vld [vmem:[#allocation53_spill] sm:$0xff] }
 0x10d   : > { %v698_v16 = vsel %vm490_vm3, %v9730_v54, %v9729_v53  ;;  %v717_v2 = vsel %vm490_vm3, %v9732_v34, %v9731_v29  ;;  %v9737_v60 = vrot.slane %v9736_v21, 2  ;;  %v5802_v63 = vadd.f32 %v1147_v5, %v1085_v9  ;;  %v9742_v54 = vld [vmem:[#allocation54_spill] sm:$0xff] }
 0x10e   : > { %v736_v25 = vsel %vm490_vm3, %v9734_v15, %v9733_v42  ;;  %v5804_v3 = vadd.f32 %v1155_v41, %v1104_v7  ;;  %v9738_v10 = vrot.slane %v5401_v39, 2  ;;  %v9740_v53 = vrot.slane %v9739_v6, 2  ;;  %v9745_v42 = vld [vmem:[#allocation60_spill] sm:$0xff]  ;;  %v9748_v7 = vld [vmem:[#allocation71_spill] sm:$0xff] }
 0x10f   : > { %v901_v57 = vsel %vm490_vm3, %v9737_v60, %v9735_v47  ;;  %v9741_v49 = vrot.slane %v5405_v36, 2  ;;  %v9743_v29 = vrot.slane %v9742_v54, 2  ;;  %v9744_v34 = vrot.slane %v5446_v31, 2  ;;  %v9747_v41 = vld [vmem:[#allocation76_spill] sm:$0xff]  ;;  %v9749_v47 = vld [vmem:[#allocation69_spill] sm:$0xff]  ;;  %v9751_v36 = vld [vmem:[#allocation74_spill] sm:$0xff] }
 0x110   : > { %v863_v22 = vsel %vm490_vm3, %v9740_v53, %v9738_v10  ;;  %v9746_v15 = vrot.slane %v9745_v42, 2  ;;  %v608_v9 = vadd.f32 %v603_v43, %v9747_v41  ;;  %v627_v39 = vadd.f32 %v622_v24, %v9748_v7 }
 0x111   : > { %v882_v32 = vsel %vm490_vm3, %v9743_v29, %v9741_v49  ;;  %v646_v60 = vadd.f32 %v641_v23, %v9749_v47  ;;  %v5824_v62 = vadd.f32 %v1163_v17, %v1123_v37  ;;  %v5826_v10 = vadd.f32 %v1171_v45, %v1142_v1  ;;  %v9752_v17 = vld [vmem:[#allocation56_spill] sm:$0xff]  ;;  %v9753_v45 = vld [vmem:[#allocation57_spill] sm:$0xff] }
 0x112   : > { %v920_v5 = vsel %vm490_vm3, %v9746_v15, %v9744_v34  ;;  %v665_v53 = vadd.f32 %v660_v0, %v9751_v36  ;;  %v945_v49 = vsel %vm356_vm1, 0.0, %v938_v56  ;;  %v684_v29 = vadd.f32 %v679_v61, %v608_v9  ;;  %v9754_v15 = vld [vmem:[#allocation58_spill] sm:$0xff]  ;;  %v9755_v61 = vld [vmem:[#allocation59_spill] sm:$0xff] }
 0x113   : > { %9750 = vst [vmem:[#allocation44_spill] sm:$0xff] %v5826_v10  ;;  %v703_v31 = vadd.f32 %v698_v16, %v627_v39  ;;  %v722_v58 = vadd.f32 %v717_v2, %v646_v60  ;;  %v962_v18 = vmul.f32 %v5647_v4, %v945_v49  ;;  %v970_v43 = vmul.f32 %v5650_v27, %v945_v49  ;;  %v9756_v9 = vld [vmem:[#allocation75_spill] sm:$0xff]  ;;  %v9757_v39 = vld [vmem:[#allocation73_spill] sm:$0xff] }
 0x114   : > { %v741_v34 = vadd.f32 %v736_v25, %v665_v53  ;;  %v978_v24 = vmul.f32 %v5653_v11, %v945_v49  ;;  %v986_v23 = vmul.f32 %v5656_v51, %v945_v49  ;;  %v749_v37 = vadd.f32 %v9752_v17, %v684_v29  ;;  %v9758_v60 = vld [vmem:[#allocation47_spill] sm:$0xff]  ;;  %v9759_v53 = vld [vmem:[#allocation46_spill] sm:$0xff] }
 0x115   : > { %v757_v1 = vadd.f32 %v9753_v45, %v703_v31  ;;  %v765_v0 = vadd.f32 %v9754_v15, %v722_v58  ;;  %v5838_v56 = vmul.f32 %v5659_v33, %v945_v49  ;;  %v5842_v2 = vmul.f32 %v5662_v40, %v945_v49 }
 0x116   : > { %v773_v16 = vadd.f32 %v9755_v61, %v741_v34  ;;  %v5845_v25 = vmul.f32 %v5665_v19, %v945_v49  ;;  %v5848_v41 = vmul.f32 %v5668_v59, %v945_v49  ;;  %v792_v7 = vadd.f32 %v9756_v9, %v749_v37 }
 0x117   : > { %v811_v47 = vadd.f32 %v9757_v39, %v757_v1  ;;  %v830_v58 = vadd.f32 %v9758_v60, %v765_v0  ;;  %v1000_v36 = vrot.slane %v5838_v56, 1  ;;  %v1019_v31 = vrot.slane %v5842_v2, 1 }
 0x118   : > { %v849_v29 = vadd.f32 %v9759_v53, %v773_v16  ;;  %v1038_v34 = vrot.slane %v5845_v25, 1  ;;  %v1057_v17 = vrot.slane %v5848_v41, 1  ;;  %v868_v45 = vadd.f32 %v863_v22, %v792_v7 }
 0x119   : > { %v887_v15 = vadd.f32 %v882_v32, %v811_v47  ;;  %v906_v61 = vadd.f32 %v901_v57, %v830_v58  ;;  %v9760_v10 = vrot.slane %v5713_v48, 1  ;;  %v9761_v0 = vrot.slane %v5716_v55, 1 }
 0x11a   : > { %v925_v1 = vadd.f32 %v920_v5, %v849_v29  ;;  %v9762_v9 = vrot.slane %v5719_v44, 1  ;;  %v9763_v48 = vrot.slane %v5722_v38, 1  ;;  %v965_v32 = vadd.f32 %v962_v18, %v868_v45 }
 0x11b   : > { %v1003_v37 = vsel %vm413_vm2, %v1000_v36, %v9760_v10  ;;  %v1022_v16 = vsel %vm413_vm2, %v1019_v31, %v9761_v0  ;;  %v973_v55 = vadd.f32 %v970_v43, %v887_v15  ;;  %v981_v5 = vadd.f32 %v978_v24, %v906_v61 }
 0x11c   : > { %v1041_v57 = vsel %vm413_vm2, %v1038_v34, %v9762_v9  ;;  %v1060_v22 = vsel %vm413_vm2, %v1057_v17, %v9763_v48  ;;  %v5883_v10 = vmul.f32 %v5671_v20, %v945_v49  ;;  %v989_v44 = vadd.f32 %v986_v23, %v925_v1  ;;  %v936_v48 = vpop.permute.xlu0 %935 }
 0x11d   : > { %v5888_v7 = vmul.f32 %v5674_v8, %v945_v49  ;;  %v5891_v38 = vmul.f32 %v5689_v13, %v945_v49  ;;  %v5894_v39 = vmul.f32 %v5692_v12, %v945_v49  ;;  %v1008_v18 = vadd.f32 %v1003_v37, %v965_v32 }
 0x11e   : > { %v1046_v43 = vadd.f32 %v1041_v57, %v981_v5  ;;  %v1076_v24 = vrot.slane %v5883_v10, 2  ;;  %v9764_v47 = vrot.slane %v9739_v6, 2  ;;  %v9765_v60 = vrot.slane %v5598_v35, 2 }
 0x11f   : > { %v1065_v58 = vadd.f32 %v1060_v22, %v989_v44  ;;  %v1095_v53 = vrot.slane %v5888_v7, 2  ;;  %v1114_v49 = vrot.slane %v5891_v38, 2  ;;  %v1133_v29 = vrot.slane %v5894_v39, 2 }
 0x120   : > { %v861_v23 = vsel %vm490_vm3, %v9765_v60, %v9764_v47  ;;  %v1027_v45 = vadd.f32 %v1022_v16, %v973_v55  ;;  %v9766_v15 = vrot.slane %v9742_v54, 2  ;;  %v9767_v6 = vrot.slane %v5604_v52, 2  ;;  %v9775_v16 = vld [vmem:[#allocation39_spill] sm:$0xff]  ;;  %v9778_v47 = vld [vmem:[#allocation38_spill] sm:$0xff] }
 0x121   : > { %v9768_v61 = vrot.slane %v9736_v21, 2  ;;  %v9769_v37 = vrot.slane %v5608_v26, 2  ;;  %v9770_v0 = vrot.slane %v9745_v42, 2  ;;  %v9771_v9 = vrot.slane %v5612_v14, 2 }
 0x122   : > { %v880_v35 = vsel %vm490_vm3, %v9767_v6, %v9766_v15  ;;  %v9772_v54 = vrot.slane %v5731_v50, 2  ;;  %v9773_v21 = vrot.slane %v5737_v46, 2  ;;  %v9774_v42 = vrot.slane %v5740_v28, 2  ;;  %v9777_v28 = vld [vmem:[#allocation40_spill] sm:$0xff] }
 0x123   : > { %v899_v1 = vsel %vm490_vm3, %v9769_v37, %v9768_v61  ;;  %v918_v57 = vsel %vm490_vm3, %v9771_v9, %v9770_v0  ;;  %v867_v22 = vadd.f32 %v861_v23, %v9775_v16  ;;  %v9776_v32 = vrot.slane %v5734_v30, 2  ;;  %v9779_v23 = vld [vmem:[#allocation41_spill] sm:$0xff] }
 0x124   : > { %v1079_v52 = vsel %vm490_vm3, %v1076_v24, %v9772_v54  ;;  %v1117_v26 = vsel %vm490_vm3, %v1114_v49, %v9773_v21  ;;  %v1136_v14 = vsel %vm490_vm3, %v1133_v29, %v9774_v42  ;;  %v886_v44 = vadd.f32 %v880_v35, %v9777_v28 }
 0x125   : > { %v5946_v50 = vadd.f32 %v1079_v52, %v1008_v18  ;;  %v1098_v46 = vsel %vm490_vm3, %v1095_v53, %v9776_v32  ;;  %v5953_v55 = vadd.f32 %v1117_v26, %v1046_v43  ;;  %v5955_v5 = vadd.f32 %v1136_v14, %v1065_v58 }
 0x126   : > { %v905_v60 = vadd.f32 %v899_v1, %v9778_v47  ;;  %v924_v15 = vadd.f32 %v918_v57, %v9779_v23  ;;  %v944_v18 = vsel %vm356_vm1, 0.0, %v936_v48  ;;  %v5977_v0 = vadd.f32 %v1098_v46, %v1027_v45 }
 0x127   : > { %v961_v30 = vmul.f32 %v5647_v4, %v944_v18  ;;  %v969_v43 = vmul.f32 %v5650_v27, %v944_v18  ;;  %v977_v58 = vmul.f32 %v5653_v11, %v944_v18  ;;  %v985_v6 = vmul.f32 %v5656_v51, %v944_v18 }
 0x128   : > { %v993_v35 = vmul.f32 %v5659_v33, %v944_v18  ;;  %v1012_v61 = vmul.f32 %v5662_v40, %v944_v18  ;;  %v1031_v37 = vmul.f32 %v5665_v19, %v944_v18  ;;  %v1050_v1 = vmul.f32 %v5668_v59, %v944_v18 }
 0x129   : > { %v980_v4 = vadd.f32 %v977_v58, %v905_v60  ;;  %v988_v27 = vadd.f32 %v985_v6, %v924_v15  ;;  %v5980_v9 = vstv %s5863_s14  ;;  %v1069_v40 = vmul.f32 %v5671_v20, %v944_v18  ;;  %s6169_s14 = sld [smem:[#allocation2 + $0x60]] }
 0x12a   : > { %v999_v11 = vrot.slane %v993_v35, 1  ;;  %v1018_v51 = vrot.slane %v1012_v61, 1  ;;  %v1037_v57 = vrot.slane %v1031_v37, 1  ;;  %v1056_v33 = vrot.slane %v1050_v1, 1  ;;  %v9783_v35 = vld [vmem:[#allocation44_spill] sm:$0xff] }
 0x12b   : > { %v1088_v19 = vmul.f32 %v5674_v8, %v944_v18  ;;  %v1107_v59 = vmul.f32 %v5689_v13, %v944_v18  ;;  %v1126_v45 = vmul.f32 %v5692_v12, %v944_v18  ;;  %v964_v48 = vadd.f32 %v961_v30, %v867_v22 }
 0x12c   : > { %v972_v54 = vadd.f32 %v969_v43, %v886_v44  ;;  %v1039_v52 = vsel %vm413_vm2, %v1037_v57, %v1038_v34  ;;  %v1058_v20 = vsel %vm413_vm2, %v1056_v33, %v1057_v17  ;;  %v1001_v8 = vsel %vm413_vm2, %v999_v11, %v1000_v36  ;;  %v4509_v17 = vld [vmem:[%s9780_s6 + $0x28] sm:$0xf] }
 0x12d   : > { %v1020_v13 = vsel %vm413_vm2, %v1018_v51, %v1019_v31  ;;  %v1045_v12 = vadd.f32 %v1039_v52, %v980_v4  ;;  %v1064_v25 = vadd.f32 %v1058_v20, %v988_v27  ;;  %v1075_v34 = vrot.slane %v1069_v40, 2  ;;  %v952_v20 = vpop.permute.xlu2 %951 }
 0x12e   : > { %v1094_v41 = vrot.slane %v1088_v19, 2  ;;  %v1113_v21 = vrot.slane %v1107_v59, 2  ;;  %v1132_v26 = vrot.slane %v1126_v45, 2  ;;  %v6012_v42 = vmul.f32 %v4509_v17, %v5980_v9 }
 0x12f   : > { %v6015_v56 = vstv %s5880_s16  ;;  %v6018_v36 = vstv %s5885_s2  ;;  %v6021_v2 = vstv %s5896_s11  ;;  %v6025_v31 = vadd.f32 %v1001_v8, %v964_v48  ;;  %s6175_s16 = sld [smem:[#allocation2 + $0x13]] }
 0x130   : > { %v6027_v14 = vadd.f32 %v1020_v13, %v972_v54  ;;  %v1115_v16 = vsel %vm490_vm3, %v1113_v21, %v1114_v49  ;;  %v1134_v22 = vsel %vm490_vm3, %v1132_v26, %v1133_v29  ;;  %v6040_v32 = vsel %vm490_vm3, %v1075_v34, %v1076_v24  ;;  %s6189_s2 = sld [smem:[#allocation2 + $0x37]] }
 0x131   : > { %v6045_v46 = vsel %vm490_vm3, %v1094_v41, %v1095_v53  ;;  %v6047_v38 = vadd.f32 %v1115_v16, %v1045_v12  ;;  %v6049_v49 = vadd.f32 %v1134_v22, %v1064_v25  ;;  %v9333_v39 = vrot.slane %v6012_v42, 1  ;;  %s6191_s11 = sld [smem:[#allocation2 + $0x5b]] }
 0x132   : > { %v6055_v29 = vmul.f32 %v4509_v17, %v6015_v56  ;;  %v6058_v10 = vmul.f32 %v4509_v17, %v6018_v36  ;;  %v6061_v24 = vmul.f32 %v4509_v17, %v6021_v2  ;;  %v6066_v7 = vstv %s5904_s15  ;;  %s6197_s15 = sld [smem:[#allocation2 + $0x7f]] }
 0x133   : > { %9781 = vst [vmem:[#allocation49_spill] sm:$0xff] %v6047_v38  ;;  %v6069_v53 = vstv %s5909_s17  ;;  %v6072_v28 = vstv %s5926_s20  ;;  %v6075_v44 = vstv %s5944_s27  ;;  %v1193_v47 = vadd.f32 %v9333_v39, %v5802_v63  ;;  %s6211_s17 = sld [smem:[#allocation2 + $0x84]] }
 0x134   : > { %9782 = vst [vmem:[#allocation50_spill] sm:$0xff] %v6049_v49  ;;  %v9332_v60 = vrot.slane %v6055_v29, 1  ;;  %v9331_v23 = vrot.slane %v6058_v10, 1  ;;  %v9324_v15 = vrot.slane %v6061_v24, 1  ;;  %v6088_v18 = vmul.f32 %v4509_v17, %v6066_v7  ;;  %s6640_s20 = sld [smem:[#allocation2 + $0x14]] }
 0x135   : > { %v6091_v30 = vmul.f32 %v4509_v17, %v6069_v53  ;;  %v6094_v43 = vmul.f32 %v4509_v17, %v6072_v28  ;;  %v6097_v63 = vmul.f32 %v4509_v17, %v6075_v44  ;;  %v6111_v37 = vstv %s5957_s3  ;;  %s6704_s27 = sld [smem:[#allocation2 + $0x38]] }
 0x136   : > { %v1212_v58 = vadd.f32 %v9332_v60, %v5804_v3  ;;  %v1231_v6 = vadd.f32 %v9331_v23, %v5824_v62  ;;  %v1250_v61 = vadd.f32 %v9324_v15, %v9783_v35  ;;  %v9323_v1 = vrot.slane %v6088_v18, 2  ;;  %v1524_v60 = vpop.permute.xlu2 %1523  ;;  %s6714_s3 = sld [smem:[#allocation2 + $0x5c]] }
 0x137   : > { %v9322_v4 = vrot.slane %v6091_v30, 2  ;;  %v9321_v3 = vrot.slane %v6094_v43, 2  ;;  %v9320_v62 = vrot.slane %v6097_v63, 2  ;;  %v6122_v27 = vstv %s5963_s4  ;;  %s6720_s4 = sld [smem:[#allocation2 + $0x80]] }
 0x138   : > { %v6125_v11 = vstv %s5969_s0  ;;  %v6128_v51 = vstv %s5975_s1  ;;  %v6131_v57 = vstv %s5982_s25  ;;  %v1269_v33 = vadd.f32 %v9323_v1, %v1193_v47  ;;  %s6726_s0 = sld [smem:[#allocation2 + $0x16]] }
 0x139   : > { %v1288_v40 = vadd.f32 %v9322_v4, %v1212_v58  ;;  %v1307_v19 = vadd.f32 %v9321_v3, %v1231_v6  ;;  %v1326_v59 = vadd.f32 %v9320_v62, %v1250_v61  ;;  %v6146_v45 = vstv %s5984_s29  ;;  %s6732_s1 = sld [smem:[#allocation2 + $0x3a]] }
 0x13a   : > { %v6149_v48 = vstv %s5990_s5  ;;  %v6152_v54 = vstv %s5998_s21  ;;  %v6155_v52 = vstv %s6006_s22  ;;  %v6160_v8 = vstv %s6008_s23  ;;  %s6746_s25 = sld [smem:[#allocation2 + $0x5e]] }
 0x13b   : > { %v6163_v13 = vstv %s6023_s24  ;;  %v6166_v12 = vstv %s6035_s26  ;;  %v958_v25 = vsel %vm369_vm0, %v952_v20, 0.0  ;;  %v6269_v23 = vstv %s6157_s13  ;;  %s6748_s29 = sld [smem:[#allocation2 + $0x82]] }
 0x13c   : > { %9784 = vst [vmem:[#allocation52_spill] sm:$0xff] %v6163_v13  ;;  %v1331_v34 = vmul.f32 %v6111_v37, %v958_v25  ;;  %v1339_v41 = vmul.f32 %v6122_v27, %v958_v25  ;;  %v1347_v21 = vmul.f32 %v6125_v11, %v958_v25  ;;  %v1355_v26 = vmul.f32 %v6128_v51, %v958_v25  ;;  %s6750_s5 = sld [smem:[#allocation2 + $0x19]] }
 0x13d   : > { %9785 = vst [vmem:[#allocation51_spill] sm:$0xff] %v6166_v12  ;;  %v6178_v17 = vmul.f32 %v6131_v57, %v958_v25  ;;  %v6181_v16 = vmul.f32 %v6146_v45, %v958_v25  ;;  %v6184_v22 = vmul.f32 %v6149_v48, %v958_v25  ;;  %v6187_v47 = vmul.f32 %v6152_v54, %v958_v25  ;;  %s6790_s21 = sld [smem:[#allocation2 + $0x3d]] }
 0x13e   : > { %v1334_v58 = vadd.f32 %v1331_v34, %v1269_v33  ;;  %v1342_v6 = vadd.f32 %v1339_v41, %v1288_v40  ;;  %v1350_v35 = vadd.f32 %v1347_v21, %v1307_v19  ;;  %v1358_v61 = vadd.f32 %v1355_v26, %v1326_v59  ;;  %s6804_s22 = sld [smem:[#allocation2 + $0x61]] }
 0x13f   : > { %9786 = vst [vmem:[#allocation48_spill] sm:$0xff] %v6178_v17  ;;  %v9328_v20 = vrot.slane %v6178_v17, 1  ;;  %v9327_v62 = vrot.slane %v6181_v16, 1  ;;  %v9326_v3 = vrot.slane %v6184_v22, 1  ;;  %v9325_v4 = vrot.slane %v6187_v47, 1  ;;  %s6821_s23 = sld [smem:[#allocation2 + $0x85]] }
 0x140   : > { %9787 = vst [vmem:[#allocation30_spill] sm:$0xff] %v6181_v16  ;;  %v6200_v1 = vmul.f32 %v6155_v52, %v958_v25  ;;  %v6203_v33 = vmul.f32 %v6160_v8, %v958_v25  ;;  %v6206_v40 = vmul.f32 %v6163_v13, %v958_v25  ;;  %v6209_v19 = vmul.f32 %v6166_v12, %v958_v25  ;;  %v9811_v12 = vld [vmem:[#allocation42_spill] sm:$0xff]  ;;  %s6837_s24 = sld [smem:[#allocation2 + $0x17]] }
 0x141   : > { %9788 = vst [vmem:[#allocation61_spill] sm:$0xff] %v6184_v22  ;;  %v1377_v59 = vadd.f32 %v9328_v20, %v1334_v58  ;;  %v1396_v34 = vadd.f32 %v9327_v62, %v1342_v6  ;;  %v1415_v41 = vadd.f32 %v9326_v3, %v1350_v35  ;;  %v1434_v21 = vadd.f32 %v9325_v4, %v1358_v61  ;;  %s6855_s26 = sld [smem:[#allocation2 + $0x3b]] }
 0x142   : > { %9789 = vst [vmem:[#allocation62_spill] sm:$0xff] %v6187_v47  ;;  %v9334_v25 = vrot.slane %v6200_v1, 2  ;;  %v9335_v26 = vrot.slane %v6203_v33, 2  ;;  %v9329_v15 = vrot.slane %v6206_v40, 2  ;;  %v9330_v58 = vrot.slane %v6209_v19, 2  ;;  %s7118_s13 = sld [smem:[#allocation2 + $0x1f]] }
 0x143   : > { %9790 = vst [vmem:[#allocation63_spill] sm:$0xff] %v6200_v1  ;;  %v6227_v6 = vadd.f32 %v6040_v32, %v6025_v31  ;;  %v6231_v35 = vadd.f32 %v6045_v46, %v6027_v14  ;;  %v6234_v61 = vstv %s6051_s7  ;;  %v6237_v4 = vstv %s6063_s9  ;;  %s6866_s7 = sld [smem:[#allocation2 + $0x5f]] }
 0x144   : > { %9791 = vst [vmem:[#allocation64_spill] sm:$0xff] %v6203_v33  ;;  %v1491_v3 = vadd.f32 %v9329_v15, %v1415_v41  ;;  %v1510_v62 = vadd.f32 %v9330_v58, %v1434_v21  ;;  %v6244_v31 = vstv %s6077_s10  ;;  %v6247_v14 = vstv %s6085_s18  ;;  %s6873_s9 = sld [smem:[#allocation2 + $0x83]] }
 0x145   : > { %9792 = vst [vmem:[#allocation65_spill] sm:$0xff] %v6206_v40  ;;  %v1453_v32 = vadd.f32 %v9334_v25, %v1377_v59  ;;  %v1472_v46 = vadd.f32 %v9335_v26, %v1396_v34  ;;  %v6254_v20 = vstv %s6099_s12  ;;  %v6257_v41 = vstv %s6113_s19  ;;  %v6290_v40 = vld [vmem:[%s9780_s6 + $0x40] sm:$0xf]  ;;  %s6888_s10 = sld [smem:[#allocation2 + $0x1a]] }
 0x146   : > { %9793 = vst [vmem:[#allocation66_spill] sm:$0xff] %v6209_v19  ;;  %v6260_v15 = vstv %s6119_s28  ;;  %v6263_v21 = vstv %s6133_s30  ;;  %v6266_v58 = vstv %s6143_s8  ;;  %v6272_v39 = vstv %s6175_s16  ;;  %s6903_s18 = sld [smem:[#allocation2 + $0x3e]] }
 0x147   : > { %9794 = vst [vmem:[#allocation67_spill] sm:$0xff] %v6227_v6  ;;  %v6275_v59 = vstv %s6189_s2  ;;  %v6278_v25 = vstv %s6191_s11  ;;  %v6281_v34 = vstv %s6197_s15  ;;  %v6284_v26 = vstv %s6169_s14  ;;  %s6916_s12 = sld [smem:[#allocation2 + $0x62]] }
 0x148   : > { %9795 = vst [vmem:[#allocation68_spill] sm:$0xff] %v6231_v35  ;;  %v6287_v19 = vstv %s6211_s17  ;;  %v1731_v33 = vmul.f32 %v6290_v40, %v6272_v39  ;;  %v1739_v1 = vmul.f32 %v6290_v40, %v6275_v59  ;;  %v6298_v49 = vmul.f32 %v6290_v40, %v6278_v25  ;;  %v4511_v6 = vld [vmem:[%s9780_s6 + $0x20] sm:$0xff]  ;;  %s6929_s19 = sld [smem:[#allocation2 + $0x86]] }
 0x149   : > { %9796 = vst [vmem:[#allocation29_spill] sm:$0xff] %v6234_v61  ;;  %v6302_v38 = vmul.f32 %v6290_v40, %v6281_v34  ;;  %v1530_v35 = vsel %vm356_vm1, 0.0, %v1524_v60  ;;  %v1146_v13 = vmul.f32 %v4511_v6, %v9811_v12  ;;  %s7106_s28 = sld [smem:[#allocation2 + $0x1b]] }
 0x14a   : > { %9797 = vst [vmem:[#allocation33_spill] sm:$0xff] %v6237_v4  ;;  %v1547_v47 = vmul.f32 %v6234_v61, %v1530_v35  ;;  %v1563_v22 = vmul.f32 %v6244_v31, %v1530_v35  ;;  %v6315_v16 = vmul.f32 %v6257_v41, %v1530_v35  ;;  %v6321_v60 = vmul.f32 %v6263_v21, %v1530_v35  ;;  %s7109_s30 = sld [smem:[#allocation2 + $0x1e]] }
 0x14b   : > { %9798 = vst [vmem:[#allocation34_spill] sm:$0xff] %v6244_v31  ;;  %s7111_s8 = sld [smem:[#allocation2 + $0x21]] }
 0x14c   : > { %9799 = vst [vmem:[#allocation35_spill] sm:$0xff] %v6247_v14  ;;  %v1566_v12 = vadd.f32 %v1563_v22, %v1491_v3  ;;  %v9377_v17 = vrot.slane %v6321_v60, 1  ;;  %s7131_s14 = sld [smem:[#allocation2 + $0x1c]] }
 0x14d   : > { %9800 = vst [vmem:[#allocation36_spill] sm:$0xff] %v6254_v20  ;;  %s7154_s16 = sld [smem:[#allocation2 + $0x22]] }
 0x14e   : > { %9801 = vst [vmem:[#allocation37_spill] sm:$0xff] %v6257_v41  ;;  %v6328_v41 = vmul.f32 %v6266_v58, %v1530_v35  ;;  %s7164_s2 = sld [smem:[#allocation2 + $0x1d]] }
 0x14f   : > { %9802 = vst [vmem:[#allocation45_spill] sm:$0xff] %v6260_v15  ;;  %s7177_s11 = sld [smem:[#allocation2 + $0x20]] }
 0x150   : > { %9803 = vst [vmem:[#allocation31_spill] sm:$0xff] %v6263_v21  ;;  %v6334_v21 = vmul.f32 %v6284_v26, %v1530_v35  ;;  %s7192_s15 = sld [smem:[#allocation2 + $0x23]] }
 0x151   : > { %9804 = vst [vmem:[#allocation55_spill] sm:$0xff] %v6272_v39  ;;  %v1555_v39 = vmul.f32 %v6237_v4, %v1530_v35  ;;  %s7212_s17 = sld [smem:[#allocation7 + $0x4]] }
 0x152   : > { %9805 = vst [vmem:[#allocation53_spill] sm:$0xff] %v6275_v59  ;;  %v1571_v59 = vmul.f32 %v6247_v14, %v1530_v35  ;;  %v9379_v14 = vrot.slane %v6315_v16, 1 }
 0x153   : > { %9806 = vst [vmem:[#allocation54_spill] sm:$0xff] %v6278_v25  ;;  %v6312_v25 = vmul.f32 %v6254_v20, %v1530_v35  ;;  %v1558_v61 = vadd.f32 %v1555_v39, %v1472_v46  ;;  %v6337_v39 = vmul.f32 %v6287_v19, %v1530_v35 }
 0x154   : > { %9807 = vst [vmem:[#allocation60_spill] sm:$0xff] %v6281_v34  ;;  %v6318_v34 = vmul.f32 %v6260_v15, %v1530_v35  ;;  %v1574_v4 = vadd.f32 %v1571_v59, %v1510_v62  ;;  %v6331_v15 = vmul.f32 %v6269_v23, %v1530_v35  ;;  %v9387_v59 = vrot.slane %v6334_v21, 2 }
 0x155   : > { %9808 = vst [vmem:[#allocation76_spill] sm:$0xff] %v6284_v26  ;;  %v9380_v31 = vrot.slane %v6312_v25, 1  ;;  %v1612_v62 = vadd.f32 %v9379_v14, %v1558_v61  ;;  %v9388_v35 = vrot.slane %v6337_v39, 2  ;;  %v6356_v61 = vmul.f32 %v4511_v6, %v6015_v56 }
 0x156   : > { %9809 = vst [vmem:[#allocation71_spill] sm:$0xff] %v6287_v19  ;;  %v9378_v20 = vrot.slane %v6318_v34, 1  ;;  %v9385_v46 = vrot.slane %v6331_v15, 2  ;;  %v9820_v19 = vld [vmem:[#allocation43_spill] sm:$0xff] }
 0x157   : > { %9810 = vst [vmem:[#allocation69_spill] sm:$0xff] %v6290_v40  ;;  %v1550_v40 = vadd.f32 %v1547_v47, %v1453_v32  ;;  %v1650_v47 = vadd.f32 %v9377_v17, %v1574_v4  ;;  %v9386_v32 = vrot.slane %v6328_v41, 2 }
 0x158   : > { %9812 = vst [vmem:[#allocation74_spill] sm:$0xff] %v6312_v25  ;;  %v1631_v22 = vadd.f32 %v9378_v20, %v1566_v12  ;;  %v1154_v25 = vmul.f32 %v4511_v6, %v9820_v19  ;;  %v6359_v12 = vmul.f32 %v4511_v6, %v6018_v36  ;;  %v1688_v17 = vadd.f32 %v9385_v46, %v1612_v62  ;;  %v9823_v62 = vld [vmem:[#allocation70_spill] sm:$0xff] }
 0x159   : > { %9813 = vst [vmem:[#allocation56_spill] sm:$0xff] %v6315_v16  ;;  %v1593_v3 = vadd.f32 %v9380_v31, %v1550_v40  ;;  %v6353_v40 = vmul.f32 %v4511_v6, %v5980_v9  ;;  %v1726_v14 = vadd.f32 %v9388_v35, %v1650_v47  ;;  %v6373_v16 = vmul.f32 %v4511_v6, %v6021_v2 }
 0x15a   : > { %9814 = vst [vmem:[#allocation57_spill] sm:$0xff] %v6318_v34  ;;  %v1707_v20 = vadd.f32 %v9387_v59, %v1631_v22  ;;  %v1162_v46 = vmul.f32 %v4511_v6, %v9823_v62  ;;  %v950_v59 = vpop.permute.xlu1 %949  ;;  %v9825_v47 = vrot.slane %v6012_v42, 1  ;;  %v9826_v34 = vrot.slane %v6055_v29, 1 }
 0x15b   : > { %9815 = vst [vmem:[#allocation58_spill] sm:$0xff] %v6321_v60  ;;  %v1669_v4 = vadd.f32 %v9386_v32, %v1593_v3  ;;  %v9390_v31 = vrot.slane %v6353_v40, 1  ;;  %v9389_v60 = vrot.slane %v6356_v61, 1  ;;  %v6377_v3 = vadd.f32 %v1739_v1, %v1688_v17  ;;  %v9824_v32 = vld [vmem:[#allocation72_spill] sm:$0xff] }
 0x15c   : > { %9816 = vst [vmem:[#allocation59_spill] sm:$0xff] %v6328_v41  ;;  %v1170_v22 = vmul.f32 %v4511_v6, %v9824_v32  ;;  %v9827_v1 = vrot.slane %v6058_v10, 1  ;;  %v9828_v17 = vrot.slane %v6359_v12, 1  ;;  %v6398_v42 = vmul.f32 %v4511_v6, %v6066_v7 }
 0x15d   : > { %9817 = vst [vmem:[#allocation75_spill] sm:$0xff] %v6331_v15  ;;  %v6375_v41 = vadd.f32 %v1731_v33, %v1669_v4  ;;  %v1187_v35 = vsel %vm413_vm2, %v9390_v31, %v9825_v47  ;;  %v1206_v33 = vsel %vm413_vm2, %v9389_v60, %v9826_v34  ;;  %v6404_v29 = vmul.f32 %v4511_v6, %v6072_v28 }
 0x15e   : > { %9818 = vst [vmem:[#allocation73_spill] sm:$0xff] %v6334_v21  ;;  %v1225_v4 = vsel %vm413_vm2, %v9828_v17, %v9827_v1  ;;  %v6407_v47 = vmul.f32 %v4511_v6, %v6075_v44  ;;  %v9829_v10 = vrot.slane %v6061_v24, 1  ;;  %v957_v1 = vsel %vm369_vm0, %v950_v59, 0.0 }
 0x15f   : > { %9819 = vst [vmem:[#allocation47_spill] sm:$0xff] %v6337_v39  ;;  %v1149_v17 = vadd.f32 %v1146_v13, %v5946_v50  ;;  %v1157_v60 = vadd.f32 %v1154_v25, %v5977_v0  ;;  %v9403_v31 = vrot.slane %v6398_v42, 2  ;;  %v9398_v39 = vrot.slane %v6404_v29, 2 }
 0x160   : > { %9821 = vst [vmem:[#allocation46_spill] sm:$0xff] %v6375_v41  ;;  %v6401_v41 = vmul.f32 %v4511_v6, %v6069_v53  ;;  %v9396_v6 = vrot.slane %v6407_v47, 2  ;;  %v1165_v24 = vadd.f32 %v1162_v46, %v5953_v55  ;;  %v1173_v21 = vadd.f32 %v1170_v22, %v5955_v5 }
 0x161   : > { %9822 = vst [vmem:[#allocation39_spill] sm:$0xff] %v6377_v3  ;;  %v9404_v3 = vrot.slane %v6373_v16, 1  ;;  %v1192_v26 = vadd.f32 %v1187_v35, %v1149_v17  ;;  %v9830_v59 = vrot.slane %v6088_v18, 2  ;;  %v9831_v0 = vrot.slane %v6091_v30, 2 }
 0x162   : > { %v9402_v15 = vrot.slane %v6401_v41, 2  ;;  %v9832_v25 = vrot.slane %v6094_v43, 2  ;;  %v9833_v5 = vrot.slane %v6097_v63, 2  ;;  %v1330_v22 = vmul.f32 %v6111_v37, %v957_v1 }
 0x163   : > { %v1244_v34 = vsel %vm413_vm2, %v9404_v3, %v9829_v10  ;;  %v1211_v10 = vadd.f32 %v1206_v33, %v1157_v60  ;;  %v1263_v50 = vsel %vm490_vm3, %v9403_v31, %v9830_v59  ;;  %v1230_v60 = vadd.f32 %v1225_v4, %v1165_v24  ;;  %v948_v31 = vpop.permute.xlu0 %947 }
 0x164   : > { %v1282_v13 = vsel %vm490_vm3, %v9402_v15, %v9831_v0  ;;  %v1301_v55 = vsel %vm490_vm3, %v9398_v39, %v9832_v25  ;;  %v1320_v18 = vsel %vm490_vm3, %v9396_v6, %v9833_v5  ;;  %v1249_v46 = vadd.f32 %v1244_v34, %v1173_v21 }
 0x165   : > { %v1268_v35 = vadd.f32 %v1263_v50, %v1192_v26  ;;  %v1287_v30 = vadd.f32 %v1282_v13, %v1211_v10  ;;  %v1338_v33 = vmul.f32 %v6122_v27, %v957_v1  ;;  %v1346_v43 = vmul.f32 %v6125_v11, %v957_v1 }
 0x166   : > { %v1354_v17 = vmul.f32 %v6128_v51, %v957_v1  ;;  %v1306_v59 = vadd.f32 %v1301_v55, %v1230_v60  ;;  %v1325_v0 = vadd.f32 %v1320_v18, %v1249_v46  ;;  %v6448_v63 = vmul.f32 %v6131_v57, %v957_v1 }
 0x167   : > { %v6451_v25 = vmul.f32 %v6146_v45, %v957_v1  ;;  %v1333_v4 = vadd.f32 %v1330_v22, %v1268_v35  ;;  %v1341_v21 = vadd.f32 %v1338_v33, %v1287_v30  ;;  %v6454_v26 = vmul.f32 %v6149_v48, %v957_v1  ;;  %v9836_v30 = vld [vmem:[#allocation48_spill] sm:$0xff] }
 0x168   : > { %v6457_v34 = vmul.f32 %v6152_v54, %v957_v1  ;;  %v1349_v24 = vadd.f32 %v1346_v43, %v1306_v59  ;;  %v1357_v10 = vadd.f32 %v1354_v17, %v1325_v0  ;;  %v9397_v50 = vrot.slane %v6448_v63, 1  ;;  %v9838_v43 = vld [vmem:[#allocation30_spill] sm:$0xff]  ;;  %v9840_v0 = vld [vmem:[#allocation61_spill] sm:$0xff] }
 0x169   : > { %v9399_v13 = vrot.slane %v6451_v25, 1  ;;  %v9400_v55 = vrot.slane %v6454_v26, 1  ;;  %v6464_v18 = vmul.f32 %v6155_v52, %v957_v1  ;;  %v6467_v60 = vmul.f32 %v6160_v8, %v957_v1 }
 0x16a   : > { %v9401_v5 = vrot.slane %v6457_v34, 1  ;;  %v6470_v46 = vadd.f32 %v6298_v49, %v1707_v20  ;;  %v6473_v35 = vadd.f32 %v6302_v38, %v1726_v14  ;;  %v9837_v22 = vrot.slane %v9836_v30, 1  ;;  %v9842_v38 = vld [vmem:[#allocation62_spill] sm:$0xff]  ;;  %v9844_v30 = vld [vmem:[#allocation52_spill] sm:$0xff] }
 0x16b   : > { %v9839_v17 = vrot.slane %v9838_v43, 1  ;;  %v9841_v6 = vrot.slane %v9840_v0, 1  ;;  %v9843_v20 = vrot.slane %v9842_v38, 1  ;;  %v9845_v43 = vld [vmem:[#allocation51_spill] sm:$0xff] }
 0x16c   : > { %9834 = vst [vmem:[#allocation40_spill] sm:$0xff] %v6470_v46  ;;  %v1371_v33 = vsel %vm413_vm2, %v9397_v50, %v9837_v22  ;;  %v6496_v22 = vmul.f32 %v9844_v30, %v957_v1  ;;  %v6499_v50 = vmul.f32 %v9845_v43, %v957_v1 }
 0x16d   : > { %9835 = vst [vmem:[#allocation38_spill] sm:$0xff] %v6473_v35  ;;  %v1390_v59 = vsel %vm413_vm2, %v9399_v13, %v9839_v17  ;;  %v1409_v49 = vsel %vm413_vm2, %v9400_v55, %v9841_v6  ;;  %v1428_v14 = vsel %vm413_vm2, %v9401_v5, %v9843_v20  ;;  %v6501_v39 = vadd.f32 %v1371_v33, %v1333_v4  ;;  %v4512_v55 = vld [vmem:[%s9780_s6 + $0x18] sm:$0xff]  ;;  %v9846_v20 = vld [vmem:[#allocation42_spill] sm:$0xff] }
 0x16e   : > { %v6503_v17 = vadd.f32 %v1390_v59, %v1341_v21  ;;  %v6505_v0 = vadd.f32 %v1409_v49, %v1349_v24  ;;  %v6507_v13 = vadd.f32 %v1428_v14, %v1357_v10  ;;  %v1145_v5 = vmul.f32 %v4512_v55, %v9846_v20 }
 0x16f   : > { %v1153_v15 = vmul.f32 %v4512_v55, %v9820_v19  ;;  %v1161_v1 = vmul.f32 %v4512_v55, %v9823_v62  ;;  %v1169_v4 = vmul.f32 %v4512_v55, %v9824_v32  ;;  %v1177_v21 = vmul.f32 %v4512_v55, %v5980_v9 }
 0x170   : > { %v1196_v24 = vmul.f32 %v4512_v55, %v6015_v56  ;;  %v1215_v10 = vmul.f32 %v4512_v55, %v6018_v36  ;;  %v1234_v33 = vmul.f32 %v4512_v55, %v6021_v2  ;;  %v1253_v59 = vmul.f32 %v4512_v55, %v6066_v7 }
 0x171   : > { %v1272_v49 = vmul.f32 %v4512_v55, %v6069_v53  ;;  %v1183_v14 = vrot.slane %v1177_v21, 1  ;;  %v1291_v19 = vmul.f32 %v4512_v55, %v6072_v28  ;;  %v1310_v62 = vmul.f32 %v4512_v55, %v6075_v44 }
 0x172   : > { %v1202_v20 = vrot.slane %v1196_v24, 1  ;;  %v1221_v38 = vrot.slane %v1215_v10, 1  ;;  %v1240_v32 = vrot.slane %v1234_v33, 1  ;;  %v1259_v6 = vrot.slane %v1253_v59, 2 }
 0x173   : > { %v1278_v9 = vrot.slane %v1272_v49, 2  ;;  %v1482_v56 = vrot.slane %v6496_v22, 2  ;;  %v9847_v36 = vrot.slane %v6353_v40, 1  ;;  %v1297_v7 = vrot.slane %v1291_v19, 2  ;;  %v9856_v19 = vld [vmem:[#allocation68_spill] sm:$0xff] }
 0x174   : > { %v1316_v3 = vrot.slane %v1310_v62, 2  ;;  %v9848_v53 = vrot.slane %v6356_v61, 1  ;;  %v9849_v28 = vrot.slane %v6359_v12, 1  ;;  %v9850_v55 = vrot.slane %v6373_v16, 1  ;;  %v9857_v62 = vld [vmem:[#allocation49_spill] sm:$0xff] }
 0x175   : > { %v1185_v2 = vsel %vm413_vm2, %v1183_v14, %v9847_v36  ;;  %v9851_v10 = vrot.slane %v6398_v42, 2  ;;  %v9852_v33 = vrot.slane %v6401_v41, 2  ;;  %v9853_v61 = vrot.slane %v6404_v29, 2  ;;  %v9854_v14 = vld [vmem:[#allocation67_spill] sm:$0xff] }
 0x176   : > { %v1204_v21 = vsel %vm413_vm2, %v1202_v20, %v9848_v53  ;;  %v1223_v44 = vsel %vm413_vm2, %v1221_v38, %v9849_v28  ;;  %v1242_v24 = vsel %vm413_vm2, %v1240_v32, %v9850_v55  ;;  %v956_v12 = vsel %vm369_vm0, %v948_v31, 0.0  ;;  %v9858_v32 = vld [vmem:[#allocation50_spill] sm:$0xff] }
 0x177   : > { %v1261_v40 = vsel %vm490_vm3, %v1259_v6, %v9851_v10  ;;  %v1280_v59 = vsel %vm490_vm3, %v1278_v9, %v9852_v33  ;;  %v1299_v49 = vsel %vm490_vm3, %v1297_v7, %v9853_v61  ;;  %v1148_v38 = vadd.f32 %v1145_v5, %v9854_v14 }
 0x178   : > { %v9855_v16 = vrot.slane %v6407_v47, 2  ;;  %v1156_v42 = vadd.f32 %v1153_v15, %v9856_v19  ;;  %v1164_v6 = vadd.f32 %v1161_v1, %v9857_v62  ;;  %v1172_v41 = vadd.f32 %v1169_v4, %v9858_v32 }
 0x179   : > { %v1191_v36 = vadd.f32 %v1185_v2, %v1148_v38  ;;  %v1329_v9 = vmul.f32 %v6111_v37, %v956_v12  ;;  %v1345_v29 = vmul.f32 %v6125_v11, %v956_v12  ;;  %v1353_v7 = vmul.f32 %v6128_v51, %v956_v12 }
 0x17a   : > { %v1318_v20 = vsel %vm490_vm3, %v1316_v3, %v9855_v16  ;;  %v1210_v31 = vadd.f32 %v1204_v21, %v1156_v42  ;;  %v1229_v53 = vadd.f32 %v1223_v44, %v1164_v6  ;;  %v1248_v5 = vadd.f32 %v1242_v24, %v1172_v41  ;;  %v9863_v42 = vld [vmem:[#allocation63_spill] sm:$0xff]  ;;  %v1522_v6 = vpop.permute.xlu1 %1521  ;;  %v9866_v41 = vld [vmem:[#allocation64_spill] sm:$0xff] }
 0x17b   : > { %v1361_v47 = vmul.f32 %v6131_v57, %v956_v12  ;;  %v1267_v28 = vadd.f32 %v1261_v40, %v1191_v36  ;;  %v1380_v3 = vmul.f32 %v6146_v45, %v956_v12  ;;  %v1399_v15 = vmul.f32 %v6149_v48, %v956_v12 }
 0x17c   : > { %v1418_v1 = vmul.f32 %v6152_v54, %v956_v12  ;;  %v1286_v4 = vadd.f32 %v1280_v59, %v1210_v31  ;;  %v1305_v2 = vadd.f32 %v1299_v49, %v1229_v53  ;;  %v1324_v55 = vadd.f32 %v1318_v20, %v1248_v5 }
 0x17d   : > { %v1367_v37 = vrot.slane %v1361_v47, 1  ;;  %v1337_v11 = vmul.f32 %v6122_v27, %v956_v12  ;;  %v1386_v10 = vrot.slane %v1380_v3, 1  ;;  %v1405_v51 = vrot.slane %v1399_v15, 1 }
 0x17e   : > { %v1424_v21 = vrot.slane %v1418_v1, 1  ;;  %v1501_v44 = vrot.slane %v6499_v50, 2  ;;  %v1332_v24 = vadd.f32 %v1329_v9, %v1267_v28  ;;  %v1348_v57 = vadd.f32 %v1345_v29, %v1305_v2  ;;  %v9869_v29 = vld [vmem:[#allocation65_spill] sm:$0xff] }
 0x17f   : > { %v1356_v40 = vadd.f32 %v1353_v7, %v1324_v55  ;;  %v1340_v33 = vadd.f32 %v1337_v11, %v1286_v4  ;;  %v9859_v45 = vrot.slane %v6448_v63, 1  ;;  %v9860_v54 = vrot.slane %v6454_v26, 1  ;;  %v9873_v4 = vld [vmem:[#allocation29_spill] sm:$0xff]  ;;  %v9874_v55 = vld [vmem:[#allocation33_spill] sm:$0xff] }
 0x180   : > { %v9861_v61 = vrot.slane %v6457_v34, 1  ;;  %v9862_v49 = vrot.slane %v6451_v25, 1  ;;  %v1437_v63 = vmul.f32 %v6155_v52, %v956_v12  ;;  %v1456_v20 = vmul.f32 %v6160_v8, %v956_v12  ;;  %v9875_v11 = vld [vmem:[#allocation34_spill] sm:$0xff] }
 0x181   : > { %v1369_v48 = vsel %vm413_vm2, %v1367_v37, %v9859_v45  ;;  %v1407_v59 = vsel %vm413_vm2, %v1405_v51, %v9860_v54  ;;  %v1475_v26 = vmul.f32 %v9844_v30, %v956_v12  ;;  %v1494_v19 = vmul.f32 %v9845_v43, %v956_v12  ;;  %v9871_v43 = vld [vmem:[#allocation66_spill] sm:$0xff]  ;;  %v9876_v51 = vld [vmem:[#allocation35_spill] sm:$0xff] }
 0x182   : > { %v1426_v27 = vsel %vm413_vm2, %v1424_v21, %v9861_v61  ;;  %v1388_v14 = vsel %vm413_vm2, %v1386_v10, %v9862_v49  ;;  %v6575_v38 = vadd.f32 %v1407_v59, %v1348_v57  ;;  %v9864_v34 = vrot.slane %v9863_v42, 2  ;;  %v9877_v57 = vld [vmem:[#allocation36_spill] sm:$0xff] }
 0x183   : > { %v6577_v16 = vadd.f32 %v1426_v27, %v1356_v40  ;;  %v9865_v62 = vrot.slane %v6464_v18, 2  ;;  %v1443_v32 = vrot.slane %v1437_v63, 2  ;;  %v9867_v36 = vrot.slane %v9866_v41, 2 }
 0x184   : > { %v9868_v9 = vrot.slane %v6467_v60, 2  ;;  %v9870_v8 = vrot.slane %v9869_v29, 2  ;;  %v9872_v12 = vrot.slane %v9871_v43, 2  ;;  %v1462_v31 = vrot.slane %v1456_v20, 2  ;;  %v9885_v29 = vld [vmem:[#allocation56_spill] sm:$0xff]  ;;  %v9887_v43 = vld [vmem:[#allocation57_spill] sm:$0xff] }
 0x185   : > { %v1447_v25 = vsel %vm490_vm3, %v9865_v62, %v9864_v34  ;;  %v1481_v53 = vrot.slane %v1475_v26, 2  ;;  %v1500_v5 = vrot.slane %v1494_v19, 2  ;;  %v1529_v1 = vsel %vm356_vm1, 0.0, %v1522_v6  ;;  %v9881_v62 = vld [vmem:[#allocation76_spill] sm:$0xff]  ;;  %v9882_v6 = vld [vmem:[#allocation71_spill] sm:$0xff] }
 0x186   : > { %v1466_v52 = vsel %vm490_vm3, %v9868_v9, %v9867_v36  ;;  %v1485_v30 = vsel %vm490_vm3, %v1482_v56, %v9870_v8  ;;  %v1504_v7 = vsel %vm490_vm3, %v1501_v44, %v9872_v12  ;;  %v1452_v47 = vadd.f32 %v1447_v25, %v6501_v39  ;;  %v9878_v39 = vld [vmem:[#allocation37_spill] sm:$0xff]  ;;  %v9883_v36 = vld [vmem:[#allocation74_spill] sm:$0xff] }
 0x187   : > { %v1471_v28 = vadd.f32 %v1466_v52, %v6503_v17  ;;  %v1490_v3 = vadd.f32 %v1485_v30, %v6505_v0  ;;  %v1509_v15 = vadd.f32 %v1504_v7, %v6507_v13  ;;  %v1546_v2 = vmul.f32 %v9873_v4, %v1529_v1  ;;  %v9879_v17 = vld [vmem:[#allocation45_spill] sm:$0xff]  ;;  %v9880_v13 = vld [vmem:[#allocation31_spill] sm:$0xff] }
 0x188   : > { %v1554_v37 = vmul.f32 %v9874_v55, %v1529_v1  ;;  %v1562_v10 = vmul.f32 %v9875_v11, %v1529_v1  ;;  %v1570_v21 = vmul.f32 %v9876_v51, %v1529_v1  ;;  %v6613_v40 = vmul.f32 %v9877_v57, %v1529_v1 }
 0x189   : > { %v6616_v45 = vmul.f32 %v9878_v39, %v1529_v1  ;;  %v6619_v0 = vmul.f32 %v9879_v17, %v1529_v1  ;;  %v6622_v54 = vmul.f32 %v9880_v13, %v1529_v1  ;;  %v1549_v59 = vadd.f32 %v1546_v2, %v1452_v47  ;;  %v9889_v47 = vld [vmem:[#allocation58_spill] sm:$0xff] }
 0x18a   : > { %v1557_v61 = vadd.f32 %v1554_v37, %v1471_v28  ;;  %v1565_v27 = vadd.f32 %v1562_v10, %v1490_v3  ;;  %v1573_v49 = vadd.f32 %v1570_v21, %v1509_v15  ;;  %v1584_v63 = vrot.slane %v6613_v40, 1 }
 0x18b   : > { %v1603_v20 = vrot.slane %v6616_v45, 1  ;;  %v1622_v26 = vrot.slane %v6619_v0, 1  ;;  %v1641_v19 = vrot.slane %v6622_v54, 1  ;;  %v6629_v42 = vmul.f32 %v6266_v58, %v1529_v1 }
 0x18c   : > { %v6632_v34 = vmul.f32 %v6269_v23, %v1529_v1  ;;  %v6635_v25 = vmul.f32 %v9881_v62, %v1529_v1  ;;  %v6638_v41 = vmul.f32 %v9882_v6, %v1529_v1  ;;  %v9884_v9 = vrot.slane %v9883_v36, 1 }
 0x18d   : > { %v9886_v8 = vrot.slane %v9885_v29, 1  ;;  %v9888_v12 = vrot.slane %v9887_v43, 1  ;;  %v9890_v28 = vrot.slane %v9889_v47, 1  ;;  %v1375_v15 = vadd.f32 %v1369_v48, %v1332_v24 }
 0x18e   : > { %v1587_v52 = vsel %vm413_vm2, %v1584_v63, %v9884_v9  ;;  %v1394_v1 = vadd.f32 %v1388_v14, %v1340_v33  ;;  %v1660_v10 = vrot.slane %v6629_v42, 2  ;;  %v1679_v21 = vrot.slane %v6632_v34, 2  ;;  %v9891_v33 = vld [vmem:[#allocation73_spill] sm:$0xff] }
 0x18f   : > { %v1606_v30 = vsel %vm413_vm2, %v1603_v20, %v9886_v8  ;;  %v1625_v7 = vsel %vm413_vm2, %v1622_v26, %v9888_v12  ;;  %v1644_v3 = vsel %vm413_vm2, %v1641_v19, %v9890_v28  ;;  %v1698_v36 = vrot.slane %v6635_v25, 2  ;;  %v9899_v12 = vld [vmem:[#allocation75_spill] sm:$0xff] }
 0x190   : > { %v1630_v2 = vadd.f32 %v1625_v7, %v1565_v27  ;;  %v1649_v37 = vadd.f32 %v1644_v3, %v1573_v49  ;;  %v1717_v9 = vrot.slane %v6638_v41, 2  ;;  %v1592_v29 = vadd.f32 %v1587_v52, %v1549_v59  ;;  %v9893_v27 = vld [vmem:[#allocation47_spill] sm:$0xff] }
 0x191   : > { %v1611_v8 = vadd.f32 %v1606_v30, %v1557_v61  ;;  %v1483_v43 = vsel %vm490_vm3, %v1481_v53, %v1482_v56  ;;  %v1502_v24 = vsel %vm490_vm3, %v1500_v5, %v1501_v44  ;;  %v9892_v48 = vrot.slane %v9891_v33, 2  ;;  %v1520_v53 = vpop.permute.xlu0 %1519  ;;  %v1536_v5 = vpop.permute.xlu2 %1535  ;;  %v9897_v61 = vld [vmem:[#allocation59_spill] sm:$0xff] }
 0x192   : > { %v9894_v49 = vrot.slane %v9893_v27, 2  ;;  %v9895_v22 = vrot.slane %v6464_v18, 2  ;;  %v9896_v50 = vrot.slane %v6467_v60, 2  ;;  %v9898_v52 = vrot.slane %v9897_v61, 2 }
 0x193   : > { %v1701_v14 = vsel %vm490_vm3, %v1698_v36, %v9892_v48  ;;  %v9900_v7 = vrot.slane %v9899_v12, 2  ;;  %v1489_v28 = vadd.f32 %v1483_v43, %v6575_v38  ;;  %v1508_v3 = vadd.f32 %v1502_v24, %v6577_v16  ;;  %v6774_v12 = vld [vmem:[%s9780_s6 + $0x38] sm:$0xff] }
 0x194   : > { %v1720_v59 = vsel %vm490_vm3, %v1717_v9, %v9894_v49  ;;  %v1445_v56 = vsel %vm490_vm3, %v1443_v32, %v9895_v22  ;;  %v1464_v44 = vsel %vm490_vm3, %v1462_v31, %v9896_v50  ;;  %v1663_v30 = vsel %vm490_vm3, %v1660_v10, %v9898_v52 }
 0x195   : > { %v1682_v18 = vsel %vm490_vm3, %v1679_v21, %v9900_v7  ;;  %v6698_v32 = vadd.f32 %v1701_v14, %v1630_v2  ;;  %v6700_v60 = vadd.f32 %v1720_v59, %v1649_v37  ;;  %v1451_v47 = vadd.f32 %v1445_v56, %v1375_v15  ;;  %v9903_v7 = vld [vmem:[#allocation55_spill] sm:$0xff] }
 0x196   : > { %v1470_v31 = vadd.f32 %v1464_v44, %v1394_v1  ;;  %v6706_v33 = vadd.f32 %v1663_v30, %v1592_v29  ;;  %v6708_v48 = vadd.f32 %v1682_v18, %v1611_v8  ;;  %v1528_v27 = vsel %vm356_vm1, 0.0, %v1520_v53 }
 0x197   : > { %v6712_v49 = vstv %s6640_s20  ;;  %v1545_v2 = vmul.f32 %v9873_v4, %v1528_v27  ;;  %v1553_v15 = vmul.f32 %v9874_v55, %v1528_v27  ;;  %v1561_v38 = vmul.f32 %v9875_v11, %v1528_v27  ;;  %s7218_s20 = sld [smem:[#allocation7 + $0x28]] }
 0x198   : > { %v1569_v16 = vmul.f32 %v9876_v51, %v1528_v27  ;;  %v1577_v1 = vmul.f32 %v9877_v57, %v1528_v27  ;;  %v1596_v37 = vmul.f32 %v9878_v39, %v1528_v27  ;;  %v1615_v29 = vmul.f32 %v9879_v17, %v1528_v27 }
 0x199   : > { %v1634_v8 = vmul.f32 %v9880_v13, %v1528_v27  ;;  %v1548_v43 = vadd.f32 %v1545_v2, %v1451_v47  ;;  %v1556_v24 = vadd.f32 %v1553_v15, %v1470_v31  ;;  %v1564_v14 = vadd.f32 %v1561_v38, %v1489_v28  ;;  %v9908_v31 = vld [vmem:[#allocation53_spill] sm:$0xff] }
 0x19a   : > { %v1572_v4 = vadd.f32 %v1569_v16, %v1508_v3  ;;  %v1583_v59 = vrot.slane %v1577_v1, 1  ;;  %v1602_v55 = vrot.slane %v1596_v37, 1  ;;  %v1621_v22 = vrot.slane %v1615_v29, 1  ;;  %v9909_v2 = vld [vmem:[#allocation69_spill] sm:$0xff] }
 0x19b   : > { %v1640_v11 = vrot.slane %v1634_v8, 1  ;;  %v1653_v51 = vmul.f32 %v6266_v58, %v1528_v27  ;;  %v1672_v57 = vmul.f32 %v6269_v23, %v1528_v27  ;;  %v1691_v39 = vmul.f32 %v9881_v62, %v1528_v27 }
 0x19c   : > { %v1710_v17 = vmul.f32 %v9882_v6, %v1528_v27  ;;  %v1585_v13 = vsel %vm413_vm2, %v1583_v59, %v1584_v63  ;;  %v1604_v56 = vsel %vm413_vm2, %v1602_v55, %v1603_v20  ;;  %v1623_v23 = vsel %vm413_vm2, %v1621_v22, %v1622_v26  ;;  %v2108_v6 = vpop.permute.xlu2 %2107  ;;  %v9913_v55 = vld [vmem:[#allocation60_spill] sm:$0xff] }
 0x19d   : > { %v1642_v58 = vsel %vm413_vm2, %v1640_v11, %v1641_v19  ;;  %v1591_v40 = vadd.f32 %v1585_v13, %v1548_v43  ;;  %v1610_v62 = vadd.f32 %v1604_v56, %v1556_v24  ;;  %v1629_v63 = vadd.f32 %v1623_v23, %v1564_v14  ;;  %v9912_v43 = vld [vmem:[#allocation54_spill] sm:$0xff] }
 0x19e   : > { %v1648_v45 = vadd.f32 %v1642_v58, %v1572_v4  ;;  %v1659_v20 = vrot.slane %v1653_v51, 2  ;;  %v1678_v0 = vrot.slane %v1672_v57, 2  ;;  %v1697_v50 = vrot.slane %v1691_v39, 2 }
 0x19f   : > { %v1716_v44 = vrot.slane %v1710_v17, 2  ;;  %v6753_v54 = vstv %s6704_s27  ;;  %v6756_v26 = vstv %s6714_s3  ;;  %v6759_v19 = vstv %s6720_s4  ;;  %s7238_s27 = sld [smem:[#allocation7 + $0x7]] }
 0x1a0   : > { %v6762_v53 = vsel %vm369_vm0, %v1536_v5, 0.0  ;;  %v1699_v61 = vsel %vm490_vm3, %v1697_v50, %v1698_v36  ;;  %v6771_v30 = vsel %vm356_vm1, 0.0, %v2108_v6  ;;  %v6778_v18 = vmul.f32 %v6774_v12, %v9903_v7  ;;  %s7246_s3 = sld [smem:[#allocation7 + $0x2b]] }
 0x1a1   : > { %9901 = vst [vmem:[#allocation41_spill] sm:$0xff] %v6762_v53  ;;  %v1718_v52 = vsel %vm490_vm3, %v1716_v44, %v1717_v9  ;;  %v1661_v25 = vsel %vm490_vm3, %v1659_v20, %v1660_v10  ;;  %v1680_v41 = vsel %vm490_vm3, %v1678_v0, %v1679_v21  ;;  %v6786_v36 = vadd.f32 %v1699_v61, %v1629_v63  ;;  %s7340_s4 = sld [smem:[#allocation2 + $0x42]] }
 0x1a2   : > { %9902 = vst [vmem:[#allocation44_spill] sm:$0xff] %v6771_v30  ;;  %v6788_v9 = vadd.f32 %v1718_v52, %v1648_v45  ;;  %v6792_v5 = vadd.f32 %v1661_v25, %v1591_v40  ;;  %v6794_v47 = vadd.f32 %v1680_v41, %v1610_v62  ;;  %v6798_v42 = vmul.f32 %v6712_v49, %v6762_v53 }
 0x1a3   : > { %v6802_v34 = vmul.f32 %v6753_v54, %v6762_v53  ;;  %v6808_v10 = vmul.f32 %v6756_v26, %v6762_v53  ;;  %v6812_v21 = vmul.f32 %v6759_v19, %v6762_v53  ;;  %v6816_v28 = vmul.f32 %v6774_v12, %v9908_v31 }
 0x1a4   : > { %9904 = vst [vmem:[#allocation43_spill] sm:$0xff] %v6798_v42  ;;  %v6819_v3 = vstv %s6726_s0  ;;  %v6832_v38 = vstv %s6732_s1  ;;  %v6835_v16 = vstv %s6746_s25  ;;  %v1746_v24 = vmul.f32 %v6774_v12, %v9912_v43  ;;  %s7369_s0 = sld [smem:[#allocation2 + $0x45]] }
 0x1a5   : > { %9905 = vst [vmem:[#allocation70_spill] sm:$0xff] %v6802_v34  ;;  %v6825_v27 = vmul.f32 %v6774_v12, %v6819_v3  ;;  %v6829_v15 = vmul.f32 %v9909_v2, %v6819_v3  ;;  %v6841_v1 = vmul.f32 %v6774_v12, %v6832_v38  ;;  %v6845_v37 = vmul.f32 %v9909_v2, %v6832_v38  ;;  %s7378_s1 = sld [smem:[#allocation2 + $0x40]] }
 0x1a6   : > { %9906 = vst [vmem:[#allocation72_spill] sm:$0xff] %v6808_v10  ;;  %v6849_v29 = vmul.f32 %v6774_v12, %v6835_v16  ;;  %v6853_v8 = vmul.f32 %v9909_v2, %v6835_v16  ;;  %v6861_v4 = vstv %s6748_s29  ;;  %v6864_v59 = vstv %s6750_s5  ;;  %s7392_s25 = sld [smem:[#allocation2 + $0x43]]  ;;  %s9983_s5 = smov 1  }
 0x1a7   : > { %9907 = vst [vmem:[#allocation48_spill] sm:$0xff] %v6812_v21  ;;  %v9408_v14 = vrot.slane %v6825_v27, 1  ;;  %v1754_v22 = vmul.f32 %v6774_v12, %v9913_v55  ;;  %v9406_v11 = vrot.slane %v6829_v15, 1  ;;  %v9407_v51 = vrot.slane %v6841_v1, 1  ;;  %s7398_s29 = sld [smem:[#allocation2 + $0x46]] }
 0x1a8   : > { %9910 = vst [vmem:[#allocation30_spill] sm:$0xff] %v6845_v37  ;;  %v9405_v57 = vrot.slane %v6845_v37, 1  ;;  %v9410_v39 = vrot.slane %v6849_v29, 1  ;;  %v6878_v17 = vmul.f32 %v6774_v12, %v6861_v4  ;;  %v6882_v13 = vmul.f32 %v9909_v2, %v6861_v4 }
 0x1a9   : > { %9911 = vst [vmem:[#allocation61_spill] sm:$0xff] %v6853_v8  ;;  %v6886_v56 = vmul.f32 %v6774_v12, %v6864_v59  ;;  %v1771_v23 = vsel %vm413_vm2, %v9408_v14, %v9406_v11  ;;  %v9409_v58 = vrot.slane %v6853_v8, 1  ;;  %v6898_v40 = vmul.f32 %v9909_v2, %v6864_v59 }
 0x1aa   : > { %9914 = vst [vmem:[#allocation62_spill] sm:$0xff] %v6882_v13  ;;  %v6901_v62 = vstv %s6790_s21  ;;  %v1790_v63 = vsel %vm413_vm2, %v9407_v51, %v9405_v57  ;;  %v9412_v45 = vrot.slane %v6878_v17, 1  ;;  %v9411_v0 = vrot.slane %v6882_v13, 1  ;;  %s7442_s21 = sld [smem:[#allocation2 + $0x41]] }
 0x1ab   : > { %9915 = vst [vmem:[#allocation52_spill] sm:$0xff] %v6898_v40  ;;  %v9415_v6 = vrot.slane %v6886_v56, 2  ;;  %v6914_v20 = vmul.f32 %v6774_v12, %v6901_v62  ;;  %v6921_v50 = vmul.f32 %v9909_v2, %v6901_v62  ;;  %v6924_v44 = vstv %s6804_s22  ;;  %s7451_s22 = sld [smem:[#allocation2 + $0x44]] }
 0x1ac   : > { %v6927_v61 = vstv %s6821_s23  ;;  %v9414_v52 = vrot.slane %v6898_v40, 2  ;;  %v6935_v41 = vmul.f32 %v6774_v12, %v6924_v44  ;;  %v6939_v57 = vmul.f32 %v9909_v2, %v6924_v44  ;;  %s7456_s23 = sld [smem:[#allocation2 + $0x47]] }
 0x1ad   : > { %9916 = vst [vmem:[#allocation51_spill] sm:$0xff] %v6921_v50  ;;  %v1809_v11 = vsel %vm413_vm2, %v9410_v39, %v9409_v58  ;;  %v1828_v51 = vsel %vm413_vm2, %v9412_v45, %v9411_v0  ;;  %v6953_v14 = vmul.f32 %v6774_v12, %v6927_v61  ;;  %v6957_v25 = vmul.f32 %v9909_v2, %v6927_v61  ;;  %v1534_v12 = vpop.permute.xlu1 %1533 }
 0x1ae   : > { %9917 = vst [vmem:[#allocation42_spill] sm:$0xff] %v6939_v57  ;;  %v1847_v58 = vsel %vm490_vm3, %v9415_v6, %v9414_v52  ;;  %v9419_v39 = vrot.slane %v6921_v50, 2  ;;  %v9421_v0 = vrot.slane %v6935_v41, 2  ;;  %v9420_v45 = vrot.slane %v6939_v57, 2 }
 0x1af   : > { %9918 = vst [vmem:[#allocation67_spill] sm:$0xff] %v6957_v25  ;;  %v6970_v13 = vstv %s6837_s24  ;;  %v6973_v35 = vstv %s6855_s26  ;;  %v9919_v52 = vrot.slane %v6914_v20, 2  ;;  %v6986_v10 = vstv %s6866_s7  ;;  %s7468_s24 = sld [smem:[#allocation7 + $0xd]]  ;;  %s9988_s7 = smov 127  }
 0x1b0   : > { %v1885_v21 = vsel %vm490_vm3, %v9421_v0, %v9420_v45  ;;  %9920 = vst [vmem:[#allocation68_spill] sm:$0xff] %v6986_v10  ;;  %v6989_v2 = vstv %s6873_s9  ;;  %v9922_v8 = vrot.slane %v6957_v25, 2  ;;  %v9923_v46 = vrot.slane %v6953_v14, 2  ;;  %s7477_s26 = sld [smem:[#allocation7 + $0x31]] }
 0x1b1   : > { %v1866_v6 = vsel %vm490_vm3, %v9919_v52, %v9419_v39  ;;  %9921 = vst [vmem:[#allocation49_spill] sm:$0xff] %v6989_v2  ;;  %v6997_v50 = vstv %s6888_s10  ;;  %v7000_v37 = vstv %s6903_s18  ;;  %v1541_v52 = vsel %vm369_vm0, %v1534_v12, 0.0  ;;  %s7488_s9 = sld [smem:[#allocation7 + $0x10]] }
 0x1b2   : > { %v1904_v34 = vsel %vm490_vm3, %v9923_v46, %v9922_v8  ;;  %v1733_v39 = vadd.f32 %v6778_v18, %v6706_v33  ;;  %v1741_v45 = vadd.f32 %v6816_v28, %v6708_v48  ;;  %v1749_v0 = vadd.f32 %v1746_v24, %v6698_v32  ;;  %s7495_s10 = sld [smem:[#allocation7 + $0x34]] }
 0x1b3   : > { %v1757_v25 = vadd.f32 %v1754_v22, %v6700_v60  ;;  %v7010_v57 = vstv %s6916_s12  ;;  %v7013_v42 = vstv %s6929_s19  ;;  %v1930_v46 = vmul.f32 %v6756_v26, %v1541_v52  ;;  %s7581_s18 = sld [smem:[#allocation2 + $0x63]] }
 0x1b4   : > { %9924 = vst [vmem:[#allocation50_spill] sm:$0xff] %v7010_v57  ;;  %v1938_v8 = vmul.f32 %v6759_v19, %v1541_v52  ;;  %v1776_v30 = vadd.f32 %v1771_v23, %v1733_v39  ;;  %v1795_v12 = vadd.f32 %v1790_v63, %v1741_v45  ;;  %v1814_v40 = vadd.f32 %v1809_v11, %v1749_v0  ;;  %s7591_s12 = sld [smem:[#allocation2 + $0x66]] }
 0x1b5   : > { %9925 = vst [vmem:[#allocation63_spill] sm:$0xff] %v7013_v42  ;;  %v1833_v53 = vadd.f32 %v1828_v51, %v1757_v25  ;;  %v7018_v33 = vmul.f32 %v6970_v13, %v1541_v52  ;;  %v7021_v48 = vmul.f32 %v6973_v35, %v1541_v52  ;;  %v7024_v32 = vmul.f32 %v6986_v10, %v1541_v52  ;;  %v4514_v25 = vld [vmem:[%s9780_s6 + $0x30] sm:$0xff]  ;;  %s7596_s19 = sld [smem:[#allocation2 + $0x69]] }
 0x1b6   : > { %v7027_v60 = vmul.f32 %v6989_v2, %v1541_v52  ;;  %v1852_v18 = vadd.f32 %v1847_v58, %v1776_v30  ;;  %v1871_v28 = vadd.f32 %v1866_v6, %v1795_v12  ;;  %v1890_v24 = vadd.f32 %v1885_v21, %v1814_v40  ;;  %v1532_v30 = vpop.permute.xlu0 %1531 }
 0x1b7   : > { %9926 = vst [vmem:[#allocation64_spill] sm:$0xff] %v7024_v32  ;;  %v1909_v22 = vadd.f32 %v1904_v34, %v1833_v53  ;;  %v1914_v11 = vmul.f32 %v6712_v49, %v1541_v52  ;;  %v1922_v51 = vmul.f32 %v6753_v54, %v1541_v52  ;;  %v7044_v53 = vmul.f32 %v6997_v50, %v1541_v52 }
 0x1b8   : > { %9927 = vst [vmem:[#allocation65_spill] sm:$0xff] %v7027_v60  ;;  %v7033_v63 = vadd.f32 %v1930_v46, %v1890_v24  ;;  %v7047_v34 = vmul.f32 %v7000_v37, %v1541_v52  ;;  %v7050_v40 = vmul.f32 %v7010_v57, %v1541_v52  ;;  %v7053_v6 = vmul.f32 %v7013_v42, %v1541_v52 }
 0x1b9   : > { %v7035_v45 = vadd.f32 %v1938_v8, %v1909_v22  ;;  %v7039_v58 = vadd.f32 %v1914_v11, %v1852_v18  ;;  %v7041_v21 = vadd.f32 %v1922_v51, %v1871_v28  ;;  %v1729_v46 = vmul.f32 %v4514_v25, %v9903_v7 }
 0x1ba   : > { %9928 = vst [vmem:[#allocation66_spill] sm:$0xff] %v7033_v63  ;;  %v1737_v8 = vmul.f32 %v4514_v25, %v9908_v31  ;;  %v1745_v28 = vmul.f32 %v4514_v25, %v9912_v43  ;;  %v1753_v24 = vmul.f32 %v4514_v25, %v9913_v55  ;;  %v1761_v22 = vmul.f32 %v4514_v25, %v6819_v3 }
 0x1bb   : > { %9929 = vst [vmem:[#allocation29_spill] sm:$0xff] %v7035_v45  ;;  %v1780_v11 = vmul.f32 %v4514_v25, %v6832_v38  ;;  %v1799_v52 = vmul.f32 %v4514_v25, %v6835_v16  ;;  %v1818_v51 = vmul.f32 %v4514_v25, %v6861_v4  ;;  %v1837_v7 = vmul.f32 %v4514_v25, %v6864_v59 }
 0x1bc   : > { %9930 = vst [vmem:[#allocation33_spill] sm:$0xff] %v7041_v21  ;;  %v1856_v31 = vmul.f32 %v4514_v25, %v6901_v62  ;;  %v1875_v12 = vmul.f32 %v4514_v25, %v6924_v44  ;;  %v1894_v18 = vmul.f32 %v4514_v25, %v6927_v61  ;;  %v1767_v43 = vrot.slane %v1761_v22, 1 }
 0x1bd   : > { %9931 = vst [vmem:[#allocation34_spill] sm:$0xff] %v7050_v40  ;;  %v1786_v23 = vrot.slane %v1780_v11, 1  ;;  %v1805_v55 = vrot.slane %v1799_v52, 1  ;;  %v1824_v39 = vrot.slane %v1818_v51, 1  ;;  %v1843_v3 = vrot.slane %v1837_v7, 2 }
 0x1be   : > { %9932 = vst [vmem:[#allocation35_spill] sm:$0xff] %v7053_v6  ;;  %v1862_v0 = vrot.slane %v1856_v31, 2  ;;  %v1881_v38 = vrot.slane %v1875_v12, 2  ;;  %v1900_v45 = vrot.slane %v1894_v18, 2  ;;  %v9933_v16 = vrot.slane %v6825_v27, 1  ;;  %v2106_v31 = vpop.permute.xlu1 %2105 }
 0x1bf   : > { %v9934_v59 = vrot.slane %v6841_v1, 1  ;;  %v9935_v44 = vrot.slane %v6849_v29, 1  ;;  %v9936_v25 = vrot.slane %v6878_v17, 1  ;;  %v9937_v11 = vrot.slane %v6886_v56, 2 }
 0x1c0   : > { %v1769_v4 = vsel %vm413_vm2, %v1767_v43, %v9933_v16  ;;  %v9938_v27 = vrot.slane %v6914_v20, 2  ;;  %v9939_v1 = vrot.slane %v6935_v41, 2  ;;  %v9940_v29 = vrot.slane %v6953_v14, 2 }
 0x1c1   : > { %v1788_v62 = vsel %vm413_vm2, %v1786_v23, %v9934_v59  ;;  %v1807_v61 = vsel %vm413_vm2, %v1805_v55, %v9935_v44  ;;  %v1826_v22 = vsel %vm413_vm2, %v1824_v39, %v9936_v25  ;;  %v1845_v12 = vsel %vm490_vm3, %v1843_v3, %v9937_v11 }
 0x1c2   : > { %v1864_v18 = vsel %vm490_vm3, %v1862_v0, %v9938_v27  ;;  %v1883_v23 = vsel %vm490_vm3, %v1881_v38, %v9939_v1  ;;  %v1902_v52 = vsel %vm490_vm3, %v1900_v45, %v9940_v29  ;;  %v1540_v17 = vsel %vm369_vm0, %v1532_v30, 0.0  ;;  %v2120_v29 = vpop.permute.xlu2 %2119 }
 0x1c3   : > { %v1732_v39 = vadd.f32 %v1729_v46, %v6792_v5  ;;  %v1740_v56 = vadd.f32 %v1737_v8, %v6794_v47  ;;  %v1748_v51 = vadd.f32 %v1745_v28, %v6786_v36  ;;  %v1756_v20 = vadd.f32 %v1753_v24, %v6788_v9  ;;  %v2104_v46 = vpop.permute.xlu0 %2103 }
 0x1c4   : > { %v1913_v0 = vmul.f32 %v6712_v49, %v1540_v17  ;;  %v1921_v41 = vmul.f32 %v6753_v54, %v1540_v17  ;;  %v1929_v7 = vmul.f32 %v6756_v26, %v1540_v17  ;;  %v1937_v30 = vmul.f32 %v6759_v19, %v1540_v17 }
 0x1c5   : > { %v1775_v14 = vadd.f32 %v1769_v4, %v1732_v39  ;;  %v1794_v43 = vadd.f32 %v1788_v62, %v1740_v56  ;;  %v1813_v45 = vadd.f32 %v1807_v61, %v1748_v51  ;;  %v1832_v55 = vadd.f32 %v1826_v22, %v1756_v20 }
 0x1c6   : > { %v1945_v5 = vmul.f32 %v6970_v13, %v1540_v17  ;;  %v1964_v47 = vmul.f32 %v6973_v35, %v1540_v17  ;;  %v1983_v36 = vmul.f32 %v6986_v10, %v1540_v17  ;;  %v2002_v26 = vmul.f32 %v6989_v2, %v1540_v17  ;;  %v2118_v20 = vpop.permute.xlu1 %2117 }
 0x1c7   : > { %v1851_v49 = vadd.f32 %v1845_v12, %v1775_v14  ;;  %v1870_v9 = vadd.f32 %v1864_v18, %v1794_v43  ;;  %v1889_v54 = vadd.f32 %v1883_v23, %v1813_v45  ;;  %v1908_v8 = vadd.f32 %v1902_v52, %v1832_v55 }
 0x1c8   : > { %v1951_v28 = vrot.slane %v1945_v5, 1  ;;  %v1970_v19 = vrot.slane %v1964_v47, 1  ;;  %v1989_v24 = vrot.slane %v1983_v36, 1  ;;  %v2008_v4 = vrot.slane %v2002_v26, 1  ;;  %v9951_v47 = vld [vmem:[#allocation46_spill] sm:$0xff] }
 0x1c9   : > { %v1916_v3 = vadd.f32 %v1913_v0, %v1851_v49  ;;  %v1924_v38 = vadd.f32 %v1921_v41, %v1870_v9  ;;  %v1932_v16 = vadd.f32 %v1929_v7, %v1889_v54  ;;  %v1940_v44 = vadd.f32 %v1937_v30, %v1908_v8  ;;  %v9953_v9 = vld [vmem:[#allocation41_spill] sm:$0xff] }
 0x1ca   : > { %v9941_v61 = vrot.slane %v7024_v32, 1  ;;  %v9942_v22 = vrot.slane %v7018_v33, 1  ;;  %v9943_v12 = vrot.slane %v7021_v48, 1  ;;  %v9945_v1 = vrot.slane %v7027_v60, 1 }
 0x1cb   : > { %v7136_v39 = vmul.f32 %v6997_v50, %v1540_v17  ;;  %v7139_v56 = vmul.f32 %v7000_v37, %v1540_v17  ;;  %v7142_v51 = vmul.f32 %v7010_v57, %v1540_v17  ;;  %v7149_v7 = vmul.f32 %v7013_v42, %v1540_v17  ;;  %v2116_v5 = vpop.permute.xlu0 %2115 }
 0x1cc   : > { %v1991_v25 = vsel %vm413_vm2, %v1989_v24, %v9941_v61  ;;  %v1953_v11 = vsel %vm413_vm2, %v1951_v28, %v9942_v22  ;;  %v1972_v27 = vsel %vm413_vm2, %v1970_v19, %v9943_v12  ;;  %v2010_v23 = vsel %vm413_vm2, %v2008_v4, %v9945_v1  ;;  %v7221_v1 = vld [vmem:[%s9780_s6 + $0x48] sm:$0xff] }
 0x1cd   : > { %v7126_v18 = vadd.f32 %v1991_v25, %v1932_v16  ;;  %v7133_v52 = vadd.f32 %v2010_v23, %v1940_v44  ;;  %9947 = vst [vmem:[#allocation45_spill] sm:$0xff] %v7139_v56  ;;  %v7144_v0 = vadd.f32 %v1953_v11, %v1916_v3  ;;  %v7146_v41 = vadd.f32 %v1972_v27, %v1924_v38  ;;  %v9958_v25 = vld [vmem:[#allocation43_spill] sm:$0xff] }
 0x1ce   : > { %9948 = vst [vmem:[#allocation31_spill] sm:$0xff] %v7142_v51  ;;  %v7152_v14 = vsel %vm356_vm1, 0.0, %v2106_v31  ;;  %v7159_v30 = vsel %vm356_vm1, 0.0, %v2104_v46  ;;  %v7162_v55 = vsel %vm369_vm0, %v2120_v29, 0.0  ;;  %v7168_v31 = vsel %vm369_vm0, %v2118_v20, 0.0  ;;  %v7227_v29 = vld [vmem:[%s9780_s6 + $0x50] sm:$0xff] }
 0x1cf   : > { %9944 = vst [vmem:[#allocation36_spill] sm:$0xff] %v7126_v18  ;;  %v9952_v36 = vrot.slane %v6829_v15, 1  ;;  %v7175_v54 = vmul.f32 %v6970_v13, %v9953_v9  ;;  %v7181_v26 = vmul.f32 %v6997_v50, %v9953_v9  ;;  %v7184_v46 = vstv %s7106_s28  ;;  %v9954_v13 = vld [vmem:[#allocation52_spill] sm:$0xff]  ;;  %s7619_s28 = sld [smem:[#allocation2 + $0x64]] }
 0x1d0   : > { %9946 = vst [vmem:[#allocation37_spill] sm:$0xff] %v7133_v52  ;;  %v7187_v8 = vstv %s7109_s30  ;;  %v7190_v28 = vstv %s7111_s8  ;;  %v9955_v19 = vrot.slane %v9954_v13, 2  ;;  %v9956_v50 = vld [vmem:[#allocation44_spill] sm:$0xff]  ;;  %v7203_v16 = vsel %vm369_vm0, %v2116_v5, 0.0  ;;  %s7636_s30 = sld [smem:[#allocation2 + $0x67]] }
 0x1d1   : > { %9949 = vst [vmem:[#allocation76_spill] sm:$0xff] %v7146_v41  ;;  %v1777_v49 = vadd.f32 %v9952_v36, %v9951_v47  ;;  %v1954_v3 = vrot.slane %v7175_v54, 1  ;;  %v7200_v38 = vmul.f32 %v7187_v8, %v9956_v50  ;;  %v2131_v4 = vmul.f32 %v7184_v46, %v9956_v50  ;;  %v7242_v54 = vld [vmem:[%s9780_s6 + $0x58] sm:$0xf]  ;;  %s7333_s6 = sld [smem:[#allocation2 + $0x3f]] }
 0x1d2   : > { %9950 = vst [vmem:[#allocation71_spill] sm:$0xff] %v7149_v7  ;;  %v7209_v44 = vmul.f32 %v7190_v28, %v9956_v50  ;;  %v2344_v61 = vstv %s7118_s13  ;;  %v2030_v11 = vrot.slane %v7181_v26, 2  ;;  %v2312_v27 = vstv %s7131_s14  ;;  %s7644_s8 = sld [smem:[#allocation2 + $0x6a]] }
 0x1d3   : > { %v1853_v24 = vadd.f32 %v9955_v19, %v1777_v49  ;;  %9957 = vst [vmem:[#allocation74_spill] sm:$0xff] %v7203_v16  ;;  %v7224_v23 = vmul.f32 %v7221_v1, %v2312_v27  ;;  %v7230_v20 = vmul.f32 %v7227_v29, %v2312_v27  ;;  %v7233_v5 = vmul.f32 %v7221_v1, %v2344_v61  ;;  %s7652_s13 = sld [smem:[#allocation2 + $0x65]] }
 0x1d4   : > { %v7236_v47 = vmul.f32 %v7227_v29, %v2344_v61  ;;  %v2347_v26 = vmul.f32 %v7242_v54, %v2344_v61  ;;  %v2420_v13 = vstv %s7154_s16  ;;  %v2315_v62 = vmul.f32 %v7242_v54, %v2312_v27  ;;  %s7678_s14 = sld [smem:[#allocation2 + $0x68]] }
 0x1d5   : > { %v1918_v22 = vadd.f32 %v9958_v25, %v1853_v24  ;;  %v7250_v24 = vmul.f32 %v7221_v1, %v2420_v13  ;;  %v7253_v25 = vmul.f32 %v7227_v29, %v2420_v13  ;;  %v2423_v61 = vmul.f32 %v7242_v54, %v2420_v13  ;;  %s7708_s16 = sld [smem:[#allocation2 + $0x6b]] }
 0x1d6   : > { %v2354_v59 = vrot.slane %v2347_v26, 1  ;;  %v2528_v43 = vstv %s7177_s11  ;;  %v2604_v49 = vstv %s7192_s15  ;;  %v9959_v27 = vrot.slane %v7236_v47, 1  ;;  %s7724_s11 = sld [smem:[#allocation7 + $0x3a]] }
 0x1d7   : > { %v1961_v36 = vadd.f32 %v1954_v3, %v1918_v22  ;;  %v2496_v22 = vstv %s7164_s2  ;;  %v2430_v19 = vrot.slane %v2423_v61, 2  ;;  %v2427_v13 = vrot.slane %v7250_v24, 2  ;;  %s7716_s2 = sld [smem:[#allocation7 + $0x16]] }
 0x1d8   : > { %v2499_v52 = vmul.f32 %v2496_v22, %v7162_v55  ;;  %v7267_v17 = vsel %vm413_vm2, %v9959_v27, %v2354_v59  ;;  %v2607_v26 = vmul.f32 %v2604_v49, %v7162_v55  ;;  %v2680_v45 = vlaneseq  ;;  %s7736_s15 = sld [smem:[#allocation7 + $0x19]] }
 0x1d9   : > { %v2037_v15 = vadd.f32 %v2030_v11, %v1961_v36  ;;  %v2531_v36 = vmul.f32 %v2528_v43, %v7162_v55  ;;  %v9960_v7 = vrot.slane %v7200_v38, 1  ;;  %v7279_v61 = vstv %s7212_s17  ;;  %s7741_s17 = sld [smem:[#allocation7 + $0x3d]] }
 0x1da   : > { %v7282_v60 = vstv %s7218_s20  ;;  %v7284_v27 = vshrl.u32 %v2680_v45, 7  ;;  %v7286_v2 = vand.u32 127, %v2680_v45  ;;  %v7289_v24 = vstv %s7238_s27  ;;  %s7835_s20 = sld [smem:[#allocation2 + $0x87]] }
 0x1db   : > { %v2134_v12 = vadd.f32 %v2131_v4, %v2037_v15  ;;  %v9961_v15 = vrot.slane %v7253_v25, 2  ;;  %v2538_v42 = vrot.slane %v2531_v36, 1  ;;  %v9964_v18 = vrot.slane %v7209_v44, 2  ;;  %s7844_s27 = sld [smem:[#allocation2 + $0x8a]] }
 0x1dc   : > { %9962 = vst [vmem:[#allocation56_spill] sm:$0xff] %v7284_v27  ;;  %v2683_v40 = vadd.s32 16, %v7284_v27  ;;  %v9967_v36 = vrot.slane %v7044_v53, 2  ;;  %v2129_v45 = vmul.f32 %v7184_v46, %v7159_v30  ;;  %v2161_v57 = vmul.f32 %v7187_v8, %v7159_v30 }
 0x1dd   : > { %v2177_v6 = vadd.f32 %v9960_v7, %v2134_v12  ;;  %v7276_v4 = vsel %vm490_vm3, %v9961_v15, %v2430_v19  ;;  %9963 = vst [vmem:[#allocation57_spill] sm:$0xff] %v7286_v2  ;;  %v2614_v7 = vrot.slane %v2607_v26, 2  ;;  %v7294_v12 = vstv %s7246_s3  ;;  %s7851_s3 = sld [smem:[#allocation2 + $0x8d]] }
 0x1de   : > { %9965 = vst [vmem:[#allocation58_spill] sm:$0xff] %v7294_v12  ;;  %v9966_v15 = vrot.slane %v7018_v33, 1  ;;  %v2031_v32 = vsel %vm490_vm3, %v9967_v36, %v2030_v11  ;;  %v2237_v33 = vmul.f32 %v7190_v28, %v7159_v30  ;;  %v2687_v26 = vadd.s32 4294967295, %v2683_v40 }
 0x1df   : > { %v2253_v51 = vadd.f32 %v9964_v18, %v2177_v6  ;;  %v2162_v18 = vmul.f32 %v7187_v8, %v7152_v14  ;;  %vm2699_vm4 = vcmp.lt.s32.totalorder %v7286_v2, 16  ;;  %v2130_v11 = vmul.f32 %v7184_v46, %v7152_v14 }
 0x1e0   : > { %v1955_v63 = vsel %vm413_vm2, %v9966_v15, %v1954_v3  ;;  %v2238_v3 = vmul.f32 %v7190_v28, %v7152_v14  ;;  %v2167_v15 = vrot.slane %v2161_v57, 1  ;;  %v2529_v8 = vmul.f32 %v2528_v43, %v7203_v16 }
 0x1e1   : > { %v2318_v6 = vadd.f32 %v2315_v62, %v2253_v51  ;;  %v2168_v10 = vrot.slane %v2162_v18, 1  ;;  %v7317_v62 = vmul.f32 %v2496_v22, %v7203_v16  ;;  %v7320_v51 = vmul.f32 %v2496_v22, %v7168_v31 }
 0x1e2   : > { %v2244_v41 = vrot.slane %v2238_v3, 2  ;;  %v2530_v28 = vmul.f32 %v2528_v43, %v7168_v31  ;;  %v2605_v40 = vmul.f32 %v2604_v49, %v7203_v16  ;;  %vm2693_vm5 = vcmp.lt.s32.totalorder %v2687_v26, 16 }
 0x1e3   : > { %v2361_v36 = vadd.f32 %v2354_v59, %v2318_v6  ;;  %v2243_v21 = vrot.slane %v2237_v33, 2  ;;  %v2606_v57 = vmul.f32 %v2604_v49, %v7168_v31  ;;  %v9968_v59 = vrot.slane %v7200_v38, 1  ;;  %vm7383_vm6 = vmand %vm2693_vm5, %vm2699_vm4 }
 0x1e4   : > { %v9969_v6 = vrot.slane %v7209_v44, 2  ;;  %v2536_v18 = vrot.slane %v2530_v28, 1  ;;  %v1960_v3 = vadd.f32 %v1955_v63, %v7039_v58  ;;  %v2535_v16 = vrot.slane %v2529_v8, 1 }
 0x1e5   : > { %v2437_v56 = vadd.f32 %v2430_v19, %v2361_v36  ;;  %v2171_v46 = vsel %vm413_vm2, %v2168_v10, %v9968_v59  ;;  %v2612_v19 = vrot.slane %v2606_v57, 2  ;;  %v9970_v33 = vrot.slane %v7044_v53, 2  ;;  %v9975_v57 = vld [vmem:[#allocation39_spill] sm:$0xff] }
 0x1e6   : > { %v2247_v22 = vsel %vm490_vm3, %v2244_v41, %v9969_v6  ;;  %v9971_v49 = vrot.slane %v7136_v39, 2  ;;  %v2611_v36 = vrot.slane %v2605_v40, 2  ;;  %v2036_v44 = vadd.f32 %v2031_v32, %v1960_v3  ;;  %v9976_v6 = vld [vmem:[#allocation30_spill] sm:$0xff] }
 0x1e7   : > { %v2502_v43 = vadd.f32 %v2499_v52, %v2437_v56  ;;  %v2169_v28 = vsel %vm413_vm2, %v2167_v15, %v2168_v10  ;;  %v7345_v58 = vsel %vm413_vm2, %v2536_v18, %v2538_v42  ;;  %v7348_v52 = vsel %vm490_vm3, %v2612_v19, %v2614_v7 }
 0x1e8   : > { %v2029_v38 = vsel %vm490_vm3, %v9971_v49, %v9970_v33  ;;  %v2245_v53 = vsel %vm490_vm3, %v2243_v21, %v2244_v41  ;;  %v2133_v39 = vadd.f32 %v2130_v11, %v2036_v44  ;;  %v9972_v8 = vrot.slane %v7236_v47, 1  ;;  %v9982_v33 = vld [vmem:[#allocation70_spill] sm:$0xff] }
 0x1e9   : > { %v2035_v59 = vadd.f32 %v2029_v38, %v7144_v0  ;;  %v2545_v63 = vadd.f32 %v2538_v42, %v2502_v43  ;;  %v9973_v40 = vrot.slane %v7233_v5, 1  ;;  %v9974_v0 = vrot.slane %v7253_v25, 2 }
 0x1ea   : > { %v7360_v42 = vsel %vm413_vm2, %v2535_v16, %v2536_v18  ;;  %v9977_v3 = vrot.slane %v9976_v6, 1  ;;  %v7367_v41 = vmul.f32 %v6973_v35, %v9953_v9  ;;  %v2176_v5 = vadd.f32 %v2171_v46, %v2133_v39 }
 0x1eb   : > { %v2132_v56 = vadd.f32 %v2129_v45, %v2035_v59  ;;  %v2353_v32 = vsel %vm413_vm2, %v9973_v40, %v9972_v8  ;;  %v2429_v10 = vsel %vm490_vm3, %v2427_v13, %v9974_v0  ;;  %v2621_v15 = vadd.f32 %v2614_v7, %v2545_v63  ;;  %v9980_v45 = vld [vmem:[#allocation51_spill] sm:$0xff] }
 0x1ec   : > { %v1796_v21 = vadd.f32 %v9977_v3, %v9975_v57  ;;  %v7372_v25 = vsel %vm490_vm3, %v2611_v36, %v2612_v19  ;;  %v7376_v16 = vmul.f32 %v7000_v37, %v9953_v9  ;;  %v7388_v7 = vadd.s32 4294967295, %v7284_v27 }
 0x1ed   : > { %v2175_v47 = vadd.f32 %v2169_v28, %v2132_v56  ;;  %vm2705_vm7 = vcmp.ge.f32.partialorder %v2621_v15, 0.0  ;;  %v2708_v13 = vmul.f32 0.1, %v2621_v15  ;;  %v9981_v11 = vrot.slane %v9980_v45, 2 }
 0x1ee   : > { %v2252_v37 = vadd.f32 %v2247_v22, %v2176_v5  ;;  %v1973_v43 = vrot.slane %v7367_v41, 1  ;;  %v7396_v19 = vstv %s7333_s6  ;;  %v2049_v38 = vrot.slane %v7376_v16, 2  ;;  %s7859_s6 = sld [smem:[#allocation2 + $0x88]] }
 0x1ef   : > { %v1872_v46 = vadd.f32 %v9981_v11, %v1796_v21  ;;  %v2251_v18 = vadd.f32 %v2245_v53, %v2175_v47  ;;  %v2711_v26 = vsel %vm2705_vm7, %v2621_v15, %v2708_v13  ;;  %v7403_v36 = vstv %s7340_s4  ;;  %s7885_s4 = sld [smem:[#allocation2 + $0x8b]] }
 0x1f0   : > { %v2714_v44 = vsel %vm7383_vm6, %v2711_v26, 0.0  ;;  %v2317_v59 = vadd.f32 %v7230_v20, %v2252_v37  ;;  %v7411_v28 = vmul.f32 %v7403_v36, %v9956_v50  ;;  %vm2688_vm8 = vcmp.ge.s32.totalorder %v7388_v7, 0 }
 0x1f1   : > { %v1926_v49 = vadd.f32 %v9982_v33, %v1872_v46  ;;  %v2316_v22 = vadd.f32 %v7224_v23, %v2251_v18  ;;  %2762 = vrot.lane.b32.xlu2 %v2714_v44, %s9983_s5  ;;  %v7415_v63 = vmul.f32 %v7279_v61, %v2714_v44  ;;  %v7418_v53 = vmul.f32 %v7282_v60, %v2714_v44  ;;  %vm7504_vm10 = vmand %vm2688_vm8, %vm2699_vm4 }
 0x1f2   : > { %v7421_v39 = vmul.f32 %v7289_v24, %v2714_v44  ;;  %v7424_v20 = vmul.f32 %v7294_v12, %v2714_v44  ;;  %v2360_v23 = vadd.f32 %v7267_v17, %v2317_v59  ;;  %v2139_v40 = vmul.f32 %v7396_v19, %v9956_v50 }
 0x1f3   : > { %9984 = vst [vmem:[#allocation73_spill] sm:$0xff] %v7415_v63  ;;  %v2359_v56 = vadd.f32 %v2353_v32, %v2316_v22  ;;  %v1980_v8 = vadd.f32 %v1973_v43, %v1926_v49  ;;  %v9446_v6 = vrot.slane %v7411_v28, 1  ;;  %v7440_v21 = vstv %s7369_s0  ;;  %s7898_s0 = sld [smem:[#allocation2 + $0x8e]] }
 0x1f4   : > { %9985 = vst [vmem:[#allocation47_spill] sm:$0xff] %v7418_v53  ;;  %v2436_v3 = vadd.f32 %v7276_v4, %v2360_v23  ;;  %v7447_v47 = vmul.f32 %v7440_v21, %v9956_v50  ;;  %v2320_v13 = vstv %s7378_s1  ;;  %v2363_v45 = vstv %s7392_s25  ;;  %s7928_s1 = sld [smem:[#allocation2 + $0x89]] }
 0x1f5   : > { %9986 = vst [vmem:[#allocation59_spill] sm:$0xff] %v7421_v39  ;;  %v2435_v17 = vadd.f32 %v2429_v10, %v2359_v56  ;;  %v2056_v32 = vadd.f32 %v2049_v38, %v1980_v8  ;;  %v2439_v46 = vstv %s7398_s29  ;;  %v7460_v18 = vmul.f32 %v7221_v1, %v2320_v13  ;;  %v10003_v39 = vld [vmem:[#allocation45_spill] sm:$0xff]  ;;  %s7942_s25 = sld [smem:[#allocation2 + $0x8c]] }
 0x1f6   : > { %9987 = vst [vmem:[#allocation75_spill] sm:$0xff] %v7424_v20  ;;  %v2501_v4 = vadd.f32 %v7320_v51, %v2436_v3  ;;  %v9445_v37 = vrot.slane %v7447_v47, 2  ;;  %v7463_v26 = vmul.f32 %v7227_v29, %v2320_v13  ;;  %v7466_v33 = vmul.f32 %v7221_v1, %v2363_v45  ;;  %s7955_s29 = sld [smem:[#allocation2 + $0x8f]] }
 0x1f7   : > { %v2500_v10 = vadd.f32 %v7317_v62, %v2435_v17  ;;  %v2142_v11 = vadd.f32 %v2139_v40, %v2056_v32  ;;  %v7475_v59 = vmul.f32 %v7227_v29, %v2363_v45  ;;  %v2323_v22 = vmul.f32 %v7242_v54, %v2320_v13 }
 0x1f8   : > { %v2544_v51 = vadd.f32 %v7345_v58, %v2501_v4  ;;  %v2366_v23 = vmul.f32 %v7242_v54, %v2363_v45  ;;  %v7483_v56 = vmul.f32 %v7221_v1, %v2439_v46  ;;  %v7486_v58 = vmul.f32 %v7227_v29, %v2439_v46 }
 0x1f9   : > { %v2543_v62 = vadd.f32 %v7360_v42, %v2500_v10  ;;  %v2196_v49 = vadd.f32 %v9446_v6, %v2142_v11  ;;  %2774 = vrot.lane.b32.xlu2 %v2714_v44, %s9988_s7  ;;  %v9444_v40 = vrot.slane %v7475_v59, 1  ;;  %v2442_v32 = vmul.f32 %v7242_v54, %v2439_v46 }
 0x1fa   : > { %v2620_v42 = vadd.f32 %v7348_v52, %v2544_v51  ;;  %v2373_v17 = vrot.slane %v2366_v23, 1  ;;  %v9443_v13 = vrot.slane %v7486_v58, 2  ;;  %v2504_v46 = vstv %s7442_s21  ;;  %s7962_s21 = sld [smem:[#allocation7 + $0x1f]] }
 0x1fb   : > { %v2619_v8 = vadd.f32 %v7372_v25, %v2543_v62  ;;  %v2272_v44 = vadd.f32 %v9445_v37, %v2196_v49  ;;  %v2449_v11 = vrot.slane %v2442_v32, 2  ;;  %v2547_v49 = vstv %s7451_s22  ;;  %s7974_s22 = sld [smem:[#allocation7 + $0x43]]  ;;  %v10092_v25 = vld [vmem:[#allocation47_spill] sm:$0xff] }
 0x1fc   : > { %vm2704_vm9 = vcmp.ge.f32.partialorder %v2620_v42, 0.0  ;;  %v2707_v52 = vmul.f32 0.1, %v2620_v42  ;;  %v7513_v7 = vsel %vm413_vm2, %v9444_v40, %v2373_v17  ;;  %v2550_v32 = vmul.f32 %v2547_v49, %v7162_v55 }
 0x1fd   : > { %vm2703_vm11 = vcmp.ge.f32.partialorder %v2619_v8, 0.0  ;;  %v2706_v45 = vmul.f32 0.1, %v2619_v8  ;;  %v2326_v4 = vadd.f32 %v2323_v22, %v2272_v44  ;;  %v7549_v15 = vstv %s7488_s9  ;;  %s8034_s9 = sld [smem:[#allocation7 + $0x25]] }
 0x1fe   : > { %v2710_v51 = vsel %vm2704_vm9, %v2620_v42, %v2707_v52  ;;  %v2507_v42 = vmul.f32 %v2504_v46, %v7162_v55  ;;  %v2623_v52 = vstv %s7456_s23  ;;  %v2557_v57 = vrot.slane %v2550_v32, 1  ;;  %9995 = vst [vmem:[#allocation54_spill] sm:$0xff] %v7549_v15  ;;  %s7980_s23 = sld [smem:[#allocation7 + $0x22]] }
 0x1ff   : > { %v2709_v62 = vsel %vm2703_vm11, %v2619_v8, %v2706_v45  ;;  %v7518_v23 = vsel %vm2699_vm4, %v2710_v51, 0.0  ;;  %v2380_v44 = vadd.f32 %v2373_v17, %v2326_v4  ;;  %v7532_v8 = vsel %vm490_vm3, %v9443_v13, %v2449_v11 }
 0x200   : > { %v7522_v22 = vsel %vm7504_vm10, %v2709_v62, 0.0  ;;  %2760 = vrot.lane.b32.xlu1 %v7518_v23, %s9983_s5  ;;  %v7537_v45 = vstv %s7468_s24  ;;  %v2626_v17 = vmul.f32 %v2623_v52, %v7162_v55  ;;  %v7541_v4 = vstv %s7477_s26  ;;  %s7985_s24 = sld [smem:[#allocation7 + $0x46]] }
 0x201   : > { %9991 = vst [vmem:[#allocation55_spill] sm:$0xff] %v7522_v22  ;;  %2758 = vrot.lane.b32.xlu0 %v7522_v22, %s9983_s5  ;;  %v2456_v51 = vadd.f32 %v2449_v11, %v2380_v44  ;;  %v9994_v62 = vrot.slane %v7021_v48, 1  ;;  %v7552_v0 = vstv %s7495_s10  ;;  %v9997_v10 = vrot.slane %v7047_v34, 2  ;;  %s8020_s26 = sld [smem:[#allocation7 + $0x1]] }
 0x202   : > { %9992 = vst [vmem:[#allocation53_spill] sm:$0xff] %v7537_v45  ;;  %v2633_v13 = vrot.slane %v2626_v17, 2  ;;  %v2137_v41 = vmul.f32 %v7396_v19, %v7159_v30  ;;  %v2180_v48 = vmul.f32 %v7403_v36, %v7159_v30  ;;  %v2181_v32 = vmul.f32 %v7403_v36, %v7152_v14  ;;  %s8049_s10 = sld [smem:[#allocation7 + $0x3]] }
 0x203   : > { %9993 = vst [vmem:[#allocation69_spill] sm:$0xff] %v7541_v4  ;;  %v1974_v5 = vsel %vm413_vm2, %v9994_v62, %v1973_v43  ;;  %v2050_v11 = vsel %vm490_vm3, %v9997_v10, %v2049_v38  ;;  %v2510_v44 = vadd.f32 %v2507_v42, %v2456_v51  ;;  %v2138_v43 = vmul.f32 %v7396_v19, %v7152_v14  ;;  %v9998_v51 = vld [vmem:[#allocation74_spill] sm:$0xff] }
 0x204   : > { %9996 = vst [vmem:[#allocation60_spill] sm:$0xff] %v7552_v0  ;;  %v2256_v16 = vmul.f32 %v7440_v21, %v7159_v30  ;;  %v2257_v38 = vmul.f32 %v7440_v21, %v7152_v14  ;;  %v2186_v42 = vrot.slane %v2180_v48, 1  ;;  %v7572_v17 = vmul.f32 %v2504_v46, %v9998_v51 }
 0x205   : > { %v2564_v10 = vadd.f32 %v2557_v57, %v2510_v44  ;;  %v2548_v62 = vmul.f32 %v2547_v49, %v9998_v51  ;;  %v2187_v3 = vrot.slane %v2181_v32, 1  ;;  %v7576_v19 = vmul.f32 %v2504_v46, %v7168_v31  ;;  %v10000_v46 = vld [vmem:[#allocation33_spill] sm:$0xff] }
 0x206   : > { %v2263_v40 = vrot.slane %v2257_v38, 2  ;;  %v2549_v36 = vmul.f32 %v2547_v49, %v7168_v31  ;;  %v2262_v6 = vrot.slane %v2256_v16, 2  ;;  %v2624_v27 = vmul.f32 %v2623_v52, %v9998_v51 }
 0x207   : > { %v2640_v37 = vadd.f32 %v2633_v13, %v2564_v10  ;;  %v2625_v21 = vmul.f32 %v2623_v52, %v7168_v31  ;;  %v9999_v44 = vrot.slane %v7411_v28, 1  ;;  %v2554_v20 = vrot.slane %v2548_v62, 1 }
 0x208   : > { %v2555_v32 = vrot.slane %v2549_v36, 1  ;;  %2772 = vrot.lane.b32.xlu1 %v7518_v23, %s9988_s7  ;;  %v1979_v49 = vadd.f32 %v1974_v5, %v10000_v46  ;;  %v10001_v16 = vrot.slane %v7447_v47, 2  ;;  %v2630_v62 = vrot.slane %v2624_v27, 2  ;;  %v10005_v47 = vld [vmem:[#allocation76_spill] sm:$0xff] }
 0x209   : > { %v2190_v48 = vsel %vm413_vm2, %v2187_v3, %v9999_v44  ;;  %2770 = vrot.lane.b32.xlu0 %v7522_v22, %s9988_s7  ;;  %vm2717_vm12 = vcmp.ge.f32.partialorder %v2640_v37, 0.0  ;;  %v2720_v52 = vmul.f32 0.1, %v2640_v37  ;;  %v2631_v38 = vrot.slane %v2625_v21, 2 }
 0x20a   : > { %v2266_v28 = vsel %vm490_vm3, %v2263_v40, %v10001_v16  ;;  %v7599_v10 = vsel %vm413_vm2, %v2555_v32, %v2557_v57  ;;  %v2055_v36 = vadd.f32 %v2050_v11, %v1979_v49  ;;  %v10002_v44 = vrot.slane %v7047_v34, 2 }
 0x20b   : > { %v10004_v5 = vrot.slane %v10003_v39, 2  ;;  %v2723_v53 = vsel %vm2717_vm12, %v2640_v37, %v2720_v52  ;;  %v7607_v63 = vsel %vm490_vm3, %v2631_v38, %v2633_v13  ;;  %v2188_v21 = vsel %vm413_vm2, %v2186_v42, %v2187_v3 }
 0x20c   : > { %v2726_v57 = vsel %vm7383_vm6, %v2723_v53, 0.0  ;;  %v2141_v22 = vadd.f32 %v2138_v43, %v2055_v36  ;;  %v2264_v27 = vsel %vm490_vm3, %v2262_v6, %v2263_v40  ;;  %v10006_v34 = vrot.slane %v7475_v59, 1 }
 0x20d   : > { %v2048_v46 = vsel %vm490_vm3, %v10004_v5, %v10002_v44  ;;  %v10007_v39 = vrot.slane %v7466_v33, 1  ;;  %v7622_v37 = vmul.f32 %v7537_v45, %v2726_v57  ;;  %v7625_v13 = vmul.f32 %v7541_v4, %v2726_v57  ;;  %3029 = vrot.lane.b32.xlu2 %v2726_v57, %s9983_s5 }
 0x20e   : > { %v2054_v16 = vadd.f32 %v2048_v46, %v10005_v47  ;;  %v7628_v3 = vmul.f32 %v7549_v15, %v2726_v57  ;;  %v10011_v53 = vrot.slane %v7486_v58, 2  ;;  %v10012_v6 = vrot.slane %v7483_v56, 2  ;;  %v10018_v46 = vld [vmem:[#allocation50_spill] sm:$0xff] }
 0x20f   : > { %v2372_v11 = vsel %vm413_vm2, %v10007_v39, %v10006_v34  ;;  %10008 = vst [vmem:[#allocation46_spill] sm:$0xff] %v7622_v37  ;;  %v7639_v59 = vmul.f32 %v7552_v0, %v2726_v57  ;;  %v2195_v40 = vadd.f32 %v2190_v48, %v2141_v22  ;;  %v7642_v42 = vsel %vm413_vm2, %v2554_v20, %v2555_v32  ;;  %v10014_v48 = vld [vmem:[#allocation40_spill] sm:$0xff]  ;;  %v10019_v34 = vld [vmem:[#allocation42_spill] sm:$0xff] }
 0x210   : > { %10009 = vst [vmem:[#allocation41_spill] sm:$0xff] %v7625_v13  ;;  %v2448_v33 = vsel %vm490_vm3, %v10012_v6, %v10011_v53  ;;  %v2140_v43 = vadd.f32 %v2137_v41, %v2054_v16  ;;  %v7650_v52 = vsel %vm490_vm3, %v2630_v62, %v2631_v38  ;;  %v10015_v41 = vld [vmem:[#allocation61_spill] sm:$0xff]  ;;  %v10017_v32 = vld [vmem:[#allocation68_spill] sm:$0xff]  ;;  %v7663_v47 = vmul.f32 %v10018_v46, %v9953_v9  ;;  %v10030_v13 = vld [vmem:[#allocation34_spill] sm:$0xff] }
 0x211   : > { %10010 = vst [vmem:[#allocation52_spill] sm:$0xff] %v7628_v3  ;;  %v2271_v36 = vadd.f32 %v2266_v28, %v2195_v40  ;;  %v10016_v44 = vrot.slane %v10015_v41, 1  ;;  %v7659_v5 = vmul.f32 %v10017_v32, %v9953_v9  ;;  %v7666_v16 = vstv %s7581_s18  ;;  %s8057_s18 = sld [smem:[#allocation7 + $0x27]] }
 0x212   : > { %10013 = vst [vmem:[#allocation44_spill] sm:$0xff] %v7639_v59  ;;  %v2194_v22 = vadd.f32 %v2188_v21, %v2140_v43  ;;  %v7669_v38 = vstv %s7591_s12  ;;  %v7672_v62 = vstv %s7596_s19  ;;  %v10020_v39 = vrot.slane %v10019_v34, 2  ;;  %s8065_s12 = sld [smem:[#allocation7 + $0x6]] }
 0x213   : > { %v1815_v20 = vadd.f32 %v10016_v44, %v10014_v48  ;;  %v2325_v28 = vadd.f32 %v7463_v26, %v2271_v36  ;;  %v9456_v6 = vrot.slane %v7659_v5, 1  ;;  %v9455_v43 = vrot.slane %v7663_v47, 2  ;;  %v10021_v36 = vld [vmem:[#allocation72_spill] sm:$0xff]  ;;  %s8071_s19 = sld [smem:[#allocation7 + $0x2a]] }
 0x214   : > { %v2270_v21 = vadd.f32 %v2264_v27, %v2194_v22  ;;  %v7684_v48 = vmul.f32 %v7669_v38, %v9956_v50  ;;  %v7688_v41 = vmul.f32 %v7672_v62, %v9956_v50  ;;  %v2328_v44 = vstv %s7619_s28  ;;  %s8077_s28 = sld [smem:[#allocation7 + $0x5]] }
 0x215   : > { %v1891_v53 = vadd.f32 %v10020_v39, %v1815_v20  ;;  %v2379_v26 = vadd.f32 %v7513_v7, %v2325_v28  ;;  %3041 = vrot.lane.b32.xlu2 %v2726_v57, %s9988_s7  ;;  %v2147_v20 = vmul.f32 %v7666_v16, %v9956_v50  ;;  %v7700_v34 = vmul.f32 %v7221_v1, %v2328_v44 }
 0x216   : > { %v2324_v27 = vadd.f32 %v7460_v18, %v2270_v21  ;;  %v9460_v32 = vrot.slane %v7684_v48, 1  ;;  %v9459_v46 = vrot.slane %v7688_v41, 2  ;;  %v7706_v21 = vmul.f32 %v7227_v29, %v2328_v44 }
 0x217   : > { %v1934_v22 = vadd.f32 %v10021_v36, %v1891_v53  ;;  %v2455_v7 = vadd.f32 %v7532_v8, %v2379_v26  ;;  %v2331_v57 = vmul.f32 %v7242_v54, %v2328_v44  ;;  %v2382_v39 = vstv %s7636_s30  ;;  %s8084_s30 = sld [smem:[#allocation7 + $0x29]] }
 0x218   : > { %v2378_v28 = vadd.f32 %v2372_v11, %v2324_v27  ;;  %v2458_v53 = vstv %s7644_s8  ;;  %v7714_v36 = vstv %s7652_s13  ;;  %v7722_v27 = vmul.f32 %v7221_v1, %v2382_v39  ;;  %s8087_s8 = sld [smem:[#allocation7 + $0x8]] }
 0x219   : > { %v1999_v18 = vadd.f32 %v9456_v6, %v1934_v22  ;;  %v2509_v8 = vadd.f32 %v7576_v19, %v2455_v7  ;;  %v7727_v22 = vmul.f32 %v7227_v29, %v2382_v39  ;;  %v2385_v44 = vmul.f32 %v7242_v54, %v2382_v39  ;;  %s8101_s13 = sld [smem:[#allocation7 + $0x2c]] }
 0x21a   : > { %v2454_v11 = vadd.f32 %v2448_v33, %v2378_v28  ;;  %v7731_v40 = vmul.f32 %v7221_v1, %v2458_v53  ;;  %v7734_v49 = vmul.f32 %v7227_v29, %v2458_v53  ;;  %v2566_v28 = vstv %s7678_s14  ;;  %s8104_s14 = sld [smem:[#allocation7 + $0xc]] }
 0x21b   : > { %v2075_v26 = vadd.f32 %v9455_v43, %v1999_v18  ;;  %v2563_v19 = vadd.f32 %v7599_v10, %v2509_v8  ;;  %v9458_v39 = vrot.slane %v7727_v22, 1  ;;  %v2392_v56 = vrot.slane %v2385_v44, 1 }
 0x21c   : > { %v2508_v33 = vadd.f32 %v7572_v17, %v2454_v11  ;;  %v2461_v58 = vmul.f32 %v7242_v54, %v2458_v53  ;;  %v9457_v17 = vrot.slane %v7734_v49, 2  ;;  %v2569_v53 = vmul.f32 %v2566_v28, %v7162_v55 }
 0x21d   : > { %v2150_v7 = vadd.f32 %v2147_v20, %v2075_v26  ;;  %v2639_v43 = vadd.f32 %v7607_v63, %v2563_v19  ;;  %v7754_v20 = vsel %vm413_vm2, %v9458_v39, %v2392_v56  ;;  %v10029_v3 = vrot.slane %v7663_v47, 2 }
 0x21e   : > { %v2562_v6 = vadd.f32 %v7642_v42, %v2508_v33  ;;  %v2468_v11 = vrot.slane %v2461_v58, 2  ;;  %v2515_v58 = vmul.f32 %v7714_v36, %v7162_v55  ;;  %v2576_v19 = vrot.slane %v2569_v53, 1 }
 0x21f   : > { %v2215_v10 = vadd.f32 %v9460_v32, %v2150_v7  ;;  %vm2716_vm13 = vcmp.ge.f32.partialorder %v2639_v43, 0.0  ;;  %v2719_v63 = vmul.f32 0.1, %v2639_v43  ;;  %v2642_v33 = vstv %s7708_s16  ;;  %s8114_s16 = sld [smem:[#allocation7 + $0x30]] }
 0x220   : > { %v2638_v42 = vadd.f32 %v7650_v52, %v2562_v6  ;;  %v7764_v44 = vsel %vm490_vm3, %v9457_v17, %v2468_v11  ;;  %v2645_v6 = vmul.f32 %v2642_v33, %v7162_v55  ;;  %v7778_v17 = vstv %s7724_s11  ;;  %s8136_s11 = sld [smem:[#allocation7 + $0x33]] }
 0x221   : > { %v2291_v26 = vadd.f32 %v9459_v46, %v2215_v10  ;;  %v2722_v7 = vsel %vm2716_vm13, %v2639_v43, %v2719_v63  ;;  %v7775_v10 = vstv %s7716_s2  ;;  %10023 = vst [vmem:[#allocation39_spill] sm:$0xff] %v7778_v17  ;;  %v7783_v46 = vstv %s7736_s15  ;;  %s8126_s2 = sld [smem:[#allocation7 + $0xf]] }
 0x222   : > { %vm2715_vm14 = vcmp.ge.f32.partialorder %v2638_v42, 0.0  ;;  %v2718_v8 = vmul.f32 0.1, %v2638_v42  ;;  %v7771_v52 = vsel %vm2699_vm4, %v2722_v7, 0.0  ;;  %10022 = vst [vmem:[#allocation43_spill] sm:$0xff] %v7775_v10  ;;  %v7786_v43 = vstv %s7741_s17  ;;  %v10027_v7 = vld [vmem:[#allocation64_spill] sm:$0xff] }
 0x223   : > { %v2334_v18 = vadd.f32 %v2331_v57, %v2291_v26  ;;  %3027 = vrot.lane.b32.xlu1 %v7771_v52, %s9983_s5  ;;  %10024 = vst [vmem:[#allocation30_spill] sm:$0xff] %v7783_v46  ;;  %v2652_v63 = vrot.slane %v2645_v6, 2  ;;  %v10026_v26 = vrot.slane %v7659_v5, 1  ;;  %v10028_v32 = vrot.slane %v10027_v7, 1  ;;  %s8151_s15 = sld [smem:[#allocation7 + $0xe]] }
 0x224   : > { %v2721_v39 = vsel %vm2715_vm14, %v2638_v42, %v2718_v8  ;;  %10025 = vst [vmem:[#allocation51_spill] sm:$0xff] %v7786_v43  ;;  %v10031_v8 = vrot.slane %v10030_v13, 2  ;;  %v2199_v5 = vmul.f32 %v7669_v38, %v7159_v30  ;;  %v2200_v42 = vmul.f32 %v7669_v38, %v7152_v14  ;;  %s8159_s17 = sld [smem:[#allocation7 + $0x32]] }
 0x225   : > { %v2399_v53 = vadd.f32 %v2392_v56, %v2334_v18  ;;  %v7790_v57 = vsel %vm7504_vm10, %v2721_v39, 0.0  ;;  %v1993_v59 = vsel %vm413_vm2, %v10028_v32, %v10026_v26  ;;  %v2145_v39 = vmul.f32 %v7666_v16, %v7159_v30 }
 0x226   : > { %v2069_v56 = vsel %vm490_vm3, %v10031_v8, %v10029_v3  ;;  %3025 = vrot.lane.b32.xlu0 %v7790_v57, %s9983_s5  ;;  %v2146_v47 = vmul.f32 %v7666_v16, %v7152_v14  ;;  %v2275_v32 = vmul.f32 %v7672_v62, %v7159_v30  ;;  %v2276_v3 = vmul.f32 %v7672_v62, %v7152_v14 }
 0x227   : > { %v2475_v18 = vadd.f32 %v2468_v11, %v2399_v53  ;;  %v7818_v11 = vmul.f32 %v7714_v36, %v9998_v51  ;;  %v2206_v53 = vrot.slane %v2200_v42, 1  ;;  %v7822_v26 = vmul.f32 %v7714_v36, %v7168_v31 }
 0x228   : > { %v2567_v38 = vmul.f32 %v2566_v28, %v9998_v51  ;;  %v2205_v7 = vrot.slane %v2199_v5, 1  ;;  %v2282_v16 = vrot.slane %v2276_v3, 2  ;;  %v2568_v8 = vmul.f32 %v2566_v28, %v7168_v31  ;;  %v10034_v5 = vld [vmem:[#allocation66_spill] sm:$0xff] }
 0x229   : > { %v2518_v6 = vadd.f32 %v2515_v58, %v2475_v18  ;;  %v2643_v37 = vmul.f32 %v2642_v33, %v9998_v51  ;;  %v10032_v62 = vrot.slane %v7684_v48, 1  ;;  %v2281_v4 = vrot.slane %v2275_v32, 2  ;;  %v10036_v32 = vld [vmem:[#allocation31_spill] sm:$0xff] }
 0x22a   : > { %v2644_v58 = vmul.f32 %v2642_v33, %v7168_v31  ;;  %v10033_v18 = vrot.slane %v7688_v41, 2  ;;  %v2573_v42 = vrot.slane %v2567_v38, 1  ;;  %v2574_v45 = vrot.slane %v2568_v8, 1  ;;  %v10038_v8 = vld [vmem:[#allocation36_spill] sm:$0xff] }
 0x22b   : > { %v2583_v0 = vadd.f32 %v2576_v19, %v2518_v6  ;;  %v2209_v15 = vsel %vm413_vm2, %v2206_v53, %v10032_v62  ;;  %v1998_v3 = vadd.f32 %v1993_v59, %v10034_v5  ;;  %v2649_v12 = vrot.slane %v2643_v37, 2  ;;  %3039 = vrot.lane.b32.xlu1 %v7771_v52, %s9988_s7 }
 0x22c   : > { %v2285_v36 = vsel %vm490_vm3, %v2282_v16, %v10033_v18  ;;  %v2650_v6 = vrot.slane %v2644_v58, 2  ;;  %v10035_v48 = vrot.slane %v10030_v13, 2  ;;  %v10037_v33 = vrot.slane %v10036_v32, 2 }
 0x22d   : > { %v2659_v28 = vadd.f32 %v2652_v63, %v2583_v0  ;;  %v7847_v38 = vsel %vm413_vm2, %v2574_v45, %v2576_v19  ;;  %v2074_v59 = vadd.f32 %v2069_v56, %v1998_v3  ;;  %v2207_v0 = vsel %vm413_vm2, %v2205_v7, %v2206_v53 }
 0x22e   : > { %v2067_v41 = vsel %vm490_vm3, %v10037_v33, %v10035_v48  ;;  %v7854_v13 = vsel %vm490_vm3, %v2650_v6, %v2652_v63  ;;  %3037 = vrot.lane.b32.xlu0 %v7790_v57, %s9988_s7  ;;  %v2283_v58 = vsel %vm490_vm3, %v2281_v4, %v2282_v16  ;;  %v10039_v18 = vrot.slane %v7727_v22, 1  ;;  %v10043_v4 = vld [vmem:[#allocation38_spill] sm:$0xff] }
 0x22f   : > { %v2073_v62 = vadd.f32 %v2067_v41, %v10038_v8  ;;  %vm2729_vm15 = vcmp.ge.f32.partialorder %v2659_v28, 0.0  ;;  %v2732_v37 = vmul.f32 0.1, %v2659_v28  ;;  %v2149_v19 = vadd.f32 %v2146_v47, %v2074_v59  ;;  %v10044_v16 = vld [vmem:[#allocation62_spill] sm:$0xff] }
 0x230   : > { %v10040_v53 = vrot.slane %v7722_v27, 1  ;;  %v10041_v5 = vrot.slane %v7734_v49, 2  ;;  %v10042_v63 = vrot.slane %v7731_v40, 2  ;;  %v2575_v32 = vsel %vm413_vm2, %v2573_v42, %v2574_v45  ;;  %v10047_v40 = vld [vmem:[#allocation63_spill] sm:$0xff] }
 0x231   : > { %v2148_v56 = vadd.f32 %v2145_v39, %v2073_v62  ;;  %v2735_v48 = vsel %vm2729_vm15, %v2659_v28, %v2732_v37  ;;  %v10045_v33 = vrot.slane %v10044_v16, 1  ;;  %v10046_v39 = vld [vmem:[#allocation49_spill] sm:$0xff]  ;;  %v2214_v41 = vadd.f32 %v2209_v15, %v2149_v19  ;;  %v10051_v62 = vld [vmem:[#allocation67_spill] sm:$0xff] }
 0x232   : > { %v2391_v7 = vsel %vm413_vm2, %v10040_v53, %v10039_v18  ;;  %v2467_v3 = vsel %vm490_vm3, %v10042_v63, %v10041_v5  ;;  %v7877_v22 = vmul.f32 %v10046_v39, %v9953_v9  ;;  %v2738_v27 = vsel %vm7383_vm6, %v2735_v48, 0.0 }
 0x233   : > { %v1834_v47 = vadd.f32 %v10045_v33, %v10043_v4  ;;  %v2213_v49 = vadd.f32 %v2207_v0, %v2148_v56  ;;  %v7883_v59 = vmul.f32 %v10047_v40, %v9953_v9  ;;  %v7888_v45 = vmul.f32 %v7775_v10, %v2738_v27  ;;  %3296 = vrot.lane.b32.xlu2 %v2738_v27, %s9983_s5 }
 0x234   : > { %v7891_v42 = vmul.f32 %v7778_v17, %v2738_v27  ;;  %v7894_v28 = vmul.f32 %v7783_v46, %v2738_v27  ;;  %v2651_v15 = vsel %vm490_vm3, %v2649_v12, %v2650_v6  ;;  %v2290_v9 = vadd.f32 %v2285_v36, %v2214_v41  ;;  %v10054_v36 = vld [vmem:[#allocation48_spill] sm:$0xff] }
 0x235   : > { %10048 = vst [vmem:[#allocation70_spill] sm:$0xff] %v7888_v45  ;;  %v2289_v8 = vadd.f32 %v2283_v58, %v2213_v49  ;;  %v10052_v0 = vrot.slane %v10051_v62, 2  ;;  %v2011_v19 = vrot.slane %v7877_v22, 1  ;;  %v7907_v5 = vmul.f32 %v7786_v43, %v2738_v27 }
 0x236   : > { %10049 = vst [vmem:[#allocation74_spill] sm:$0xff] %v7891_v42  ;;  %v2333_v12 = vadd.f32 %v7706_v21, %v2290_v9  ;;  %v2087_v63 = vrot.slane %v7883_v59, 2  ;;  %v7914_v48 = vstv %s7835_s20  ;;  %v7917_v4 = vstv %s7844_s27  ;;  %s8165_s20 = sld [smem:[#allocation7 + $0x11]] }
 0x237   : > { %10050 = vst [vmem:[#allocation33_spill] sm:$0xff] %v7894_v28  ;;  %v1910_v37 = vadd.f32 %v10052_v0, %v1834_v47  ;;  %v2332_v6 = vadd.f32 %v7700_v34, %v2289_v8  ;;  %v7920_v16 = vstv %s7851_s3  ;;  %v2336_v33 = vstv %s7859_s6  ;;  %s8171_s27 = sld [smem:[#allocation7 + $0x35]] }
 0x238   : > { %10053 = vst [vmem:[#allocation45_spill] sm:$0xff] %v7907_v5  ;;  %v2398_v47 = vadd.f32 %v7754_v20, %v2333_v12  ;;  %v2155_v34 = vmul.f32 %v7914_v48, %v9956_v50  ;;  %v7933_v49 = vmul.f32 %v7917_v4, %v9956_v50  ;;  %v7937_v20 = vmul.f32 %v7920_v16, %v9956_v50  ;;  %s8185_s3 = sld [smem:[#allocation7 + $0x15]] }
 0x239   : > { %v1942_v58 = vadd.f32 %v10054_v36, %v1910_v37  ;;  %v2397_v39 = vadd.f32 %v2391_v7, %v2332_v6  ;;  %v7940_v7 = vmul.f32 %v7221_v1, %v2336_v33  ;;  %v7948_v62 = vmul.f32 %v7227_v29, %v2336_v33  ;;  %s8193_s6 = sld [smem:[#allocation7 + $0x39]] }
 0x23a   : > { %v2474_v40 = vadd.f32 %v7764_v44, %v2398_v47  ;;  %v2227_v0 = vrot.slane %v7933_v49, 1  ;;  %v2303_v50 = vrot.slane %v7937_v20, 2  ;;  %v2401_v37 = vstv %s7885_s4  ;;  %s8201_s4 = sld [smem:[#allocation7 + $0x18]] }
 0x23b   : > { %v2018_v21 = vadd.f32 %v2011_v19, %v1942_v58  ;;  %v2473_v9 = vadd.f32 %v2467_v3, %v2397_v39  ;;  %3308 = vrot.lane.b32.xlu2 %v2738_v27, %s9988_s7  ;;  %v2477_v12 = vstv %s7898_s0  ;;  %v7960_v36 = vmul.f32 %v7221_v1, %v2401_v37  ;;  %s8210_s0 = sld [smem:[#allocation7 + $0x3c]] }
 0x23c   : > { %v2517_v6 = vadd.f32 %v7822_v26, %v2474_v40  ;;  %v7965_v27 = vmul.f32 %v7227_v29, %v2401_v37  ;;  %v2404_v58 = vmul.f32 %v7242_v54, %v2401_v37  ;;  %v7969_v47 = vmul.f32 %v7221_v1, %v2477_v12 }
 0x23d   : > { %v2094_v8 = vadd.f32 %v2087_v63, %v2018_v21  ;;  %v2516_v44 = vadd.f32 %v7818_v11, %v2473_v9  ;;  %v7972_v39 = vmul.f32 %v7227_v29, %v2477_v12  ;;  %v2480_v9 = vmul.f32 %v7242_v54, %v2477_v12 }
 0x23e   : > { %v2582_v11 = vadd.f32 %v7847_v38, %v2517_v6  ;;  %v9476_v40 = vrot.slane %v7965_v27, 1  ;;  %v2411_v29 = vrot.slane %v2404_v58, 1  ;;  %v8018_v18 = vstv %s7962_s21  ;;  %s8281_s21 = sld [smem:[#allocation8 + $0x1]] }
 0x23f   : > { %v2158_v3 = vadd.f32 %v2155_v34, %v2094_v8  ;;  %v2581_v26 = vadd.f32 %v2575_v32, %v2516_v44  ;;  %v2339_v34 = vmul.f32 %v7242_v54, %v2336_v33  ;;  %v9475_v37 = vrot.slane %v7972_v39, 2  ;;  %10057 = vst [vmem:[#allocation61_spill] sm:$0xff] %v8018_v18 }
 0x240   : > { %v2658_v38 = vadd.f32 %v7854_v13, %v2582_v11  ;;  %v2487_v6 = vrot.slane %v2480_v9, 2  ;;  %v2520_v44 = vstv %s7928_s1  ;;  %v7997_v13 = vsel %vm413_vm2, %v9476_v40, %v2411_v29  ;;  %s8260_s1 = sld [smem:[#allocation7 + $0xa]] }
 0x241   : > { %v2234_v21 = vadd.f32 %v2227_v0, %v2158_v3  ;;  %v2657_v32 = vadd.f32 %v2651_v15, %v2581_v26  ;;  %v2585_v3 = vstv %s7942_s25  ;;  %v2661_v9 = vstv %s7955_s29  ;;  %s8272_s25 = sld [smem:[#allocation7 + $0x2e]] }
 0x242   : > { %vm2728_vm5 = vcmp.ge.f32.partialorder %v2658_v38, 0.0  ;;  %v2731_v58 = vmul.f32 0.1, %v2658_v38  ;;  %v8002_v15 = vsel %vm490_vm3, %v9475_v37, %v2487_v6  ;;  %v8005_v11 = vmul.f32 %v2585_v3, %v7162_v55  ;;  %s8278_s29 = sld [smem:[#allocation8]] }
 0x243   : > { %v2310_v8 = vadd.f32 %v2303_v50, %v2234_v21  ;;  %vm2727_vm7 = vcmp.ge.f32.partialorder %v2657_v32, 0.0  ;;  %v2730_v54 = vmul.f32 0.1, %v2657_v32  ;;  %v2219_v22 = vmul.f32 %v7917_v4, %v7152_v14 }
 0x244   : > { %v2734_v26 = vsel %vm2728_vm5, %v2658_v38, %v2731_v58  ;;  %v2595_v38 = vrot.slane %v8005_v11, 1  ;;  %v8029_v58 = vstv %s7974_s22  ;;  %v10063_v11 = vld [vmem:[#allocation35_spill] sm:$0xff]  ;;  %v2154_v59 = vmul.f32 %v7914_v48, %v7152_v14  ;;  %s8292_s22 = sld [smem:[#allocation7]] }
 0x245   : > { %v2342_v12 = vadd.f32 %v2339_v34, %v2310_v8  ;;  %v2733_v21 = vsel %vm2727_vm7, %v2657_v32, %v2730_v54  ;;  %v2523_v34 = vmul.f32 %v2520_v44, %v7162_v55  ;;  %v8011_v8 = vsel %vm2699_vm4, %v2734_v26, 0.0  ;;  %10058 = vst [vmem:[#allocation68_spill] sm:$0xff] %v8029_v58  ;;  %v10061_v26 = vld [vmem:[#allocation65_spill] sm:$0xff] }
 0x246   : > { %10055 = vst [vmem:[#allocation76_spill] sm:$0xff] %v8011_v8  ;;  %v8015_v41 = vsel %vm7504_vm10, %v2733_v21, 0.0  ;;  %3294 = vrot.lane.b32.xlu1 %v8011_v8, %s9983_s5  ;;  %v2664_v32 = vmul.f32 %v2661_v9, %v7162_v55  ;;  %v8032_v54 = vstv %s7980_s23  ;;  %v10062_v21 = vrot.slane %v10061_v26, 1  ;;  %s8296_s23 = sld [smem:[#allocation7 + $0x24]] }
 0x247   : > { %10056 = vst [vmem:[#allocation40_spill] sm:$0xff] %v8015_v41  ;;  %v2418_v53 = vadd.f32 %v2411_v29, %v2342_v12  ;;  %3292 = vrot.lane.b32.xlu0 %v8015_v41, %s9983_s5  ;;  %v8037_v12 = vstv %s7985_s24  ;;  %v10064_v33 = vrot.slane %v10063_v11, 2  ;;  %v2225_v26 = vrot.slane %v2219_v22, 1  ;;  %s8312_s24 = sld [smem:[#allocation7 + $0x17]] }
 0x248   : > { %10059 = vst [vmem:[#allocation50_spill] sm:$0xff] %v8032_v54  ;;  %v2012_v56 = vsel %vm413_vm2, %v10062_v21, %v2011_v19  ;;  %v2671_v37 = vrot.slane %v2664_v32, 2  ;;  %v8068_v21 = vmul.f32 %v2520_v44, %v9998_v51  ;;  %v2663_v22 = vmul.f32 %v2661_v9, %v7168_v31 }
 0x249   : > { %v2494_v29 = vadd.f32 %v2487_v6, %v2418_v53  ;;  %10060 = vst [vmem:[#allocation42_spill] sm:$0xff] %v8037_v12  ;;  %v2088_v55 = vsel %vm490_vm3, %v10064_v33, %v2087_v63  ;;  %v2153_v53 = vmul.f32 %v7914_v48, %v7159_v30  ;;  %v2218_v6 = vmul.f32 %v7917_v4, %v7159_v30 }
 0x24a   : > { %v2294_v63 = vmul.f32 %v7920_v16, %v7159_v30  ;;  %v2295_v33 = vmul.f32 %v7920_v16, %v7152_v14  ;;  %v2586_v4 = vmul.f32 %v2585_v3, %v9998_v51  ;;  %v8074_v48 = vmul.f32 %v2520_v44, %v7168_v31  ;;  %v10065_v44 = vld [vmem:[#allocation29_spill] sm:$0xff] }
 0x24b   : > { %v2526_v19 = vadd.f32 %v2523_v34, %v2494_v29  ;;  %v2224_v32 = vrot.slane %v2218_v6, 1  ;;  %v2587_v30 = vmul.f32 %v2585_v3, %v7168_v31  ;;  %v2228_v14 = vsel %vm413_vm2, %v2225_v26, %v2227_v0 }
 0x24c   : > { %v2301_v29 = vrot.slane %v2295_v33, 2  ;;  %v2300_v16 = vrot.slane %v2294_v63, 2  ;;  %v2662_v6 = vmul.f32 %v2661_v9, %v9998_v51  ;;  %v2592_v33 = vrot.slane %v2586_v4, 1  ;;  %v10067_v51 = vld [vmem:[#allocation71_spill] sm:$0xff] }
 0x24d   : > { %v2602_v34 = vadd.f32 %v2595_v38, %v2526_v19  ;;  %v2593_v1 = vrot.slane %v2587_v30, 1  ;;  %v2017_v40 = vadd.f32 %v2012_v56, %v10065_v44  ;;  %v2669_v0 = vrot.slane %v2663_v22, 2  ;;  %v2763_v22 = vpop.permute.xlu2 %2762 }
 0x24e   : > { %v2304_v49 = vsel %vm490_vm3, %v2301_v29, %v2303_v50  ;;  %v2668_v3 = vrot.slane %v2662_v6, 2  ;;  %3306 = vrot.lane.b32.xlu1 %v8011_v8, %s9988_s7  ;;  %v10066_v31 = vrot.slane %v10063_v11, 2  ;;  %v10068_v9 = vrot.slane %v10067_v51, 2  ;;  %v10069_v11 = vld [vmem:[#allocation37_spill] sm:$0xff] }
 0x24f   : > { %v2678_v19 = vadd.f32 %v2671_v37, %v2602_v34  ;;  %3304 = vrot.lane.b32.xlu0 %v8015_v41, %s9988_s7  ;;  %v2093_v63 = vadd.f32 %v2088_v55, %v2017_v40  ;;  %v2226_v50 = vsel %vm413_vm2, %v2224_v32, %v2225_v26  ;;  %v8107_v4 = vsel %vm413_vm2, %v2593_v1, %v2595_v38  ;;  %v10087_v41 = vld [vmem:[#allocation55_spill] sm:$0xff] }
 0x250   : > { %v2086_v56 = vsel %vm490_vm3, %v10068_v9, %v10066_v31  ;;  %v8110_v34 = vsel %vm490_vm3, %v2669_v0, %v2671_v37  ;;  %v2302_v6 = vsel %vm490_vm3, %v2300_v16, %v2301_v29  ;;  %v10070_v55 = vrot.slane %v7965_v27, 1 }
 0x251   : > { %vm2741_vm8 = vcmp.ge.f32.partialorder %v2678_v19, 0.0  ;;  %v2744_v20 = vmul.f32 0.1, %v2678_v19  ;;  %v2092_v30 = vadd.f32 %v2086_v56, %v10069_v11  ;;  %v2157_v40 = vadd.f32 %v2154_v59, %v2093_v63 }
 0x252   : > { %v10071_v32 = vrot.slane %v7960_v36, 1  ;;  %v10072_v38 = vrot.slane %v7972_v39, 2  ;;  %v10073_v37 = vrot.slane %v7969_v47, 2  ;;  %v8131_v27 = vsel %vm413_vm2, %v2592_v33, %v2593_v1 }
 0x253   : > { %v2747_v44 = vsel %vm2741_vm8, %v2678_v19, %v2744_v20  ;;  %v2156_v59 = vadd.f32 %v2153_v53, %v2092_v30  ;;  %v8134_v36 = vstv %s8049_s10  ;;  %v2233_v1 = vadd.f32 %v2228_v14, %v2157_v40  ;;  %s8484_s10 = sld [smem:[#allocation7 + $0x26]] }
 0x254   : > { %v2410_v26 = vsel %vm413_vm2, %v10071_v32, %v10070_v55  ;;  %v2486_v31 = vsel %vm490_vm3, %v10073_v37, %v10072_v38  ;;  %v2750_v29 = vsel %vm7383_vm6, %v2747_v44, 0.0  ;;  %v8154_v19 = vstv %s8057_s18  ;;  %s8523_s18 = sld [smem:[#allocation7 + $0x1e]] }
 0x255   : > { %v8139_v39 = vmul.f32 %v8018_v18, %v2750_v29  ;;  %v8142_v47 = vmul.f32 %v8029_v58, %v2750_v29  ;;  %v8145_v16 = vmul.f32 %v8032_v54, %v2750_v29  ;;  %v8148_v35 = vmul.f32 %v8037_v12, %v2750_v29  ;;  %3563 = vrot.lane.b32.xlu2 %v2750_v29, %s9983_s5  ;;  %v2775_v55 = vpop.permute.xlu2 %2774 }
 0x256   : > { %v2232_v53 = vadd.f32 %v2226_v50, %v2156_v59  ;;  %v8157_v33 = vstv %s8065_s12  ;;  %v2670_v20 = vsel %vm490_vm3, %v2668_v3, %v2669_v0  ;;  %v2309_v63 = vadd.f32 %v2304_v49, %v2233_v1  ;;  %s8526_s12 = sld [smem:[#allocation7 + $0x42]] }
 0x257   : > { %10074 = vst [vmem:[#allocation72_spill] sm:$0xff] %v8139_v39  ;;  %v8168_v50 = vstv %s8071_s19  ;;  %v2769_v11 = vsel %vm356_vm1, 0.0, %v2763_v22  ;;  %v8191_v22 = vstv %s8077_s28  ;;  %v8199_v59 = vstv %s8084_s30  ;;  %v10086_v39 = vld [vmem:[#allocation58_spill] sm:$0xff]  ;;  %s8534_s19 = sld [smem:[#allocation7 + $0x21]] }
 0x258   : > { %10075 = vst [vmem:[#allocation64_spill] sm:$0xff] %v8142_v47  ;;  %v2308_v14 = vadd.f32 %v2302_v6, %v2232_v53  ;;  %v8174_v30 = vmul.f32 %v8134_v36, %v2769_v11  ;;  %v8177_v44 = vmul.f32 %v8154_v19, %v2769_v11  ;;  %v8180_v40 = vmul.f32 %v8157_v33, %v2769_v11  ;;  %s8542_s28 = sld [smem:[#allocation7 + $0x45]] }
 0x259   : > { %10076 = vst [vmem:[#allocation34_spill] sm:$0xff] %v8145_v16  ;;  %v8183_v49 = vmul.f32 %v8168_v50, %v2769_v11  ;;  %v2341_v0 = vadd.f32 %v7948_v62, %v2309_v63  ;;  %v8205_v1 = vstv %s8087_s8  ;;  %v8208_v53 = vstv %s8101_s13  ;;  %s8549_s30 = sld [smem:[#allocation7 + $0x13]] }
 0x25a   : > { %10077 = vst [vmem:[#allocation66_spill] sm:$0xff] %v8148_v35  ;;  %v2340_v6 = vadd.f32 %v7940_v7, %v2308_v14  ;;  %v2781_v14 = vsel %vm369_vm0, %v2775_v55, 0.0  ;;  %v8216_v11 = vstv %s8104_s14  ;;  %v8219_v3 = vstv %s8114_s16  ;;  %s8557_s8 = sld [smem:[#allocation7 + $0x9]] }
 0x25b   : > { %v2417_v62 = vadd.f32 %v7997_v13, %v2341_v0  ;;  %10078 = vst [vmem:[#allocation31_spill] sm:$0xff] %v8216_v11  ;;  %v8223_v0 = vmul.f32 %v8191_v22, %v2781_v14  ;;  %v8232_v55 = vmul.f32 %v8208_v53, %v2781_v14  ;;  %v8235_v56 = vstv %s8126_s2  ;;  %s8561_s13 = sld [smem:[#allocation7 + $0x2d]] }
 0x25c   : > { %v2416_v7 = vadd.f32 %v2410_v26, %v2340_v6  ;;  %10079 = vst [vmem:[#allocation36_spill] sm:$0xff] %v8219_v3  ;;  %v8226_v6 = vmul.f32 %v8199_v59, %v2781_v14  ;;  %v8244_v9 = vstv %s8151_s15  ;;  %v8250_v37 = vstv %s8159_s17  ;;  %s8566_s14 = sld [smem:[#allocation7 + $0x20]] }
 0x25d   : > { %3575 = vrot.lane.b32.xlu2 %v2750_v29, %s9988_s7  ;;  %v2493_v13 = vadd.f32 %v8002_v15, %v2417_v62  ;;  %v8229_v29 = vmul.f32 %v8205_v1, %v2781_v14  ;;  %10080 = vst [vmem:[#allocation38_spill] sm:$0xff] %v8235_v56  ;;  %v8238_v15 = vstv %s8136_s11  ;;  %v8266_v51 = vstv %s8193_s6  ;;  %s8573_s16 = sld [smem:[#allocation7 + $0x44]] }
 0x25e   : > { %v2492_v26 = vadd.f32 %v2486_v31, %v2416_v7  ;;  %10081 = vst [vmem:[#allocation62_spill] sm:$0xff] %v8238_v15  ;;  %v8269_v14 = vstv %s8201_s4  ;;  %v2863_v63 = vstv %s8020_s26  ;;  %v2877_v32 = vmul.f32 %v7279_v61, %v7518_v23  ;;  %s8326_s26 = sld [smem:[#allocation7 + $0x3b]] }
 0x25f   : > { %v2525_v31 = vadd.f32 %v8074_v48, %v2493_v13  ;;  %10082 = vst [vmem:[#allocation49_spill] sm:$0xff] %v8244_v9  ;;  %v8255_v13 = vstv %s8165_s20  ;;  %v2894_v35 = vmul.f32 %v7282_v60, %v7518_v23  ;;  %v2928_v12 = vmul.f32 %v10086_v39, %v7518_v23  ;;  %s8578_s2 = sld [smem:[#allocation7 + $0x23]] }
 0x260   : > { %v2524_v62 = vadd.f32 %v8068_v21, %v2492_v26  ;;  %10083 = vst [vmem:[#allocation63_spill] sm:$0xff] %v8250_v37  ;;  %v8258_v21 = vstv %s8171_s27  ;;  %v8263_v26 = vstv %s8185_s3  ;;  %v8302_v5 = vmul.f32 %v2863_v63, %v10087_v41  ;;  %s8586_s11 = sld [smem:[#allocation7 + $0x47]] }
 0x261   : > { %v2601_v38 = vadd.f32 %v8107_v4, %v2525_v31  ;;  %10084 = vst [vmem:[#allocation67_spill] sm:$0xff] %v8255_v13  ;;  %v8276_v31 = vstv %s8210_s0  ;;  %v2900_v16 = vrot.slane %v2894_v35, 1  ;;  %v3136_v45 = vstv %s8272_s25  ;;  %s8598_s15 = sld [smem:[#allocation7 + $0x37]] }
 0x262   : > { %v2600_v48 = vadd.f32 %v8131_v27, %v2524_v62  ;;  %10085 = vst [vmem:[#allocation48_spill] sm:$0xff] %v8258_v21  ;;  %v2869_v27 = vstv %s8034_s9  ;;  %v8284_v62 = vmul.f32 %v2863_v63, %v7518_v23  ;;  %v2934_v63 = vrot.slane %v2928_v12, 2  ;;  %s8337_s9 = sld [smem:[#allocation7 + $0x1a]] }
 0x263   : > { %v2677_v7 = vadd.f32 %v8110_v34, %v2601_v38  ;;  %v2911_v34 = vmul.f32 %v7289_v24, %v7518_v23  ;;  %v8299_v18 = vmul.f32 %v2869_v27, %v7518_v23  ;;  %v8320_v23 = vmul.f32 %v2869_v27, %v10087_v41  ;;  %s8630_s17 = sld [smem:[#allocation7 + $0xb]] }
 0x264   : > { %v2676_v4 = vadd.f32 %v2670_v20, %v2600_v48  ;;  %v2883_v48 = vrot.slane %v2877_v32, 1  ;;  %v10090_v32 = vld [vmem:[#allocation73_spill] sm:$0xff]  ;;  %v2893_v27 = vmul.f32 %v7282_v60, %v10087_v41  ;;  %v3130_v12 = vstv %s8260_s1  ;;  %s8681_s20 = sld [smem:[#allocation7 + $0x2f]] }
 0x265   : > { %vm2740_vm6 = vcmp.ge.f32.partialorder %v2677_v7, 0.0  ;;  %v2743_v20 = vmul.f32 0.1, %v2677_v7  ;;  %v2917_v47 = vrot.slane %v2911_v34, 2  ;;  %v2876_v34 = vmul.f32 %v7279_v61, %v10087_v41  ;;  %v10096_v61 = vld [vmem:[#allocation75_spill] sm:$0xff]  ;;  %s8735_s27 = sld [smem:[#allocation7 + $0x12]] }
 0x266   : > { %vm2739_vm9 = vcmp.ge.f32.partialorder %v2676_v4, 0.0  ;;  %v2742_v38 = vmul.f32 0.1, %v2676_v4  ;;  %v10097_v2 = vrot.slane %v10096_v61, 2  ;;  %v8413_v17 = vmul.f32 %v3130_v12, %v7790_v57  ;;  %s8741_s3 = sld [smem:[#allocation7 + $0x36]] }
 0x267   : > { %v2746_v54 = vsel %vm2740_vm6, %v2677_v7, %v2743_v20  ;;  %v10091_v7 = vrot.slane %v10090_v32, 1  ;;  %v10094_v20 = vld [vmem:[#allocation59_spill] sm:$0xff]  ;;  %v2882_v42 = vrot.slane %v2876_v34, 1  ;;  %v8416_v10 = vmul.f32 %v3136_v45, %v7790_v57  ;;  %s8838_s6 = sld [smem:[#allocation7 + $0x14]] }
 0x268   : > { %v2745_v58 = vsel %vm2739_vm9, %v2676_v4, %v2742_v38  ;;  %v8306_v28 = vsel %vm2699_vm4, %v2746_v54, 0.0  ;;  %v10095_v38 = vrot.slane %v10094_v20, 2  ;;  %v8354_v60 = vsel %vm490_vm3, %v2934_v63, %v10097_v2  ;;  %10110 = vst [vmem:[#allocation75_spill] sm:$0xff] %v8413_v17  ;;  %s8842_s4 = sld [smem:[#allocation7 + $0x38]] }
 0x269   : > { %10088 = vst [vmem:[#allocation65_spill] sm:$0xff] %v8306_v28  ;;  %v8310_v35 = vsel %vm7504_vm10, %v2745_v58, 0.0  ;;  %v8317_v4 = vsel %vm413_vm2, %v2883_v48, %v10091_v7  ;;  %3561 = vrot.lane.b32.xlu1 %v8306_v28, %s9983_s5  ;;  %v10093_v58 = vrot.slane %v10092_v25, 1  ;;  %v2910_v7 = vmul.f32 %v7289_v24, %v10087_v41  ;;  %s8908_s0 = sld [smem:[#allocation7 + $0x1b]] }
 0x26a   : > { %10089 = vst [vmem:[#allocation35_spill] sm:$0xff] %v8310_v35  ;;  %3559 = vrot.lane.b32.xlu0 %v8310_v35, %s9983_s5  ;;  %v8342_v32 = vsel %vm490_vm3, %v2917_v47, %v10095_v38  ;;  %v2927_v25 = vmul.f32 %v10086_v39, %v10087_v41  ;;  %s8349_s5 = sld [smem:[#allocation7 + $0x3e]]  ;;  %v2899_v20 = vrot.slane %v2893_v27, 1  ;;  %v8359_v24 = vmul.f32 %v3130_v12, %v7771_v52 }
 0x26b   : > { %v8331_v54 = vsel %vm413_vm2, %v2900_v16, %v10093_v58  ;;  %v3030_v58 = vpop.permute.xlu2 %3029  ;;  %v2916_v43 = vrot.slane %v2910_v7, 2  ;;  %v8374_v34 = vsel %vm413_vm2, %v2882_v42, %v2883_v48  ;;  %v10108_v42 = vld [vmem:[#allocation60_spill] sm:$0xff]  ;;  %s8914_s1 = sld [smem:[#allocation7 + $0x3f]] }
 0x26c   : > { %v3036_v38 = vsel %vm356_vm1, 0.0, %v3030_v58  ;;  %v2933_v46 = vrot.slane %v2927_v25, 2  ;;  %10098 = vst [vmem:[#allocation29_spill] sm:$0xff] %v8359_v24  ;;  %v8377_v27 = vsel %vm413_vm2, %v2899_v20, %v2900_v16  ;;  %v8383_v25 = vmul.f32 %v3136_v45, %v7771_v52  ;;  %v10104_v16 = vld [vmem:[#allocation53_spill] sm:$0xff]  ;;  %v10106_v58 = vld [vmem:[#allocation54_spill] sm:$0xff]  ;;  %s8920_s25 = sld [smem:[#allocation7 + $0x1c]] }
 0x26d   : > { %v8362_v41 = vmul.f32 %v8216_v11, %v3036_v38  ;;  %v8365_v39 = vmul.f32 %v8219_v3, %v3036_v38  ;;  %v8368_v61 = vmul.f32 %v8235_v56, %v3036_v38  ;;  %v8371_v2 = vmul.f32 %v8238_v15, %v3036_v38  ;;  %10111 = vst [vmem:[#allocation53_spill] sm:$0xff] %v8416_v10  ;;  %v10120_v11 = vld [vmem:[#allocation46_spill] sm:$0xff] }
 0x26e   : > { %v8380_v7 = vsel %vm490_vm3, %v2916_v43, %v2917_v47  ;;  %10103 = vst [vmem:[#allocation73_spill] sm:$0xff] %v8383_v25  ;;  %v8389_v48 = vsel %vm490_vm3, %v2933_v46, %v2934_v63  ;;  %v8393_v43 = vmul.f32 %v10104_v16, %v7771_v52  ;;  %v10105_v47 = vld [vmem:[#allocation69_spill] sm:$0xff]  ;;  %v8401_v38 = vmul.f32 %v10106_v58, %v7771_v52 }
 0x26f   : > { %10099 = vst [vmem:[#allocation71_spill] sm:$0xff] %v8362_v41  ;;  %v8397_v20 = vmul.f32 %v10105_v47, %v7771_v52  ;;  %v8405_v46 = vmul.f32 %v10108_v42, %v7771_v52  ;;  %v8420_v8 = vmul.f32 %v10104_v16, %v7790_v57  ;;  %v2752_v52 = vstv %s8278_s29  ;;  %s8925_s29 = sld [smem:[#allocation7 + $0x40]] }
 0x270   : > { %10100 = vst [vmem:[#allocation37_spill] sm:$0xff] %v8365_v39  ;;  %v2754_v25 = vstv %s8281_s21  ;;  %v2783_v24 = vstv %s8292_s22  ;;  %v8427_v39 = vstv %s8312_s24  ;;  %v8433_v63 = vstv %s8337_s9  ;;  %s8934_s21 = sld [smem:[#allocation7 + $0x1d]] }
 0x271   : > { %10101 = vst [vmem:[#allocation58_spill] sm:$0xff] %v8368_v61  ;;  %3573 = vrot.lane.b32.xlu1 %v8306_v28, %s9988_s7  ;;  %v2789_v61 = vstv %s8296_s23  ;;  %v8436_v12 = vstv %s8349_s5  ;;  %v10121_v10 = vrot.slane %v10120_v11, 1  ;;  %v10122_v16 = vrot.slane %v8393_v43, 1  ;;  %s8938_s22 = sld [smem:[#allocation7 + $0x41]] }
 0x272   : > { %10102 = vst [vmem:[#allocation55_spill] sm:$0xff] %v8371_v2  ;;  %3571 = vrot.lane.b32.xlu0 %v8310_v35, %s9988_s7  ;;  %v8430_v35 = vstv %s8326_s26  ;;  %v2761_v3 = vpop.permute.xlu1 %2760  ;;  %v9539_v11 = vrot.slane %v8405_v46, 2  ;;  %s8480_s7 = sld [smem:[#allocation7 + $0x2]] }
 0x273   : > { %10107 = vst [vmem:[#allocation47_spill] sm:$0xff] %v8401_v38  ;;  %v3042_v28 = vpop.permute.xlu2 %3041  ;;  %v8459_v17 = vsel %vm413_vm2, %v10122_v16, %v10121_v10  ;;  %s10253_s23 = sld [smem:[#allocation19_spill]] }
 0x274   : > { %10109 = vst [vmem:[#allocation59_spill] sm:$0xff] %v8405_v46  ;;  %v3048_v45 = vsel %vm369_vm0, %v3042_v28, 0.0  ;;  %v2759_v28 = vpop.permute.xlu0 %2758  ;;  %s10255_s9 = sld [smem:[#allocation21_spill]] }
 0x275   : > { %10112 = vst [vmem:[#allocation69_spill] sm:$0xff] %v8427_v39  ;;  %v8443_v2 = vmul.f32 %v8244_v9, %v3048_v45  ;;  %v8446_v41 = vmul.f32 %v8250_v37, %v3048_v45  ;;  %v8449_v15 = vmul.f32 %v8255_v13, %v3048_v45  ;;  %v8452_v56 = vmul.f32 %v8258_v21, %v3048_v45  ;;  %v10124_v9 = vld [vmem:[#allocation41_spill] sm:$0xff]  ;;  %v10128_v13 = vld [vmem:[#allocation52_spill] sm:$0xff] }
 0x276   : > { %10113 = vst [vmem:[#allocation54_spill] sm:$0xff] %v8430_v35  ;;  %v10126_v37 = vrot.slane %v8397_v20, 1  ;;  %v10129_v35 = vrot.slane %v10128_v13, 2  ;;  %v10130_v45 = vrot.slane %v8401_v38, 2  ;;  %v2767_v13 = vsel %vm356_vm1, 0.0, %v2759_v28 }
 0x277   : > { %10114 = vst [vmem:[#allocation60_spill] sm:$0xff] %v8433_v63  ;;  %v10136_v38 = vrot.slane %v8177_v44, 1  ;;  %v2830_v44 = vmul.f32 %v8157_v33, %v2767_v13 }
 0x278   : > { %10115 = vst [vmem:[#allocation77_spill] sm:$0xff] %v8436_v12  ;;  %v10125_v12 = vrot.slane %v10124_v9, 1  ;;  %v8473_v21 = vsel %vm490_vm3, %v10130_v45, %v10129_v35  ;;  %v10132_v35 = vld [vmem:[#allocation44_spill] sm:$0xff] }
 0x279   : > { %10116 = vst [vmem:[#allocation78_spill] sm:$0xff] %v8443_v2  ;;  %s9096_s24 = sand.u32 1, %s10253_s23  }
 0x27a   : > { %10117 = vst [vmem:[#allocation79_spill] sm:$0xff] %v8446_v41  ;;  %v8466_v63 = vsel %vm413_vm2, %v10126_v37, %v10125_v12  ;;  %v2768_v37 = vsel %vm356_vm1, 0.0, %v2761_v3  ;;  %v10133_v12 = vrot.slane %v10132_v35, 2  ;;  %v2790_v41 = vmul.f32 %v2789_v61, %v2767_v13  ;;  %s4139_s26 = sshll.u32 %s9096_s24, 5  ;;  %s4385_s5 = sshll.u32 %s10255_s9, 5 }
 0x27b   : > { %10118 = vst [vmem:[#allocation80_spill] sm:$0xff] %v8449_v15  ;;  %v2785_v9 = vmul.f32 %v2783_v24, %v2768_v37  ;;  %v2791_v39 = vmul.f32 %v2789_v61, %v2768_v37  ;;  %v2797_v16 = vmul.f32 %v8134_v36, %v2768_v37  ;;  %v2831_v3 = vmul.f32 %v8157_v33, %v2768_v37 }
 0x27c   : > { %10119 = vst [vmem:[#allocation81_spill] sm:$0xff] %v8452_v56  ;;  %v8491_v45 = vsel %vm490_vm3, %v9539_v11, %v10133_v12  ;;  %v2814_v56 = vmul.f32 %v8154_v19, %v2768_v37  ;;  %v2848_v28 = vmul.f32 %v8168_v50, %v2768_v37  ;;  %v2784_v15 = vmul.f32 %v2783_v24, %v2767_v13 }
 0x27d   : > { %10123 = vst [vmem:[#allocation46_spill] sm:$0xff] %v8459_v17  ;;  %v2787_v35 = vadd.f32 %v2785_v9, %v2752_v52  ;;  %v2793_v2 = vadd.f32 %v2791_v39, %v2754_v25  ;;  %v2803_v46 = vrot.slane %v2797_v16, 1  ;;  %v2837_v12 = vrot.slane %v2831_v3, 2 }
 0x27e   : > { %10127 = vst [vmem:[#allocation41_spill] sm:$0xff] %v8466_v63  ;;  %v2854_v11 = vrot.slane %v2848_v28, 2  ;;  %v2792_v10 = vadd.f32 %v2790_v41, %v2754_v25  ;;  %v10135_v63 = vrot.slane %v8174_v30, 1  ;;  %v2796_v24 = vmul.f32 %v8134_v36, %v2767_v13 }
 0x27f   : > { %10131 = vst [vmem:[#allocation52_spill] sm:$0xff] %v8473_v21  ;;  %v2820_v21 = vrot.slane %v2814_v56, 1  ;;  %v2813_v39 = vmul.f32 %v8154_v19, %v2767_v13  ;;  %v10137_v9 = vrot.slane %v8180_v40, 2  ;;  %v10138_v30 = vrot.slane %v8183_v49, 2 }
 0x280   : > { %10134 = vst [vmem:[#allocation44_spill] sm:$0xff] %v8491_v45  ;;  %v2786_v45 = vadd.f32 %v2784_v15, %v2752_v52  ;;  %v2806_v17 = vsel %vm413_vm2, %v2803_v46, %v10135_v63  ;;  %v2802_v25 = vrot.slane %v2796_v24, 1  ;;  %v2773_v52 = vpop.permute.xlu1 %2772  ;;  %v2943_v19 = vstv %s8480_s7  ;;  %s9109_s7 = scalar_lea.vmem [#allocation10], %s4139_s26 }
 0x281   : > { %v2823_v37 = vsel %vm413_vm2, %v2820_v21, %v10136_v38  ;;  %v2810_v61 = vadd.f32 %v2806_v17, %v2787_v35  ;;  %v2840_v15 = vsel %vm490_vm3, %v2837_v12, %v10137_v9  ;;  %v2857_v41 = vsel %vm490_vm3, %v2854_v11, %v10138_v30 }
 0x282   : > { %v2827_v56 = vadd.f32 %v2823_v37, %v2793_v2  ;;  %v2819_v63 = vrot.slane %v2813_v39, 1  ;;  %v2847_v38 = vmul.f32 %v8168_v50, %v2767_v13  ;;  %v2949_v17 = vstv %s8484_s10 }
 0x283   : > { %v2844_v36 = vadd.f32 %v2840_v15, %v2810_v61  ;;  %v2804_v2 = vsel %vm413_vm2, %v2802_v25, %v2803_v46  ;;  %v2836_v3 = vrot.slane %v2830_v44, 2  ;;  %v2780_v37 = vsel %vm369_vm0, %v2773_v52, 0.0  ;;  %v2771_v61 = vpop.permute.xlu0 %2770 }
 0x284   : > { %v2861_v16 = vadd.f32 %v2857_v41, %v2827_v56  ;;  %v2821_v40 = vsel %vm413_vm2, %v2819_v63, %v2820_v21  ;;  %v2853_v28 = vrot.slane %v2847_v38, 2  ;;  %v2809_v49 = vadd.f32 %v2804_v2, %v2786_v45 }
 0x285   : > { %v2826_v35 = vadd.f32 %v2821_v40, %v2792_v10  ;;  %v2867_v24 = vadd.f32 %v8284_v62, %v2844_v36  ;;  %v2838_v33 = vsel %vm490_vm3, %v2836_v3, %v2837_v12  ;;  %v2945_v39 = vmul.f32 %v2943_v19, %v2780_v37 }
 0x286   : > { %v2855_v50 = vsel %vm490_vm3, %v2853_v28, %v2854_v11  ;;  %v2873_v13 = vadd.f32 %v8299_v18, %v2861_v16  ;;  %v2843_v46 = vadd.f32 %v2838_v33, %v2809_v49  ;;  %v2951_v45 = vmul.f32 %v2949_v17, %v2780_v37 }
 0x287   : > { %v2860_v21 = vadd.f32 %v2855_v50, %v2826_v35  ;;  %v2890_v56 = vadd.f32 %v8317_v4, %v2867_v24  ;;  %v2957_v62 = vmul.f32 %v8191_v22, %v2780_v37  ;;  %v2974_v12 = vmul.f32 %v8199_v59, %v2780_v37 }
 0x288   : > { %v2907_v10 = vadd.f32 %v8331_v54, %v2873_v13  ;;  %v8532_v11 = vmul.f32 %v8205_v1, %v2780_v37  ;;  %v8538_v9 = vmul.f32 %v8208_v53, %v2780_v37  ;;  %v2779_v4 = vsel %vm369_vm0, %v2771_v61, 0.0 }
 0x289   : > { %v2924_v18 = vadd.f32 %v8342_v32, %v2890_v56  ;;  %v2866_v15 = vadd.f32 %v8302_v5, %v2843_v46  ;;  %v2963_v30 = vrot.slane %v2957_v62, 1  ;;  %v2980_v41 = vrot.slane %v2974_v12, 1 }
 0x28a   : > { %v2941_v54 = vadd.f32 %v8354_v60, %v2907_v10  ;;  %v2997_v25 = vrot.slane %v8532_v11, 2  ;;  %v3014_v44 = vrot.slane %v8538_v9, 2  ;;  %v2872_v32 = vadd.f32 %v8320_v23, %v2860_v21  ;;  %v10161_v9 = vld [vmem:[#allocation37_spill] sm:$0xff] }
 0x28b   : > { %v2947_v63 = vadd.f32 %v2945_v39, %v2924_v18  ;;  %v2889_v38 = vadd.f32 %v8374_v34, %v2866_v15  ;;  %v10139_v5 = vrot.slane %v8223_v0, 1  ;;  %v10140_v60 = vrot.slane %v8226_v6, 1 }
 0x28c   : > { %v2953_v52 = vadd.f32 %v2951_v45, %v2941_v54  ;;  %v2944_v2 = vmul.f32 %v2943_v19, %v2779_v4  ;;  %v2906_v23 = vadd.f32 %v8377_v27, %v2872_v32  ;;  %v2950_v3 = vmul.f32 %v2949_v17, %v2779_v4 }
 0x28d   : > { %v2966_v36 = vsel %vm413_vm2, %v2963_v30, %v10139_v5  ;;  %v2983_v16 = vsel %vm413_vm2, %v2980_v41, %v10140_v60  ;;  %v2923_v34 = vadd.f32 %v8380_v7, %v2889_v38  ;;  %v2956_v28 = vmul.f32 %v8191_v22, %v2779_v4 }
 0x28e   : > { %v2970_v40 = vadd.f32 %v2966_v36, %v2947_v63  ;;  %v2987_v0 = vadd.f32 %v2983_v16, %v2953_v52  ;;  %v2973_v6 = vmul.f32 %v8199_v59, %v2779_v4  ;;  %v2990_v49 = vmul.f32 %v8205_v1, %v2779_v4  ;;  %v3297_v59 = vpop.permute.xlu2 %3296 }
 0x28f   : > { %v2940_v19 = vadd.f32 %v8389_v48, %v2906_v23  ;;  %v2946_v27 = vadd.f32 %v2944_v2, %v2923_v34  ;;  %v3007_v7 = vmul.f32 %v8208_v53, %v2779_v4  ;;  %v8571_v35 = vstv %s8523_s18 }
 0x290   : > { %v2962_v17 = vrot.slane %v2956_v28, 1  ;;  %v2979_v37 = vrot.slane %v2973_v6, 1  ;;  %v2996_v22 = vrot.slane %v2990_v49, 2  ;;  %v8576_v24 = vstv %s8526_s12  ;;  %v10148_v28 = vld [vmem:[#allocation69_spill] sm:$0xff]  ;;  %v10149_v49 = vld [vmem:[#allocation54_spill] sm:$0xff]  ;;  %s10257_s12 = sld [smem:[#allocation90_spill]] }
 0x291   : > { %v2952_v1 = vadd.f32 %v2950_v3, %v2940_v19  ;;  %v3013_v33 = vrot.slane %v3007_v7, 2  ;;  %v8581_v50 = vstv %s8534_s19  ;;  %v8584_v48 = vstv %s8542_s28  ;;  %s9126_s28 = scalar_lea.vmem [#allocation11], %s4139_s26 }
 0x292   : > { %v3303_v53 = vsel %vm356_vm1, 0.0, %v3297_v59  ;;  %v2964_v13 = vsel %vm413_vm2, %v2962_v17, %v2963_v30  ;;  %v2981_v39 = vsel %vm413_vm2, %v2979_v37, %v2980_v41  ;;  %v10141_v61 = vrot.slane %v8393_v43, 1  ;;  %v10151_v17 = vld [vmem:[#allocation77_spill] sm:$0xff] }
 0x293   : > { %v10142_v46 = vrot.slane %v8420_v8, 1  ;;  %v8601_v56 = vmul.f32 %v8263_v26, %v3303_v53  ;;  %v8604_v45 = vmul.f32 %v8266_v51, %v3303_v53  ;;  %v8607_v10 = vmul.f32 %v8269_v14, %v3303_v53 }
 0x294   : > { %v8610_v43 = vmul.f32 %v8276_v31, %v3303_v53  ;;  %v2969_v8 = vadd.f32 %v2964_v13, %v2946_v27  ;;  %v2986_v62 = vadd.f32 %v2981_v39, %v2952_v1  ;;  %v3160_v12 = vmul.f32 %v10105_v47, %v7790_v57  ;;  %v10150_v27 = vld [vmem:[#allocation60_spill] sm:$0xff]  ;;  %v10153_v1 = vld [vmem:[#allocation47_spill] sm:$0xff] }
 0x295   : > { %v8596_v21 = vsel %vm413_vm2, %v10142_v46, %v10141_v61  ;;  %v3177_v11 = vmul.f32 %v10106_v58, %v7790_v57  ;;  %v10143_v54 = vrot.slane %v8229_v29, 2  ;;  %v10144_v47 = vrot.slane %v8232_v55, 2  ;;  %v10159_v39 = vld [vmem:[#allocation71_spill] sm:$0xff] }
 0x296   : > { %v3050_v41 = vstv %s8557_s8  ;;  %v3056_v63 = vstv %s8561_s13  ;;  %v2998_v52 = vsel %vm490_vm3, %v2996_v22, %v2997_v25  ;;  %v3015_v5 = vsel %vm490_vm3, %v3013_v33, %v3014_v44  ;;  %v3309_v55 = vpop.permute.xlu2 %3308  ;;  %v3028_v22 = vpop.permute.xlu1 %3027  ;;  %s9119_s19 = scalar_lea.hbm %s10257_s12, %s4385_s5 }
 0x297   : > { %v3000_v30 = vsel %vm490_vm3, %v2997_v25, %v10143_v54  ;;  %v3017_v58 = vsel %vm490_vm3, %v3014_v44, %v10144_v47  ;;  %v3003_v29 = vadd.f32 %v2998_v52, %v2969_v8  ;;  %v3020_v36 = vadd.f32 %v3015_v5, %v2986_v62  ;;  %v10158_v5 = vld [vmem:[#allocation62_spill] sm:$0xff]  ;;  %s3945_s8 = sshll.u32 %s9119_s19, 4  ;;  %s9146_s8 = int_to_ptr.hbm [resolvable:$true] %s3945_s8 }
 0x298   : > { %v3004_v32 = vadd.f32 %v3000_v30, %v2970_v40  ;;  %v3021_v38 = vadd.f32 %v3017_v58, %v2987_v0  ;;  %v8633_v60 = vstv %s8566_s14  ;;  %v8636_v16 = vstv %s8573_s16  ;;  %v10156_v30 = vld [vmem:[#allocation36_spill] sm:$0xff]  ;;  %v10157_v58 = vld [vmem:[#allocation38_spill] sm:$0xff]  ;;  %s10258_s16 = sld [smem:[#allocation91_spill]] }
 0x299   : > { %10145 = vst [vmem:[#allocation82_spill] sm:$0xff] %v8636_v16  ;;  %v8639_v2 = vstv %s8578_s2  ;;  %v8642_v23 = vstv %s8586_s11  ;;  %v3166_v40 = vrot.slane %v3160_v12, 1  ;;  %v3183_v34 = vrot.slane %v3177_v11, 2  ;;  %v10155_v11 = vld [vmem:[#allocation31_spill] sm:$0xff] }
 0x29a   : > { %10146 = vst [vmem:[#allocation83_spill] sm:$0xff] %v8639_v2  ;;  %v3315_v3 = vsel %vm369_vm0, %v3309_v55, 0.0  ;;  %v8647_v25 = vmul.f32 %v10108_v42, %v7790_v57  ;;  %v9541_v44 = vstv %s8549_s30  ;;  %v3035_v59 = vsel %vm356_vm1, 0.0, %v3028_v22 }
 0x29b   : > { %10147 = vst [vmem:[#allocation84_spill] sm:$0xff] %v8642_v23  ;;  %v8652_v6 = vmul.f32 %v10148_v28, %v3315_v3  ;;  %v8655_v19 = vmul.f32 %v10149_v49, %v3315_v3  ;;  %v8658_v7 = vmul.f32 %v10150_v27, %v3315_v3  ;;  %v8661_v37 = vmul.f32 %v10151_v17, %v3315_v3 }
 0x29c   : > { %v10152_v57 = vrot.slane %v8397_v20, 1  ;;  %v10154_v33 = vrot.slane %v10153_v1, 2  ;;  %v3200_v13 = vrot.slane %v8647_v25, 2  ;;  %v3026_v20 = vpop.permute.xlu0 %3025  ;;  %v3052_v62 = vmul.f32 %v3050_v41, %v3035_v59 }
 0x29d   : > { %v3058_v12 = vmul.f32 %v3056_v63, %v3035_v59  ;;  %v3064_v54 = vmul.f32 %v10155_v11, %v3035_v59  ;;  %v3081_v47 = vmul.f32 %v10156_v30, %v3035_v59  ;;  %v3098_v52 = vmul.f32 %v10157_v58, %v3035_v59 }
 0x29e   : > { %v8667_v42 = vsel %vm413_vm2, %v3166_v40, %v10152_v57  ;;  %v8672_v53 = vsel %vm490_vm3, %v3183_v34, %v10154_v33  ;;  %v3115_v55 = vmul.f32 %v10158_v5, %v3035_v59  ;;  %v3034_v40 = vsel %vm356_vm1, 0.0, %v3026_v20  ;;  %s9141_s2 = scalar_lea.hbm %s10258_s16, %s4385_s5 }
 0x29f   : > { %v3210_v34 = vstv %s8630_s17  ;;  %v3054_v3 = vadd.f32 %v3052_v62, %v3004_v32  ;;  %v3060_v22 = vadd.f32 %v3058_v12, %v3021_v38  ;;  %v3070_v57 = vrot.slane %v3064_v54, 1  ;;  %v10163_v62 = vld [vmem:[#allocation58_spill] sm:$0xff]  ;;  %s3964_s17 = sshll.u32 %s9141_s2, 4  ;;  %s3965_s17 = int_to_ptr.hbm [resolvable:$true] %s3964_s17 }
 0x2a0   : > { %v3087_v1 = vrot.slane %v3081_v47, 1  ;;  %v3104_v33 = vrot.slane %v3098_v52, 2  ;;  %v3121_v8 = vrot.slane %v3115_v55, 2  ;;  %v3051_v46 = vmul.f32 %v3050_v41, %v3034_v40 }
 0x2a1   : > { %v3057_v61 = vmul.f32 %v3056_v63, %v3034_v40  ;;  %v10160_v15 = vrot.slane %v10159_v39, 1  ;;  %v10162_v18 = vrot.slane %v10161_v9, 1  ;;  %v3063_v59 = vmul.f32 %v10155_v11, %v3034_v40  ;;  %v10165_v63 = vld [vmem:[#allocation55_spill] sm:$0xff] }
 0x2a2   : > { %v3080_v20 = vmul.f32 %v10156_v30, %v3034_v40  ;;  %v10164_v12 = vrot.slane %v10163_v62, 2  ;;  %v10166_v54 = vrot.slane %v10165_v63, 2  ;;  %v3053_v47 = vadd.f32 %v3051_v46, %v3003_v29 }
 0x2a3   : > { %v3073_v4 = vsel %vm413_vm2, %v3070_v57, %v10160_v15  ;;  %v3090_v0 = vsel %vm413_vm2, %v3087_v1, %v10162_v18  ;;  %v3040_v15 = vpop.permute.xlu1 %3039  ;;  %v3059_v9 = vadd.f32 %v3057_v61, %v3020_v36  ;;  %v3069_v52 = vrot.slane %v3063_v59, 1  ;;  %v10167_v61 = vld [vmem:[#allocation29_spill] sm:$0xff]  ;;  %v10168_v59 = vld [vmem:[#allocation73_spill] sm:$0xff] }
 0x2a4   : > { %v3077_v32 = vadd.f32 %v3073_v4, %v3054_v3  ;;  %v3094_v38 = vadd.f32 %v3090_v0, %v3060_v22  ;;  %v3107_v41 = vsel %vm490_vm3, %v3104_v33, %v10164_v12  ;;  %v3124_v39 = vsel %vm490_vm3, %v3121_v8, %v10166_v54  ;;  %v3038_v54 = vpop.permute.xlu0 %3037 }
 0x2a5   : > { %v3086_v18 = vrot.slane %v3080_v20, 1  ;;  %v3097_v30 = vmul.f32 %v10157_v58, %v3034_v40  ;;  %v3114_v4 = vmul.f32 %v10158_v5, %v3034_v40  ;;  %v3071_v0 = vsel %vm413_vm2, %v3069_v52, %v3070_v57  ;;  %v10169_v57 = vld [vmem:[#allocation49_spill] sm:$0xff] }
 0x2a6   : > { %v3111_v11 = vadd.f32 %v3107_v41, %v3077_v32  ;;  %v3128_v55 = vadd.f32 %v3124_v39, %v3094_v38  ;;  %v3216_v22 = vstv %s8681_s20  ;;  %v3047_v62 = vsel %vm369_vm0, %v3040_v15, 0.0  ;;  %v10170_v38 = vld [vmem:[#allocation63_spill] sm:$0xff]  ;;  %v10172_v52 = vld [vmem:[#allocation41_spill] sm:$0xff]  ;;  %s3924_s20 = scalar_lea.sflag [#allocation3], %s9096_s24 }
 0x2a7   : > { %v3088_v3 = vsel %vm413_vm2, %v3086_v18, %v3087_v1  ;;  %v3076_v12 = vadd.f32 %v3071_v0, %v3053_v47  ;;  %v3103_v29 = vrot.slane %v3097_v30, 2  ;;  %v3120_v36 = vrot.slane %v3114_v4, 2  ;;  %v10171_v47 = vld [vmem:[#allocation46_spill] sm:$0xff]  ;;  %v10173_v30 = vld [vmem:[#allocation67_spill] sm:$0xff]  ;;  %v10174_v0 = vld [vmem:[#allocation48_spill] sm:$0xff] }
 0x2a8   : > { %v3093_v63 = vadd.f32 %v3088_v3, %v3059_v9  ;;  %v3134_v46 = vadd.f32 %v10167_v61, %v3111_v11  ;;  %v3140_v20 = vadd.f32 %v10168_v59, %v3128_v55  ;;  %v3212_v32 = vmul.f32 %v3210_v34, %v3047_v62  ;;  %v10175_v3 = vld [vmem:[#allocation52_spill] sm:$0xff]  ;;  %v10177_v61 = vld [vmem:[#allocation59_spill] sm:$0xff] }
 0x2a9   : > { %v3218_v58 = vmul.f32 %v3216_v22, %v3047_v62  ;;  %v3105_v5 = vsel %vm490_vm3, %v3103_v29, %v3104_v33  ;;  %v3122_v40 = vsel %vm490_vm3, %v3120_v36, %v3121_v8  ;;  %v3224_v1 = vmul.f32 %v10169_v57, %v3047_v62  ;;  %v10176_v29 = vld [vmem:[#allocation44_spill] sm:$0xff] }
 0x2aa   : > { %v3241_v41 = vmul.f32 %v10170_v38, %v3047_v62  ;;  %v3110_v39 = vadd.f32 %v3105_v5, %v3076_v12  ;;  %v3127_v15 = vadd.f32 %v3122_v40, %v3093_v63  ;;  %v3157_v9 = vadd.f32 %v10171_v47, %v3134_v46  ;;  %v10179_v46 = vld [vmem:[#allocation78_spill] sm:$0xff]  ;;  %v10181_v40 = vld [vmem:[#allocation79_spill] sm:$0xff] }
 0x2ab   : > { %v3174_v18 = vadd.f32 %v10172_v52, %v3140_v20  ;;  %v3230_v11 = vrot.slane %v3224_v1, 1  ;;  %v3258_v4 = vmul.f32 %v10173_v30, %v3047_v62  ;;  %v3275_v33 = vmul.f32 %v10174_v0, %v3047_v62 }
 0x2ac   : > { %v3247_v55 = vrot.slane %v3241_v41, 1  ;;  %v3191_v8 = vadd.f32 %v10175_v3, %v3157_v9  ;;  %v10178_v59 = vrot.slane %v10177_v61, 2  ;;  %v3046_v63 = vsel %vm369_vm0, %v3038_v54, 0.0 }
 0x2ad   : > { %v3208_v36 = vadd.f32 %v10176_v29, %v3174_v18  ;;  %v10180_v20 = vrot.slane %v10179_v46, 1  ;;  %v10182_v1 = vrot.slane %v10181_v40, 1  ;;  %v3264_v41 = vrot.slane %v3258_v4, 2  ;;  %v10183_v18 = vld [vmem:[#allocation75_spill] sm:$0xff]  ;;  %v10184_v29 = vld [vmem:[#allocation53_spill] sm:$0xff] }
 0x2ae   : > { %v3202_v12 = vsel %vm490_vm3, %v3200_v13, %v10178_v59  ;;  %v3281_v47 = vrot.slane %v3275_v33, 2  ;;  %v3214_v9 = vadd.f32 %v3212_v32, %v3191_v8  ;;  %v3133_v3 = vadd.f32 %v10183_v18, %v3110_v39 }
 0x2af   : > { %v3233_v5 = vsel %vm413_vm2, %v3230_v11, %v10180_v20  ;;  %v3250_v62 = vsel %vm413_vm2, %v3247_v55, %v10182_v1  ;;  %v3220_v52 = vadd.f32 %v3218_v58, %v3208_v36  ;;  %v3139_v25 = vadd.f32 %v10184_v29, %v3127_v15  ;;  %v3564_v39 = vpop.permute.xlu2 %3563  ;;  %v10185_v36 = vld [vmem:[#allocation80_spill] sm:$0xff] }
 0x2b0   : > { %v3211_v13 = vmul.f32 %v3210_v34, %v3046_v63  ;;  %v3217_v54 = vmul.f32 %v3216_v22, %v3046_v63  ;;  %v3223_v61 = vmul.f32 %v10169_v57, %v3046_v63  ;;  %v3240_v59 = vmul.f32 %v10170_v38, %v3046_v63 }
 0x2b1   : > { %v3237_v46 = vadd.f32 %v3233_v5, %v3214_v9  ;;  %v3254_v4 = vadd.f32 %v3250_v62, %v3220_v52  ;;  %v3156_v32 = vadd.f32 %v8596_v21, %v3133_v3  ;;  %v3173_v58 = vadd.f32 %v8667_v42, %v3139_v25  ;;  %v10199_v9 = vld [vmem:[#allocation70_spill] sm:$0xff] }
 0x2b2   : > { %v3229_v33 = vrot.slane %v3223_v61, 1  ;;  %v3246_v15 = vrot.slane %v3240_v59, 1  ;;  %v3257_v8 = vmul.f32 %v10173_v30, %v3046_v63  ;;  %v3274_v34 = vmul.f32 %v10174_v0, %v3046_v63 }
 0x2b3   : > { %v3570_v22 = vsel %vm356_vm1, 0.0, %v3564_v39  ;;  %v3190_v57 = vadd.f32 %v8672_v53, %v3156_v32  ;;  %v3207_v38 = vadd.f32 %v3202_v12, %v3173_v58  ;;  %v10186_v20 = vrot.slane %v10185_v36, 2  ;;  %v10191_v36 = vld [vmem:[#allocation43_spill] sm:$0xff] }
 0x2b4   : > { %v8753_v21 = vmul.f32 %v8571_v35, %v3570_v22  ;;  %v8756_v42 = vmul.f32 %v8576_v24, %v3570_v22  ;;  %v8759_v30 = vmul.f32 %v8581_v50, %v3570_v22  ;;  %v8762_v0 = vmul.f32 %v8584_v48, %v3570_v22 }
 0x2b5   : > { %v3267_v5 = vsel %vm490_vm3, %v3264_v41, %v10186_v20  ;;  %v3213_v53 = vadd.f32 %v3211_v13, %v3190_v57  ;;  %v3219_v12 = vadd.f32 %v3217_v54, %v3207_v38  ;;  %v3231_v63 = vsel %vm413_vm2, %v3229_v33, %v3230_v11  ;;  %v10187_v13 = vld [vmem:[#allocation81_spill] sm:$0xff]  ;;  %v10189_v33 = vld [vmem:[#allocation76_spill] sm:$0xff] }
 0x2b6   : > { %v3248_v40 = vsel %vm413_vm2, %v3246_v15, %v3247_v55  ;;  %v3263_v29 = vrot.slane %v3257_v8, 2  ;;  %v3280_v25 = vrot.slane %v3274_v34, 2  ;;  %v10188_v54 = vrot.slane %v10187_v13, 2 }
 0x2b7   : > { %v3236_v18 = vadd.f32 %v3231_v63, %v3213_v53  ;;  %v3253_v3 = vadd.f32 %v3248_v40, %v3219_v12  ;;  %v3317_v61 = vstv %s8735_s27  ;;  %v3323_v55 = vstv %s8741_s3  ;;  %v3576_v22 = vpop.permute.xlu2 %3575  ;;  %v10194_v53 = vld [vmem:[#allocation51_spill] sm:$0xff]  ;;  %s4592_s27 = sshra.s32 %s9146_s8, 4  ;;  %s4593_s27 = int_to_ptr.hbm [resolvable:$true] %s4592_s27 }
 0x2b8   : > { %v3284_v11 = vsel %vm490_vm3, %v3281_v47, %v10188_v54  ;;  %v3271_v59 = vadd.f32 %v3267_v5, %v3237_v46  ;;  %v3265_v58 = vsel %vm490_vm3, %v3263_v29, %v3264_v41  ;;  %v3282_v39 = vsel %vm490_vm3, %v3280_v25, %v3281_v47  ;;  %v10192_v41 = vld [vmem:[#allocation39_spill] sm:$0xff]  ;;  %v3295_v29 = vpop.permute.xlu1 %3294  ;;  %s4594_s3 = scalar_lea.hbm %s4593_s27, 32  ;;  %p4599_p5 = scmp.lt.s32.totalorder %s4593_s27, %s10257_s12 }
 0x2b9   : > { %v3288_v32 = vadd.f32 %v3284_v11, %v3254_v4  ;;  %v8780_v15 = vmul.f32 %v9541_v44, %v10189_v33  ;;  %v3270_v57 = vadd.f32 %v3265_v58, %v3236_v18  ;;  %v3287_v8 = vadd.f32 %v3282_v39, %v3253_v3  ;;  %v10193_v4 = vld [vmem:[#allocation30_spill] sm:$0xff]  ;;  %v3293_v25 = vpop.permute.xlu0 %3292  ;;  %v10201_v44 = vld [vmem:[#allocation74_spill] sm:$0xff]  ;;  %p4595_p1 = scmp.ne.s32.totalorder %s4593_s27, %s4594_s3 }
 0x2ba   : > { %v10190_v34 = vstv %s8598_s15  ;;  %v8789_v20 = vmul.f32 %v10191_v36, %v10189_v33  ;;  %v3582_v46 = vsel %vm369_vm0, %v3576_v22, 0.0  ;;  %v8794_v47 = vmul.f32 %v10192_v41, %v10189_v33 }
 0x2bb   : > { %v8785_v38 = vmul.f32 %v10190_v34, %v10189_v33  ;;  %v8798_v5 = vmul.f32 %v10193_v4, %v10189_v33  ;;  %v8802_v12 = vmul.f32 %v10194_v53, %v10189_v33  ;;  %v8805_v63 = vmul.f32 %v8633_v60, %v3582_v46  ;;  %p4596_p2 = pnand %p4595_p1, %p4785_p4 }
 0x2bc   : > { %v8808_v40 = vmul.f32 %v8636_v16, %v3582_v46  ;;  %v8811_v18 = vmul.f32 %v8639_v2, %v3582_v46  ;;  %v8814_v3 = vmul.f32 %v8642_v23, %v3582_v46  ;;  %v9542_v13 = vrot.slane %v8789_v20, 1 }
 0x2bd   : > { %10195 = vst [vmem:[#allocation69_spill] sm:$0xff] %v8805_v63  ;;  %v9544_v54 = vrot.slane %v8794_v47, 1  ;;  %v3302_v46 = vsel %vm356_vm1, 0.0, %v3295_v29  ;;  %v3301_v52 = vsel %vm356_vm1, 0.0, %v3293_v25  ;;  %v10200_v62 = vrot.slane %v10199_v9, 1  ;;  %p4597_p3 = pneg %p4596_p2 }
 0x2be   : > { %10196 = vst [vmem:[#allocation54_spill] sm:$0xff] %v8808_v40  ;;  %v10202_v58 = vrot.slane %v10201_v44, 1  ;;  %v3319_v39 = vmul.f32 %v3317_v61, %v3302_v46  ;;  %v3325_v22 = vmul.f32 %v3323_v55, %v3302_v46  ;;  %v3331_v34 = vmul.f32 %v8263_v26, %v3302_v46 }
 0x2bf   : > { %10197 = vst [vmem:[#allocation60_spill] sm:$0xff] %v8811_v18  ;;  %v3420_v1 = vsel %vm413_vm2, %v9542_v13, %v10200_v62  ;;  %v3348_v29 = vmul.f32 %v8266_v51, %v3302_v46  ;;  %v3365_v9 = vmul.f32 %v8269_v14, %v3302_v46  ;;  %v3382_v25 = vmul.f32 %v8276_v31, %v3302_v46 }
 0x2c0   : > { %10198 = vst [vmem:[#allocation77_spill] sm:$0xff] %v8814_v3  ;;  %v3437_v33 = vsel %vm413_vm2, %v9544_v54, %v10202_v58  ;;  %v3318_v11 = vmul.f32 %v3317_v61, %v3301_v52  ;;  %v3324_v62 = vmul.f32 %v3323_v55, %v3301_v52  ;;  %v3321_v44 = vadd.f32 %v3319_v39, %v3271_v59 }
 0x2c1   : > { %v3327_v13 = vadd.f32 %v3325_v22, %v3288_v32  ;;  %v3337_v3 = vrot.slane %v3331_v34, 1  ;;  %v3354_v58 = vrot.slane %v3348_v29, 1  ;;  %v3371_v54 = vrot.slane %v3365_v9, 2  ;;  %v10210_v34 = vld [vmem:[#allocation45_spill] sm:$0xff] }
 0x2c2   : > { %v3388_v18 = vrot.slane %v3382_v25, 2  ;;  %v3320_v40 = vadd.f32 %v3318_v11, %v3270_v57  ;;  %v3326_v63 = vadd.f32 %v3324_v62, %v3287_v8  ;;  %v10203_v23 = vrot.slane %v8601_v56, 1  ;;  %v3307_v25 = vpop.permute.xlu1 %3306 }
 0x2c3   : > { %v10204_v16 = vrot.slane %v8604_v45, 1  ;;  %v3330_v61 = vmul.f32 %v8263_v26, %v3301_v52  ;;  %v3347_v55 = vmul.f32 %v8266_v51, %v3301_v52  ;;  %v10205_v39 = vrot.slane %v8607_v10, 2 }
 0x2c4   : > { %v3340_v2 = vsel %vm413_vm2, %v3337_v3, %v10203_v23  ;;  %v10206_v57 = vrot.slane %v8610_v43, 2  ;;  %v3381_v26 = vmul.f32 %v8276_v31, %v3301_v52  ;;  %v10209_v10 = vrot.slane %v8798_v5, 2 }
 0x2c5   : > { %v3357_v46 = vsel %vm413_vm2, %v3354_v58, %v10204_v16  ;;  %v3344_v59 = vadd.f32 %v3340_v2, %v3321_v44  ;;  %v3374_v22 = vsel %vm490_vm3, %v3371_v54, %v10205_v39  ;;  %v3336_v23 = vrot.slane %v3330_v61, 1  ;;  %v10207_v2 = vld [vmem:[#allocation33_spill] sm:$0xff] }
 0x2c6   : > { %v3361_v32 = vadd.f32 %v3357_v46, %v3327_v13  ;;  %v3391_v56 = vsel %vm490_vm3, %v3388_v18, %v10206_v57  ;;  %v3353_v45 = vrot.slane %v3347_v55, 1  ;;  %v3364_v16 = vmul.f32 %v8269_v14, %v3301_v52 }
 0x2c7   : > { %v3378_v8 = vadd.f32 %v3374_v22, %v3344_v59  ;;  %v10208_v13 = vrot.slane %v10207_v2, 2  ;;  %v10211_v43 = vrot.slane %v10210_v34, 2  ;;  %v10212_v29 = vrot.slane %v8802_v12, 2 }
 0x2c8   : > { %v3395_v51 = vadd.f32 %v3391_v56, %v3361_v32  ;;  %v3338_v62 = vsel %vm413_vm2, %v3336_v23, %v3337_v3  ;;  %v3355_v14 = vsel %vm413_vm2, %v3353_v45, %v3354_v58  ;;  %v3370_v31 = vrot.slane %v3364_v16, 2 }
 0x2c9   : > { %v3454_v11 = vsel %vm490_vm3, %v10209_v10, %v10208_v13  ;;  %v3471_v9 = vsel %vm490_vm3, %v10212_v29, %v10211_v43  ;;  %v3387_v52 = vrot.slane %v3381_v26, 2  ;;  %v3343_v44 = vadd.f32 %v3338_v62, %v3320_v40  ;;  %v3305_v29 = vpop.permute.xlu0 %3304 }
 0x2ca   : > { %v3360_v46 = vadd.f32 %v3355_v14, %v3326_v63  ;;  %v3477_v61 = vstv %s8838_s6  ;;  %v3483_v55 = vstv %s8842_s4  ;;  %v3372_v59 = vsel %vm490_vm3, %v3370_v31, %v3371_v54 }
 0x2cb   : > { %v3389_v32 = vsel %vm490_vm3, %v3387_v52, %v3388_v18  ;;  %v3314_v39 = vsel %vm369_vm0, %v3307_v25, 0.0  ;;  %v3401_v22 = vadd.f32 %v8780_v15, %v3378_v8  ;;  %v3377_v57 = vadd.f32 %v3372_v59, %v3343_v44  ;;  %v10213_v15 = vld [vmem:[#allocation40_spill] sm:$0xff] }
 0x2cc   : > { %v3394_v3 = vadd.f32 %v3389_v32, %v3360_v46  ;;  %v3407_v58 = vadd.f32 %v8785_v38, %v3395_v51  ;;  %v3479_v56 = vmul.f32 %v3477_v61, %v3314_v39  ;;  %v3485_v40 = vmul.f32 %v3483_v55, %v3314_v39 }
 0x2cd   : > { %v3424_v23 = vadd.f32 %v3420_v1, %v3401_v22  ;;  %v3491_v63 = vmul.f32 %v10148_v28, %v3314_v39  ;;  %v8881_v45 = vmul.f32 %v10149_v49, %v3314_v39  ;;  %v8884_v18 = vmul.f32 %v10150_v27, %v3314_v39 }
 0x2ce   : > { %v3441_v54 = vadd.f32 %v3437_v33, %v3407_v58  ;;  %v8887_v16 = vmul.f32 %v10151_v17, %v3314_v39  ;;  %v10214_v26 = vstv %s8549_s30  ;;  %v10215_v51 = vstv %s8598_s15  ;;  %s3943_s30 = sshll.u32 %s9109_s7, 4  ;;  %s3962_s15 = sshll.u32 %s9126_s28, 4  ;;  %s9144_s30 = int_to_ptr.vmem [resolvable:$true] %s3943_s30  ;;  %s3963_s15 = int_to_ptr.vmem [resolvable:$true] %s3962_s15 }
 0x2cf   : > { %v3398_v8 = vmul.f32 %v10214_v26, %v10213_v15  ;;  %v3458_v2 = vadd.f32 %v3454_v11, %v3424_v23  ;;  %v3497_v38 = vrot.slane %v3491_v63, 1  ;;  %v3514_v1 = vrot.slane %v8881_v45, 1 }
 0x2d0   : > { %v3404_v13 = vmul.f32 %v10215_v51, %v10213_v15  ;;  %v3475_v10 = vadd.f32 %v3471_v9, %v3441_v54  ;;  %v3531_v34 = vrot.slane %v8884_v18, 2  ;;  %v3548_v33 = vrot.slane %v8887_v16, 2 }
 0x2d1   : > { %v3410_v43 = vmul.f32 %v10191_v36, %v10213_v15  ;;  %v3481_v25 = vadd.f32 %v3479_v56, %v3458_v2  ;;  %v10216_v62 = vrot.slane %v8652_v6, 1  ;;  %v10217_v14 = vrot.slane %v8655_v19, 1 }
 0x2d2   : > { %v3427_v9 = vmul.f32 %v10192_v41, %v10213_v15  ;;  %v3487_v52 = vadd.f32 %v3485_v40, %v3475_v10  ;;  %v3444_v36 = vmul.f32 %v10193_v4, %v10213_v15  ;;  %v3461_v46 = vmul.f32 %v10194_v53, %v10213_v15 }
 0x2d3   : > { %v3500_v11 = vsel %vm413_vm2, %v3497_v38, %v10216_v62  ;;  %v3517_v31 = vsel %vm413_vm2, %v3514_v1, %v10217_v14  ;;  %v3416_v44 = vrot.slane %v3410_v43, 1  ;;  %v3313_v19 = vsel %vm369_vm0, %v3305_v29, 0.0 }
 0x2d4   : > { %v3504_v6 = vadd.f32 %v3500_v11, %v3481_v25  ;;  %v3433_v59 = vrot.slane %v3427_v9, 1  ;;  %v3400_v32 = vadd.f32 %v3398_v8, %v3377_v57  ;;  %v3521_v39 = vadd.f32 %v3517_v31, %v3487_v52 }
 0x2d5   : > { %v10218_v41 = vrot.slane %v8789_v20, 1  ;;  %v3450_v58 = vrot.slane %v3444_v36, 2  ;;  %v3467_v56 = vrot.slane %v3461_v46, 2  ;;  %v10219_v4 = vrot.slane %v8794_v47, 1 }
 0x2d6   : > { %v3406_v23 = vadd.f32 %v3404_v13, %v3394_v3  ;;  %v3478_v63 = vmul.f32 %v3477_v61, %v3313_v19  ;;  %v10220_v57 = vrot.slane %v8798_v5, 2  ;;  %v10221_v20 = vrot.slane %v8802_v12, 2 }
 0x2d7   : > { %v3418_v22 = vsel %vm413_vm2, %v3416_v44, %v10218_v41  ;;  %v3435_v53 = vsel %vm413_vm2, %v3433_v59, %v10219_v4  ;;  %v3484_v18 = vmul.f32 %v3483_v55, %v3313_v19  ;;  %v3490_v16 = vmul.f32 %v10148_v28, %v3313_v19  ;;  %v10224_v44 = vld [vmem:[#allocation65_spill] sm:$0xff] }
 0x2d8   : > { %v3423_v40 = vadd.f32 %v3418_v22, %v3400_v32  ;;  %v3452_v45 = vsel %vm490_vm3, %v3450_v58, %v10220_v57  ;;  %v3469_v54 = vsel %vm490_vm3, %v3467_v56, %v10221_v20  ;;  %v3440_v47 = vadd.f32 %v3435_v53, %v3406_v23 }
 0x2d9   : > { %v3507_v61 = vmul.f32 %v10149_v49, %v3313_v19  ;;  %v3524_v15 = vmul.f32 %v10150_v27, %v3313_v19  ;;  %v3496_v5 = vrot.slane %v3490_v16, 1  ;;  %v3541_v12 = vmul.f32 %v10151_v17, %v3313_v19 }
 0x2da   : > { %v3457_v3 = vadd.f32 %v3452_v45, %v3423_v40  ;;  %v10222_v26 = vrot.slane %v8658_v7, 2  ;;  %v10223_v28 = vrot.slane %v8661_v37, 2  ;;  %v3474_v2 = vadd.f32 %v3469_v54, %v3440_v47 }
 0x2db   : > { %v3513_v13 = vrot.slane %v3507_v61, 1  ;;  %v3530_v49 = vrot.slane %v3524_v15, 2  ;;  %v3498_v27 = vsel %vm413_vm2, %v3496_v5, %v3497_v38  ;;  %v3547_v10 = vrot.slane %v3541_v12, 2  ;;  %v3562_v56 = vpop.permute.xlu1 %3561 }
 0x2dc   : > { %v3534_v55 = vsel %vm490_vm3, %v3531_v34, %v10222_v26  ;;  %v3551_v8 = vsel %vm490_vm3, %v3548_v33, %v10223_v28  ;;  %v3480_v51 = vadd.f32 %v3478_v63, %v3457_v3  ;;  %v3584_v43 = vstv %s8908_s0  ;;  %v3560_v4 = vpop.permute.xlu0 %3559  ;;  %v10229_v63 = vld [vmem:[#allocation35_spill] sm:$0xff]  ;;  %s4598_s0 = scalar_lea.hbm %s10257_s12, 64 }
 0x2dd   : > { %v3590_v29 = vstv %s8914_s1  ;;  %v3486_v17 = vadd.f32 %v3484_v18, %v3474_v2  ;;  %v3515_v7 = vsel %vm413_vm2, %v3513_v13, %v3514_v1  ;;  %v3538_v62 = vadd.f32 %v3534_v55, %v3504_v6  ;;  %v10225_v1 = vld [vmem:[#allocation61_spill] sm:$0xff]  ;;  %v10226_v6 = vld [vmem:[#allocation68_spill] sm:$0xff]  ;;  %p4600_p6 = scmp.lt.s32.totalorder %s4598_s0, %s4594_s3 }
 0x2de   : > { %v3503_v25 = vadd.f32 %v3498_v27, %v3480_v51  ;;  %v3555_v37 = vadd.f32 %v3551_v8, %v3521_v39  ;;  %v3532_v11 = vsel %vm490_vm3, %v3530_v49, %v3531_v34  ;;  %v3549_v14 = vsel %vm490_vm3, %v3547_v10, %v3548_v33  ;;  %v10227_v34 = vld [vmem:[#allocation50_spill] sm:$0xff] }
 0x2df   : > { %v3664_v31 = vstv %s8920_s25  ;;  %v3520_v9 = vadd.f32 %v3515_v7, %v3486_v17  ;;  %v3670_v36 = vstv %s8925_s29  ;;  %v8963_v59 = vmul.f32 %v10225_v1, %v10224_v44  ;;  %v10228_v39 = vld [vmem:[#allocation42_spill] sm:$0xff]  ;;  %p4601_p7 = por %p4600_p6, %p4599_p5 }
 0x2e0   : > { %v3537_v52 = vadd.f32 %v3532_v11, %v3503_v25  ;;  %v8955_v38 = vmul.f32 %v3664_v31, %v10224_v44  ;;  %v8959_v46 = vmul.f32 %v3670_v36, %v10224_v44  ;;  %v8967_v19 = vmul.f32 %v10226_v6, %v10224_v44 }
 0x2e1   : > { %v8971_v33 = vmul.f32 %v10227_v34, %v10224_v44  ;;  %v3554_v32 = vadd.f32 %v3549_v14, %v3520_v9  ;;  %v8975_v41 = vmul.f32 %v10228_v39, %v10224_v44  ;;  %v3744_v22 = vstv %s8934_s21  ;;  %p4602_p9 = pnand %p4601_p7, %p4597_p3 }
 0x2e2   : > { %v3750_v58 = vstv %s8938_s22  ;;  %v3684_v53 = vrot.slane %v8963_v59, 1  ;;  %v3701_v23 = vrot.slane %v8967_v19, 1  ;;  %v8983_v57 = vmul.f32 %v3664_v31, %v10229_v63 }
 0x2e3   : > { %v3718_v40 = vrot.slane %v8971_v33, 2  ;;  %v3569_v45 = vsel %vm356_vm1, 0.0, %v3562_v56  ;;  %v3568_v20 = vsel %vm356_vm1, 0.0, %v3560_v4  ;;  %v3735_v54 = vrot.slane %v8975_v41, 2  ;;  %v10236_v56 = vld [vmem:[#allocation64_spill] sm:$0xff] }
 0x2e4   : > { %v8989_v18 = vmul.f32 %v3670_v36, %v10229_v63  ;;  %v3586_v16 = vmul.f32 %v3584_v43, %v3569_v45  ;;  %v3592_v47 = vmul.f32 %v3590_v29, %v3569_v45  ;;  %v3598_v3 = vmul.f32 %v8571_v35, %v3569_v45 }
 0x2e5   : > { %v3615_v61 = vmul.f32 %v8576_v24, %v3569_v45  ;;  %v3632_v15 = vmul.f32 %v8581_v50, %v3569_v45  ;;  %v3649_v5 = vmul.f32 %v8584_v48, %v3569_v45  ;;  %v3585_v12 = vmul.f32 %v3584_v43, %v3568_v20  ;;  %v3574_v45 = vpop.permute.xlu1 %3573 }
 0x2e6   : > { %v3591_v26 = vmul.f32 %v3590_v29, %v3568_v20  ;;  %v3588_v55 = vadd.f32 %v3586_v16, %v3538_v62  ;;  %v3594_v28 = vadd.f32 %v3592_v47, %v3555_v37  ;;  %v3604_v8 = vrot.slane %v3598_v3, 1 }
 0x2e7   : > { %v3621_v2 = vrot.slane %v3615_v61, 1  ;;  %v3638_v51 = vrot.slane %v3632_v15, 2  ;;  %v3655_v13 = vrot.slane %v3649_v5, 2  ;;  %v3587_v49 = vadd.f32 %v3585_v12, %v3537_v52  ;;  %v10238_v61 = vld [vmem:[#allocation34_spill] sm:$0xff] }
 0x2e8   : > { %v3593_v27 = vadd.f32 %v3591_v26, %v3554_v32  ;;  %v10230_v10 = vrot.slane %v8753_v21, 1  ;;  %v10231_v25 = vrot.slane %v8756_v42, 1  ;;  %v3597_v11 = vmul.f32 %v8571_v35, %v3568_v20  ;;  %v10234_v32 = vld [vmem:[#allocation72_spill] sm:$0xff]  ;;  %v10240_v12 = vld [vmem:[#allocation66_spill] sm:$0xff] }
 0x2e9   : > { %v3614_v43 = vmul.f32 %v8576_v24, %v3568_v20  ;;  %v10232_v37 = vrot.slane %v8759_v30, 2  ;;  %v10233_v31 = vrot.slane %v8762_v0, 2  ;;  %v3631_v42 = vmul.f32 %v8581_v50, %v3568_v20 }
 0x2ea   : > { %v3607_v17 = vsel %vm413_vm2, %v3604_v8, %v10230_v10  ;;  %v3624_v7 = vsel %vm413_vm2, %v3621_v2, %v10231_v25  ;;  %v3603_v9 = vrot.slane %v3597_v11, 1  ;;  %v3648_v44 = vmul.f32 %v8584_v48, %v3568_v20 }
 0x2eb   : > { %v3611_v29 = vadd.f32 %v3607_v17, %v3588_v55  ;;  %v3628_v62 = vadd.f32 %v3624_v7, %v3594_v28  ;;  %v3641_v14 = vsel %vm490_vm3, %v3638_v51, %v10232_v37  ;;  %v3658_v21 = vsel %vm490_vm3, %v3655_v13, %v10233_v31  ;;  %v10243_v37 = vld [vmem:[#allocation83_spill] sm:$0xff] }
 0x2ec   : > { %v3620_v52 = vrot.slane %v3614_v43, 1  ;;  %v10235_v24 = vrot.slane %v10234_v32, 1  ;;  %v10237_v4 = vrot.slane %v10236_v56, 1  ;;  %v3605_v50 = vsel %vm413_vm2, %v3603_v9, %v3604_v8 }
 0x2ed   : > { %v3645_v36 = vadd.f32 %v3641_v14, %v3611_v29  ;;  %v3662_v35 = vadd.f32 %v3658_v21, %v3628_v62  ;;  %v3637_v20 = vrot.slane %v3631_v42, 2  ;;  %v3654_v16 = vrot.slane %v3648_v44, 2  ;;  %v10242_v29 = vld [vmem:[#allocation82_spill] sm:$0xff]  ;;  %v10244_v14 = vld [vmem:[#allocation84_spill] sm:$0xff] }
 0x2ee   : > { %v3687_v30 = vsel %vm413_vm2, %v3684_v53, %v10235_v24  ;;  %v3704_v0 = vsel %vm413_vm2, %v3701_v23, %v10237_v4  ;;  %v3622_v48 = vsel %vm413_vm2, %v3620_v52, %v3621_v2  ;;  %v3610_v47 = vadd.f32 %v3605_v50, %v3587_v49  ;;  %v10245_v24 = vld [vmem:[#allocation69_spill] sm:$0xff]  ;;  %v10247_v4 = vld [vmem:[#allocation54_spill] sm:$0xff]  ;;  %v3572_v50 = vpop.permute.xlu0 %3571 }
 0x2ef   : > { %v3627_v3 = vadd.f32 %v3622_v48, %v3593_v27  ;;  %v10239_v15 = vrot.slane %v10238_v61, 2  ;;  %v10241_v26 = vrot.slane %v10240_v12, 2  ;;  %v3639_v28 = vsel %vm490_vm3, %v3637_v20, %v3638_v51  ;;  %v10249_v20 = vld [vmem:[#allocation60_spill] sm:$0xff] }
 0x2f0   : > { %v3656_v8 = vsel %vm490_vm3, %v3654_v16, %v3655_v13  ;;  %v3581_v2 = vsel %vm369_vm0, %v3574_v45, 0.0  ;;  %v3668_v49 = vadd.f32 %v8955_v38, %v3645_v36  ;;  %v3644_v27 = vadd.f32 %v3639_v28, %v3610_v47  ;;  %v10251_v47 = vld [vmem:[#allocation77_spill] sm:$0xff] }
 0x2f1   : > { %v3721_v5 = vsel %vm490_vm3, %v3718_v40, %v10239_v15  ;;  %v3738_v55 = vsel %vm490_vm3, %v3735_v54, %v10241_v26  ;;  %v3661_v10 = vadd.f32 %v3656_v8, %v3627_v3  ;;  %v3674_v17 = vadd.f32 %v8959_v46, %v3662_v35 }
 0x2f2   : > { %v3746_v25 = vmul.f32 %v3744_v22, %v3581_v2  ;;  %v3691_v7 = vadd.f32 %v3687_v30, %v3668_v49  ;;  %v3752_v11 = vmul.f32 %v3750_v58, %v3581_v2  ;;  %v3758_v43 = vmul.f32 %v8633_v60, %v3581_v2 }
 0x2f3   : > { %v3775_v62 = vmul.f32 %v10242_v29, %v3581_v2  ;;  %v3708_v51 = vadd.f32 %v3704_v0, %v3674_v17  ;;  %v3792_v13 = vmul.f32 %v10243_v37, %v3581_v2  ;;  %v3809_v31 = vmul.f32 %v10244_v14, %v3581_v2 }
 0x2f4   : > { %v3677_v38 = vmul.f32 %v10225_v1, %v10229_v63  ;;  %v3725_v21 = vadd.f32 %v3721_v5, %v3691_v7  ;;  %v3764_v9 = vrot.slane %v3758_v43, 1  ;;  %v3694_v52 = vmul.f32 %v10226_v6, %v10229_v63 }
 0x2f5   : > { %v3781_v46 = vrot.slane %v3775_v62, 1  ;;  %v3742_v42 = vadd.f32 %v3738_v55, %v3708_v51  ;;  %v3798_v44 = vrot.slane %v3792_v13, 2  ;;  %v3815_v36 = vrot.slane %v3809_v31, 2 }
 0x2f6   : > { %v3683_v35 = vrot.slane %v3677_v38, 1  ;;  %v3748_v32 = vadd.f32 %v3746_v25, %v3725_v21  ;;  %v10246_v30 = vrot.slane %v10245_v24, 1  ;;  %v10248_v0 = vrot.slane %v10247_v4, 1 }
 0x2f7   : > { %v3700_v1 = vrot.slane %v3694_v52, 1  ;;  %v3754_v48 = vadd.f32 %v3752_v11, %v3742_v42  ;;  %v10250_v16 = vrot.slane %v10249_v20, 2  ;;  %v10252_v3 = vrot.slane %v10251_v47, 2 }
 0x2f8   : > { %v3767_v56 = vsel %vm413_vm2, %v3764_v9, %v10246_v30  ;;  %v3784_v45 = vsel %vm413_vm2, %v3781_v46, %v10248_v0  ;;  %v3685_v15 = vsel %vm413_vm2, %v3683_v35, %v3684_v53  ;;  %v3711_v26 = vmul.f32 %v10227_v34, %v10229_v63 }
 0x2f9   : > { %v3801_v6 = vsel %vm490_vm3, %v3798_v44, %v10250_v16  ;;  %v3818_v61 = vsel %vm490_vm3, %v3815_v36, %v10252_v3  ;;  %v3771_v5 = vadd.f32 %v3767_v56, %v3748_v32  ;;  %v3702_v12 = vsel %vm413_vm2, %v3700_v1, %v3701_v23 }
 0x2fa   : > { %v3728_v55 = vmul.f32 %v10228_v39, %v10229_v63  ;;  %v3788_v28 = vadd.f32 %v3784_v45, %v3754_v48  ;;  %v3580_v8 = vsel %vm369_vm0, %v3572_v50, 0.0  ;;  %v3667_v2 = vadd.f32 %v8983_v57, %v3644_v27  ;;  %v10254_v48 = vld [vmem:[#allocation56_spill] sm:$0xff] }
 0x2fb   : > { %v3673_v59 = vadd.f32 %v8989_v18, %v3661_v10  ;;  %v3805_v53 = vadd.f32 %v3801_v6, %v3771_v5  ;;  %v3717_v49 = vrot.slane %v3711_v26, 2  ;;  %v3745_v19 = vmul.f32 %v3744_v22, %v3580_v8 }
 0x2fc   : > { %v3734_v17 = vrot.slane %v3728_v55, 2  ;;  %v3822_v25 = vadd.f32 %v3818_v61, %v3788_v28  ;;  %v3690_v23 = vadd.f32 %v3685_v15, %v3667_v2  ;;  %v3751_v34 = vmul.f32 %v3750_v58, %v3580_v8  ;;  %v10256_v28 = vld [vmem:[#allocation57_spill] sm:$0xff] }
 0x2fd   : > { %v3707_v7 = vadd.f32 %v3702_v12, %v3673_v59  ;;  %v4370_v11 = vmul.f32 -1.442695, %v3805_v53  ;;  %v3719_v39 = vsel %vm490_vm3, %v3717_v49, %v3718_v40  ;;  %v3757_v57 = vmul.f32 %v8633_v60, %v3580_v8 }
 0x2fe   : > { %v3736_v63 = vsel %vm490_vm3, %v3734_v17, %v3735_v54  ;;  %v4372_v18 = vmul.f32 -1.442695, %v3822_v25  ;;  %v3724_v27 = vadd.f32 %v3719_v39, %v3690_v23  ;;  %v3774_v22 = vmul.f32 %v10242_v29, %v3580_v8 }
 0x2ff   : > { %v3741_v10 = vadd.f32 %v3736_v63, %v3707_v7  ;;  %4493 = vpow2.f32 %v4370_v11  ;;  %v3763_v43 = vrot.slane %v3757_v57, 1  ;;  %v3791_v58 = vmul.f32 %v10243_v37, %v3580_v8 }
 0x300   : > { %v3808_v62 = vmul.f32 %v10244_v14, %v3580_v8  ;;  %4495 = vpow2.f32 %v4372_v18  ;;  %v3747_v33 = vadd.f32 %v3745_v19, %v3724_v27  ;;  %v3780_v51 = vrot.slane %v3774_v22, 1 }
 0x301   : > { %v3753_v40 = vadd.f32 %v3751_v34, %v3741_v10  ;;  %v3765_v41 = vsel %vm413_vm2, %v3763_v43, %v3764_v9  ;;  %v3797_v54 = vrot.slane %v3791_v58, 2  ;;  %v2682_v20 = vadd.s32 8, %v10254_v48 }
 0x302   : > { %v3814_v13 = vrot.slane %v3808_v62, 2  ;;  %v3770_v60 = vadd.f32 %v3765_v41, %v3747_v33  ;;  %v3782_v31 = vsel %vm413_vm2, %v3780_v51, %v3781_v46  ;;  %v3904_v8 = vcvt.s32.f32 %v10256_v28 }
 0x303   : > { %v3787_v38 = vadd.f32 %v3782_v31, %v3753_v40  ;;  %v3799_v29 = vsel %vm490_vm3, %v3797_v54, %v3798_v44  ;;  %v3903_v12 = vcvt.s32.f32 %v2682_v20  ;;  %v3902_v40 = vcvt.s32.f32 %v10254_v48 }
 0x304   : > { %v3804_v21 = vadd.f32 %v3799_v29, %v3770_v60  ;;  %v3816_v52 = vsel %vm490_vm3, %v3814_v13, %v3815_v36 }
 0x305   : > { %v4494_v37 = vpop.eup %4493  ;;  %v3821_v42 = vadd.f32 %v3816_v52, %v3787_v38 }
 0x306   : > { %v4496_v14 = vpop.eup %4495  ;;  %v3830_v35 = vadd.f32 1.0, %v4494_v37  ;;  %v4369_v32 = vmul.f32 -1.442695, %v3804_v21 }
 0x307   : > { %v3868_v24 = vadd.f32 1.0, %v4496_v14  ;;  %v4371_v30 = vmul.f32 -1.442695, %v3821_v42 }
 0x308   : > { %4497 = vrcp.f32 %v3830_v35  ;;  %v3855_v16 = vand.u32 2147483647, %v3830_v35  ;;  %v3857_v6 = vand.u32 2147483648, %v3830_v35  ;;  %vm3851_vm2 = vweird.f32 %v3830_v35 }
 0x309   : > { %4499 = vrcp.f32 %v3868_v24  ;;  %v3895_v3 = vand.u32 2147483648, %v3868_v24  ;;  %v3893_v15 = vand.u32 2147483647, %v3868_v24  ;;  %vm3889_vm4 = vweird.f32 %v3868_v24 }
 0x30a   : > { %4501 = vpow2.f32 %v4369_v32  ;;  %v3858_v26 = vor.u32 1.1754944e-38, %v3857_v6  ;;  %vm3856_vm10 = vcmp.eq.f32.partialorder %v3855_v16, 8.507059e+37 }
 0x30b   : > { %4503 = vpow2.f32 %v4371_v30  ;;  %v3896_v59 = vor.u32 1.1754944e-38, %v3895_v3  ;;  %vm3894_vm12 = vcmp.eq.f32.partialorder %v3893_v15, 8.507059e+37 }
 0x30e   : > { %v4498_v9 = vpop.eup %4497 }
 0x30f   : > { %v4500_v46 = vpop.eup %4499  ;;  %v3847_v56 = vmul.f32 %v4498_v9, %v3830_v35  ;;  %vm3852_vm0 = vweird.f32 %v4498_v9 }
 0x310   : > { %v4502_v4 = vpop.eup %4501  ;;  %v3885_v44 = vmul.f32 %v4500_v46, %v3868_v24  ;;  %vm3890_vm1 = vweird.f32 %v4500_v46  ;;  %vm3853_vm3 = vmor %vm3851_vm2, %vm3852_vm0 }
 0x311   : > { %v4504_v0 = vpop.eup %4503  ;;  %v3848_v45 = vsub.f32 1.0, %v3847_v56  ;;  %v9093_v36 = vadd.f32 1.0, %v4502_v4  ;;  %vm3891_vm11 = vmor %vm3889_vm4, %vm3890_vm1 }
 0x312   : > { %v3886_v1 = vsub.f32 1.0, %v3885_v44  ;;  %v9098_v50 = vadd.f32 1.0, %v4504_v0 }
 0x313   : > { %4505 = vrcp.f32 %v9093_v36  ;;  %v3849_v47 = vmul.f32 %v4498_v9, %v3848_v45  ;;  %v3842_v18 = vand.u32 2147483648, %v9093_v36  ;;  %v3840_v22 = vand.u32 2147483647, %v9093_v36 }
 0x314   : > { %4507 = vrcp.f32 %v9098_v50  ;;  %v3887_v61 = vmul.f32 %v4500_v46, %v3886_v1  ;;  %v3880_v43 = vand.u32 2147483648, %v9098_v50  ;;  %v3878_v62 = vand.u32 2147483647, %v9098_v50 }
 0x315   : > { %v3850_v5 = vadd.f32 %v4498_v9, %v3849_v47  ;;  %vm3836_vm15 = vweird.f32 %v9093_v36  ;;  %v3843_v51 = vor.u32 1.1754944e-38, %v3842_v18  ;;  %vm3874_vm7 = vweird.f32 %v9098_v50 }
 0x316   : > { %v3888_v55 = vadd.f32 %v4500_v46, %v3887_v61  ;;  %vm3841_vm8 = vcmp.eq.f32.partialorder %v3840_v22, 8.507059e+37  ;;  %v3881_v13 = vor.u32 1.1754944e-38, %v3880_v43  ;;  %vm3879_vm9 = vcmp.eq.f32.partialorder %v3878_v62, 8.507059e+37 }
 0x317   : > { %v3854_v2 = vsel %vm3853_vm3, %v4498_v9, %v3850_v5 }
 0x318   : > { %v3859_v49 = vsel %vm3856_vm10, %v3858_v26, %v3854_v2  ;;  %v3892_v17 = vsel %vm3891_vm11, %v4500_v46, %v3888_v55 }
 0x319   : > { %v4506_v53 = vpop.eup %4505  ;;  %v3897_v23 = vsel %vm3894_vm12, %v3896_v59, %v3892_v17  ;;  %3906 = vst [vmem:[%s9109_s7 + $0x8] sm:$0xff] %v3859_v49  ;;  %v3911_v7 = vadd.f32 %v3903_v12, %v3859_v49 }
 0x31a   : > { %v4508_v19 = vpop.eup %4507  ;;  %v3832_v25 = vmul.f32 %v4506_v53, %v9093_v36  ;;  %4374 = vst [vmem:[%s9109_s7 + $0x18] sm:$0xff] %v3897_v23  ;;  %v3917_v11 = vadd.f32 %v3904_v8, %v3897_v23  ;;  %vm3837_vm13 = vweird.f32 %v4506_v53 }
 0x31b   : > { %v3870_v34 = vmul.f32 %v4508_v19, %v9098_v50  ;;  %v3913_v63 = vmul.f32 8.0, %v3911_v7  ;;  %vm3875_vm14 = vweird.f32 %v4508_v19  ;;  %vm3838_vm5 = vmor %vm3836_vm15, %vm3837_vm13 }
 0x31c   : > { %v3833_v39 = vsub.f32 1.0, %v3832_v25  ;;  %v3919_v27 = vmul.f32 8.0, %v3917_v11  ;;  %vm3876_vm6 = vmor %vm3874_vm7, %vm3875_vm14 }
 0x31d   : > { %v3871_v57 = vsub.f32 1.0, %v3870_v34  ;;  %3915 = vst [vmem:[%s9126_s28 + $0x8] sm:$0xff] %v3913_v63 }
 0x31e   : > { %v3834_v10 = vmul.f32 %v4506_v53, %v3833_v39  ;;  %4376 = vst [vmem:[%s9126_s28 + $0x18] sm:$0xff] %v3919_v27 }
 0x31f   : > { %v3872_v58 = vmul.f32 %v4508_v19, %v3871_v57 }
 0x320   : > { %v3835_v33 = vadd.f32 %v4506_v53, %v3834_v10 }
 0x321   : > { %v3873_v41 = vadd.f32 %v4508_v19, %v3872_v58 }
 0x322   : > { %v3839_v54 = vsel %vm3838_vm5, %v4506_v53, %v3835_v33 }
 0x323   : > { %v3844_v60 = vsel %vm3841_vm8, %v3843_v51, %v3839_v54  ;;  %v3877_v31 = vsel %vm3876_vm6, %v4508_v19, %v3873_v41 }
 0x324   : > { %v3882_v38 = vsel %vm3879_vm9, %v3881_v13, %v3877_v31  ;;  %3905 = vst [vmem:[%s9109_s7] sm:$0xff] %v3844_v60  ;;  %v3910_v29 = vadd.f32 %v3902_v40, %v3844_v60 }
 0x325   : > { %4373 = vst [vmem:[%s9109_s7 + $0x10] sm:$0xff] %v3882_v38  ;;  %v3916_v21 = vadd.f32 %v3904_v8, %v3882_v38 }
 0x326   : > { %4605 = shalt.err (!%p4602_p9)
}
 0x327   : > { %s4708_s29 = smov 128   ;;  %s4709_s21 = smov 8   ;;  %v3912_v52 = vmul.f32 8.0, %v3910_v29  ;;  %v3918_v37 = vmul.f32 8.0, %v3916_v21 }
 0x328   : > { %4404 = dma.vmem_to_hbm [thread:$0]  (%p4785_p4), %s9144_s30, 512, %s9146_s8, %s3924_s20, %s4708_s29, %s4708_s29, %s4709_s21  }
 0x329   : > { %3914 = vst [vmem:[%s9126_s28] sm:$0xff] %v3912_v52  ;;  %s3929_s22 = scalar_lea.sflag [#allocation12], %s9096_s24  ;;  %s4620_s23 = sshra.s32 %s3965_s17, 4  ;;  %s4621_s23 = int_to_ptr.hbm [resolvable:$true] %s4620_s23 }
 0x32a   : > { %4375 = vst [vmem:[%s9126_s28 + $0x10] sm:$0xff] %v3918_v37  ;;  %s4622_s26 = scalar_lea.hbm %s4621_s23, 32  ;;  %s4626_s7 = scalar_lea.hbm %s10258_s16, 64 }
 0x32b   : > { %p4623_p10 = scmp.ne.s32.totalorder %s4621_s23, %s4622_s26  ;;  %p4627_p13 = scmp.lt.s32.totalorder %s4621_s23, %s10258_s16 }
 0x32c   : > { %p4628_p0 = scmp.lt.s32.totalorder %s4626_s7, %s4622_s26 }
 0x32d   : > { %p4624_p11 = pnand %p4623_p10, %p4785_p4 }
 0x32e   : > { %p4629_p1 = por %p4628_p0, %p4627_p13 }
 0x32f   : > { %p4625_p12 = pneg %p4624_p11 }
 0x331   : > { %p4630_p2 = pnand %p4629_p1, %p4625_p12 }
 0x333   : > { %4633 = shalt.err (!%p4630_p2)
}
 0x334   : > { %4405 = dma.vmem_to_hbm [thread:$0]  (%p4785_p4), %s3963_s15, 512, %s3965_s17, %s3929_s22, %s4708_s29, %s4708_s29, %s4709_s21  }
 0x335 PF: > { %s10260_s24 = sld [smem:[#allocation23_spill]] }
 0x336   : > { %s10261_s19 = sld [smem:[#allocation18_spill]] }
 0x33b   : > { %p4436_p3 = scmp.ge.s32.totalorder %s10260_s24, 2 }
 0x33c   : > { %s3979_s30 = sand.u32 1, %s10261_s19  }
 0x33d   : > { %p4422_p5 = pnand %p4436_p3, %p4792_p8  ;;  %s3980_s8 = scalar_lea.sflag [#allocation3], %s3979_s30 }
 0x33f   : > { %p4423_p6 = pneg %p4422_p5 }
 0x341   : > { %4671 = dma.done.wait (%p4423_p6), %s3980_s8, 512  }
 0x342   : > { %4673 = vsyncadd (%p4423_p6), %s3980_s8, 4294966784  ;;  %s3990_s13 = scalar_lea.sflag [#allocation12], %s3979_s30 }
 0x343   : > { %4675 = dma.done.wait (%p4423_p6), %s3990_s13, 512  }
 0x344   : > { %4677 = vsyncadd (%p4423_p6), %s3990_s13, 4294966784  ;;  %s26_s26 = sadd.s32 1, %s10260_s24   ;;  %s10263_s21 = sld [smem:[#allocation19_spill]] }
 0x345   : > { %p23_p7 = scmp.ge.s32.totalorder %s26_s26, 4   ;;  %s10264_s22 = sld [smem:[#allocation20_spill]] }
 0x346   : > { %s10265_s23 = sld [smem:[#allocation27_spill]] }
 0x347   : > { %s10266_s24 = sld [smem:[#allocation22_spill]]  ;;  %25 = sbr.rel (!%p23_p7) target bundleno = 17 (0x11), region = 115 }
 0x348   : > { %s10267_s25 = sld [smem:[#allocation24_spill]] }
 0x34c   :  { %3996 = vsyncpa [#allocation3], 1 }
 0x34d   :  { %3998 = vsyncpa [#allocation3 + $0x1], 1 }
 0x34e   :  { %3999 = vsyncpa [#allocation12], 1 }
 0x34f   :  { %4001 = vsyncpa [#allocation12 + $0x1], 1 }
 0x350   :  { %4002 = vsyncpa [#allocation4], 1 }
 0x351   :  { %4004 = vsyncpa [#allocation4 + $0x1], 1 }
 0x352   :  { %4005 = vsyncpa [#allocation6], 1 }
 0x353   :  { %4006 = vsyncpa [#allocation9], 1 }

</bundles_post_ra>
